<compile_context>
chip_gen: v7x
topology: tpu7x:2x2x1
jax: 0.10.0
libtpu: 0.0.40
codegen_flags: <defaults>
</compile_context>

<pallas_src>
import functools

import jax
import jax.numpy as jnp
from jax.experimental import pallas as pl
from jax.experimental.pallas import tpu as pltpu


def _layer_norm(x, w, b, eps=1e-5):
    mu = jnp.mean(x, axis=-1, keepdims=True)
    var = jnp.mean((x - mu) ** 2, axis=-1, keepdims=True)
    return (x - mu) * jax.lax.rsqrt(var + eps) * w + b


def transformer_kernel(x_ref, enc_w_ref, enc_b_ref, cls_ref,
                       in_w_ref, in_b_ref, out_w_ref, out_b_ref,
                       ff1_w_ref, ff1_b_ref, ff2_w_ref, ff2_b_ref,
                       n1_w_ref, n1_b_ref, n2_w_ref, n2_b_ref,
                       dec_w_ref, dec_b_ref, o_ref, h_ref,
                       *, num_layers, num_heads, sp_pad):
    f32 = jnp.float32
    Nb, S, dIn = x_ref.shape
    dT = enc_w_ref.shape[1]
    H = num_heads
    dh = dT // H
    Sp = S + 1                                  # valid tokens (CLS + S)
    rows = Nb * sp_pad
    scale = 1.0 / float(dh) ** 0.5

    # ---- encoder Linear over the fused (Nb*S) row dimension ----
    x2d = x_ref[...].reshape(Nb * S, dIn)
    x_emb = jnp.dot(x2d, enc_w_ref[...], preferred_element_type=f32) + enc_b_ref[...]

    # ---- assemble [CLS ; x_emb ; zero-pad] in a sublane-aligned VMEM scratch
    #      (no jnp.concatenate) ----
    h_ref[...] = jnp.zeros((Nb, sp_pad, dT), f32)
    h_ref[:, 0:1, :] = jnp.broadcast_to(cls_ref[...].reshape(1, 1, dT), (Nb, 1, dT))
    h_ref[:, 1:Sp, :] = x_emb.reshape(Nb, S, dT)
    h2d = h_ref[...].reshape(rows, dT)

    # key-validity mask for the padded token rows (hoisted out of the layer loop)
    kmask = jax.lax.broadcasted_iota(jnp.int32, (Nb, sp_pad, sp_pad), 2) < Sp
    neg = jnp.float32(-1e30)

    # num_layers is small -> static unroll.
    # TODO(synk): switch to lax.fori_loop with dynamic ref[l] indexing (or a layer
    # grid axis with per-layer weight streaming) for large L / large dT (v7x VMEM).
    for l in range(num_layers):
        # q/k/v via leading-axis weight split: three (rows,dT)x(dT,dT) MXU matmuls.
        q = jnp.dot(h2d, in_w_ref[l, 0], preferred_element_type=f32) + in_b_ref[l, 0]
        k = jnp.dot(h2d, in_w_ref[l, 1], preferred_element_type=f32) + in_b_ref[l, 1]
        v = jnp.dot(h2d, in_w_ref[l, 2], preferred_element_type=f32) + in_b_ref[l, 2]
        q3 = q.reshape(Nb, sp_pad, dT)
        k3 = k.reshape(Nb, sp_pad, dT)
        v3 = v.reshape(Nb, sp_pad, dT)

        out_w = out_w_ref[l]                                  # (dT, dT), (in, out)
        attn = jnp.zeros((rows, dT), f32)
        for hd in range(H):                                   # heads batched over Nb
            lo, hi = hd * dh, (hd + 1) * dh
            qh, kh, vh = q3[:, :, lo:hi], k3[:, :, lo:hi], v3[:, :, lo:hi]
            s = jnp.einsum('bqd,bkd->bqk', qh, kh,
                           preferred_element_type=f32) * scale
            s = jnp.where(kmask, s, neg)
            s = s - jnp.max(s, axis=-1, keepdims=True)
            p = jnp.exp(s)
            p = p * pl.reciprocal(jnp.sum(p, axis=-1, keepdims=True), approx=True)
            oh = jnp.einsum('bqk,bkd->bqd', p, vh, preferred_element_type=f32)
            # accumulate the output projection per head -> no concat / lane shuffle
            attn = attn + jnp.dot(oh.reshape(rows, dh), out_w[lo:hi, :],
                                  preferred_element_type=f32)
        attn = attn + out_b_ref[l]
        # TODO(synk): dropout (p=0.1) omitted -> eval-mode semantics.
        h2d = _layer_norm(h2d + attn, n1_w_ref[l], n1_b_ref[l])

        # --- feed-forward (ReLU), fused over all rows ---
        ff = jnp.dot(h2d, ff1_w_ref[l], preferred_element_type=f32) + ff1_b_ref[l]
        ff = jnp.maximum(ff, 0.0)
        ff = jnp.dot(ff, ff2_w_ref[l], preferred_element_type=f32) + ff2_b_ref[l]
        h2d = _layer_norm(h2d + ff, n2_w_ref[l], n2_b_ref[l])

    # ---- decoder Linear on the CLS token (row 0 of every batch element) ----
    cls_out = h2d.reshape(Nb, sp_pad, dT)[:, 0:1, :].reshape(Nb, dT)
    o_ref[...] = jnp.dot(cls_out, dec_w_ref[...],
                         preferred_element_type=f32) + dec_b_ref[...]


def transformer_forward(x, params, *, num_heads, num_layers, batch_block=8):
    """x: (S, N, dIn)  ->  (N, dOut)   (matches decoder(tf_out[0,:,:]))."""
    S, N, dIn = x.shape
    dT = params["enc_w"].shape[0]
    dOut = params["dec_w"].shape[0]
    L = num_layers

    # batch-major layout; a block of Nb batch elements per grid step
    Nb = min(batch_block, N)
    grid_n = pl.cdiv(N, Nb)
    N_pad = grid_n * Nb
    xb = jnp.transpose(x, (1, 0, 2))                              # (N, S, dIn)
    if N_pad != N:
        xb = jnp.concatenate(
            [xb, jnp.zeros((N_pad - N, S, dIn), xb.dtype)], axis=0)

    # sublane-aligned padded token count (CLS + S rounded up to a multiple of 8)
    sp_pad = ((S + 1 + 7) // 8) * 8

    # --- pre-transpose / restructure weights on the host: kernel computes x @ W ---
    # TODO(synk): on v6e/v7x, casting matmul operands to bf16 (keeping f32 accumulate
    # and f32 layernorm/softmax) would ~2x MXU throughput and halve weight VMEM.
    weights = [
        params["enc_w"].T,                                            # (dIn, dT)
        params["enc_b"].reshape(1, dT),
        params["cls"].reshape(1, dT),
        params["in_w"].reshape(L, 3, dT, dT).transpose(0, 1, 3, 2),   # (L,3,dT,dT)
        params["in_b"].reshape(L, 3, 1, dT),
        params["out_w"].transpose(0, 2, 1),                           # (L,dT,dT)
        params["out_b"].reshape(L, 1, dT),
        params["ff1_w"].transpose(0, 2, 1),                           # (L,dT,4dT)
        params["ff1_b"].reshape(L, 1, 4 * dT),
        params["ff2_w"].transpose(0, 2, 1),                           # (L,4dT,dT)
        params["ff2_b"].reshape(L, 1, dT),
        params["n1_w"], params["n1_b"], params["n2_w"], params["n2_b"],
        params["dec_w"].T,                                            # (dT, dOut)
        params["dec_b"].reshape(1, dOut),
    ]

    def _full_spec(arr):
        nd = arr.ndim
        return pl.BlockSpec(arr.shape, lambda n, _nd=nd: (0,) * _nd)

    kernel = functools.partial(transformer_kernel, num_layers=num_layers,
                               num_heads=num_heads, sp_pad=sp_pad)
    out = pl.pallas_call(
        kernel,
        out_shape=jax.ShapeDtypeStruct((N_pad, dOut), jnp.float32),
        grid_spec=pltpu.PrefetchScalarGridSpec(
            num_scalar_prefetch=0,
            grid=(grid_n,),
            in_specs=[pl.BlockSpec((Nb, S, dIn), lambda n: (n, 0, 0))]
                     + [_full_spec(w) for w in weights],
            out_specs=pl.BlockSpec((Nb, dOut), lambda n: (n, 0)),
            scratch_shapes=[pltpu.VMEM((Nb, sp_pad, dT), jnp.float32)]),
        compiler_params=pltpu.CompilerParams(
            dimension_semantics=("parallel",)),
    )(xb, *weights)
    return out[:N]                                                 # (N, dOut)


# ------------------------- pure-JAX reference -------------------------
def _reference_forward(x, params, *, num_heads, num_layers):
    S, N, dIn = x.shape
    dT = params["enc_w"].shape[0]
    dh = dT // num_heads

    def one_batch(xb):                                      # xb: (S, dIn)
        h = jnp.concatenate(
            [params["cls"], xb @ params["enc_w"].T + params["enc_b"]], axis=0)
        for l in range(num_layers):
            qkv = h @ params["in_w"][l].T + params["in_b"][l]
            q, k, v = qkv[:, :dT], qkv[:, dT:2 * dT], qkv[:, 2 * dT:]
            outs = []
            for hd in range(num_heads):
                qh = q[:, hd * dh:(hd + 1) * dh]
                kh = k[:, hd * dh:(hd + 1) * dh]
                vh = v[:, hd * dh:(hd + 1) * dh]
                s = (qh @ kh.T) / jnp.sqrt(jnp.float32(dh))
                p = jax.nn.softmax(s, axis=-1)
                outs.append(p @ vh)
            attn = jnp.concatenate(outs, axis=-1) @ params["out_w"][l].T \
                   + params["out_b"][l]
            h = _layer_norm(h + attn, params["n1_w"][l], params["n1_b"][l])
            ff = jnp.maximum(h @ params["ff1_w"][l].T + params["ff1_b"][l], 0.0)
            ff = ff @ params["ff2_w"][l].T + params["ff2_b"][l]
            h = _layer_norm(h + ff, params["n2_w"][l], params["n2_b"][l])
        return (h[0:1, :] @ params["dec_w"].T + params["dec_b"])[0]

    return jax.vmap(one_batch)(jnp.transpose(x, (1, 0, 2)))  # (N, dOut)


def init_params(key, dx, dy, dOut, dT, num_layers):
    dIn = dx + dy
    ks = jax.random.split(key, 13)
    r = lambda k, shp, s=0.1: jax.random.normal(k, shp, dtype=jnp.float32) * s
    L = num_layers
    return dict(
        enc_w=r(ks[0], (dT, dIn)), enc_b=r(ks[1], (1, dT)),
        cls=r(ks[2], (1, dT)),
        in_w=r(ks[3], (L, 3 * dT, dT)), in_b=r(ks[4], (L, 1, 3 * dT)),
        out_w=r(ks[5], (L, dT, dT)), out_b=r(ks[6], (L, 1, dT)),
        ff1_w=r(ks[7], (L, 4 * dT, dT)), ff1_b=r(ks[8], (L, 1, 4 * dT)),
        ff2_w=r(ks[9], (L, dT, 4 * dT)), ff2_b=r(ks[10], (L, 1, dT)),
        n1_w=jnp.ones((L, 1, dT), jnp.float32),
        n1_b=jnp.zeros((L, 1, dT), jnp.float32),
        n2_w=jnp.ones((L, 1, dT), jnp.float32),
        n2_b=jnp.zeros((L, 1, dT), jnp.float32),
        dec_w=r(ks[11], (dOut, dT)), dec_b=r(ks[12], (1, dOut)),
    )


if __name__ == "__main__":
    dx, dy, dOut, dT, num_heads, num_layers = 3, 5, 4, 32, 4, 2
    S, N = 8, 16                       # N=16, Nb=8 -> 2 grid steps (both v7x TCs busy)
    dIn = dx + dy

    key = jax.random.PRNGKey(0)
    kx, kp = jax.random.split(key)
    x = jax.random.normal(kx, (S, N, dIn), dtype=jnp.float32)   # (seq, batch, dIn)
    params = init_params(kp, dx, dy, dOut, dT, num_layers)

    out = transformer_forward(x, params, num_heads=num_heads,
                              num_layers=num_layers)
    out = jax.block_until_ready(out)

    ref = _reference_forward(x, params, num_heads=num_heads,
                             num_layers=num_layers)
    assert out.shape == (N, dOut)
    assert jnp.allclose(out, ref, rtol=2e-3, atol=2e-3), "mismatch vs JAX reference"
    print("KERNEL_OK")
</pallas_src>

<mosaic_0001>
module attributes {stable_mosaic.version = 11 : i64} {
  func.func @transformer_kernel(%arg0: i32, %arg1: memref<8x8x8xf32, #tpu.memory_space<vmem>>, %arg2: memref<8x32xf32, #tpu.memory_space<vmem>>, %arg3: memref<1x32xf32, #tpu.memory_space<vmem>>, %arg4: memref<1x32xf32, #tpu.memory_space<vmem>>, %arg5: memref<2x3x32x32xf32, #tpu.memory_space<vmem>>, %arg6: memref<2x3x1x32xf32, #tpu.memory_space<vmem>>, %arg7: memref<2x32x32xf32, #tpu.memory_space<vmem>>, %arg8: memref<2x1x32xf32, #tpu.memory_space<vmem>>, %arg9: memref<2x32x128xf32, #tpu.memory_space<vmem>>, %arg10: memref<2x1x128xf32, #tpu.memory_space<vmem>>, %arg11: memref<2x128x32xf32, #tpu.memory_space<vmem>>, %arg12: memref<2x1x32xf32, #tpu.memory_space<vmem>>, %arg13: memref<2x1x32xf32, #tpu.memory_space<vmem>>, %arg14: memref<2x1x32xf32, #tpu.memory_space<vmem>>, %arg15: memref<2x1x32xf32, #tpu.memory_space<vmem>>, %arg16: memref<2x1x32xf32, #tpu.memory_space<vmem>>, %arg17: memref<32x4xf32, #tpu.memory_space<vmem>>, %arg18: memref<1x4xf32, #tpu.memory_space<vmem>>, %arg19: memref<8x4xf32, #tpu.memory_space<vmem>>, %arg20: memref<8x16x32xf32, #tpu.memory_space<vmem>>) attributes {dimension_semantics = [#tpu.dimension_semantics<parallel>], iteration_bounds = array<i64: 2>, scalar_prefetch = 0 : i64, scratch_operands = 1 : i64, tpu.core_type = #tpu.core_type<tc>, window_params = [{transform_indices = @transform_0, window_bounds = array<i64: 8, 8, 8>}, {pipeline_mode = #tpu.pipeline_mode<synchronous>, transform_indices = @transform_1, window_bounds = array<i64: 8, 32>}, {pipeline_mode = #tpu.pipeline_mode<synchronous>, transform_indices = @transform_2, window_bounds = array<i64: 1, 32>}, {pipeline_mode = #tpu.pipeline_mode<synchronous>, transform_indices = @transform_3, window_bounds = array<i64: 1, 32>}, {pipeline_mode = #tpu.pipeline_mode<synchronous>, transform_indices = @transform_4, window_bounds = array<i64: 2, 3, 32, 32>}, {pipeline_mode = #tpu.pipeline_mode<synchronous>, transform_indices = @transform_5, window_bounds = array<i64: 2, 3, 1, 32>}, {pipeline_mode = #tpu.pipeline_mode<synchronous>, transform_indices = @transform_6, window_bounds = array<i64: 2, 32, 32>}, {pipeline_mode = #tpu.pipeline_mode<synchronous>, transform_indices = @transform_7, window_bounds = array<i64: 2, 1, 32>}, {pipeline_mode = #tpu.pipeline_mode<synchronous>, transform_indices = @transform_8, window_bounds = array<i64: 2, 32, 128>}, {pipeline_mode = #tpu.pipeline_mode<synchronous>, transform_indices = @transform_9, window_bounds = array<i64: 2, 1, 128>}, {pipeline_mode = #tpu.pipeline_mode<synchronous>, transform_indices = @transform_10, window_bounds = array<i64: 2, 128, 32>}, {pipeline_mode = #tpu.pipeline_mode<synchronous>, transform_indices = @transform_11, window_bounds = array<i64: 2, 1, 32>}, {pipeline_mode = #tpu.pipeline_mode<synchronous>, transform_indices = @transform_12, window_bounds = array<i64: 2, 1, 32>}, {pipeline_mode = #tpu.pipeline_mode<synchronous>, transform_indices = @transform_13, window_bounds = array<i64: 2, 1, 32>}, {pipeline_mode = #tpu.pipeline_mode<synchronous>, transform_indices = @transform_14, window_bounds = array<i64: 2, 1, 32>}, {pipeline_mode = #tpu.pipeline_mode<synchronous>, transform_indices = @transform_15, window_bounds = array<i64: 2, 1, 32>}, {pipeline_mode = #tpu.pipeline_mode<synchronous>, transform_indices = @transform_16, window_bounds = array<i64: 32, 4>}, {pipeline_mode = #tpu.pipeline_mode<synchronous>, transform_indices = @transform_17, window_bounds = array<i64: 1, 4>}, {transform_indices = @transform_18, window_bounds = array<i64: 8, 4>}]} {
    %c0 = arith.constant 0 : index
    %c0_0 = arith.constant 0 : index
    %c0_1 = arith.constant 0 : index
    %0 = vector.load %arg1[%c0, %c0_0, %c0_1] : memref<8x8x8xf32, #tpu.memory_space<vmem>>, vector<8x8x8xf32>
    %1 = vector.shape_cast %0 : vector<8x8x8xf32> to vector<64x8xf32>
    %c0_2 = arith.constant 0 : index
    %c0_3 = arith.constant 0 : index
    %2 = vector.load %arg2[%c0_2, %c0_3] : memref<8x32xf32, #tpu.memory_space<vmem>>, vector<8x32xf32>
    %cst = arith.constant dense<0.000000e+00> : vector<64x32xf32>
    %3 = tpu.matmul %1, %2, %cst {dimension_numbers = #tpu.dot_dimension_numbers<[1], [0], [0], [1], [0, 0, 1, 1], [], []>} : vector<64x8xf32>, vector<8x32xf32>, vector<64x32xf32> -> vector<64x32xf32>
    %c0_4 = arith.constant 0 : index
    %c0_5 = arith.constant 0 : index
    %4 = vector.load %arg3[%c0_4, %c0_5] : memref<1x32xf32, #tpu.memory_space<vmem>>, vector<1x32xf32>
    %5 = vector.broadcast %4 : vector<1x32xf32> to vector<64x32xf32>
    %6 = arith.addf %3, %5 : vector<64x32xf32>
    %cst_6 = arith.constant 0.000000e+00 : f32
    %7 = vector.broadcast %cst_6 : f32 to vector<8x16x32xf32>
    %c0_7 = arith.constant 0 : index
    %c0_8 = arith.constant 0 : index
    %c0_9 = arith.constant 0 : index
    %8 = vector.load %arg20[%c0_7, %c0_8, %c0_9] : memref<8x16x32xf32, #tpu.memory_space<vmem>>, vector<8x16x32xf32>
    tpu.vector_store %arg20[%c0_7, %c0_8, %c0_9], %7 {strides = array<i32>} : memref<8x16x32xf32, #tpu.memory_space<vmem>>, vector<8x16x32xf32>,
    %c0_10 = arith.constant 0 : index
    %c0_11 = arith.constant 0 : index
    %9 = vector.load %arg4[%c0_10, %c0_11] : memref<1x32xf32, #tpu.memory_space<vmem>>, vector<1x32xf32>
    %10 = vector.shape_cast %9 : vector<1x32xf32> to vector<1x1x32xf32>
    %11 = vector.shape_cast %10 : vector<1x1x32xf32> to vector<1x1x32xf32>
    %12 = vector.broadcast %11 : vector<1x1x32xf32> to vector<8x1x32xf32>
    %c0_12 = arith.constant 0 : index
    %c0_13 = arith.constant 0 : index
    %c0_14 = arith.constant 0 : index
    %13 = vector.load %arg20[%c0_12, %c0_13, %c0_14] : memref<8x16x32xf32, #tpu.memory_space<vmem>>, vector<8x1x32xf32>
    tpu.vector_store %arg20[%c0_12, %c0_13, %c0_14], %12 {strides = array<i32>} : memref<8x16x32xf32, #tpu.memory_space<vmem>>, vector<8x1x32xf32>,
    %14 = vector.shape_cast %6 : vector<64x32xf32> to vector<8x8x32xf32>
    %c0_15 = arith.constant 0 : index
    %c1 = arith.constant 1 : index
    %c0_16 = arith.constant 0 : index
    %15 = vector.load %arg20[%c0_15, %c1, %c0_16] : memref<8x16x32xf32, #tpu.memory_space<vmem>>, vector<8x8x32xf32>
    tpu.vector_store %arg20[%c0_15, %c1, %c0_16], %14 {strides = array<i32>} : memref<8x16x32xf32, #tpu.memory_space<vmem>>, vector<8x8x32xf32>,
    %c0_17 = arith.constant 0 : index
    %c0_18 = arith.constant 0 : index
    %c0_19 = arith.constant 0 : index
    %16 = vector.load %arg20[%c0_17, %c0_18, %c0_19] : memref<8x16x32xf32, #tpu.memory_space<vmem>>, vector<8x16x32xf32>
    %17 = vector.shape_cast %16 : vector<8x16x32xf32> to vector<128x32xf32>
    %18 = tpu.iota {dimensions = array<i32: 2>} : vector<8x16x16xi32>
    %c9_i32 = arith.constant 9 : i32
    %19 = vector.broadcast %c9_i32 : i32 to vector<8x16x16xi32>
    %20 = arith.cmpi slt, %18, %19 : vector<8x16x16xi32>
    %c0_20 = arith.constant 0 : index
    %c0_21 = arith.constant 0 : index
    %c0_22 = arith.constant 0 : index
    %c0_23 = arith.constant 0 : index
    %21 = vector.load %arg5[%c0_20, %c0_21, %c0_22, %c0_23] : memref<2x3x32x32xf32, #tpu.memory_space<vmem>>, vector<1x1x32x32xf32>
    %22 = vector.shape_cast %21 : vector<1x1x32x32xf32> to vector<32x32xf32>
    %cst_24 = arith.constant dense<0.000000e+00> : vector<128x32xf32>
    %23 = tpu.matmul %17, %22, %cst_24 {dimension_numbers = #tpu.dot_dimension_numbers<[1], [0], [0], [1], [0, 0, 1, 1], [], []>} : vector<128x32xf32>, vector<32x32xf32>, vector<128x32xf32> -> vector<128x32xf32>
    %c0_25 = arith.constant 0 : index
    %c0_26 = arith.constant 0 : index
    %c0_27 = arith.constant 0 : index
    %c0_28 = arith.constant 0 : index
    %24 = vector.load %arg6[%c0_25, %c0_26, %c0_27, %c0_28] : memref<2x3x1x32xf32, #tpu.memory_space<vmem>>, vector<1x1x1x32xf32>
    %25 = vector.shape_cast %24 : vector<1x1x1x32xf32> to vector<1x32xf32>
    %26 = vector.broadcast %25 : vector<1x32xf32> to vector<128x32xf32>
    %27 = arith.addf %23, %26 : vector<128x32xf32>
    %c0_29 = arith.constant 0 : index
    %c1_30 = arith.constant 1 : index
    %c0_31 = arith.constant 0 : index
    %c0_32 = arith.constant 0 : index
    %28 = vector.load %arg5[%c0_29, %c1_30, %c0_31, %c0_32] : memref<2x3x32x32xf32, #tpu.memory_space<vmem>>, vector<1x1x32x32xf32>
    %29 = vector.shape_cast %28 : vector<1x1x32x32xf32> to vector<32x32xf32>
    %cst_33 = arith.constant dense<0.000000e+00> : vector<128x32xf32>
    %30 = tpu.matmul %17, %29, %cst_33 {dimension_numbers = #tpu.dot_dimension_numbers<[1], [0], [0], [1], [0, 0, 1, 1], [], []>} : vector<128x32xf32>, vector<32x32xf32>, vector<128x32xf32> -> vector<128x32xf32>
    %c0_34 = arith.constant 0 : index
    %c1_35 = arith.constant 1 : index
    %c0_36 = arith.constant 0 : index
    %c0_37 = arith.constant 0 : index
    %31 = vector.load %arg6[%c0_34, %c1_35, %c0_36, %c0_37] : memref<2x3x1x32xf32, #tpu.memory_space<vmem>>, vector<1x1x1x32xf32>
    %32 = vector.shape_cast %31 : vector<1x1x1x32xf32> to vector<1x32xf32>
    %33 = vector.broadcast %32 : vector<1x32xf32> to vector<128x32xf32>
    %34 = arith.addf %30, %33 : vector<128x32xf32>
    %c0_38 = arith.constant 0 : index
    %c2 = arith.constant 2 : index
    %c0_39 = arith.constant 0 : index
    %c0_40 = arith.constant 0 : index
    %35 = vector.load %arg5[%c0_38, %c2, %c0_39, %c0_40] : memref<2x3x32x32xf32, #tpu.memory_space<vmem>>, vector<1x1x32x32xf32>
    %36 = vector.shape_cast %35 : vector<1x1x32x32xf32> to vector<32x32xf32>
    %cst_41 = arith.constant dense<0.000000e+00> : vector<128x32xf32>
    %37 = tpu.matmul %17, %36, %cst_41 {dimension_numbers = #tpu.dot_dimension_numbers<[1], [0], [0], [1], [0, 0, 1, 1], [], []>} : vector<128x32xf32>, vector<32x32xf32>, vector<128x32xf32> -> vector<128x32xf32>
    %c0_42 = arith.constant 0 : index
    %c2_43 = arith.constant 2 : index
    %c0_44 = arith.constant 0 : index
    %c0_45 = arith.constant 0 : index
    %38 = vector.load %arg6[%c0_42, %c2_43, %c0_44, %c0_45] : memref<2x3x1x32xf32, #tpu.memory_space<vmem>>, vector<1x1x1x32xf32>
    %39 = vector.shape_cast %38 : vector<1x1x1x32xf32> to vector<1x32xf32>
    %40 = vector.broadcast %39 : vector<1x32xf32> to vector<128x32xf32>
    %41 = arith.addf %37, %40 : vector<128x32xf32>
    %42 = vector.shape_cast %27 : vector<128x32xf32> to vector<8x16x32xf32>
    %43 = vector.shape_cast %34 : vector<128x32xf32> to vector<8x16x32xf32>
    %44 = vector.shape_cast %41 : vector<128x32xf32> to vector<8x16x32xf32>
    %c0_46 = arith.constant 0 : index
    %c0_47 = arith.constant 0 : index
    %c0_48 = arith.constant 0 : index
    %45 = vector.load %arg7[%c0_46, %c0_47, %c0_48] : memref<2x32x32xf32, #tpu.memory_space<vmem>>, vector<1x32x32xf32>
    %46 = vector.shape_cast %45 : vector<1x32x32xf32> to vector<32x32xf32>
    %cst_49 = arith.constant 0.000000e+00 : f32
    %47 = vector.broadcast %cst_49 : f32 to vector<128x32xf32>
    %48 = vector.extract_strided_slice %42 {offsets = [0, 0, 0], sizes = [8, 16, 8], strides = [1, 1, 1]} : vector<8x16x32xf32> to vector<8x16x8xf32>
    %49 = vector.extract_strided_slice %43 {offsets = [0, 0, 0], sizes = [8, 16, 8], strides = [1, 1, 1]} : vector<8x16x32xf32> to vector<8x16x8xf32>
    %50 = vector.extract_strided_slice %44 {offsets = [0, 0, 0], sizes = [8, 16, 8], strides = [1, 1, 1]} : vector<8x16x32xf32> to vector<8x16x8xf32>
    "tpu.trace_start"() <{level = 10 : i32, message = "bqd,bkd->bqk"}> : () -> ()
    %cst_50 = arith.constant dense<0.000000e+00> : vector<8x16x16xf32>
    %51 = tpu.matmul %48, %49, %cst_50 {dimension_numbers = #tpu.dot_dimension_numbers<[2], [2], [1], [1], [0, 0, 0, 1, 1, 1], [0], [0]>} : vector<8x16x8xf32>, vector<8x16x8xf32>, vector<8x16x16xf32> -> vector<8x16x16xf32>
    "tpu.trace_stop"() : () -> ()
    %cst_51 = arith.constant 0.353553385 : f32
    %52 = vector.broadcast %cst_51 : f32 to vector<8x16x16xf32>
    %53 = arith.mulf %51, %52 : vector<8x16x16xf32>
    %cst_52 = arith.constant -1.000000e+30 : f32
    %54 = vector.broadcast %cst_52 : f32 to vector<8x16x16xf32>
    %55 = arith.select %20, %53, %54 : vector<8x16x16xi1>, vector<8x16x16xf32>
    %cst_53 = arith.constant dense<0xFF800000> : vector<8x16xf32>
    %56 = vector.multi_reduction <maximumf>, %55, %cst_53 [2] : vector<8x16x16xf32> to vector<8x16xf32>
    %57 = vector.shape_cast %56 : vector<8x16xf32> to vector<8x16x1xf32>
    %58 = vector.broadcast %57 : vector<8x16x1xf32> to vector<8x16x16xf32>
    %59 = arith.subf %55, %58 : vector<8x16x16xf32>
    %60 = math.exp %59 : vector<8x16x16xf32>
    %cst_54 = arith.constant dense<0.000000e+00> : vector<8x16xf32>
    %61 = vector.multi_reduction <add>, %60, %cst_54 [2] : vector<8x16x16xf32> to vector<8x16xf32>
    %62 = vector.shape_cast %61 : vector<8x16xf32> to vector<8x16x1xf32>
    %63 = tpu.reciprocal %62 {approx = true} : vector<8x16x1xf32> -> vector<8x16x1xf32>
    %64 = vector.broadcast %63 : vector<8x16x1xf32> to vector<8x16x16xf32>
    %65 = arith.mulf %60, %64 : vector<8x16x16xf32>
    "tpu.trace_start"() <{level = 10 : i32, message = "bqk,bkd->bqd"}> : () -> ()
    %cst_55 = arith.constant dense<0.000000e+00> : vector<8x16x8xf32>
    %66 = tpu.matmul %65, %50, %cst_55 {dimension_numbers = #tpu.dot_dimension_numbers<[2], [1], [1], [2], [0, 0, 0, 1, 1, 2], [0], [0]>} : vector<8x16x16xf32>, vector<8x16x8xf32>, vector<8x16x8xf32> -> vector<8x16x8xf32>
    "tpu.trace_stop"() : () -> ()
    %67 = vector.shape_cast %66 : vector<8x16x8xf32> to vector<128x8xf32>
    %68 = vector.extract_strided_slice %46 {offsets = [0, 0], sizes = [8, 32], strides = [1, 1]} : vector<32x32xf32> to vector<8x32xf32>
    %cst_56 = arith.constant dense<0.000000e+00> : vector<128x32xf32>
    %69 = tpu.matmul %67, %68, %cst_56 {dimension_numbers = #tpu.dot_dimension_numbers<[1], [0], [0], [1], [0, 0, 1, 1], [], []>} : vector<128x8xf32>, vector<8x32xf32>, vector<128x32xf32> -> vector<128x32xf32>
    %70 = arith.addf %47, %69 : vector<128x32xf32>
    %71 = vector.extract_strided_slice %42 {offsets = [0, 0, 8], sizes = [8, 16, 8], strides = [1, 1, 1]} : vector<8x16x32xf32> to vector<8x16x8xf32>
    %72 = vector.extract_strided_slice %43 {offsets = [0, 0, 8], sizes = [8, 16, 8], strides = [1, 1, 1]} : vector<8x16x32xf32> to vector<8x16x8xf32>
    %73 = vector.extract_strided_slice %44 {offsets = [0, 0, 8], sizes = [8, 16, 8], strides = [1, 1, 1]} : vector<8x16x32xf32> to vector<8x16x8xf32>
    "tpu.trace_start"() <{level = 10 : i32, message = "bqd,bkd->bqk"}> : () -> ()
    %cst_57 = arith.constant dense<0.000000e+00> : vector<8x16x16xf32>
    %74 = tpu.matmul %71, %72, %cst_57 {dimension_numbers = #tpu.dot_dimension_numbers<[2], [2], [1], [1], [0, 0, 0, 1, 1, 1], [0], [0]>} : vector<8x16x8xf32>, vector<8x16x8xf32>, vector<8x16x16xf32> -> vector<8x16x16xf32>
    "tpu.trace_stop"() : () -> ()
    %cst_58 = arith.constant 0.353553385 : f32
    %75 = vector.broadcast %cst_58 : f32 to vector<8x16x16xf32>
    %76 = arith.mulf %74, %75 : vector<8x16x16xf32>
    %cst_59 = arith.constant -1.000000e+30 : f32
    %77 = vector.broadcast %cst_59 : f32 to vector<8x16x16xf32>
    %78 = arith.select %20, %76, %77 : vector<8x16x16xi1>, vector<8x16x16xf32>
    %cst_60 = arith.constant dense<0xFF800000> : vector<8x16xf32>
    %79 = vector.multi_reduction <maximumf>, %78, %cst_60 [2] : vector<8x16x16xf32> to vector<8x16xf32>
    %80 = vector.shape_cast %79 : vector<8x16xf32> to vector<8x16x1xf32>
    %81 = vector.broadcast %80 : vector<8x16x1xf32> to vector<8x16x16xf32>
    %82 = arith.subf %78, %81 : vector<8x16x16xf32>
    %83 = math.exp %82 : vector<8x16x16xf32>
    %cst_61 = arith.constant dense<0.000000e+00> : vector<8x16xf32>
    %84 = vector.multi_reduction <add>, %83, %cst_61 [2] : vector<8x16x16xf32> to vector<8x16xf32>
    %85 = vector.shape_cast %84 : vector<8x16xf32> to vector<8x16x1xf32>
    %86 = tpu.reciprocal %85 {approx = true} : vector<8x16x1xf32> -> vector<8x16x1xf32>
    %87 = vector.broadcast %86 : vector<8x16x1xf32> to vector<8x16x16xf32>
    %88 = arith.mulf %83, %87 : vector<8x16x16xf32>
    "tpu.trace_start"() <{level = 10 : i32, message = "bqk,bkd->bqd"}> : () -> ()
    %cst_62 = arith.constant dense<0.000000e+00> : vector<8x16x8xf32>
    %89 = tpu.matmul %88, %73, %cst_62 {dimension_numbers = #tpu.dot_dimension_numbers<[2], [1], [1], [2], [0, 0, 0, 1, 1, 2], [0], [0]>} : vector<8x16x16xf32>, vector<8x16x8xf32>, vector<8x16x8xf32> -> vector<8x16x8xf32>
    "tpu.trace_stop"() : () -> ()
    %90 = vector.shape_cast %89 : vector<8x16x8xf32> to vector<128x8xf32>
    %91 = vector.extract_strided_slice %46 {offsets = [8, 0], sizes = [8, 32], strides = [1, 1]} : vector<32x32xf32> to vector<8x32xf32>
    %cst_63 = arith.constant dense<0.000000e+00> : vector<128x32xf32>
    %92 = tpu.matmul %90, %91, %cst_63 {dimension_numbers = #tpu.dot_dimension_numbers<[1], [0], [0], [1], [0, 0, 1, 1], [], []>} : vector<128x8xf32>, vector<8x32xf32>, vector<128x32xf32> -> vector<128x32xf32>
    %93 = arith.addf %70, %92 : vector<128x32xf32>
    %94 = vector.extract_strided_slice %42 {offsets = [0, 0, 16], sizes = [8, 16, 8], strides = [1, 1, 1]} : vector<8x16x32xf32> to vector<8x16x8xf32>
    %95 = vector.extract_strided_slice %43 {offsets = [0, 0, 16], sizes = [8, 16, 8], strides = [1, 1, 1]} : vector<8x16x32xf32> to vector<8x16x8xf32>
    %96 = vector.extract_strided_slice %44 {offsets = [0, 0, 16], sizes = [8, 16, 8], strides = [1, 1, 1]} : vector<8x16x32xf32> to vector<8x16x8xf32>
    "tpu.trace_start"() <{level = 10 : i32, message = "bqd,bkd->bqk"}> : () -> ()
    %cst_64 = arith.constant dense<0.000000e+00> : vector<8x16x16xf32>
    %97 = tpu.matmul %94, %95, %cst_64 {dimension_numbers = #tpu.dot_dimension_numbers<[2], [2], [1], [1], [0, 0, 0, 1, 1, 1], [0], [0]>} : vector<8x16x8xf32>, vector<8x16x8xf32>, vector<8x16x16xf32> -> vector<8x16x16xf32>
    "tpu.trace_stop"() : () -> ()
    %cst_65 = arith.constant 0.353553385 : f32
    %98 = vector.broadcast %cst_65 : f32 to vector<8x16x16xf32>
    %99 = arith.mulf %97, %98 : vector<8x16x16xf32>
    %cst_66 = arith.constant -1.000000e+30 : f32
    %100 = vector.broadcast %cst_66 : f32 to vector<8x16x16xf32>
    %101 = arith.select %20, %99, %100 : vector<8x16x16xi1>, vector<8x16x16xf32>
    %cst_67 = arith.constant dense<0xFF800000> : vector<8x16xf32>
    %102 = vector.multi_reduction <maximumf>, %101, %cst_67 [2] : vector<8x16x16xf32> to vector<8x16xf32>
    %103 = vector.shape_cast %102 : vector<8x16xf32> to vector<8x16x1xf32>
    %104 = vector.broadcast %103 : vector<8x16x1xf32> to vector<8x16x16xf32>
    %105 = arith.subf %101, %104 : vector<8x16x16xf32>
    %106 = math.exp %105 : vector<8x16x16xf32>
    %cst_68 = arith.constant dense<0.000000e+00> : vector<8x16xf32>
    %107 = vector.multi_reduction <add>, %106, %cst_68 [2] : vector<8x16x16xf32> to vector<8x16xf32>
    %108 = vector.shape_cast %107 : vector<8x16xf32> to vector<8x16x1xf32>
    %109 = tpu.reciprocal %108 {approx = true} : vector<8x16x1xf32> -> vector<8x16x1xf32>
    %110 = vector.broadcast %109 : vector<8x16x1xf32> to vector<8x16x16xf32>
    %111 = arith.mulf %106, %110 : vector<8x16x16xf32>
    "tpu.trace_start"() <{level = 10 : i32, message = "bqk,bkd->bqd"}> : () -> ()
    %cst_69 = arith.constant dense<0.000000e+00> : vector<8x16x8xf32>
    %112 = tpu.matmul %111, %96, %cst_69 {dimension_numbers = #tpu.dot_dimension_numbers<[2], [1], [1], [2], [0, 0, 0, 1, 1, 2], [0], [0]>} : vector<8x16x16xf32>, vector<8x16x8xf32>, vector<8x16x8xf32> -> vector<8x16x8xf32>
    "tpu.trace_stop"() : () -> ()
    %113 = vector.shape_cast %112 : vector<8x16x8xf32> to vector<128x8xf32>
    %114 = vector.extract_strided_slice %46 {offsets = [16, 0], sizes = [8, 32], strides = [1, 1]} : vector<32x32xf32> to vector<8x32xf32>
    %cst_70 = arith.constant dense<0.000000e+00> : vector<128x32xf32>
    %115 = tpu.matmul %113, %114, %cst_70 {dimension_numbers = #tpu.dot_dimension_numbers<[1], [0], [0], [1], [0, 0, 1, 1], [], []>} : vector<128x8xf32>, vector<8x32xf32>, vector<128x32xf32> -> vector<128x32xf32>
    %116 = arith.addf %93, %115 : vector<128x32xf32>
    %117 = vector.extract_strided_slice %42 {offsets = [0, 0, 24], sizes = [8, 16, 8], strides = [1, 1, 1]} : vector<8x16x32xf32> to vector<8x16x8xf32>
    %118 = vector.extract_strided_slice %43 {offsets = [0, 0, 24], sizes = [8, 16, 8], strides = [1, 1, 1]} : vector<8x16x32xf32> to vector<8x16x8xf32>
    %119 = vector.extract_strided_slice %44 {offsets = [0, 0, 24], sizes = [8, 16, 8], strides = [1, 1, 1]} : vector<8x16x32xf32> to vector<8x16x8xf32>
    "tpu.trace_start"() <{level = 10 : i32, message = "bqd,bkd->bqk"}> : () -> ()
    %cst_71 = arith.constant dense<0.000000e+00> : vector<8x16x16xf32>
    %120 = tpu.matmul %117, %118, %cst_71 {dimension_numbers = #tpu.dot_dimension_numbers<[2], [2], [1], [1], [0, 0, 0, 1, 1, 1], [0], [0]>} : vector<8x16x8xf32>, vector<8x16x8xf32>, vector<8x16x16xf32> -> vector<8x16x16xf32>
    "tpu.trace_stop"() : () -> ()
    %cst_72 = arith.constant 0.353553385 : f32
    %121 = vector.broadcast %cst_72 : f32 to vector<8x16x16xf32>
    %122 = arith.mulf %120, %121 : vector<8x16x16xf32>
    %cst_73 = arith.constant -1.000000e+30 : f32
    %123 = vector.broadcast %cst_73 : f32 to vector<8x16x16xf32>
    %124 = arith.select %20, %122, %123 : vector<8x16x16xi1>, vector<8x16x16xf32>
    %cst_74 = arith.constant dense<0xFF800000> : vector<8x16xf32>
    %125 = vector.multi_reduction <maximumf>, %124, %cst_74 [2] : vector<8x16x16xf32> to vector<8x16xf32>
    %126 = vector.shape_cast %125 : vector<8x16xf32> to vector<8x16x1xf32>
    %127 = vector.broadcast %126 : vector<8x16x1xf32> to vector<8x16x16xf32>
    %128 = arith.subf %124, %127 : vector<8x16x16xf32>
    %129 = math.exp %128 : vector<8x16x16xf32>
    %cst_75 = arith.constant dense<0.000000e+00> : vector<8x16xf32>
    %130 = vector.multi_reduction <add>, %129, %cst_75 [2] : vector<8x16x16xf32> to vector<8x16xf32>
    %131 = vector.shape_cast %130 : vector<8x16xf32> to vector<8x16x1xf32>
    %132 = tpu.reciprocal %131 {approx = true} : vector<8x16x1xf32> -> vector<8x16x1xf32>
    %133 = vector.broadcast %132 : vector<8x16x1xf32> to vector<8x16x16xf32>
    %134 = arith.mulf %129, %133 : vector<8x16x16xf32>
    "tpu.trace_start"() <{level = 10 : i32, message = "bqk,bkd->bqd"}> : () -> ()
    %cst_76 = arith.constant dense<0.000000e+00> : vector<8x16x8xf32>
    %135 = tpu.matmul %134, %119, %cst_76 {dimension_numbers = #tpu.dot_dimension_numbers<[2], [1], [1], [2], [0, 0, 0, 1, 1, 2], [0], [0]>} : vector<8x16x16xf32>, vector<8x16x8xf32>, vector<8x16x8xf32> -> vector<8x16x8xf32>
    "tpu.trace_stop"() : () -> ()
    %136 = vector.shape_cast %135 : vector<8x16x8xf32> to vector<128x8xf32>
    %137 = vector.extract_strided_slice %46 {offsets = [24, 0], sizes = [8, 32], strides = [1, 1]} : vector<32x32xf32> to vector<8x32xf32>
    %cst_77 = arith.constant dense<0.000000e+00> : vector<128x32xf32>
    %138 = tpu.matmul %136, %137, %cst_77 {dimension_numbers = #tpu.dot_dimension_numbers<[1], [0], [0], [1], [0, 0, 1, 1], [], []>} : vector<128x8xf32>, vector<8x32xf32>, vector<128x32xf32> -> vector<128x32xf32>
    %139 = arith.addf %116, %138 : vector<128x32xf32>
    %c0_78 = arith.constant 0 : index
    %c0_79 = arith.constant 0 : index
    %c0_80 = arith.constant 0 : index
    %140 = vector.load %arg8[%c0_78, %c0_79, %c0_80] : memref<2x1x32xf32, #tpu.memory_space<vmem>>, vector<1x1x32xf32>
    %141 = vector.shape_cast %140 : vector<1x1x32xf32> to vector<1x32xf32>
    %142 = vector.broadcast %141 : vector<1x32xf32> to vector<128x32xf32>
    %143 = arith.addf %139, %142 : vector<128x32xf32>
    %144 = arith.addf %17, %143 : vector<128x32xf32>
    %c0_81 = arith.constant 0 : index
    %c0_82 = arith.constant 0 : index
    %c0_83 = arith.constant 0 : index
    %145 = vector.load %arg13[%c0_81, %c0_82, %c0_83] : memref<2x1x32xf32, #tpu.memory_space<vmem>>, vector<1x1x32xf32>
    %146 = vector.shape_cast %145 : vector<1x1x32xf32> to vector<1x32xf32>
    %c0_84 = arith.constant 0 : index
    %c0_85 = arith.constant 0 : index
    %c0_86 = arith.constant 0 : index
    %147 = vector.load %arg14[%c0_84, %c0_85, %c0_86] : memref<2x1x32xf32, #tpu.memory_space<vmem>>, vector<1x1x32xf32>
    %148 = vector.shape_cast %147 : vector<1x1x32xf32> to vector<1x32xf32>
    %cst_87 = arith.constant dense<0.000000e+00> : vector<128xf32>
    %149 = vector.multi_reduction <add>, %144, %cst_87 [1] : vector<128x32xf32> to vector<128xf32>
    %150 = vector.shape_cast %149 : vector<128xf32> to vector<128x1xf32>
    %cst_88 = arith.constant 3.200000e+01 : f32
    %151 = vector.broadcast %cst_88 : f32 to vector<128x1xf32>
    %152 = arith.divf %150, %151 : vector<128x1xf32>
    %153 = vector.broadcast %152 : vector<128x1xf32> to vector<128x32xf32>
    %154 = arith.subf %144, %153 : vector<128x32xf32>
    %155 = arith.mulf %154, %154 : vector<128x32xf32>
    %cst_89 = arith.constant dense<0.000000e+00> : vector<128xf32>
    %156 = vector.multi_reduction <add>, %155, %cst_89 [1] : vector<128x32xf32> to vector<128xf32>
    %157 = vector.shape_cast %156 : vector<128xf32> to vector<128x1xf32>
    %cst_90 = arith.constant 3.200000e+01 : f32
    %158 = vector.broadcast %cst_90 : f32 to vector<128x1xf32>
    %159 = arith.divf %157, %158 : vector<128x1xf32>
    %160 = vector.broadcast %152 : vector<128x1xf32> to vector<128x32xf32>
    %161 = arith.subf %144, %160 : vector<128x32xf32>
    %cst_91 = arith.constant 9.99999974E-6 : f32
    %162 = vector.broadcast %cst_91 : f32 to vector<128x1xf32>
    %163 = arith.addf %159, %162 : vector<128x1xf32>
    %164 = math.rsqrt %163 : vector<128x1xf32>
    %165 = vector.broadcast %164 : vector<128x1xf32> to vector<128x32xf32>
    %166 = arith.mulf %161, %165 : vector<128x32xf32>
    %167 = vector.broadcast %146 : vector<1x32xf32> to vector<128x32xf32>
    %168 = arith.mulf %166, %167 : vector<128x32xf32>
    %169 = vector.broadcast %148 : vector<1x32xf32> to vector<128x32xf32>
    %170 = arith.addf %168, %169 : vector<128x32xf32>
    %c0_92 = arith.constant 0 : index
    %c0_93 = arith.constant 0 : index
    %c0_94 = arith.constant 0 : index
    %171 = vector.load %arg9[%c0_92, %c0_93, %c0_94] : memref<2x32x128xf32, #tpu.memory_space<vmem>>, vector<1x32x128xf32>
    %172 = vector.shape_cast %171 : vector<1x32x128xf32> to vector<32x128xf32>
    %cst_95 = arith.constant dense<0.000000e+00> : vector<128x128xf32>
    %173 = tpu.matmul %170, %172, %cst_95 {dimension_numbers = #tpu.dot_dimension_numbers<[1], [0], [0], [1], [0, 0, 1, 1], [], []>} : vector<128x32xf32>, vector<32x128xf32>, vector<128x128xf32> -> vector<128x128xf32>
    %c0_96 = arith.constant 0 : index
    %c0_97 = arith.constant 0 : index
    %c0_98 = arith.constant 0 : index
    %174 = vector.load %arg10[%c0_96, %c0_97, %c0_98] : memref<2x1x128xf32, #tpu.memory_space<vmem>>, vector<1x1x128xf32>
    %175 = vector.shape_cast %174 : vector<1x1x128xf32> to vector<1x128xf32>
    %176 = vector.broadcast %175 : vector<1x128xf32> to vector<128x128xf32>
    %177 = arith.addf %173, %176 : vector<128x128xf32>
    %cst_99 = arith.constant 0.000000e+00 : f32
    %178 = vector.broadcast %cst_99 : f32 to vector<128x128xf32>
    %179 = arith.maximumf %177, %178 : vector<128x128xf32>
    %c0_100 = arith.constant 0 : index
    %c0_101 = arith.constant 0 : index
    %c0_102 = arith.constant 0 : index
    %180 = vector.load %arg11[%c0_100, %c0_101, %c0_102] : memref<2x128x32xf32, #tpu.memory_space<vmem>>, vector<1x128x32xf32>
    %181 = vector.shape_cast %180 : vector<1x128x32xf32> to vector<128x32xf32>
    %cst_103 = arith.constant dense<0.000000e+00> : vector<128x32xf32>
    %182 = tpu.matmul %179, %181, %cst_103 {dimension_numbers = #tpu.dot_dimension_numbers<[1], [0], [0], [1], [0, 0, 1, 1], [], []>} : vector<128x128xf32>, vector<128x32xf32>, vector<128x32xf32> -> vector<128x32xf32>
    %c0_104 = arith.constant 0 : index
    %c0_105 = arith.constant 0 : index
    %c0_106 = arith.constant 0 : index
    %183 = vector.load %arg12[%c0_104, %c0_105, %c0_106] : memref<2x1x32xf32, #tpu.memory_space<vmem>>, vector<1x1x32xf32>
    %184 = vector.shape_cast %183 : vector<1x1x32xf32> to vector<1x32xf32>
    %185 = vector.broadcast %184 : vector<1x32xf32> to vector<128x32xf32>
    %186 = arith.addf %182, %185 : vector<128x32xf32>
    %187 = arith.addf %170, %186 : vector<128x32xf32>
    %c0_107 = arith.constant 0 : index
    %c0_108 = arith.constant 0 : index
    %c0_109 = arith.constant 0 : index
    %188 = vector.load %arg15[%c0_107, %c0_108, %c0_109] : memref<2x1x32xf32, #tpu.memory_space<vmem>>, vector<1x1x32xf32>
    %189 = vector.shape_cast %188 : vector<1x1x32xf32> to vector<1x32xf32>
    %c0_110 = arith.constant 0 : index
    %c0_111 = arith.constant 0 : index
    %c0_112 = arith.constant 0 : index
    %190 = vector.load %arg16[%c0_110, %c0_111, %c0_112] : memref<2x1x32xf32, #tpu.memory_space<vmem>>, vector<1x1x32xf32>
    %191 = vector.shape_cast %190 : vector<1x1x32xf32> to vector<1x32xf32>
    %cst_113 = arith.constant dense<0.000000e+00> : vector<128xf32>
    %192 = vector.multi_reduction <add>, %187, %cst_113 [1] : vector<128x32xf32> to vector<128xf32>
    %193 = vector.shape_cast %192 : vector<128xf32> to vector<128x1xf32>
    %cst_114 = arith.constant 3.200000e+01 : f32
    %194 = vector.broadcast %cst_114 : f32 to vector<128x1xf32>
    %195 = arith.divf %193, %194 : vector<128x1xf32>
    %196 = vector.broadcast %195 : vector<128x1xf32> to vector<128x32xf32>
    %197 = arith.subf %187, %196 : vector<128x32xf32>
    %198 = arith.mulf %197, %197 : vector<128x32xf32>
    %cst_115 = arith.constant dense<0.000000e+00> : vector<128xf32>
    %199 = vector.multi_reduction <add>, %198, %cst_115 [1] : vector<128x32xf32> to vector<128xf32>
    %200 = vector.shape_cast %199 : vector<128xf32> to vector<128x1xf32>
    %cst_116 = arith.constant 3.200000e+01 : f32
    %201 = vector.broadcast %cst_116 : f32 to vector<128x1xf32>
    %202 = arith.divf %200, %201 : vector<128x1xf32>
    %203 = vector.broadcast %195 : vector<128x1xf32> to vector<128x32xf32>
    %204 = arith.subf %187, %203 : vector<128x32xf32>
    %cst_117 = arith.constant 9.99999974E-6 : f32
    %205 = vector.broadcast %cst_117 : f32 to vector<128x1xf32>
    %206 = arith.addf %202, %205 : vector<128x1xf32>
    %207 = math.rsqrt %206 : vector<128x1xf32>
    %208 = vector.broadcast %207 : vector<128x1xf32> to vector<128x32xf32>
    %209 = arith.mulf %204, %208 : vector<128x32xf32>
    %210 = vector.broadcast %189 : vector<1x32xf32> to vector<128x32xf32>
    %211 = arith.mulf %209, %210 : vector<128x32xf32>
    %212 = vector.broadcast %191 : vector<1x32xf32> to vector<128x32xf32>
    %213 = arith.addf %211, %212 : vector<128x32xf32>
    %c1_118 = arith.constant 1 : index
    %c0_119 = arith.constant 0 : index
    %c0_120 = arith.constant 0 : index
    %c0_121 = arith.constant 0 : index
    %214 = vector.load %arg5[%c1_118, %c0_119, %c0_120, %c0_121] : memref<2x3x32x32xf32, #tpu.memory_space<vmem>>, vector<1x1x32x32xf32>
    %215 = vector.shape_cast %214 : vector<1x1x32x32xf32> to vector<32x32xf32>
    %cst_122 = arith.constant dense<0.000000e+00> : vector<128x32xf32>
    %216 = tpu.matmul %213, %215, %cst_122 {dimension_numbers = #tpu.dot_dimension_numbers<[1], [0], [0], [1], [0, 0, 1, 1], [], []>} : vector<128x32xf32>, vector<32x32xf32>, vector<128x32xf32> -> vector<128x32xf32>
    %c1_123 = arith.constant 1 : index
    %c0_124 = arith.constant 0 : index
    %c0_125 = arith.constant 0 : index
    %c0_126 = arith.constant 0 : index
    %217 = vector.load %arg6[%c1_123, %c0_124, %c0_125, %c0_126] : memref<2x3x1x32xf32, #tpu.memory_space<vmem>>, vector<1x1x1x32xf32>
    %218 = vector.shape_cast %217 : vector<1x1x1x32xf32> to vector<1x32xf32>
    %219 = vector.broadcast %218 : vector<1x32xf32> to vector<128x32xf32>
    %220 = arith.addf %216, %219 : vector<128x32xf32>
    %c1_127 = arith.constant 1 : index
    %c1_128 = arith.constant 1 : index
    %c0_129 = arith.constant 0 : index
    %c0_130 = arith.constant 0 : index
    %221 = vector.load %arg5[%c1_127, %c1_128, %c0_129, %c0_130] : memref<2x3x32x32xf32, #tpu.memory_space<vmem>>, vector<1x1x32x32xf32>
    %222 = vector.shape_cast %221 : vector<1x1x32x32xf32> to vector<32x32xf32>
    %cst_131 = arith.constant dense<0.000000e+00> : vector<128x32xf32>
    %223 = tpu.matmul %213, %222, %cst_131 {dimension_numbers = #tpu.dot_dimension_numbers<[1], [0], [0], [1], [0, 0, 1, 1], [], []>} : vector<128x32xf32>, vector<32x32xf32>, vector<128x32xf32> -> vector<128x32xf32>
    %c1_132 = arith.constant 1 : index
    %c1_133 = arith.constant 1 : index
    %c0_134 = arith.constant 0 : index
    %c0_135 = arith.constant 0 : index
    %224 = vector.load %arg6[%c1_132, %c1_133, %c0_134, %c0_135] : memref<2x3x1x32xf32, #tpu.memory_space<vmem>>, vector<1x1x1x32xf32>
    %225 = vector.shape_cast %224 : vector<1x1x1x32xf32> to vector<1x32xf32>
    %226 = vector.broadcast %225 : vector<1x32xf32> to vector<128x32xf32>
    %227 = arith.addf %223, %226 : vector<128x32xf32>
    %c1_136 = arith.constant 1 : index
    %c2_137 = arith.constant 2 : index
    %c0_138 = arith.constant 0 : index
    %c0_139 = arith.constant 0 : index
    %228 = vector.load %arg5[%c1_136, %c2_137, %c0_138, %c0_139] : memref<2x3x32x32xf32, #tpu.memory_space<vmem>>, vector<1x1x32x32xf32>
    %229 = vector.shape_cast %228 : vector<1x1x32x32xf32> to vector<32x32xf32>
    %cst_140 = arith.constant dense<0.000000e+00> : vector<128x32xf32>
    %230 = tpu.matmul %213, %229, %cst_140 {dimension_numbers = #tpu.dot_dimension_numbers<[1], [0], [0], [1], [0, 0, 1, 1], [], []>} : vector<128x32xf32>, vector<32x32xf32>, vector<128x32xf32> -> vector<128x32xf32>
    %c1_141 = arith.constant 1 : index
    %c2_142 = arith.constant 2 : index
    %c0_143 = arith.constant 0 : index
    %c0_144 = arith.constant 0 : index
    %231 = vector.load %arg6[%c1_141, %c2_142, %c0_143, %c0_144] : memref<2x3x1x32xf32, #tpu.memory_space<vmem>>, vector<1x1x1x32xf32>
    %232 = vector.shape_cast %231 : vector<1x1x1x32xf32> to vector<1x32xf32>
    %233 = vector.broadcast %232 : vector<1x32xf32> to vector<128x32xf32>
    %234 = arith.addf %230, %233 : vector<128x32xf32>
    %235 = vector.shape_cast %220 : vector<128x32xf32> to vector<8x16x32xf32>
    %236 = vector.shape_cast %227 : vector<128x32xf32> to vector<8x16x32xf32>
    %237 = vector.shape_cast %234 : vector<128x32xf32> to vector<8x16x32xf32>
    %c1_145 = arith.constant 1 : index
    %c0_146 = arith.constant 0 : index
    %c0_147 = arith.constant 0 : index
    %238 = vector.load %arg7[%c1_145, %c0_146, %c0_147] : memref<2x32x32xf32, #tpu.memory_space<vmem>>, vector<1x32x32xf32>
    %239 = vector.shape_cast %238 : vector<1x32x32xf32> to vector<32x32xf32>
    %cst_148 = arith.constant 0.000000e+00 : f32
    %240 = vector.broadcast %cst_148 : f32 to vector<128x32xf32>
    %241 = vector.extract_strided_slice %235 {offsets = [0, 0, 0], sizes = [8, 16, 8], strides = [1, 1, 1]} : vector<8x16x32xf32> to vector<8x16x8xf32>
    %242 = vector.extract_strided_slice %236 {offsets = [0, 0, 0], sizes = [8, 16, 8], strides = [1, 1, 1]} : vector<8x16x32xf32> to vector<8x16x8xf32>
    %243 = vector.extract_strided_slice %237 {offsets = [0, 0, 0], sizes = [8, 16, 8], strides = [1, 1, 1]} : vector<8x16x32xf32> to vector<8x16x8xf32>
    "tpu.trace_start"() <{level = 10 : i32, message = "bqd,bkd->bqk"}> : () -> ()
    %cst_149 = arith.constant dense<0.000000e+00> : vector<8x16x16xf32>
    %244 = tpu.matmul %241, %242, %cst_149 {dimension_numbers = #tpu.dot_dimension_numbers<[2], [2], [1], [1], [0, 0, 0, 1, 1, 1], [0], [0]>} : vector<8x16x8xf32>, vector<8x16x8xf32>, vector<8x16x16xf32> -> vector<8x16x16xf32>
    "tpu.trace_stop"() : () -> ()
    %cst_150 = arith.constant 0.353553385 : f32
    %245 = vector.broadcast %cst_150 : f32 to vector<8x16x16xf32>
    %246 = arith.mulf %244, %245 : vector<8x16x16xf32>
    %cst_151 = arith.constant -1.000000e+30 : f32
    %247 = vector.broadcast %cst_151 : f32 to vector<8x16x16xf32>
    %248 = arith.select %20, %246, %247 : vector<8x16x16xi1>, vector<8x16x16xf32>
    %cst_152 = arith.constant dense<0xFF800000> : vector<8x16xf32>
    %249 = vector.multi_reduction <maximumf>, %248, %cst_152 [2] : vector<8x16x16xf32> to vector<8x16xf32>
    %250 = vector.shape_cast %249 : vector<8x16xf32> to vector<8x16x1xf32>
    %251 = vector.broadcast %250 : vector<8x16x1xf32> to vector<8x16x16xf32>
    %252 = arith.subf %248, %251 : vector<8x16x16xf32>
    %253 = math.exp %252 : vector<8x16x16xf32>
    %cst_153 = arith.constant dense<0.000000e+00> : vector<8x16xf32>
    %254 = vector.multi_reduction <add>, %253, %cst_153 [2] : vector<8x16x16xf32> to vector<8x16xf32>
    %255 = vector.shape_cast %254 : vector<8x16xf32> to vector<8x16x1xf32>
    %256 = tpu.reciprocal %255 {approx = true} : vector<8x16x1xf32> -> vector<8x16x1xf32>
    %257 = vector.broadcast %256 : vector<8x16x1xf32> to vector<8x16x16xf32>
    %258 = arith.mulf %253, %257 : vector<8x16x16xf32>
    "tpu.trace_start"() <{level = 10 : i32, message = "bqk,bkd->bqd"}> : () -> ()
    %cst_154 = arith.constant dense<0.000000e+00> : vector<8x16x8xf32>
    %259 = tpu.matmul %258, %243, %cst_154 {dimension_numbers = #tpu.dot_dimension_numbers<[2], [1], [1], [2], [0, 0, 0, 1, 1, 2], [0], [0]>} : vector<8x16x16xf32>, vector<8x16x8xf32>, vector<8x16x8xf32> -> vector<8x16x8xf32>
    "tpu.trace_stop"() : () -> ()
    %260 = vector.shape_cast %259 : vector<8x16x8xf32> to vector<128x8xf32>
    %261 = vector.extract_strided_slice %239 {offsets = [0, 0], sizes = [8, 32], strides = [1, 1]} : vector<32x32xf32> to vector<8x32xf32>
    %cst_155 = arith.constant dense<0.000000e+00> : vector<128x32xf32>
    %262 = tpu.matmul %260, %261, %cst_155 {dimension_numbers = #tpu.dot_dimension_numbers<[1], [0], [0], [1], [0, 0, 1, 1], [], []>} : vector<128x8xf32>, vector<8x32xf32>, vector<128x32xf32> -> vector<128x32xf32>
    %263 = arith.addf %240, %262 : vector<128x32xf32>
    %264 = vector.extract_strided_slice %235 {offsets = [0, 0, 8], sizes = [8, 16, 8], strides = [1, 1, 1]} : vector<8x16x32xf32> to vector<8x16x8xf32>
    %265 = vector.extract_strided_slice %236 {offsets = [0, 0, 8], sizes = [8, 16, 8], strides = [1, 1, 1]} : vector<8x16x32xf32> to vector<8x16x8xf32>
    %266 = vector.extract_strided_slice %237 {offsets = [0, 0, 8], sizes = [8, 16, 8], strides = [1, 1, 1]} : vector<8x16x32xf32> to vector<8x16x8xf32>
    "tpu.trace_start"() <{level = 10 : i32, message = "bqd,bkd->bqk"}> : () -> ()
    %cst_156 = arith.constant dense<0.000000e+00> : vector<8x16x16xf32>
    %267 = tpu.matmul %264, %265, %cst_156 {dimension_numbers = #tpu.dot_dimension_numbers<[2], [2], [1], [1], [0, 0, 0, 1, 1, 1], [0], [0]>} : vector<8x16x8xf32>, vector<8x16x8xf32>, vector<8x16x16xf32> -> vector<8x16x16xf32>
    "tpu.trace_stop"() : () -> ()
    %cst_157 = arith.constant 0.353553385 : f32
    %268 = vector.broadcast %cst_157 : f32 to vector<8x16x16xf32>
    %269 = arith.mulf %267, %268 : vector<8x16x16xf32>
    %cst_158 = arith.constant -1.000000e+30 : f32
    %270 = vector.broadcast %cst_158 : f32 to vector<8x16x16xf32>
    %271 = arith.select %20, %269, %270 : vector<8x16x16xi1>, vector<8x16x16xf32>
    %cst_159 = arith.constant dense<0xFF800000> : vector<8x16xf32>
    %272 = vector.multi_reduction <maximumf>, %271, %cst_159 [2] : vector<8x16x16xf32> to vector<8x16xf32>
    %273 = vector.shape_cast %272 : vector<8x16xf32> to vector<8x16x1xf32>
    %274 = vector.broadcast %273 : vector<8x16x1xf32> to vector<8x16x16xf32>
    %275 = arith.subf %271, %274 : vector<8x16x16xf32>
    %276 = math.exp %275 : vector<8x16x16xf32>
    %cst_160 = arith.constant dense<0.000000e+00> : vector<8x16xf32>
    %277 = vector.multi_reduction <add>, %276, %cst_160 [2] : vector<8x16x16xf32> to vector<8x16xf32>
    %278 = vector.shape_cast %277 : vector<8x16xf32> to vector<8x16x1xf32>
    %279 = tpu.reciprocal %278 {approx = true} : vector<8x16x1xf32> -> vector<8x16x1xf32>
    %280 = vector.broadcast %279 : vector<8x16x1xf32> to vector<8x16x16xf32>
    %281 = arith.mulf %276, %280 : vector<8x16x16xf32>
    "tpu.trace_start"() <{level = 10 : i32, message = "bqk,bkd->bqd"}> : () -> ()
    %cst_161 = arith.constant dense<0.000000e+00> : vector<8x16x8xf32>
    %282 = tpu.matmul %281, %266, %cst_161 {dimension_numbers = #tpu.dot_dimension_numbers<[2], [1], [1], [2], [0, 0, 0, 1, 1, 2], [0], [0]>} : vector<8x16x16xf32>, vector<8x16x8xf32>, vector<8x16x8xf32> -> vector<8x16x8xf32>
    "tpu.trace_stop"() : () -> ()
    %283 = vector.shape_cast %282 : vector<8x16x8xf32> to vector<128x8xf32>
    %284 = vector.extract_strided_slice %239 {offsets = [8, 0], sizes = [8, 32], strides = [1, 1]} : vector<32x32xf32> to vector<8x32xf32>
    %cst_162 = arith.constant dense<0.000000e+00> : vector<128x32xf32>
    %285 = tpu.matmul %283, %284, %cst_162 {dimension_numbers = #tpu.dot_dimension_numbers<[1], [0], [0], [1], [0, 0, 1, 1], [], []>} : vector<128x8xf32>, vector<8x32xf32>, vector<128x32xf32> -> vector<128x32xf32>
    %286 = arith.addf %263, %285 : vector<128x32xf32>
    %287 = vector.extract_strided_slice %235 {offsets = [0, 0, 16], sizes = [8, 16, 8], strides = [1, 1, 1]} : vector<8x16x32xf32> to vector<8x16x8xf32>
    %288 = vector.extract_strided_slice %236 {offsets = [0, 0, 16], sizes = [8, 16, 8], strides = [1, 1, 1]} : vector<8x16x32xf32> to vector<8x16x8xf32>
    %289 = vector.extract_strided_slice %237 {offsets = [0, 0, 16], sizes = [8, 16, 8], strides = [1, 1, 1]} : vector<8x16x32xf32> to vector<8x16x8xf32>
    "tpu.trace_start"() <{level = 10 : i32, message = "bqd,bkd->bqk"}> : () -> ()
    %cst_163 = arith.constant dense<0.000000e+00> : vector<8x16x16xf32>
    %290 = tpu.matmul %287, %288, %cst_163 {dimension_numbers = #tpu.dot_dimension_numbers<[2], [2], [1], [1], [0, 0, 0, 1, 1, 1], [0], [0]>} : vector<8x16x8xf32>, vector<8x16x8xf32>, vector<8x16x16xf32> -> vector<8x16x16xf32>
    "tpu.trace_stop"() : () -> ()
    %cst_164 = arith.constant 0.353553385 : f32
    %291 = vector.broadcast %cst_164 : f32 to vector<8x16x16xf32>
    %292 = arith.mulf %290, %291 : vector<8x16x16xf32>
    %cst_165 = arith.constant -1.000000e+30 : f32
    %293 = vector.broadcast %cst_165 : f32 to vector<8x16x16xf32>
    %294 = arith.select %20, %292, %293 : vector<8x16x16xi1>, vector<8x16x16xf32>
    %cst_166 = arith.constant dense<0xFF800000> : vector<8x16xf32>
    %295 = vector.multi_reduction <maximumf>, %294, %cst_166 [2] : vector<8x16x16xf32> to vector<8x16xf32>
    %296 = vector.shape_cast %295 : vector<8x16xf32> to vector<8x16x1xf32>
    %297 = vector.broadcast %296 : vector<8x16x1xf32> to vector<8x16x16xf32>
    %298 = arith.subf %294, %297 : vector<8x16x16xf32>
    %299 = math.exp %298 : vector<8x16x16xf32>
    %cst_167 = arith.constant dense<0.000000e+00> : vector<8x16xf32>
    %300 = vector.multi_reduction <add>, %299, %cst_167 [2] : vector<8x16x16xf32> to vector<8x16xf32>
    %301 = vector.shape_cast %300 : vector<8x16xf32> to vector<8x16x1xf32>
    %302 = tpu.reciprocal %301 {approx = true} : vector<8x16x1xf32> -> vector<8x16x1xf32>
    %303 = vector.broadcast %302 : vector<8x16x1xf32> to vector<8x16x16xf32>
    %304 = arith.mulf %299, %303 : vector<8x16x16xf32>
    "tpu.trace_start"() <{level = 10 : i32, message = "bqk,bkd->bqd"}> : () -> ()
    %cst_168 = arith.constant dense<0.000000e+00> : vector<8x16x8xf32>
    %305 = tpu.matmul %304, %289, %cst_168 {dimension_numbers = #tpu.dot_dimension_numbers<[2], [1], [1], [2], [0, 0, 0, 1, 1, 2], [0], [0]>} : vector<8x16x16xf32>, vector<8x16x8xf32>, vector<8x16x8xf32> -> vector<8x16x8xf32>
    "tpu.trace_stop"() : () -> ()
    %306 = vector.shape_cast %305 : vector<8x16x8xf32> to vector<128x8xf32>
    %307 = vector.extract_strided_slice %239 {offsets = [16, 0], sizes = [8, 32], strides = [1, 1]} : vector<32x32xf32> to vector<8x32xf32>
    %cst_169 = arith.constant dense<0.000000e+00> : vector<128x32xf32>
    %308 = tpu.matmul %306, %307, %cst_169 {dimension_numbers = #tpu.dot_dimension_numbers<[1], [0], [0], [1], [0, 0, 1, 1], [], []>} : vector<128x8xf32>, vector<8x32xf32>, vector<128x32xf32> -> vector<128x32xf32>
    %309 = arith.addf %286, %308 : vector<128x32xf32>
    %310 = vector.extract_strided_slice %235 {offsets = [0, 0, 24], sizes = [8, 16, 8], strides = [1, 1, 1]} : vector<8x16x32xf32> to vector<8x16x8xf32>
    %311 = vector.extract_strided_slice %236 {offsets = [0, 0, 24], sizes = [8, 16, 8], strides = [1, 1, 1]} : vector<8x16x32xf32> to vector<8x16x8xf32>
    %312 = vector.extract_strided_slice %237 {offsets = [0, 0, 24], sizes = [8, 16, 8], strides = [1, 1, 1]} : vector<8x16x32xf32> to vector<8x16x8xf32>
    "tpu.trace_start"() <{level = 10 : i32, message = "bqd,bkd->bqk"}> : () -> ()
    %cst_170 = arith.constant dense<0.000000e+00> : vector<8x16x16xf32>
    %313 = tpu.matmul %310, %311, %cst_170 {dimension_numbers = #tpu.dot_dimension_numbers<[2], [2], [1], [1], [0, 0, 0, 1, 1, 1], [0], [0]>} : vector<8x16x8xf32>, vector<8x16x8xf32>, vector<8x16x16xf32> -> vector<8x16x16xf32>
    "tpu.trace_stop"() : () -> ()
    %cst_171 = arith.constant 0.353553385 : f32
    %314 = vector.broadcast %cst_171 : f32 to vector<8x16x16xf32>
    %315 = arith.mulf %313, %314 : vector<8x16x16xf32>
    %cst_172 = arith.constant -1.000000e+30 : f32
    %316 = vector.broadcast %cst_172 : f32 to vector<8x16x16xf32>
    %317 = arith.select %20, %315, %316 : vector<8x16x16xi1>, vector<8x16x16xf32>
    %cst_173 = arith.constant dense<0xFF800000> : vector<8x16xf32>
    %318 = vector.multi_reduction <maximumf>, %317, %cst_173 [2] : vector<8x16x16xf32> to vector<8x16xf32>
    %319 = vector.shape_cast %318 : vector<8x16xf32> to vector<8x16x1xf32>
    %320 = vector.broadcast %319 : vector<8x16x1xf32> to vector<8x16x16xf32>
    %321 = arith.subf %317, %320 : vector<8x16x16xf32>
    %322 = math.exp %321 : vector<8x16x16xf32>
    %cst_174 = arith.constant dense<0.000000e+00> : vector<8x16xf32>
    %323 = vector.multi_reduction <add>, %322, %cst_174 [2] : vector<8x16x16xf32> to vector<8x16xf32>
    %324 = vector.shape_cast %323 : vector<8x16xf32> to vector<8x16x1xf32>
    %325 = tpu.reciprocal %324 {approx = true} : vector<8x16x1xf32> -> vector<8x16x1xf32>
    %326 = vector.broadcast %325 : vector<8x16x1xf32> to vector<8x16x16xf32>
    %327 = arith.mulf %322, %326 : vector<8x16x16xf32>
    "tpu.trace_start"() <{level = 10 : i32, message = "bqk,bkd->bqd"}> : () -> ()
    %cst_175 = arith.constant dense<0.000000e+00> : vector<8x16x8xf32>
    %328 = tpu.matmul %327, %312, %cst_175 {dimension_numbers = #tpu.dot_dimension_numbers<[2], [1], [1], [2], [0, 0, 0, 1, 1, 2], [0], [0]>} : vector<8x16x16xf32>, vector<8x16x8xf32>, vector<8x16x8xf32> -> vector<8x16x8xf32>
    "tpu.trace_stop"() : () -> ()
    %329 = vector.shape_cast %328 : vector<8x16x8xf32> to vector<128x8xf32>
    %330 = vector.extract_strided_slice %239 {offsets = [24, 0], sizes = [8, 32], strides = [1, 1]} : vector<32x32xf32> to vector<8x32xf32>
    %cst_176 = arith.constant dense<0.000000e+00> : vector<128x32xf32>
    %331 = tpu.matmul %329, %330, %cst_176 {dimension_numbers = #tpu.dot_dimension_numbers<[1], [0], [0], [1], [0, 0, 1, 1], [], []>} : vector<128x8xf32>, vector<8x32xf32>, vector<128x32xf32> -> vector<128x32xf32>
    %332 = arith.addf %309, %331 : vector<128x32xf32>
    %c1_177 = arith.constant 1 : index
    %c0_178 = arith.constant 0 : index
    %c0_179 = arith.constant 0 : index
    %333 = vector.load %arg8[%c1_177, %c0_178, %c0_179] : memref<2x1x32xf32, #tpu.memory_space<vmem>>, vector<1x1x32xf32>
    %334 = vector.shape_cast %333 : vector<1x1x32xf32> to vector<1x32xf32>
    %335 = vector.broadcast %334 : vector<1x32xf32> to vector<128x32xf32>
    %336 = arith.addf %332, %335 : vector<128x32xf32>
    %337 = arith.addf %213, %336 : vector<128x32xf32>
    %c1_180 = arith.constant 1 : index
    %c0_181 = arith.constant 0 : index
    %c0_182 = arith.constant 0 : index
    %338 = vector.load %arg13[%c1_180, %c0_181, %c0_182] : memref<2x1x32xf32, #tpu.memory_space<vmem>>, vector<1x1x32xf32>
    %339 = vector.shape_cast %338 : vector<1x1x32xf32> to vector<1x32xf32>
    %c1_183 = arith.constant 1 : index
    %c0_184 = arith.constant 0 : index
    %c0_185 = arith.constant 0 : index
    %340 = vector.load %arg14[%c1_183, %c0_184, %c0_185] : memref<2x1x32xf32, #tpu.memory_space<vmem>>, vector<1x1x32xf32>
    %341 = vector.shape_cast %340 : vector<1x1x32xf32> to vector<1x32xf32>
    %cst_186 = arith.constant dense<0.000000e+00> : vector<128xf32>
    %342 = vector.multi_reduction <add>, %337, %cst_186 [1] : vector<128x32xf32> to vector<128xf32>
    %343 = vector.shape_cast %342 : vector<128xf32> to vector<128x1xf32>
    %cst_187 = arith.constant 3.200000e+01 : f32
    %344 = vector.broadcast %cst_187 : f32 to vector<128x1xf32>
    %345 = arith.divf %343, %344 : vector<128x1xf32>
    %346 = vector.broadcast %345 : vector<128x1xf32> to vector<128x32xf32>
    %347 = arith.subf %337, %346 : vector<128x32xf32>
    %348 = arith.mulf %347, %347 : vector<128x32xf32>
    %cst_188 = arith.constant dense<0.000000e+00> : vector<128xf32>
    %349 = vector.multi_reduction <add>, %348, %cst_188 [1] : vector<128x32xf32> to vector<128xf32>
    %350 = vector.shape_cast %349 : vector<128xf32> to vector<128x1xf32>
    %cst_189 = arith.constant 3.200000e+01 : f32
    %351 = vector.broadcast %cst_189 : f32 to vector<128x1xf32>
    %352 = arith.divf %350, %351 : vector<128x1xf32>
    %353 = vector.broadcast %345 : vector<128x1xf32> to vector<128x32xf32>
    %354 = arith.subf %337, %353 : vector<128x32xf32>
    %cst_190 = arith.constant 9.99999974E-6 : f32
    %355 = vector.broadcast %cst_190 : f32 to vector<128x1xf32>
    %356 = arith.addf %352, %355 : vector<128x1xf32>
    %357 = math.rsqrt %356 : vector<128x1xf32>
    %358 = vector.broadcast %357 : vector<128x1xf32> to vector<128x32xf32>
    %359 = arith.mulf %354, %358 : vector<128x32xf32>
    %360 = vector.broadcast %339 : vector<1x32xf32> to vector<128x32xf32>
    %361 = arith.mulf %359, %360 : vector<128x32xf32>
    %362 = vector.broadcast %341 : vector<1x32xf32> to vector<128x32xf32>
    %363 = arith.addf %361, %362 : vector<128x32xf32>
    %c1_191 = arith.constant 1 : index
    %c0_192 = arith.constant 0 : index
    %c0_193 = arith.constant 0 : index
    %364 = vector.load %arg9[%c1_191, %c0_192, %c0_193] : memref<2x32x128xf32, #tpu.memory_space<vmem>>, vector<1x32x128xf32>
    %365 = vector.shape_cast %364 : vector<1x32x128xf32> to vector<32x128xf32>
    %cst_194 = arith.constant dense<0.000000e+00> : vector<128x128xf32>
    %366 = tpu.matmul %363, %365, %cst_194 {dimension_numbers = #tpu.dot_dimension_numbers<[1], [0], [0], [1], [0, 0, 1, 1], [], []>} : vector<128x32xf32>, vector<32x128xf32>, vector<128x128xf32> -> vector<128x128xf32>
    %c1_195 = arith.constant 1 : index
    %c0_196 = arith.constant 0 : index
    %c0_197 = arith.constant 0 : index
    %367 = vector.load %arg10[%c1_195, %c0_196, %c0_197] : memref<2x1x128xf32, #tpu.memory_space<vmem>>, vector<1x1x128xf32>
    %368 = vector.shape_cast %367 : vector<1x1x128xf32> to vector<1x128xf32>
    %369 = vector.broadcast %368 : vector<1x128xf32> to vector<128x128xf32>
    %370 = arith.addf %366, %369 : vector<128x128xf32>
    %cst_198 = arith.constant 0.000000e+00 : f32
    %371 = vector.broadcast %cst_198 : f32 to vector<128x128xf32>
    %372 = arith.maximumf %370, %371 : vector<128x128xf32>
    %c1_199 = arith.constant 1 : index
    %c0_200 = arith.constant 0 : index
    %c0_201 = arith.constant 0 : index
    %373 = vector.load %arg11[%c1_199, %c0_200, %c0_201] : memref<2x128x32xf32, #tpu.memory_space<vmem>>, vector<1x128x32xf32>
    %374 = vector.shape_cast %373 : vector<1x128x32xf32> to vector<128x32xf32>
    %cst_202 = arith.constant dense<0.000000e+00> : vector<128x32xf32>
    %375 = tpu.matmul %372, %374, %cst_202 {dimension_numbers = #tpu.dot_dimension_numbers<[1], [0], [0], [1], [0, 0, 1, 1], [], []>} : vector<128x128xf32>, vector<128x32xf32>, vector<128x32xf32> -> vector<128x32xf32>
    %c1_203 = arith.constant 1 : index
    %c0_204 = arith.constant 0 : index
    %c0_205 = arith.constant 0 : index
    %376 = vector.load %arg12[%c1_203, %c0_204, %c0_205] : memref<2x1x32xf32, #tpu.memory_space<vmem>>, vector<1x1x32xf32>
    %377 = vector.shape_cast %376 : vector<1x1x32xf32> to vector<1x32xf32>
    %378 = vector.broadcast %377 : vector<1x32xf32> to vector<128x32xf32>
    %379 = arith.addf %375, %378 : vector<128x32xf32>
    %380 = arith.addf %363, %379 : vector<128x32xf32>
    %c1_206 = arith.constant 1 : index
    %c0_207 = arith.constant 0 : index
    %c0_208 = arith.constant 0 : index
    %381 = vector.load %arg15[%c1_206, %c0_207, %c0_208] : memref<2x1x32xf32, #tpu.memory_space<vmem>>, vector<1x1x32xf32>
    %382 = vector.shape_cast %381 : vector<1x1x32xf32> to vector<1x32xf32>
    %c1_209 = arith.constant 1 : index
    %c0_210 = arith.constant 0 : index
    %c0_211 = arith.constant 0 : index
    %383 = vector.load %arg16[%c1_209, %c0_210, %c0_211] : memref<2x1x32xf32, #tpu.memory_space<vmem>>, vector<1x1x32xf32>
    %384 = vector.shape_cast %383 : vector<1x1x32xf32> to vector<1x32xf32>
    %cst_212 = arith.constant dense<0.000000e+00> : vector<128xf32>
    %385 = vector.multi_reduction <add>, %380, %cst_212 [1] : vector<128x32xf32> to vector<128xf32>
    %386 = vector.shape_cast %385 : vector<128xf32> to vector<128x1xf32>
    %cst_213 = arith.constant 3.200000e+01 : f32
    %387 = vector.broadcast %cst_213 : f32 to vector<128x1xf32>
    %388 = arith.divf %386, %387 : vector<128x1xf32>
    %389 = vector.broadcast %388 : vector<128x1xf32> to vector<128x32xf32>
    %390 = arith.subf %380, %389 : vector<128x32xf32>
    %391 = arith.mulf %390, %390 : vector<128x32xf32>
    %cst_214 = arith.constant dense<0.000000e+00> : vector<128xf32>
    %392 = vector.multi_reduction <add>, %391, %cst_214 [1] : vector<128x32xf32> to vector<128xf32>
    %393 = vector.shape_cast %392 : vector<128xf32> to vector<128x1xf32>
    %cst_215 = arith.constant 3.200000e+01 : f32
    %394 = vector.broadcast %cst_215 : f32 to vector<128x1xf32>
    %395 = arith.divf %393, %394 : vector<128x1xf32>
    %396 = vector.broadcast %388 : vector<128x1xf32> to vector<128x32xf32>
    %397 = arith.subf %380, %396 : vector<128x32xf32>
    %cst_216 = arith.constant 9.99999974E-6 : f32
    %398 = vector.broadcast %cst_216 : f32 to vector<128x1xf32>
    %399 = arith.addf %395, %398 : vector<128x1xf32>
    %400 = math.rsqrt %399 : vector<128x1xf32>
    %401 = vector.broadcast %400 : vector<128x1xf32> to vector<128x32xf32>
    %402 = arith.mulf %397, %401 : vector<128x32xf32>
    %403 = vector.broadcast %382 : vector<1x32xf32> to vector<128x32xf32>
    %404 = arith.mulf %402, %403 : vector<128x32xf32>
    %405 = vector.broadcast %384 : vector<1x32xf32> to vector<128x32xf32>
    %406 = arith.addf %404, %405 : vector<128x32xf32>
    %407 = vector.shape_cast %406 : vector<128x32xf32> to vector<8x16x32xf32>
    %408 = vector.extract_strided_slice %407 {offsets = [0, 0, 0], sizes = [8, 1, 32], strides = [1, 1, 1]} : vector<8x16x32xf32> to vector<8x1x32xf32>
    %409 = vector.shape_cast %408 : vector<8x1x32xf32> to vector<8x32xf32>
    %c0_217 = arith.constant 0 : index
    %c0_218 = arith.constant 0 : index
    %410 = vector.load %arg17[%c0_217, %c0_218] : memref<32x4xf32, #tpu.memory_space<vmem>>, vector<32x4xf32>
    %cst_219 = arith.constant dense<0.000000e+00> : vector<8x4xf32>
    %411 = tpu.matmul %409, %410, %cst_219 {dimension_numbers = #tpu.dot_dimension_numbers<[1], [0], [0], [1], [0, 0, 1, 1], [], []>} : vector<8x32xf32>, vector<32x4xf32>, vector<8x4xf32> -> vector<8x4xf32>
    %c0_220 = arith.constant 0 : index
    %c0_221 = arith.constant 0 : index
    %412 = vector.load %arg18[%c0_220, %c0_221] : memref<1x4xf32, #tpu.memory_space<vmem>>, vector<1x4xf32>
    %413 = vector.broadcast %412 : vector<1x4xf32> to vector<8x4xf32>
    %414 = arith.addf %411, %413 : vector<8x4xf32>
    %c0_222 = arith.constant 0 : index
    %c0_223 = arith.constant 0 : index
    %415 = vector.load %arg19[%c0_222, %c0_223] : memref<8x4xf32, #tpu.memory_space<vmem>>, vector<8x4xf32>
    tpu.vector_store %arg19[%c0_222, %c0_223], %414 {strides = array<i32>} : memref<8x4xf32, #tpu.memory_space<vmem>>, vector<8x4xf32>,
    return
  }
  func.func @transform_0(%arg0: i32) -> (i32, i32, i32) {
    %c0_i32 = arith.constant 0 : i32
    %c0_i32_0 = arith.constant 0 : i32
    %c0_i32_1 = arith.constant 0 : i32
    return %arg0, %c0_i32, %c0_i32_0 : i32, i32, i32
  }
  func.func @transform_1(%arg0: i32) -> (i32, i32) {
    %c0_i32 = arith.constant 0 : i32
    %c0_i32_0 = arith.constant 0 : i32
    %c0_i32_1 = arith.constant 0 : i32
    return %c0_i32, %c0_i32_0 : i32, i32
  }
  func.func @transform_2(%arg0: i32) -> (i32, i32) {
    %c0_i32 = arith.constant 0 : i32
    %c0_i32_0 = arith.constant 0 : i32
    %c0_i32_1 = arith.constant 0 : i32
    return %c0_i32, %c0_i32_0 : i32, i32
  }
  func.func @transform_3(%arg0: i32) -> (i32, i32) {
    %c0_i32 = arith.constant 0 : i32
    %c0_i32_0 = arith.constant 0 : i32
    %c0_i32_1 = arith.constant 0 : i32
    return %c0_i32, %c0_i32_0 : i32, i32
  }
  func.func @transform_4(%arg0: i32) -> (i32, i32, i32, i32) {
    %c0_i32 = arith.constant 0 : i32
    %c0_i32_0 = arith.constant 0 : i32
    %c0_i32_1 = arith.constant 0 : i32
    %c0_i32_2 = arith.constant 0 : i32
    %c0_i32_3 = arith.constant 0 : i32
    return %c0_i32, %c0_i32_0, %c0_i32_1, %c0_i32_2 : i32, i32, i32, i32
  }
  func.func @transform_5(%arg0: i32) -> (i32, i32, i32, i32) {
    %c0_i32 = arith.constant 0 : i32
    %c0_i32_0 = arith.constant 0 : i32
    %c0_i32_1 = arith.constant 0 : i32
    %c0_i32_2 = arith.constant 0 : i32
    %c0_i32_3 = arith.constant 0 : i32
    return %c0_i32, %c0_i32_0, %c0_i32_1, %c0_i32_2 : i32, i32, i32, i32
  }
  func.func @transform_6(%arg0: i32) -> (i32, i32, i32) {
    %c0_i32 = arith.constant 0 : i32
    %c0_i32_0 = arith.constant 0 : i32
    %c0_i32_1 = arith.constant 0 : i32
    %c0_i32_2 = arith.constant 0 : i32
    return %c0_i32, %c0_i32_0, %c0_i32_1 : i32, i32, i32
  }
  func.func @transform_7(%arg0: i32) -> (i32, i32, i32) {
    %c0_i32 = arith.constant 0 : i32
    %c0_i32_0 = arith.constant 0 : i32
    %c0_i32_1 = arith.constant 0 : i32
    %c0_i32_2 = arith.constant 0 : i32
    return %c0_i32, %c0_i32_0, %c0_i32_1 : i32, i32, i32
  }
  func.func @transform_8(%arg0: i32) -> (i32, i32, i32) {
    %c0_i32 = arith.constant 0 : i32
    %c0_i32_0 = arith.constant 0 : i32
    %c0_i32_1 = arith.constant 0 : i32
    %c0_i32_2 = arith.constant 0 : i32
    return %c0_i32, %c0_i32_0, %c0_i32_1 : i32, i32, i32
  }
  func.func @transform_9(%arg0: i32) -> (i32, i32, i32) {
    %c0_i32 = arith.constant 0 : i32
    %c0_i32_0 = arith.constant 0 : i32
    %c0_i32_1 = arith.constant 0 : i32
    %c0_i32_2 = arith.constant 0 : i32
    return %c0_i32, %c0_i32_0, %c0_i32_1 : i32, i32, i32
  }
  func.func @transform_10(%arg0: i32) -> (i32, i32, i32) {
    %c0_i32 = arith.constant 0 : i32
    %c0_i32_0 = arith.constant 0 : i32
    %c0_i32_1 = arith.constant 0 : i32
    %c0_i32_2 = arith.constant 0 : i32
    return %c0_i32, %c0_i32_0, %c0_i32_1 : i32, i32, i32
  }
  func.func @transform_11(%arg0: i32) -> (i32, i32, i32) {
    %c0_i32 = arith.constant 0 : i32
    %c0_i32_0 = arith.constant 0 : i32
    %c0_i32_1 = arith.constant 0 : i32
    %c0_i32_2 = arith.constant 0 : i32
    return %c0_i32, %c0_i32_0, %c0_i32_1 : i32, i32, i32
  }
  func.func @transform_12(%arg0: i32) -> (i32, i32, i32) {
    %c0_i32 = arith.constant 0 : i32
    %c0_i32_0 = arith.constant 0 : i32
    %c0_i32_1 = arith.constant 0 : i32
    %c0_i32_2 = arith.constant 0 : i32
    return %c0_i32, %c0_i32_0, %c0_i32_1 : i32, i32, i32
  }
  func.func @transform_13(%arg0: i32) -> (i32, i32, i32) {
    %c0_i32 = arith.constant 0 : i32
    %c0_i32_0 = arith.constant 0 : i32
    %c0_i32_1 = arith.constant 0 : i32
    %c0_i32_2 = arith.constant 0 : i32
    return %c0_i32, %c0_i32_0, %c0_i32_1 : i32, i32, i32
  }
  func.func @transform_14(%arg0: i32) -> (i32, i32, i32) {
    %c0_i32 = arith.constant 0 : i32
    %c0_i32_0 = arith.constant 0 : i32
    %c0_i32_1 = arith.constant 0 : i32
    %c0_i32_2 = arith.constant 0 : i32
    return %c0_i32, %c0_i32_0, %c0_i32_1 : i32, i32, i32
  }
  func.func @transform_15(%arg0: i32) -> (i32, i32, i32) {
    %c0_i32 = arith.constant 0 : i32
    %c0_i32_0 = arith.constant 0 : i32
    %c0_i32_1 = arith.constant 0 : i32
    %c0_i32_2 = arith.constant 0 : i32
    return %c0_i32, %c0_i32_0, %c0_i32_1 : i32, i32, i32
  }
  func.func @transform_16(%arg0: i32) -> (i32, i32) {
    %c0_i32 = arith.constant 0 : i32
    %c0_i32_0 = arith.constant 0 : i32
    %c0_i32_1 = arith.constant 0 : i32
    return %c0_i32, %c0_i32_0 : i32, i32
  }
  func.func @transform_17(%arg0: i32) -> (i32, i32) {
    %c0_i32 = arith.constant 0 : i32
    %c0_i32_0 = arith.constant 0 : i32
    %c0_i32_1 = arith.constant 0 : i32
    return %c0_i32, %c0_i32_0 : i32, i32
  }
  func.func @transform_18(%arg0: i32) -> (i32, i32) {
    %c0_i32 = arith.constant 0 : i32
    %c0_i32_0 = arith.constant 0 : i32
    return %arg0, %c0_i32 : i32, i32
  }
}

</mosaic_0001>

<bundles_post_ra>
// kernel: tpu_custom_call.1
= control target key start
LH: loop header
LB: loop body
LE: loop exit
PB: predicated region body
PF: predicated region fallthrough
CT: control target
= control target key end

     0   :  { %s23544_s27 = smov 0   ;;  %s28233_s0 = inlined_call_operand.vmem [shape: f32[16,8,8], index: 0, kind: input, shape index: {}]   ;;  %s28234_s1 = inlined_call_operand.vmem [shape: f32[8,32], index: 1, kind: input, shape index: {}]   ;;  %s28235_s2 = inlined_call_operand.vmem [shape: f32[1,32], index: 2, kind: input, shape index: {}]   ;;  %s28236_s3 = inlined_call_operand.vmem [shape: f32[1,32], index: 3, kind: input, shape index: {}]   ;;  %s28237_s4 = inlined_call_operand.vmem [shape: f32[2,3,32,32], index: 4, kind: input, shape index: {}]   ;;  %s28238_s5 = inlined_call_operand.vmem [shape: f32[2,3,1,32], index: 5, kind: input, shape index: {}]   ;;  %s28239_s6 = inlined_call_operand.vmem [shape: f32[2,32,32], index: 6, kind: input, shape index: {}]   ;;  %s28240_s7 = inlined_call_operand.vmem [shape: f32[2,1,32], index: 7, kind: input, shape index: {}]   ;;  %s28241_s8 = inlined_call_operand.vmem [shape: f32[2,32,128], index: 8, kind: input, shape index: {}]   ;;  %s28242_s9 = inlined_call_operand.vmem [shape: f32[2,1,128], index: 9, kind: input, shape index: {}]   ;;  %s28243_s10 = inlined_call_operand.vmem [shape: f32[2,128,32], index: 10, kind: input, shape index: {}]   ;;  %s28244_s11 = inlined_call_operand.vmem [shape: f32[2,1,32], index: 11, kind: input, shape index: {}]   ;;  %s28245_s12 = inlined_call_operand.vmem [shape: f32[2,1,32], index: 12, kind: input, shape index: {}]   ;;  %s28246_s13 = inlined_call_operand.vmem [shape: f32[2,1,32], index: 13, kind: input, shape index: {}]   ;;  %s28247_s14 = inlined_call_operand.vmem [shape: f32[2,1,32], index: 14, kind: input, shape index: {}]   ;;  %s28248_s15 = inlined_call_operand.vmem [shape: f32[2,1,32], index: 15, kind: input, shape index: {}]   ;;  %s28249_s16 = inlined_call_operand.vmem [shape: f32[32,4], index: 16, kind: input, shape index: {}]   ;;  %s28250_s17 = inlined_call_operand.vmem [shape: f32[1,4], index: 17, kind: input, shape index: {}]   ;;  %s28251_s18 = inlined_call_operand.vmem [shape: f32[16,4], index: 18, kind: output, shape index: {}]  }
   0x1   :  { %28320 = sst [smem:[#allocation56_spill]] %s28233_s0 }
   0x2   :  { %28321 = sst [smem:[#allocation57_spill]] %s28234_s1 }
   0x3   :  { %28322 = sst [smem:[#allocation58_spill]] %s28235_s2 }
   0x4 LB: > { %s23550_s28 = sadd.s32 4294967295, %s23441_s27   ;;  %p18311_p0 = scmp.ge.s32.totalorder %s23441_s27, 1  ;;  %s23441_s27 = sphi %s23544_s27, %s28_s27  }
   0x5   : > { %p513_p1 = scmp.lt.s32.totalorder %s23441_s27, 3 }
   0x7   : > { %p514_p2 = pnand %p18311_p0, %p513_p1 }
   0x9   : > { %517 = sbr.rel (%p514_p2) target bundleno = 9530 (0x253a), region = 92 }
  0x10   : > { %s28323_s0 = sld [smem:[#allocation57_spill]]  ;;  %s18312_s19 = sshll.u32 %s23550_s28, 3  ;;  %vm592_vm0 = vcmask 64512   ;;  %vm722_vm1 = vcmask 261120   ;;  %v739_v9 = vld [vmem:[%s28236_s3] sm:$0x1] }
  0x11   : > { %p567_p3 = scmp.lt.s32.totalorder %s18312_s19, 15  ;;  %s28324_s22 = sld [smem:[#allocation56_spill]]  ;;  %vm740_vm2 = vcmask 253952   ;;  %v28252_v10 = vmov 0.0   ;;  %v776_v11 = vld [vmem:[%s28237_s4] sm:$0xff]  ;;  %v777_v12 = vld [vmem:[%s28237_s4 + $0x8] sm:$0xff]  ;;  %vm23745_vm3 = vmpackc.low %vm592_vm0, %vm592_vm0 }
  0x12   : > { %725 = vst.msk [vmem:[#allocation2 + $0x10] sm:$0xff] %vm722_vm1, %v28252_v10  ;;  %726 = vst.msk [vmem:[#allocation2 + $0x18] sm:$0xff] %vm722_vm1, %v28252_v10  ;;  %v21427_v13 = vpack.c.bf16 %v777_v12, %v776_v11  ;;  %v778_v14 = vld [vmem:[%s28237_s4 + $0x10] sm:$0xff]  ;;  %v779_v15 = vld [vmem:[%s28237_s4 + $0x18] sm:$0xff]  ;;  %vm2028_vm5 = vcmask 130048   ;;  %s23444_s20 = smov 120  }
  0x13   : > { %s28520_s19 = smov (!%p567_p3, %s18312_s19), 15  ;;  %723 = vst.msk [vmem:[#allocation2] sm:$0xff] %vm722_vm1, %v28252_v10  ;;  %724 = vst.msk [vmem:[#allocation2 + $0x8] sm:$0xff] %vm722_vm1, %v28252_v10  ;;  %v21431_v16 = vpack.c.bf16 %v779_v15, %v778_v14  ;;  %v18341_v17 = vld [vmem:[%s28237_s4 + $0x20] sm:$0xff]  ;;  %v18342_v18 = vld [vmem:[%s28237_s4 + $0x28] sm:$0xff]  ;;  %s23445_s21 = smov 112  }
  0x14   : > { %s18313_s1 = sshll.u32 %s28520_s19, 3  ;;  %727 = vst.msk [vmem:[#allocation2 + $0x20] sm:$0xff] %vm722_vm1, %v28252_v10  ;;  %728 = vst.msk [vmem:[#allocation2 + $0x28] sm:$0xff] %vm722_vm1, %v28252_v10  ;;  %22201 = vmatprep.subr.bf16.mxu1 %v21427_v13  ;;  %v21435_v19 = vpack.c.bf16 %v18342_v18, %v18341_v17  ;;  %v18363_v20 = vld [vmem:[%s28237_s4 + $0x40] sm:$0xff]  ;;  %v18364_v21 = vld [vmem:[%s28237_s4 + $0x48] sm:$0xff]  ;;  %s28325_s19 = sld [smem:[#allocation58_spill]] }
  0x15   : > { %729 = vst.msk [vmem:[#allocation2 + $0x30] sm:$0xff] %vm722_vm1, %v28252_v10  ;;  %730 = vst.msk [vmem:[#allocation2 + $0x38] sm:$0xff] %vm722_vm1, %v28252_v10  ;;  %22203 = vmatpush3.bf16.msra.mxu1 %v21427_v13  ;;  %v21443_v22 = vpack.c.bf16 %v18364_v21, %v18363_v20  ;;  %v18343_v33 = vld [vmem:[%s28237_s4 + $0x30] sm:$0xff]  ;;  %v18344_v34 = vld [vmem:[%s28237_s4 + $0x38] sm:$0xff]  ;;  %s23446_s25 = smov 104   ;;  %vm23448_vm6 = vmmov 0  }
  0x16   : > { %v584_v0 = vld [vmem:[%s28323_s0] sm:$0xff]  ;;  %731 = vst.msk [vmem:[#allocation2 + $0x40] sm:$0xff] %vm722_vm1, %v28252_v10  ;;  %732 = vst.msk [vmem:[#allocation2 + $0x48] sm:$0xff] %vm722_vm1, %v28252_v10  ;;  %22202 = vmatprep.subr.bf16.mxu1 %v21431_v16  ;;  %v21439_v40 = vpack.c.bf16 %v18344_v34, %v18343_v33  ;;  %v18365_v42 = vld [vmem:[%s28237_s4 + $0x50] sm:$0xff]  ;;  %vm18160_vm7 = vcmask 1041409   ;;  %vm18163_vm8 = vcmask 1042434  }
  0x17   : > { %19930 = vmatprep.subr.mxu0 %v584_v0  ;;  %s570_s2 = scalar_lea.vmem %s28324_s22, %s18313_s1  ;;  %733 = vst.msk [vmem:[#allocation2 + $0x50] sm:$0xff] %vm722_vm1, %v28252_v10  ;;  %734 = vst.msk [vmem:[#allocation2 + $0x58] sm:$0xff] %vm722_vm1, %v28252_v10  ;;  %v18366_v43 = vld [vmem:[%s28237_s4 + $0x58] sm:$0xff]  ;;  %v23710_v62 = vld [vmem:[%s28238_s5] ss:$0 sm:$0xff]  ;;  %vm18166_vm9 = vcmask 1043459  }
  0x18   : > { %19931 = vmatpush3.msra.mxu0 %v584_v0  ;;  %v576_v1 = vld [vmem:[%s570_s2] sm:$0xff]  ;;  %v577_v2 = vld [vmem:[%s570_s2 + $0x8] sm:$0xff]  ;;  %v578_v3 = vld [vmem:[%s570_s2 + $0x10] sm:$0xff]  ;;  %735 = vst.msk [vmem:[#allocation2 + $0x60] sm:$0xff] %vm722_vm1, %v28252_v10  ;;  %v21447_v51 = vpack.c.bf16 %v18366_v43, %v18365_v42  ;;  %vm18169_vm10 = vcmask 1044484   ;;  %vm18172_vm11 = vcmask 1045509  }
  0x19   : > { %19932 = vmatprep.mubr.msk.f32.mxu0 %vm592_vm0, %v576_v1  ;;  %v579_v4 = vld [vmem:[%s570_s2 + $0x18] sm:$0xff]  ;;  %v580_v5 = vld [vmem:[%s570_s2 + $0x20] sm:$0xff]  ;;  %v581_v6 = vld [vmem:[%s570_s2 + $0x28] sm:$0xff]  ;;  %736 = vst.msk [vmem:[#allocation2 + $0x68] sm:$0xff] %vm722_vm1, %v28252_v10  ;;  %21428 = vmatprep.subr.bf16.mxu0 %v21427_v13  ;;  %vm18175_vm12 = vcmask 1046534   ;;  %vm18178_vm13 = vcmask 1047559  }
  0x1a   : > { %19933 = vmatmul.mubr.msk.f32.vlgmr.msra.gmra.mrb[0].mxu0 %vm592_vm0, %v577_v2  ;;  %v582_v7 = vld [vmem:[%s570_s2 + $0x30] sm:$0xff]  ;;  %v583_v8 = vld [vmem:[%s570_s2 + $0x38] sm:$0xff]  ;;  %737 = vst.msk [vmem:[#allocation2 + $0x70] sm:$0xff] %vm722_vm1, %v28252_v10  ;;  %738 = vst.msk [vmem:[#allocation2 + $0x78] sm:$0xff] %vm722_vm1, %v28252_v10  ;;  %22204 = vmatpush3.bf16.msra.mxu1 %v21431_v16  ;;  %p572_p4 = scmp.lt.s32.totalorder %s23550_s28, 1  ;;  %vm18252_vm14 = vcmask 31744  }
  0x1b   : > { %19935 = vmatprep.mubr.msk.f32.mxu0 %vm592_vm0, %v578_v3  ;;  %742 = vst.msk [vmem:[#allocation2 + $0x10] sm:$0x1] %vm740_vm2, %v739_v9  ;;  %741 = vst.msk [vmem:[#allocation2] sm:$0x1] %vm740_vm2, %v739_v9  ;;  %21430 = vmatpush3.bf16.msra.mxu0 %v21427_v13  ;;  %v18315_v23 = vld [vmem:[%s28325_s19] ss:$0 sm:$0xff] }
  0x1c   : > { %743 = vst.msk [vmem:[#allocation2 + $0x20] sm:$0x1] %vm740_vm2, %v739_v9  ;;  %744 = vst.msk [vmem:[#allocation2 + $0x30] sm:$0x1] %vm740_vm2, %v739_v9  ;;  %21432 = vmatprep.subr.bf16.mxu0 %v21431_v16  ;;  %21444 = vmatprep.subr.bf16.mxu1 %v21443_v22  ;;  %v23735_v12 = vld [vmem:[%s28238_s5 + $0x1] ss:$0 sm:$0xff] }
  0x1d   : > { %745 = vst.msk [vmem:[#allocation2 + $0x40] sm:$0x1] %vm740_vm2, %v739_v9  ;;  %746 = vst.msk [vmem:[#allocation2 + $0x50] sm:$0x1] %vm740_vm2, %v739_v9  ;;  %s28522_s28 = smov (!%p572_p4, %s23550_s28), 1 }
  0x1e   : > { %19936 = vmatmul.mubr.msk.f32.gmra.mrb[2].mxu0 %vm592_vm0, %v579_v4  ;;  %747 = vst.msk [vmem:[#allocation2 + $0x60] sm:$0x1] %vm740_vm2, %v739_v9  ;;  %748 = vst.msk [vmem:[#allocation2 + $0x70] sm:$0x1] %vm740_vm2, %v739_v9  ;;  %s18314_s29 = sshll.u32 %s28522_s28, 3 }
  0x1f   : > { %19938 = vmatprep.mubr.msk.f32.mxu0 %vm592_vm0, %v580_v5  ;;  %21434 = vmatpush3.bf16.msra.mxu0 %v21431_v16  ;;  %s575_s1 = scalar_lea.vmem %s28251_s18, %s18314_s29 }
  0x20   : > { %21436 = vmatprep.subr.bf16.mxu0 %v21435_v19 }
  0x22   : > { %19939 = vmatmul.mubr.msk.f32.gmra.mrb[4].mxu0 %vm592_vm0, %v581_v6 }
  0x23   : > { %19941 = vmatprep.mubr.msk.f32.mxu0 %vm592_vm0, %v582_v7 }
  0x26   : > { %19942 = vmatmul.mubr.msk.f32.gmra.mrb[6].mxu0 %vm592_vm0, %v583_v8 }
  0xed   : > { %v19934_v24 = vpop.f32.mrb[0].mxu0 }
  0xee   : > { %v689_v25 = vadd.f32 %v19934_v24, %v18315_v23  ;;  %v683_v26 = vpop.f32.mrb[1].mxu0 }
  0xef   : > { %v684_v27 = vadd.f32 %v18315_v23, %v683_v26 }
  0xf0   : > { %750 = vst.msk [vmem:[#allocation2 + $0x11] sm:$0xff] %vm722_vm1, %v689_v25 }
  0xf1   : > { %749 = vst.msk [vmem:[#allocation2 + $0x1] sm:$0xff] %vm722_vm1, %v684_v27  ;;  %v19937_v28 = vpop.f32.mrb[2].mxu0 }
  0xf2   : > { %v699_v29 = vadd.f32 %v19937_v28, %v18315_v23  ;;  %v693_v30 = vpop.f32.mrb[3].mxu0 }
  0xf3   : > { %v694_v31 = vadd.f32 %v18315_v23, %v693_v30 }
  0xf4   : > { %752 = vst.msk [vmem:[#allocation2 + $0x31] sm:$0xff] %vm722_vm1, %v699_v29 }
  0xf5   : > { %751 = vst.msk [vmem:[#allocation2 + $0x21] sm:$0xff] %vm722_vm1, %v694_v31  ;;  %v19940_v32 = vpop.f32.mrb[4].mxu0 }
  0xf6   : > { %v709_v35 = vadd.f32 %v19940_v32, %v18315_v23  ;;  %v703_v36 = vpop.f32.mrb[5].mxu0 }
  0xf7   : > { %v704_v37 = vadd.f32 %v18315_v23, %v703_v36  ;;  %v759_v44 = vld [vmem:[#allocation2 + $0x10] sm:$0xff]  ;;  %v760_v52 = vld [vmem:[#allocation2 + $0x18] sm:$0xff]  ;;  %v23774_v36 = vld [vmem:[%s28238_s5 + $0x2] ss:$0 sm:$0xff] }
  0xf8   : > { %754 = vst.msk [vmem:[#allocation2 + $0x51] sm:$0xff] %vm722_vm1, %v709_v35  ;;  %v757_v38 = vld [vmem:[#allocation2] sm:$0xff]  ;;  %v758_v39 = vld [vmem:[#allocation2 + $0x8] sm:$0xff] }
  0xf9   : > { %753 = vst.msk [vmem:[#allocation2 + $0x41] sm:$0xff] %vm722_vm1, %v704_v37  ;;  %19952 = vmatprep.mubr.msk.f32.mxu0 %vm722_vm1, %v757_v38  ;;  %v19943_v41 = vpop.f32.mrb[6].mxu0 }
  0xfa   : > { %19953 = vmatmul.mubr.msk.f32.vlgmr.msra.gmra.mrb[8].mxu0 %vm722_vm1, %v758_v39  ;;  %v719_v45 = vadd.f32 %v19943_v41, %v18315_v23  ;;  %v713_v46 = vpop.f32.mrb[7].mxu0 }
  0xfb   : > { %19955 = vmatprep.mubr.msk.f32.mxu0 %vm722_vm1, %v759_v44  ;;  %v763_v47 = vld [vmem:[#allocation2 + $0x30] sm:$0xff]  ;;  %v714_v48 = vadd.f32 %v18315_v23, %v713_v46  ;;  %v764_v49 = vld [vmem:[#allocation2 + $0x38] sm:$0xff]  ;;  %21438 = vmatpush3.bf16.msra.mxu0 %v21435_v19 }
  0xfc   : > { %756 = vst.msk [vmem:[#allocation2 + $0x71] sm:$0xff] %vm722_vm1, %v719_v45  ;;  %19961 = vmatprep.mubr.msk.f32.mxu1 %vm722_vm1, %v763_v47  ;;  %v761_v50 = vld [vmem:[#allocation2 + $0x20] sm:$0xff]  ;;  %21440 = vmatprep.subr.bf16.mxu0 %v21439_v40  ;;  %v762_v56 = vld [vmem:[#allocation2 + $0x28] sm:$0xff] }
  0xfd   : > { %755 = vst.msk [vmem:[#allocation2 + $0x61] sm:$0xff] %vm722_vm1, %v714_v48  ;;  %19962 = vmatmul.mubr.msk.f32.vlgmr.msra.gmra.mrb[0].mxu1 %vm722_vm1, %v764_v49 }
  0xfe   : > { %19956 = vmatmul.mubr.msk.f32.gmra.mrb[10].mxu0 %vm722_vm1, %v760_v52  ;;  %21446 = vmatpush3.bf16.msra.mxu1 %v21443_v22 }
  0xff   : > { %19958 = vmatprep.mubr.msk.f32.mxu0 %vm722_vm1, %v761_v50  ;;  %21442 = vmatpush3.bf16.msra.mxu0 %v21439_v40  ;;  %v767_v55 = vld [vmem:[#allocation2 + $0x50] sm:$0xff]  ;;  %v768_v57 = vld [vmem:[#allocation2 + $0x58] sm:$0xff] }
 0x100   : > { %v765_v53 = vld [vmem:[#allocation2 + $0x40] sm:$0xff]  ;;  %v766_v54 = vld [vmem:[#allocation2 + $0x48] sm:$0xff]  ;;  %21448 = vmatprep.subr.bf16.mxu1 %v21447_v51 }
 0x101   : > { %19964 = vmatprep.mubr.msk.f32.mxu1 %vm722_vm1, %v765_v53 }
 0x102   : > { %19959 = vmatmul.mubr.msk.f32.gmra.mrb[12].mxu0 %vm722_vm1, %v762_v56  ;;  %19965 = vmatmul.mubr.msk.f32.gmra.mrb[2].mxu1 %vm722_vm1, %v766_v54 }
 0x103   : > { %19984 = vmatprep.mubr.msk.f32.mxu0 %vm722_vm1, %v757_v38  ;;  %19967 = vmatprep.mubr.msk.f32.mxu1 %vm722_vm1, %v767_v55  ;;  %v771_v60 = vld [vmem:[#allocation2 + $0x70] sm:$0xff]  ;;  %v772_v61 = vld [vmem:[#allocation2 + $0x78] sm:$0xff] }
 0x104   : > { %v769_v58 = vld [vmem:[#allocation2 + $0x60] sm:$0xff]  ;;  %21450 = vmatpush3.bf16.msra.mxu1 %v21447_v51  ;;  %v770_v59 = vld [vmem:[#allocation2 + $0x68] sm:$0xff] }
 0x106   : > { %19968 = vmatmul.mubr.msk.f32.gmra.mrb[4].mxu1 %vm722_vm1, %v768_v57  ;;  %19985 = vmatmul.mubr.msk.f32.vlgmr.msra.gmra.mrb[14].mxu0 %vm722_vm1, %v758_v39 }
 0x107   : > { %19987 = vmatprep.mubr.msk.f32.mxu0 %vm722_vm1, %v759_v44  ;;  %19970 = vmatprep.mubr.msk.f32.mxu1 %vm722_vm1, %v769_v58 }
 0x10a   : > { %19971 = vmatmul.mubr.msk.f32.gmra.mrb[6].mxu1 %vm722_vm1, %v770_v59  ;;  %19988 = vmatmul.mubr.msk.f32.gmra.mrb[16].mxu0 %vm722_vm1, %v760_v52 }
 0x10b   : > { %19990 = vmatprep.mubr.msk.f32.mxu0 %vm722_vm1, %v761_v50  ;;  %19973 = vmatprep.mubr.msk.f32.mxu1 %vm722_vm1, %v771_v60 }
 0x10e   : > { %19974 = vmatmul.mubr.msk.f32.gmra.mrb[8].mxu1 %vm722_vm1, %v772_v61  ;;  %19991 = vmatmul.mubr.msk.f32.gmra.mrb[18].mxu0 %vm722_vm1, %v762_v56 }
 0x10f   : > { %19993 = vmatprep.mubr.msk.f32.mxu0 %vm722_vm1, %v763_v47  ;;  %20016 = vmatprep.mubr.msk.f32.mxu1 %vm722_vm1, %v757_v38 }
 0x112   : > { %19994 = vmatmul.mubr.msk.f32.gmra.mrb[20].mxu0 %vm722_vm1, %v764_v49  ;;  %20017 = vmatmul.mubr.msk.f32.vlgmr.msra.gmra.mrb[10].mxu1 %vm722_vm1, %v758_v39 }
 0x113   : > { %20019 = vmatprep.mubr.msk.f32.mxu1 %vm722_vm1, %v759_v44  ;;  %19996 = vmatprep.mubr.msk.f32.mxu0 %vm722_vm1, %v765_v53 }
 0x116   : > { %19997 = vmatmul.mubr.msk.f32.gmra.mrb[22].mxu0 %vm722_vm1, %v766_v54  ;;  %20020 = vmatmul.mubr.msk.f32.gmra.mrb[12].mxu1 %vm722_vm1, %v760_v52 }
 0x117   : > { %20022 = vmatprep.mubr.msk.f32.mxu1 %vm722_vm1, %v761_v50  ;;  %19999 = vmatprep.mubr.msk.f32.mxu0 %vm722_vm1, %v767_v55 }
 0x11a   : > { %20000 = vmatmul.mubr.msk.f32.gmra.mrb[24].mxu0 %vm722_vm1, %v768_v57  ;;  %20023 = vmatmul.mubr.msk.f32.gmra.mrb[14].mxu1 %vm722_vm1, %v762_v56 }
 0x11b   : > { %20025 = vmatprep.mubr.msk.f32.mxu1 %vm722_vm1, %v763_v47  ;;  %20002 = vmatprep.mubr.msk.f32.mxu0 %vm722_vm1, %v769_v58 }
 0x11e   : > { %20003 = vmatmul.mubr.msk.f32.gmra.mrb[26].mxu0 %vm722_vm1, %v770_v59  ;;  %20026 = vmatmul.mubr.msk.f32.gmra.mrb[16].mxu1 %vm722_vm1, %v764_v49 }
 0x11f   : > { %20005 = vmatprep.mubr.msk.f32.mxu0 %vm722_vm1, %v771_v60  ;;  %20028 = vmatprep.mubr.msk.f32.mxu1 %vm722_vm1, %v765_v53 }
 0x122   : > { %20006 = vmatmul.mubr.msk.f32.gmra.mrb[28].mxu0 %vm722_vm1, %v772_v61  ;;  %20029 = vmatmul.mubr.msk.f32.gmra.mrb[18].mxu1 %vm722_vm1, %v766_v54 }
 0x123   : > { %20031 = vmatprep.mubr.msk.f32.mxu1 %vm722_vm1, %v767_v55 }
 0x126   : > { %20032 = vmatmul.mubr.msk.f32.gmra.mrb[20].mxu1 %vm722_vm1, %v768_v57 }
 0x127   : > { %20034 = vmatprep.mubr.msk.f32.mxu1 %vm722_vm1, %v769_v58 }
 0x12a   : > { %20035 = vmatmul.mubr.msk.f32.gmra.mrb[22].mxu1 %vm722_vm1, %v770_v59 }
 0x12b   : > { %20037 = vmatprep.mubr.msk.f32.mxu1 %vm722_vm1, %v771_v60 }
 0x12e   : > { %20038 = vmatmul.mubr.msk.f32.gmra.mrb[24].mxu1 %vm722_vm1, %v772_v61 }
 0x1cd   : > { %v19954_v63 = vpop.f32.mrb[8].mxu0 }
 0x1ce   : > { %v901_v0 = vpop.f32.mrb[9].mxu0  ;;  %v23777_v37 = vadd.f32 %v19954_v63, %v23710_v62 }
 0x1cf   : > { %v23713_v1 = vadd.f32 %v23710_v62, %v901_v0 }
 0x1d0   : > { %v23715_v2 = vpop.f32.mrb[0].mxu1  ;;  %28329 = vst [vmem:[#allocation4_spill] sm:$0xff] %v23777_v37 }
 0x1d1   : > { %v23717_v3 = vpop.f32.mrb[10].mxu0  ;;  %20044 = vmatprep.mubr.msk.f32.mxu0 %vm592_vm0, %v23713_v1  ;;  %v931_v4 = vpop.f32.mrb[1].mxu1 }
 0x1d2   : > { %v911_v5 = vpop.f32.mrb[11].mxu0  ;;  %v23722_v6 = vadd.f32 %v23710_v62, %v931_v4  ;;  %v23810_v61 = vadd.f32 %v23717_v3, %v23710_v62 }
 0x1d3   : > { %v23782_v42 = vadd.f32 %v23710_v62, %v911_v5 }
 0x1d4   : > { %28326 = vst [vmem:[#allocation3_spill] sm:$0xff] %v23722_v6  ;;  %20065 = vmatprep.mubr.msk.f32.mxu1 %vm592_vm0, %v23722_v6  ;;  %28334 = vst [vmem:[#allocation9_spill] sm:$0xff] %v23810_v61 }
 0x1d5   : > { %v23726_v7 = vpop.f32.mrb[12].mxu0  ;;  %v23728_v8 = vpop.f32.mrb[2].mxu1  ;;  %28331 = vst [vmem:[#allocation6_spill] sm:$0xff] %v23782_v42 }
 0x1d6   : > { %v921_v9 = vpop.f32.mrb[13].mxu0  ;;  %v23730_v11 = vpop.f32.mrb[3].mxu1 }
 0x1d7   : > { %v23813_v63 = vadd.f32 %v23710_v62, %v921_v9 }
 0x1d9   : > { %v19986_v13 = vpop.f32.mrb[14].mxu0  ;;  %v23737_v14 = vpop.f32.mrb[4].mxu1  ;;  %28335 = vst [vmem:[#allocation10_spill] sm:$0xff] %v23813_v63 }
 0x1da   : > { %v1065_v15 = vadd.f32 %v19986_v13, %v23735_v12  ;;  %v1059_v16 = vpop.f32.mrb[15].mxu0  ;;  %v23740_v17 = vpop.f32.mrb[5].mxu1 }
 0x1db   : > { %v1060_v18 = vadd.f32 %v23735_v12, %v1059_v16 }
 0x1dd   : > { %v19989_v20 = vpop.f32.mrb[16].mxu0  ;;  %v21451_v21 = vpack.c.bf16 %v1065_v15, %v1060_v18  ;;  %v23749_v22 = vpop.f32.mrb[6].mxu1  ;;  %v23751_v23 = vpack.i.bf16 %v1065_v15, %v1060_v18 }
 0x1de   : > { %v1075_v24 = vadd.f32 %v19989_v20, %v23735_v12  ;;  %v1069_v25 = vpop.f32.mrb[17].mxu0  ;;  %v23754_v26 = vpop.f32.mrb[7].mxu1 }
 0x1df   : > { %v1070_v27 = vadd.f32 %v23735_v12, %v1069_v25  ;;  %21453 = vmatprep.subr.msk.bf16.mxu0 %vm23745_vm3, %v21451_v21  ;;  %v23831_v25 = vadd.f32 %v23715_v2, %v23710_v62 }
 0x1e0   : > { %21456 = vmatpush3.bf16.xpose.msk.msra.mxu0 %vm23745_vm3, %v21451_v21 }
 0x1e1   : > { %v19992_v28 = vpop.f32.mrb[18].mxu0  ;;  %v23761_v29 = vpop.f32.mrb[8].mxu1  ;;  %v21457_v30 = vpack.c.bf16 %v1075_v24, %v1070_v27  ;;  %v23763_v31 = vpack.i.bf16 %v1075_v24, %v1070_v27  ;;  %28337 = vst [vmem:[#allocation12_spill] sm:$0xff] %v23831_v25  ;;  %v23835_v27 = vadd.f32 %v23710_v62, %v23740_v17 }
 0x1e2   : > { %v1085_v32 = vadd.f32 %v19992_v28, %v23735_v12  ;;  %v1079_v33 = vpop.f32.mrb[19].mxu0  ;;  %v23766_v34 = vpop.f32.mrb[9].mxu1 }
 0x1e3   : > { %v1080_v35 = vadd.f32 %v23735_v12, %v1079_v33  ;;  %21459 = vmatprep.subr.msk.bf16.mxu0 %vm23745_vm3, %v21457_v30  ;;  %28338 = vst [vmem:[#allocation13_spill] sm:$0xff] %v23835_v27 }
 0x1e5   : > { %v19995_v38 = vpop.f32.mrb[20].mxu0  ;;  %v20018_v39 = vpop.f32.mrb[10].mxu1  ;;  %v21463_v40 = vpack.c.bf16 %v1085_v32, %v1080_v35  ;;  %v23779_v41 = vpack.i.bf16 %v1085_v32, %v1080_v35 }
 0x1e6   : > { %v1095_v43 = vadd.f32 %v19995_v38, %v23735_v12  ;;  %v1223_v44 = vadd.f32 %v20018_v39, %v23774_v36  ;;  %v1089_v45 = vpop.f32.mrb[21].mxu0  ;;  %v1217_v46 = vpop.f32.mrb[11].mxu1 }
 0x1e7   : > { %28330 = vst [vmem:[#allocation5_spill] sm:$0xff] %v23779_v41  ;;  %v1090_v47 = vadd.f32 %v23735_v12, %v1089_v45  ;;  %v1218_v48 = vadd.f32 %v23774_v36, %v1217_v46  ;;  %20045 = vmatmul.mubr.msk.f32.vlgmr.msra.gmra.mrb[30].mxu0 %vm592_vm0, %v23777_v37  ;;  %v23859_v45 = vadd.f32 %v23726_v7, %v23710_v62 }
 0x1e8   : > { %21462 = vmatpush3.bf16.xpose.msk.msra.mxu0 %vm23745_vm3, %v21457_v30  ;;  %20051 = vmatprep.mubr.msk.f32.mxu0 %vm592_vm0, %v23782_v42  ;;  %v23863_v46 = vadd.f32 %v23710_v62, %v23730_v11 }
 0x1e9   : > { %v20021_v49 = vpop.f32.mrb[12].mxu1  ;;  %21465 = vmatprep.subr.msk.bf16.mxu0 %vm23745_vm3, %v21463_v40  ;;  %v19998_v50 = vpop.f32.mrb[22].mxu0  ;;  %v21469_v51 = vpack.c.bf16 %v1095_v43, %v1090_v47  ;;  %v23796_v52 = vpack.c.bf16 %v1223_v44, %v1218_v48  ;;  %v23798_v53 = vpack.i.bf16 %v1095_v43, %v1090_v47  ;;  %v23802_v58 = vpack.i.bf16 %v1223_v44, %v1218_v48 }
 0x1ea   : > { %v1233_v54 = vadd.f32 %v20021_v49, %v23774_v36  ;;  %v1227_v55 = vpop.f32.mrb[13].mxu1  ;;  %v1105_v56 = vadd.f32 %v19998_v50, %v23735_v12  ;;  %v1099_v57 = vpop.f32.mrb[23].mxu0  ;;  %28341 = vst [vmem:[#allocation16_spill] sm:$0xff] %v23859_v45  ;;  %28342 = vst [vmem:[#allocation17_spill] sm:$0xff] %v23863_v46 }
 0x1eb   : > { %28332 = vst [vmem:[#allocation7_spill] sm:$0xff] %v23798_v53  ;;  %28333 = vst [vmem:[#allocation8_spill] sm:$0xff] %v23802_v58  ;;  %v1228_v59 = vadd.f32 %v23774_v36, %v1227_v55  ;;  %21471 = vmatprep.subr.msk.bf16.mxu1 %vm23745_vm3, %v21469_v51  ;;  %v1100_v60 = vadd.f32 %v23735_v12, %v1099_v57 }
 0x1ec   : > { %21474 = vmatpush3.bf16.xpose.msk.msra.mxu1 %vm23745_vm3, %v21469_v51 }
 0x1ed   : > { %v20001_v0 = vpop.f32.mrb[24].mxu0  ;;  %v20024_v4 = vpop.f32.mrb[14].mxu1  ;;  %v21475_v5 = vpack.c.bf16 %v1105_v56, %v1100_v60  ;;  %v23817_v13 = vpack.c.bf16 %v1233_v54, %v1228_v59  ;;  %v23819_v15 = vpack.i.bf16 %v1105_v56, %v1100_v60  ;;  %v23821_v16 = vpack.i.bf16 %v1233_v54, %v1228_v59 }
 0x1ee   : > { %v1115_v18 = vadd.f32 %v20001_v0, %v23735_v12  ;;  %v1243_v3 = vadd.f32 %v20024_v4, %v23774_v36  ;;  %v1109_v20 = vpop.f32.mrb[25].mxu0  ;;  %v1237_v21 = vpop.f32.mrb[15].mxu1  ;;  %v23883_v60 = vadd.f32 %v23737_v14, %v23710_v62  ;;  %v23887_v0 = vadd.f32 %v23710_v62, %v23766_v34 }
 0x1ef   : > { %28336 = vst [vmem:[#allocation11_spill] sm:$0xff] %v23819_v15  ;;  %v1110_v9 = vadd.f32 %v23735_v12, %v1109_v20  ;;  %v1238_v24 = vadd.f32 %v23774_v36, %v1237_v21  ;;  %20052 = vmatmul.mubr.msk.f32.vlgmr.msra.gmra.mrb[32].mxu0 %vm592_vm0, %v23810_v61  ;;  %v23909_v21 = vadd.f32 %v23728_v8, %v23710_v62 }
 0x1f0   : > { %21468 = vmatpush3.bf16.xpose.msk.msra.mxu0 %vm23745_vm3, %v21463_v40  ;;  %20058 = vmatprep.mubr.msk.f32.mxu0 %vm592_vm0, %v23813_v63 }
 0x1f1   : > { %v20027_v28 = vpop.f32.mrb[16].mxu1  ;;  %v20004_v30 = vpop.f32.mrb[26].mxu0  ;;  %v21481_v32 = vpack.c.bf16 %v1115_v18, %v1110_v9  ;;  %21477 = vmatprep.subr.msk.bf16.mxu0 %vm23745_vm3, %v21475_v5  ;;  %v23843_v33 = vpack.c.bf16 %v1243_v3, %v1238_v24  ;;  %v23845_v2 = vpack.i.bf16 %v1115_v18, %v1110_v9  ;;  %v23849_v40 = vpack.i.bf16 %v1243_v3, %v1238_v24 }
 0x1f2   : > { %v1253_v35 = vadd.f32 %v20027_v28, %v23774_v36  ;;  %v1247_v17 = vpop.f32.mrb[17].mxu1  ;;  %v1125_v38 = vadd.f32 %v20004_v30, %v23735_v12  ;;  %v1119_v39 = vpop.f32.mrb[27].mxu0  ;;  %28346 = vst [vmem:[#allocation21_spill] sm:$0xff] %v23909_v21  ;;  %v23922_v30 = vadd.f32 %v23710_v62, %v23754_v26 }
 0x1f3   : > { %28339 = vst [vmem:[#allocation14_spill] sm:$0xff] %v23845_v2  ;;  %28340 = vst [vmem:[#allocation15_spill] sm:$0xff] %v23849_v40  ;;  %v1248_v43 = vadd.f32 %v23774_v36, %v1247_v17  ;;  %20066 = vmatmul.mubr.msk.f32.vlgmr.msra.gmra.mrb[26].mxu1 %vm592_vm0, %v23831_v25  ;;  %21483 = vmatprep.subr.msk.bf16.mxu1 %vm23745_vm3, %v21481_v32  ;;  %v1120_v44 = vadd.f32 %v23735_v12, %v1119_v39 }
 0x1f4   : > { %21486 = vmatpush3.bf16.xpose.msk.msra.mxu1 %vm23745_vm3, %v21481_v32  ;;  %20079 = vmatprep.mubr.msk.f32.mxu1 %vm592_vm0, %v23835_v27  ;;  %v23930_v17 = vadd.f32 %v23761_v29, %v23710_v62 }
 0x1f5   : > { %v20007_v47 = vpop.f32.mrb[28].mxu0  ;;  %v20030_v48 = vpop.f32.mrb[18].mxu1  ;;  %v21487_v49 = vpack.c.bf16 %v1125_v38, %v1120_v44  ;;  %v23869_v50 = vpack.c.bf16 %v1253_v35, %v1248_v43  ;;  %v23871_v51 = vpack.i.bf16 %v1125_v38, %v1120_v44  ;;  %v23873_v54 = vpack.i.bf16 %v1253_v35, %v1248_v43 }
 0x1f6   : > { %v1135_v7 = vadd.f32 %v20007_v47, %v23735_v12  ;;  %v1129_v55 = vpop.f32.mrb[29].mxu0  ;;  %v1263_v11 = vadd.f32 %v20030_v48, %v23774_v36  ;;  %v1257_v56 = vpop.f32.mrb[19].mxu1  ;;  %v23947_v47 = vadd.f32 %v23749_v22, %v23710_v62 }
 0x1f7   : > { %28343 = vst [vmem:[#allocation18_spill] sm:$0xff] %v23873_v54  ;;  %v1130_v57 = vadd.f32 %v23735_v12, %v1129_v55  ;;  %20059 = vmatmul.mubr.msk.f32.vlgmr.msra.gmra.mrb[34].mxu0 %vm592_vm0, %v23859_v45  ;;  %v1258_v59 = vadd.f32 %v23774_v36, %v1257_v56 }
 0x1f8   : > { %21480 = vmatpush3.bf16.xpose.msk.msra.mxu0 %vm23745_vm3, %v21475_v5  ;;  %20072 = vmatprep.mubr.msk.f32.mxu0 %vm592_vm0, %v23863_v46 }
 0x1f9   : > { %v21493_v12 = vpack.c.bf16 %v1135_v7, %v1130_v57  ;;  %v20033_v4 = vpop.f32.mrb[20].mxu1  ;;  %21489 = vmatprep.subr.msk.bf16.mxu0 %vm23745_vm3, %v21487_v49  ;;  %v23895_v18 = vpack.c.bf16 %v1263_v11, %v1258_v59  ;;  %v23897_v3 = vpack.i.bf16 %v1135_v7, %v1130_v57  ;;  %v23900_v34 = vpack.i.bf16 %v1263_v11, %v1258_v59 }
 0x1fa   : > { %v1273_v14 = vadd.f32 %v20033_v4, %v23774_v36  ;;  %v1267_v20 = vpop.f32.mrb[21].mxu1 }
 0x1fb   : > { %28344 = vst [vmem:[#allocation19_spill] sm:$0xff] %v23895_v18  ;;  %28345 = vst [vmem:[#allocation20_spill] sm:$0xff] %v23900_v34  ;;  %20080 = vmatmul.mubr.msk.f32.vlgmr.msra.gmra.mrb[28].mxu1 %vm592_vm0, %v23883_v60  ;;  %21495 = vmatprep.subr.msk.bf16.mxu1 %vm23745_vm3, %v21493_v12  ;;  %v1268_v5 = vadd.f32 %v23774_v36, %v1267_v20 }
 0x1fc   : > { %21498 = vmatpush3.bf16.xpose.msk.msra.mxu1 %vm23745_vm3, %v21493_v12  ;;  %20093 = vmatprep.mubr.msk.f32.mxu1 %vm592_vm0, %v23887_v0 }
 0x1fd   : > { %21508 = vmatprep.subr.bf16.mxu1 %v23843_v33  ;;  %v20036_v9 = vpop.f32.mrb[22].mxu1  ;;  %v23916_v24 = vpack.c.bf16 %v1273_v14, %v1268_v5  ;;  %v23918_v28 = vpack.i.bf16 %v1273_v14, %v1268_v5 }
 0x1fe   : > { %v1283_v8 = vadd.f32 %v20036_v9, %v23774_v36  ;;  %v1277_v32 = vpop.f32.mrb[23].mxu1 }
 0x1ff   : > { %28347 = vst [vmem:[#allocation22_spill] sm:$0xff] %v23918_v28  ;;  %20073 = vmatmul.mubr.msk.f32.vlgmr.msra.gmra.mrb[36].mxu0 %vm592_vm0, %v23909_v21  ;;  %v1278_v35 = vadd.f32 %v23774_v36, %v1277_v32 }
 0x200   : > { %21492 = vmatpush3.bf16.xpose.msk.msra.mxu0 %vm23745_vm3, %v21487_v49  ;;  %20086 = vmatprep.mubr.msk.f32.mxu0 %vm592_vm0, %v23922_v30 }
 0x201   : > { %21500 = vmatprep.subr.bf16.mxu0 %v23796_v52  ;;  %v20039_v26 = vpop.f32.mrb[24].mxu1  ;;  %v23937_v38 = vpack.c.bf16 %v1283_v8, %v1278_v35  ;;  %v23939_v39 = vpack.i.bf16 %v1283_v8, %v1278_v35 }
 0x202   : > { %v1293_v43 = vadd.f32 %v20039_v26, %v23774_v36  ;;  %v1287_v44 = vpop.f32.mrb[25].mxu1 }
 0x203   : > { %28348 = vst [vmem:[#allocation23_spill] sm:$0xff] %v23937_v38  ;;  %28349 = vst [vmem:[#allocation24_spill] sm:$0xff] %v23939_v39  ;;  %20094 = vmatmul.mubr.msk.f32.vlgmr.msra.gmra.mrb[30].mxu1 %vm592_vm0, %v23930_v17  ;;  %v1288_v29 = vadd.f32 %v23774_v36, %v1287_v44  ;;  %v773_v36 = vlaneseq }
 0x204   : > { %21510 = vmatpush3.bf16.msra.mxu1 %v23843_v33 }
 0x205   : > { %21516 = vmatprep.subr.bf16.mxu1 %v23895_v18  ;;  %v23951_v48 = vpack.c.bf16 %v1293_v43, %v1288_v29  ;;  %v23953_v49 = vpack.i.bf16 %v1293_v43, %v1288_v29  ;;  %v23959_v7 = vand.u32 127, %v773_v36 }
 0x207   : > { %28350 = vst [vmem:[#allocation25_spill] sm:$0xff] %v23953_v49  ;;  %20087 = vmatmul.mubr.msk.f32.vlgmr.msra.gmra.mrb[38].mxu0 %vm592_vm0, %v23947_v47  ;;  %vm775_vm4 = vcmp.lt.s32.totalorder %v23959_v7, 9 }
 0x208   : > { %21502 = vmatpush3.bf16.msra.mxu0 %v23796_v52 }
 0x209   : > { %21504 = vmatprep.subr.bf16.mxu0 %v23817_v13 }
 0x2ba   : > { %v20046_v62 = vpop.f32.mrb[30].mxu0 }
 0x2bb   : > { %v1378_v22 = vpop.f32.mrb[31].mxu0  ;;  %v1997_v33 = vmul.f32 0.35355338, %v20046_v62 }
 0x2bc   : > { %v1996_v55 = vmul.f32 0.35355338, %v1378_v22 }
 0x2bd   : > { %v2013_v52 = vsel %vm775_vm4, %v1997_v33, -1e+30 }
 0x2be   : > { %v2012_v11 = vsel %vm775_vm4, %v1996_v55, -1e+30  ;;  %v2032_v12 = vsel %vm2028_vm5, %v2013_v52, -inf }
 0x2bf   : > { %v2029_v56 = vsel %vm2028_vm5, %v2012_v11, -inf }
 0x2c0   : > { %2030 = vmax.xlane.f32.xlu0 %v2029_v56 }
 0x2c2   : > { %v20053_v57 = vpop.f32.mrb[32].mxu0 }
 0x2c3   : > { %v1465_v59 = vpop.f32.mrb[33].mxu0  ;;  %v1999_v4 = vmul.f32 0.35355338, %v20053_v57 }
 0x2c4   : > { %v1998_v14 = vmul.f32 0.35355338, %v1465_v59  ;;  %2033 = vmax.xlane.f32.xlu0 %v2032_v12 }
 0x2c5   : > { %v2015_v26 = vsel %vm775_vm4, %v1999_v4, -1e+30 }
 0x2c6   : > { %v20067_v20 = vpop.f32.mrb[26].mxu1  ;;  %v2014_v5 = vsel %vm775_vm4, %v1998_v14, -1e+30  ;;  %v2038_v62 = vsel %vm2028_vm5, %v2015_v26, -inf }
 0x2c7   : > { %v1639_v9 = vpop.f32.mrb[27].mxu1  ;;  %v2035_v8 = vsel %vm2028_vm5, %v2014_v5, -inf  ;;  %v2003_v32 = vmul.f32 0.35355338, %v20067_v20 }
 0x2c8   : > { %v2002_v35 = vmul.f32 0.35355338, %v1639_v9  ;;  %2036 = vmax.xlane.f32.xlu1 %v2035_v8 }
 0x2c9   : > { %v2019_v22 = vsel %vm775_vm4, %v2003_v32, -1e+30 }
 0x2ca   : > { %v23973_v43 = vpop.f32.mrb[34].mxu0  ;;  %v2018_v44 = vsel %vm775_vm4, %v2002_v35, -1e+30  ;;  %v2050_v57 = vsel %vm2028_vm5, %v2019_v22, -inf }
 0x2cb   : > { %v23977_v29 = vpop.f32.mrb[35].mxu0  ;;  %v2047_v36 = vsel %vm2028_vm5, %v2018_v44, -inf }
 0x2cc   : > { %2048 = vmax.xlane.f32.xlu0 %v2047_v36  ;;  %2039 = vmax.xlane.f32.xlu1 %v2038_v62 }
 0x2ce   : > { %v20081_v33 = vpop.f32.mrb[28].mxu1 }
 0x2cf   : > { %v2007_v55 = vmul.f32 0.35355338, %v20081_v33  ;;  %v1813_v56 = vpop.f32.mrb[29].mxu1 }
 0x2d0   : > { %v2006_v59 = vmul.f32 0.35355338, %v1813_v56  ;;  %2051 = vmax.xlane.f32.xlu1 %v2050_v57 }
 0x2d1   : > { %v2023_v12 = vsel %vm775_vm4, %v2007_v55, -1e+30 }
 0x2d2   : > { %v23986_v4 = vpop.f32.mrb[36].mxu0  ;;  %v2022_v14 = vsel %vm775_vm4, %v2006_v59, -1e+30  ;;  %v2062_v20 = vsel %vm2028_vm5, %v2023_v12, -inf }
 0x2d3   : > { %v2059_v9 = vsel %vm2028_vm5, %v2022_v14, -inf  ;;  %v23992_v8 = vpop.f32.mrb[37].mxu0 }
 0x2d4   : > { %2060 = vmax.xlane.f32.xlu0 %v2059_v9  ;;  %2063 = vmax.xlane.f32.xlu1 %v2062_v20 }
 0x2d6   : > { %v20095_v32 = vpop.f32.mrb[30].mxu1 }
 0x2d7   : > { %v2011_v35 = vmul.f32 0.35355338, %v20095_v32  ;;  %v1987_v36 = vpop.f32.mrb[31].mxu1 }
 0x2d8   : > { %v2010_v62 = vmul.f32 0.35355338, %v1987_v36 }
 0x2d9   : > { %v2027_v33 = vsel %vm775_vm4, %v2011_v35, -1e+30 }
 0x2da   : > { %v2074_v55 = vsel %vm2028_vm5, %v2027_v33, -inf  ;;  %v23997_v56 = vpop.f32.mrb[38].mxu0  ;;  %v2026_v57 = vsel %vm775_vm4, %v2010_v62, -1e+30 }
 0x2db   : > { %2075 = vmax.xlane.f32.xlu1 %v2074_v55  ;;  %v2071_v59 = vsel %vm2028_vm5, %v2026_v57, -inf  ;;  %v24002_v10 = vpop.f32.mrb[39].mxu0 }
 0x2dc   : > { %2072 = vmax.xlane.f32.xlu0 %v2071_v59 }
 0x34d   : > { %v2031_v20 = vpop.xlane.xlu0 %2030 }
 0x34e   : > { %v2077_v9 = vsub.f32 %v2012_v11, %v2031_v20 }
 0x350   : > { %v2093_v32 = vmul.f32 1.442695, %v2077_v9 }
 0x351   : > { %v2034_v36 = vpop.xlane.xlu0 %2033 }
 0x352   : > { %22795 = vpow2.f32 %v2093_v32  ;;  %v2078_v34 = vsub.f32 %v2013_v52, %v2034_v36 }
 0x354   : > { %v2095_v35 = vmul.f32 1.442695, %v2078_v34 }
 0x355   : > { %v2037_v39 = vpop.xlane.xlu1 %2036 }
 0x356   : > { %22797 = vpow2.f32 %v2095_v35  ;;  %v2079_v40 = vsub.f32 %v2014_v5, %v2037_v39 }
 0x358   : > { %v2097_v58 = vmul.f32 1.442695, %v2079_v40 }
 0x359   : > { %v2049_v38 = vpop.xlane.xlu0 %2048  ;;  %v2040_v18 = vpop.xlane.xlu1 %2039 }
 0x35a   : > { %22799 = vpow2.f32 %v2097_v58  ;;  %v2083_v62 = vsub.f32 %v2018_v44, %v2049_v38  ;;  %v2080_v55 = vsub.f32 %v2015_v26, %v2040_v18 }
 0x35c   : > { %v24004_v49 = vpop.eup %22795  ;;  %v2105_v28 = vmul.f32 1.442695, %v2083_v62  ;;  %v2099_v59 = vmul.f32 1.442695, %v2080_v55 }
 0x35d   : > { %v2052_v54 = vpop.xlane.xlu1 %2051  ;;  %v2125_v11 = vsel %vm2028_vm5, %v24004_v49, 0.0 }
 0x35e   : > { %22801 = vpow2.f32 %v2105_v28  ;;  %v2084_v52 = vsub.f32 %v2019_v22, %v2052_v54  ;;  %2126 = vadd.xlane.f32.xlu0 %v2125_v11 }
 0x35f   : > { %22803 = vpow2.f32 %v2099_v59 }
 0x360   : > { %v24008_v34 = vpop.eup %22797  ;;  %v2107_v40 = vmul.f32 1.442695, %v2084_v52 }
 0x361   : > { %v2061_v39 = vpop.xlane.xlu0 %2060  ;;  %v2064_v5 = vpop.xlane.xlu1 %2063  ;;  %v2128_v58 = vsel %vm2028_vm5, %v24008_v34, 0.0 }
 0x362   : > { %22805 = vpow2.f32 %v2107_v40  ;;  %v2087_v18 = vsub.f32 %v2022_v14, %v2061_v39  ;;  %v2088_v38 = vsub.f32 %v2023_v12, %v2064_v5  ;;  %2129 = vadd.xlane.f32.xlu1 %v2128_v58 }
 0x364   : > { %v24012_v26 = vpop.eup %22799  ;;  %v2113_v44 = vmul.f32 1.442695, %v2087_v18  ;;  %v2115_v20 = vmul.f32 1.442695, %v2088_v38  ;;  %v2000_v38 = vmul.f32 0.35355338, %v23977_v29 }
 0x365   : > { %v2131_v54 = vsel %vm2028_vm5, %v24012_v26, 0.0  ;;  %v2009_v29 = vmul.f32 0.35355338, %v23997_v56 }
 0x366   : > { %22807 = vpow2.f32 %v2113_v44  ;;  %2132 = vadd.xlane.f32.xlu0 %v2131_v54  ;;  %v2004_v44 = vmul.f32 0.35355338, %v23992_v8  ;;  %v2001_v54 = vmul.f32 0.35355338, %v23973_v43  ;;  %v2008_v43 = vmul.f32 0.35355338, %v24002_v10 }
 0x367   : > { %22809 = vpow2.f32 %v2115_v20  ;;  %v24072_v20 = vsel %vm775_vm4, %v2000_v38, -1e+30 }
 0x368   : > { %v24016_v28 = vpop.eup %22801  ;;  %v2076_v22 = vpop.xlane.xlu1 %2075  ;;  %v24104_v10 = vsel %vm775_vm4, %v2008_v43, -1e+30 }
 0x369   : > { %v24018_v9 = vpop.eup %22803  ;;  %v2092_v32 = vsub.f32 %v2027_v33, %v2076_v22  ;;  %v2073_v36 = vpop.xlane.xlu0 %2072  ;;  %v2143_v12 = vsel %vm2028_vm5, %v24016_v28, 0.0  ;;  %v2041_v22 = vsel %vm2028_vm5, %v24072_v20, -inf }
 0x36a   : > { %v2091_v14 = vsub.f32 %v2026_v57, %v2073_v36  ;;  %2144 = vadd.xlane.f32.xlu0 %v2143_v12  ;;  %v2134_v35 = vsel %vm2028_vm5, %v24018_v9, 0.0  ;;  %v24080_v36 = vsel %vm775_vm4, %v2004_v44, -1e+30  ;;  %v24087_v12 = vsel %vm775_vm4, %v2001_v54, -1e+30 }
 0x36b   : > { %v2123_v62 = vmul.f32 1.442695, %v2092_v32  ;;  %2135 = vadd.xlane.f32.xlu1 %v2134_v35  ;;  %v2005_v32 = vmul.f32 0.35355338, %v23986_v4  ;;  %v2053_v8 = vsel %vm2028_vm5, %v24080_v36, -inf }
 0x36c   : > { %v24024_v55 = vpop.eup %22805  ;;  %v2121_v59 = vmul.f32 1.442695, %v2091_v14  ;;  %v2044_v14 = vsel %vm2028_vm5, %v24087_v12, -inf  ;;  %v24100_v35 = vsel %vm775_vm4, %v2009_v29, -1e+30 }
 0x36d   : > { %22811 = vpow2.f32 %v2123_v62  ;;  %v2146_v11 = vsel %vm2028_vm5, %v24024_v55, 0.0  ;;  %v24092_v4 = vsel %vm775_vm4, %v2005_v32, -1e+30  ;;  %v2068_v62 = vsel %vm2028_vm5, %v24100_v35, -inf }
 0x36e   : > { %22813 = vpow2.f32 %v2121_v59  ;;  %v2056_v56 = vsel %vm2028_vm5, %v24092_v4, -inf  ;;  %v2065_v59 = vsel %vm2028_vm5, %v24104_v10, -inf }
 0x36f   : > { %2147 = vadd.xlane.f32.xlu1 %v2146_v11 }
 0x370   : > { %v24028_v33 = vpop.eup %22807 }
 0x371   : > { %v24030_v52 = vpop.eup %22809  ;;  %v2155_v57 = vsel %vm2028_vm5, %v24028_v33, 0.0 }
 0x372   : > { %2156 = vadd.xlane.f32.xlu0 %v2155_v57  ;;  %v2158_v40 = vsel %vm2028_vm5, %v24030_v52, 0.0 }
 0x373   : > { %2159 = vadd.xlane.f32.xlu1 %v2158_v40 }
 0x377   : > { %v24036_v39 = vpop.eup %22811 }
 0x378   : > { %v24038_v5 = vpop.eup %22813  ;;  %v2170_v58 = vsel %vm2028_vm5, %v24036_v39, 0.0 }
 0x379   : > { %2171 = vadd.xlane.f32.xlu1 %v2170_v58  ;;  %v2167_v18 = vsel %vm2028_vm5, %v24038_v5, 0.0 }
 0x37a   : > { %2168 = vadd.xlane.f32.xlu0 %v2167_v18 }
 0x38a   : > { %22321 = vrot.lane.b32.xlu1 %v23798_v53, %s23444_s20 }
 0x38e   : > { %2944 = vrot.lane.b32.xlu1 %v23782_v42, %s23444_s20 }
 0x390   : > { %22316 = vrot.lane.b32.xlu0 %v23763_v31, %s23444_s20 }
 0x392   : > { %2946 = vrot.lane.b32.xlu1 %v23810_v61, %s23444_s20 }
 0x394   : > { %22326 = vrot.lane.b32.xlu0 %v23845_v2, %s23444_s20 }
 0x396   : > { %3126 = vrot.lane.b32.xlu1 %v23722_v6, %s23444_s20 }
 0x398   : > { %3128 = vrot.lane.b32.xlu0 %v23831_v25, %s23444_s20 }
 0x39a   : > { %3308 = vrot.lane.b32.xlu1 %v23835_v27, %s23444_s20 }
 0x39c   : > { %22331 = vrot.lane.b32.xlu0 %v23897_v3, %s23444_s20 }
 0x39e   : > { %3310 = vrot.lane.b32.xlu1 %v23883_v60, %s23444_s20 }
 0x3a0   : > { %3490 = vrot.lane.b32.xlu0 %v23887_v0, %s23444_s20 }
 0x3a2   : > { %3492 = vrot.lane.b32.xlu1 %v23930_v17, %s23444_s20 }
 0x3bf   : > { %2042 = vmax.xlane.f32.xlu0 %v2041_v22 }
 0x3c3   : > { %2054 = vmax.xlane.f32.xlu0 %v2053_v8 }
 0x3c6   : > { %2045 = vmax.xlane.f32.xlu1 %v2044_v14 }
 0x3c7   : > { %2057 = vmax.xlane.f32.xlu0 %v2056_v56 }
 0x3ca   : > { %2069 = vmax.xlane.f32.xlu1 %v2068_v62 }
 0x3cb   : > { %2066 = vmax.xlane.f32.xlu0 %v2065_v59 }
 0x3eb   : > { %v2127_v11 = vpop.xlane.xlu0 %2126 }
 0x3ec   : > { %22815 = vrcp.f32 %v2127_v11 }
 0x3ef   : > { %v2130_v57 = vpop.xlane.xlu1 %2129 }
 0x3f0   : > { %22817 = vrcp.f32 %v2130_v57 }
 0x3f3   : > { %v2133_v40 = vpop.xlane.xlu0 %2132 }
 0x3f4   : > { %22819 = vrcp.f32 %v2133_v40 }
 0x3f6   : > { %v22816_v58 = vpop.eup %22815 }
 0x3f7   : > { %v2145_v18 = vpop.xlane.xlu0 %2144  ;;  %v2189_v38 = vmul.f32 %v22816_v58, %v24004_v49 }
 0x3f8   : > { %22821 = vrcp.f32 %v2145_v18  ;;  %v2136_v44 = vpop.xlane.xlu1 %2135 }
 0x3f9   : > { %22823 = vrcp.f32 %v2136_v44  ;;  %20100 = vmatprep.mubr.msk.f32.mxu0 %vm2028_vm5, %v2189_v38 }
 0x3fa   : > { %v22818_v54 = vpop.eup %22817 }
 0x3fb   : > { %v2190_v22 = vmul.f32 %v22818_v54, %v24008_v34 }
 0x3fc   : > { %v2148_v32 = vpop.xlane.xlu1 %2147 }
 0x3fd   : > { %22825 = vrcp.f32 %v2148_v32  ;;  %20101 = vmatmul.mubr.msk.f32.vlgmr.msra.gmra.mrb[40].mxu0 %vm2028_vm5, %v2190_v22 }
 0x3fe   : > { %v22820_v29 = vpop.eup %22819  ;;  %21506 = vmatpush3.bf16.msra.mxu0 %v23817_v13 }
 0x3ff   : > { %21512 = vmatprep.subr.bf16.mxu0 %v23869_v50  ;;  %v2157_v8 = vpop.xlane.xlu0 %2156  ;;  %v2191_v49 = vmul.f32 %v22820_v29, %v24012_v26 }
 0x400   : > { %22827 = vrcp.f32 %v2157_v8  ;;  %v2160_v43 = vpop.xlane.xlu1 %2159 }
 0x401   : > { %22829 = vrcp.f32 %v2160_v43  ;;  %20107 = vmatprep.mubr.msk.f32.mxu0 %vm2028_vm5, %v2191_v49 }
 0x402   : > { %v22822_v14 = vpop.eup %22821 }
 0x403   : > { %v22824_v56 = vpop.eup %22823  ;;  %v2195_v34 = vmul.f32 %v22822_v14, %v24016_v28 }
 0x404   : > { %v2192_v62 = vmul.f32 %v22824_v56, %v24018_v9 }
 0x406   : > { %20108 = vmatmul.mubr.msk.f32.vlgmr.msra.gmra.mrb[42].mxu0 %vm2028_vm5, %v2192_v62  ;;  %v2172_v59 = vpop.xlane.xlu1 %2171 }
 0x407   : > { %v22826_v13 = vpop.eup %22825  ;;  %21514 = vmatpush3.bf16.msra.mxu0 %v23869_v50  ;;  %20121 = vmatprep.mubr.msk.f32.mxu0 %vm2028_vm5, %v2195_v34  ;;  %22831 = vrcp.f32 %v2172_v59  ;;  %v2169_v26 = vpop.xlane.xlu0 %2168 }
 0x408   : > { %21520 = vmatprep.subr.bf16.mxu0 %v23916_v24  ;;  %22833 = vrcp.f32 %v2169_v26  ;;  %v2196_v11 = vmul.f32 %v22826_v13, %v24024_v55 }
 0x40a   : > { %v22828_v57 = vpop.eup %22827  ;;  %20122 = vmatmul.mubr.msk.f32.vlgmr.msra.gmra.mrb[44].mxu0 %vm2028_vm5, %v2196_v11  ;;  %v22322_v38 = vpop.permute.xlu1 %22321 }
 0x40b   : > { %v22830_v28 = vpop.eup %22829  ;;  %21522 = vmatpush3.bf16.msra.mxu0 %v23916_v24  ;;  %v22317_v9 = vpop.permute.xlu0 %22316  ;;  %v2199_v40 = vmul.f32 %v22828_v57, %v24028_v33  ;;  %v22324_v33 = vunpack.i.h.bf16 %v22322_v38  ;;  %v22323_v54 = vunpack.i.l.bf16 %v22322_v38 }
 0x40c   : > { %21528 = vmatprep.subr.bf16.mxu0 %v23951_v48  ;;  %v22319_v50 = vunpack.i.h.bf16 %v22317_v9  ;;  %v22318_v58 = vunpack.i.l.bf16 %v22317_v9  ;;  %v2200_v18 = vmul.f32 %v22830_v28, %v24030_v52 }
 0x40d   : > { %20135 = vmatprep.mubr.msk.f32.mxu0 %vm2028_vm5, %v2199_v40  ;;  %v21549_v8 = vpack.c.bf16 %v22324_v33, %v22323_v54 }
 0x40e   : > { %v21537_v44 = vpack.c.bf16 %v22319_v50, %v22318_v58  ;;  %20136 = vmatmul.mubr.msk.f32.vlgmr.msra.gmra.mrb[46].mxu0 %vm2028_vm5, %v2200_v18  ;;  %v2945_v22 = vpop.permute.xlu1 %2944 }
 0x40f   : > { %21530 = vmatpush3.bf16.msra.mxu0 %v23951_v48  ;;  %v22327_v29 = vpop.permute.xlu0 %22326 }
 0x410   : > { %21539 = vmatprep.subr.msk.bf16.mxu0 %vm23745_vm3, %v21537_v44  ;;  %v22329_v43 = vunpack.i.h.bf16 %v22327_v29 }
 0x411   : > { %v22832_v24 = vpop.eup %22831 }
 0x412   : > { %v22834_v55 = vpop.eup %22833  ;;  %v2204_v52 = vmul.f32 %v22832_v24, %v24036_v39  ;;  %v2947_v48 = vpop.permute.xlu1 %2946 }
 0x413   : > { %v2203_v32 = vmul.f32 %v22834_v55, %v24038_v5  ;;  %v3129_v49 = vpop.permute.xlu0 %3128  ;;  %v22328_v5 = vunpack.i.l.bf16 %v22327_v29 }
 0x415   : > { %20149 = vmatprep.mubr.msk.f32.mxu0 %vm2028_vm5, %v2203_v32  ;;  %v21561_v14 = vpack.c.bf16 %v22329_v43, %v22328_v5 }
 0x416   : > { %20150 = vmatmul.mubr.msk.f32.vlgmr.msra.gmra.mrb[48].mxu0 %vm2028_vm5, %v2204_v52  ;;  %v3127_v56 = vpop.permute.xlu1 %3126 }
 0x417   : > { %20163 = vmatprep.mubr.msk.f32.mxu0 %vm592_vm0, %v2945_v22  ;;  %v22332_v39 = vpop.permute.xlu0 %22331 }
 0x418   : > { %21542 = vmatpush3.bf16.xpose.msk.msra.mxu0 %vm23745_vm3, %v21537_v44  ;;  %v22334_v34 = vunpack.i.h.bf16 %v22332_v39  ;;  %v22333_v62 = vunpack.i.l.bf16 %v22332_v39 }
 0x419   : > { %21551 = vmatprep.subr.msk.bf16.mxu0 %vm23745_vm3, %v21549_v8 }
 0x41a   : > { %v21573_v59 = vpack.c.bf16 %v22334_v34, %v22333_v62  ;;  %v3309_v13 = vpop.permute.xlu1 %3308  ;;  %v28351_v34 = vld [vmem:[#allocation18_spill] sm:$0xff] }
 0x41b   : > { %v3491_v11 = vpop.permute.xlu0 %3490  ;;  %v28352_v62 = vld [vmem:[#allocation22_spill] sm:$0xff] }
 0x41e   : > { %v3311_v26 = vpop.permute.xlu1 %3310 }
 0x41f   : > { %20164 = vmatmul.mubr.msk.f32.vlgmr.msra.gmra.mrb[50].mxu0 %vm592_vm0, %v2947_v48 }
 0x420   : > { %21554 = vmatpush3.bf16.xpose.msk.msra.mxu0 %vm23745_vm3, %v21549_v8  ;;  %20177 = vmatprep.mubr.msk.f32.mxu0 %vm592_vm0, %v3127_v56 }
 0x421   : > { %21563 = vmatprep.subr.msk.bf16.mxu0 %vm23745_vm3, %v21561_v14 }
 0x422   : > { %v3493_v57 = vpop.permute.xlu1 %3492 }
 0x427   : > { %20178 = vmatmul.mubr.msk.f32.vlgmr.msra.gmra.mrb[52].mxu0 %vm592_vm0, %v3129_v49 }
 0x428   : > { %21566 = vmatpush3.bf16.xpose.msk.msra.mxu0 %vm23745_vm3, %v21561_v14  ;;  %20191 = vmatprep.mubr.msk.f32.mxu0 %vm592_vm0, %v3309_v13 }
 0x429   : > { %21575 = vmatprep.subr.msk.bf16.mxu0 %vm23745_vm3, %v21573_v59 }
 0x42f   : > { %20192 = vmatmul.mubr.msk.f32.vlgmr.msra.gmra.mrb[54].mxu0 %vm592_vm0, %v3311_v26 }
 0x430   : > { %21578 = vmatpush3.bf16.xpose.msk.msra.mxu0 %vm23745_vm3, %v21573_v59  ;;  %20205 = vmatprep.mubr.msk.f32.mxu0 %vm592_vm0, %v3491_v11  ;;  %v28353_v59 = vld [vmem:[#allocation25_spill] sm:$0xff] }
 0x437   : > { %20206 = vmatmul.mubr.msk.f32.vlgmr.msra.gmra.mrb[56].mxu0 %vm592_vm0, %v3493_v57 }
 0x44c   : > { %v2043_v28 = vpop.xlane.xlu0 %2042 }
 0x44d   : > { %v2081_v9 = vsub.f32 %v24072_v20, %v2043_v28 }
 0x44f   : > { %v2101_v40 = vmul.f32 1.442695, %v2081_v9 }
 0x450   : > { %v2055_v50 = vpop.xlane.xlu0 %2054 }
 0x451   : > { %22835 = vpow2.f32 %v2101_v40  ;;  %v2085_v58 = vsub.f32 %v24080_v36, %v2055_v50 }
 0x453   : > { %v2109_v18 = vmul.f32 1.442695, %v2085_v58  ;;  %v2046_v38 = vpop.xlane.xlu1 %2045 }
 0x454   : > { %v2082_v44 = vsub.f32 %v24087_v12, %v2046_v38  ;;  %v2058_v24 = vpop.xlane.xlu0 %2057 }
 0x455   : > { %22837 = vpow2.f32 %v2109_v18  ;;  %v2086_v55 = vsub.f32 %v24092_v4, %v2058_v24 }
 0x456   : > { %v2103_v33 = vmul.f32 1.442695, %v2082_v44 }
 0x457   : > { %v2111_v54 = vmul.f32 1.442695, %v2086_v55  ;;  %v2070_v22 = vpop.xlane.xlu1 %2069 }
 0x458   : > { %22839 = vpow2.f32 %v2103_v33  ;;  %v2090_v32 = vsub.f32 %v24100_v35, %v2070_v22  ;;  %v2067_v20 = vpop.xlane.xlu0 %2066 }
 0x459   : > { %v2089_v29 = vsub.f32 %v24104_v10, %v2067_v20  ;;  %22841 = vpow2.f32 %v2111_v54 }
 0x45a   : > { %v2119_v52 = vmul.f32 1.442695, %v2090_v32 }
 0x45b   : > { %v24167_v36 = vpop.eup %22835  ;;  %v2117_v8 = vmul.f32 1.442695, %v2089_v29 }
 0x45c   : > { %v2137_v12 = vsel %vm2028_vm5, %v24167_v36, 0.0 }
 0x45d   : > { %22843 = vpow2.f32 %v2117_v8  ;;  %2138 = vadd.xlane.f32.xlu0 %v2137_v12 }
 0x45e   : > { %22845 = vpow2.f32 %v2119_v52 }
 0x45f   : > { %v24171_v4 = vpop.eup %22837 }
 0x460   : > { %v2149_v48 = vsel %vm2028_vm5, %v24171_v4, 0.0 }
 0x461   : > { %2150 = vadd.xlane.f32.xlu0 %v2149_v48 }
 0x462   : > { %v24175_v35 = vpop.eup %22839 }
 0x463   : > { %v2140_v10 = vsel %vm2028_vm5, %v24175_v35, 0.0  ;;  %v24179_v49 = vpop.eup %22841 }
 0x464   : > { %2141 = vadd.xlane.f32.xlu1 %v2140_v10  ;;  %v2152_v5 = vsel %vm2028_vm5, %v24179_v49, 0.0 }
 0x467   : > { %v24181_v43 = vpop.eup %22843 }
 0x468   : > { %v24185_v14 = vpop.eup %22845  ;;  %2153 = vadd.xlane.f32.xlu1 %v2152_v5  ;;  %v2161_v56 = vsel %vm2028_vm5, %v24181_v43, 0.0 }
 0x469   : > { %2162 = vadd.xlane.f32.xlu0 %v2161_v56  ;;  %v2164_v39 = vsel %vm2028_vm5, %v24185_v14, 0.0 }
 0x46c   : > { %2165 = vadd.xlane.f32.xlu1 %v2164_v39 }
 0x47d   : > { %22341 = vrot.lane.b32.xlu1 %v23779_v41, %s23444_s20 }
 0x47f   : > { %22336 = vrot.lane.b32.xlu0 %v23751_v23, %s23444_s20 }
 0x481   : > { %2853 = vrot.lane.b32.xlu1 %v23713_v1, %s23444_s20 }
 0x483   : > { %22346 = vrot.lane.b32.xlu0 %v23819_v15, %s23444_s20 }
 0x485   : > { %2855 = vrot.lane.b32.xlu1 %v23777_v37, %s23444_s20 }
 0x487   : > { %3037 = vrot.lane.b32.xlu0 %v23859_v45, %s23444_s20 }
 0x489   : > { %3035 = vrot.lane.b32.xlu1 %v23813_v63, %s23444_s20 }
 0x48b   : > { %3217 = vrot.lane.b32.xlu0 %v23863_v46, %s23444_s20 }
 0x48d   : > { %22351 = vrot.lane.b32.xlu1 %v23871_v51, %s23444_s20 }
 0x48f   : > { %3399 = vrot.lane.b32.xlu0 %v23922_v30, %s23444_s20 }
 0x491   : > { %3219 = vrot.lane.b32.xlu1 %v23909_v21, %s23444_s20 }
 0x493   : > { %22356 = vrot.lane.b32.xlu0 %v23821_v16, %s23444_s20 }
 0x495   : > { %3401 = vrot.lane.b32.xlu1 %v23947_v47, %s23444_s20 }
 0x497   : > { %22376 = vrot.lane.b32.xlu0 %v23751_v23, %s23445_s21 }
 0x499   : > { %22361 = vrot.lane.b32.xlu1 %v28351_v34, %s23444_s20 }
 0x49b   : > { %4887 = vrot.lane.b32.xlu0 %v23713_v1, %s23445_s21 }
 0x49d   : > { %22366 = vrot.lane.b32.xlu1 %v28352_v62, %s23444_s20 }
 0x49f   : > { %22386 = vrot.lane.b32.xlu0 %v23779_v41, %s23445_s21 }
 0x4a1   : > { %22371 = vrot.lane.b32.xlu1 %v28353_v59, %s23444_s20 }
 0x4a3   : > { %4980 = vrot.lane.b32.xlu0 %v23810_v61, %s23445_s21 }
 0x4a5   : > { %22381 = vrot.lane.b32.xlu1 %v23763_v31, %s23445_s21 }
 0x4a7   : > { %5069 = vrot.lane.b32.xlu0 %v23813_v63, %s23445_s21 }
 0x4a9   : > { %4889 = vrot.lane.b32.xlu1 %v23777_v37, %s23445_s21 }
 0x4ab   : > { %22396 = vrot.lane.b32.xlu0 %v23819_v15, %s23445_s21 }
 0x4ad   : > { %4978 = vrot.lane.b32.xlu1 %v23782_v42, %s23445_s21 }
 0x4b1   : > { %22391 = vrot.lane.b32.xlu1 %v23798_v53, %s23445_s21 }
 0x4b5   : > { %5071 = vrot.lane.b32.xlu1 %v23859_v45, %s23445_s21 }
 0x4b9   : > { %5160 = vrot.lane.b32.xlu1 %v23722_v6, %s23445_s21 }
 0x4bd   : > { %5162 = vrot.lane.b32.xlu1 %v23831_v25, %s23445_s21 }
 0x4d0   : > { %v24249_v13 = vpop.f32.mrb[40].mxu0 }
 0x4d1   : > { %28354 = vst [vmem:[#allocation18_spill] sm:$0xff] %v24249_v13  ;;  %v24251_v26 = vpop.f32.mrb[41].mxu0 }
 0x4d2   : > { %28355 = vst [vmem:[#allocation22_spill] sm:$0xff] %v24251_v26 }
 0x4d9   : > { %v24253_v11 = vpop.f32.mrb[42].mxu0 }
 0x4da   : > { %28356 = vst [vmem:[#allocation25_spill] sm:$0xff] %v24253_v11  ;;  %v24255_v57 = vpop.f32.mrb[43].mxu0 }
 0x4db   : > { %28357 = vst [vmem:[#allocation26_spill] sm:$0xff] %v24255_v57 }
 0x4dd   : > { %v24257_v28 = vpop.f32.mrb[44].mxu0 }
 0x4de   : > { %28358 = vst [vmem:[#allocation27_spill] sm:$0xff] %v24257_v28  ;;  %v24259_v9 = vpop.f32.mrb[45].mxu0 }
 0x4df   : > { %28359 = vst [vmem:[#allocation28_spill] sm:$0xff] %v24259_v9 }
 0x4e1   : > { %v24261_v40 = vpop.f32.mrb[46].mxu0 }
 0x4e2   : > { %28360 = vst [vmem:[#allocation29_spill] sm:$0xff] %v24261_v40  ;;  %v24263_v50 = vpop.f32.mrb[47].mxu0 }
 0x4e3   : > { %28361 = vst [vmem:[#allocation30_spill] sm:$0xff] %v24263_v50 }
 0x4e9   : > { %v24265_v58 = vpop.f32.mrb[48].mxu0 }
 0x4ea   : > { %28362 = vst [vmem:[#allocation31_spill] sm:$0xff] %v24265_v58  ;;  %v24267_v18 = vpop.f32.mrb[49].mxu0  ;;  %v2139_v38 = vpop.xlane.xlu0 %2138 }
 0x4eb   : > { %28363 = vst [vmem:[#allocation32_spill] sm:$0xff] %v24267_v18  ;;  %22847 = vrcp.f32 %v2139_v38 }
 0x4ee   : > { %v2151_v44 = vpop.xlane.xlu0 %2150 }
 0x4ef   : > { %22849 = vrcp.f32 %v2151_v44 }
 0x4f1   : > { %v2142_v24 = vpop.xlane.xlu1 %2141 }
 0x4f2   : > { %22851 = vrcp.f32 %v2142_v24  ;;  %v20165_v55 = vpop.f32.mrb[50].mxu0 }
 0x4f3   : > { %v3584_v33 = vmul.f32 0.35355338, %v20165_v55  ;;  %v3026_v54 = vpop.f32.mrb[51].mxu0 }
 0x4f4   : > { %v3583_v22 = vmul.f32 0.35355338, %v3026_v54 }
 0x4f5   : > { %v22848_v32 = vpop.eup %22847  ;;  %v2154_v20 = vpop.xlane.xlu1 %2153  ;;  %v24271_v29 = vsel %vm775_vm4, %v3584_v33, -1e+30 }
 0x4f6   : > { %22853 = vrcp.f32 %v2154_v20  ;;  %v3622_v52 = vsel %vm2028_vm5, %v24271_v29, -inf  ;;  %v2163_v8 = vpop.xlane.xlu0 %2162  ;;  %v24277_v12 = vsel %vm775_vm4, %v3583_v22, -1e+30  ;;  %v2193_v48 = vmul.f32 %v22848_v32, %v24167_v36 }
 0x4f7   : > { %3623 = vmax.xlane.f32.xlu1 %v3622_v52  ;;  %22855 = vrcp.f32 %v2163_v8  ;;  %v3619_v10 = vsel %vm2028_vm5, %v24277_v12, -inf  ;;  %v28364_v52 = vld [vmem:[#allocation19_spill] sm:$0xff] }
 0x4f8   : > { %3620 = vmax.xlane.f32.xlu0 %v3619_v10  ;;  %20114 = vmatprep.mubr.msk.f32.mxu1 %vm2028_vm5, %v2193_v48  ;;  %v28365_v48 = vld [vmem:[#allocation23_spill] sm:$0xff] }
 0x4f9   : > { %v2166_v5 = vpop.xlane.xlu1 %2165  ;;  %v22850_v38 = vpop.eup %22849 }
 0x4fa   : > { %22857 = vrcp.f32 %v2166_v5  ;;  %v24283_v56 = vpop.f32.mrb[52].mxu0  ;;  %v22337_v39 = vpop.permute.xlu0 %22336  ;;  %v2197_v54 = vmul.f32 %v22850_v38, %v24171_v4 }
 0x4fb   : > { %v24285_v44 = vpop.f32.mrb[53].mxu0  ;;  %v22339_v22 = vunpack.i.h.bf16 %v22337_v39  ;;  %v22338_v32 = vunpack.i.l.bf16 %v22337_v39 }
 0x4fc   : > { %v22852_v24 = vpop.eup %22851 }
 0x4fd   : > { %v22342_v55 = vpop.permute.xlu1 %22341  ;;  %v2194_v36 = vmul.f32 %v22852_v24, %v24175_v35  ;;  %v21531_v38 = vpack.c.bf16 %v22339_v22, %v22338_v32 }
 0x4fe   : > { %v22347_v33 = vpop.permute.xlu0 %22346  ;;  %v22343_v22 = vunpack.i.l.bf16 %v22342_v55 }
 0x4ff   : > { %20115 = vmatmul.mubr.msk.f32.vlgmr.msra.gmra.mrb[32].mxu1 %vm2028_vm5, %v2194_v36 }
 0x500   : > { %v22854_v20 = vpop.eup %22853  ;;  %21518 = vmatpush3.bf16.msra.mxu1 %v28364_v52  ;;  %20128 = vmatprep.mubr.msk.f32.mxu1 %vm2028_vm5, %v2197_v54 }
 0x501   : > { %v22856_v8 = vpop.eup %22855  ;;  %21524 = vmatprep.subr.bf16.mxu1 %v28365_v48  ;;  %v2854_v10 = vpop.permute.xlu1 %2853  ;;  %v2198_v5 = vmul.f32 %v22854_v20, %v24179_v49 }
 0x502   : > { %v24294_v58 = vpop.f32.mrb[54].mxu0  ;;  %v3038_v35 = vpop.permute.xlu0 %3037  ;;  %v2201_v4 = vmul.f32 %v22856_v8, %v24181_v43  ;;  %v22344_v43 = vunpack.i.h.bf16 %v22342_v55  ;;  %v22348_v55 = vunpack.i.l.bf16 %v22347_v33 }
 0x503   : > { %v24297_v39 = vpop.f32.mrb[55].mxu0  ;;  %20129 = vmatmul.mubr.msk.f32.vlgmr.msra.gmra.mrb[34].mxu1 %vm2028_vm5, %v2198_v5 }
 0x504   : > { %v22858_v24 = vpop.eup %22857  ;;  %21526 = vmatpush3.bf16.msra.mxu1 %v28365_v48  ;;  %20142 = vmatprep.mubr.msk.f32.mxu1 %vm2028_vm5, %v2201_v4  ;;  %v21543_v48 = vpack.c.bf16 %v22344_v43, %v22343_v22 }
 0x505   : > { %21533 = vmatprep.subr.msk.bf16.mxu1 %vm23745_vm3, %v21531_v38  ;;  %v2856_v36 = vpop.permute.xlu1 %2855  ;;  %v2202_v49 = vmul.f32 %v22858_v24, %v24185_v14 }
 0x506   : > { %v3218_v54 = vpop.permute.xlu0 %3217 }
 0x507   : > { %20143 = vmatmul.mubr.msk.f32.vlgmr.msra.gmra.mrb[36].mxu1 %vm2028_vm5, %v2202_v49  ;;  %v22349_v49 = vunpack.i.h.bf16 %v22347_v33 }
 0x508   : > { %20156 = vmatprep.mubr.msk.f32.mxu1 %vm592_vm0, %v2854_v10 }
 0x509   : > { %v3036_v32 = vpop.permute.xlu1 %3035  ;;  %v21555_v40 = vpack.c.bf16 %v22349_v49, %v22348_v55  ;;  %v3588_v55 = vmul.f32 0.35355338, %v24283_v56 }
 0x50a   : > { %v20207_v20 = vpop.f32.mrb[56].mxu0  ;;  %v3400_v52 = vpop.permute.xlu0 %3399 }
 0x50b   : > { %v24307_v8 = vpop.f32.mrb[57].mxu0 }
 0x50d   : > { %21536 = vmatpush3.bf16.xpose.msk.msra.mxu1 %vm23745_vm3, %v21531_v38  ;;  %v22352_v5 = vpop.permute.xlu1 %22351 }
 0x50e   : > { %21545 = vmatprep.subr.msk.bf16.mxu1 %vm23745_vm3, %v21543_v48  ;;  %v22357_v14 = vpop.permute.xlu0 %22356  ;;  %v22354_v43 = vunpack.i.h.bf16 %v22352_v5  ;;  %v22353_v22 = vunpack.i.l.bf16 %v22352_v5  ;;  %v3592_v5 = vmul.f32 0.35355338, %v24294_v58 }
 0x50f   : > { %v22359_v4 = vunpack.i.h.bf16 %v22357_v14  ;;  %v22358_v24 = vunpack.i.l.bf16 %v22357_v14 }
 0x510   : > { %v24365_v56 = vsel %vm775_vm4, %v3592_v5, -1e+30 }
 0x511   : > { %v3220_v18 = vpop.permute.xlu1 %3219  ;;  %v21583_v10 = vpack.c.bf16 %v22359_v4, %v22358_v24  ;;  %v21567_v4 = vpack.c.bf16 %v22354_v43, %v22353_v22 }
 0x513   : > { %21584 = vmatprep.subr.bf16.mxu0 %v21583_v10 }
 0x514   : > { %20157 = vmatmul.mubr.msk.f32.vlgmr.msra.gmra.mrb[38].mxu1 %vm592_vm0, %v2856_v36  ;;  %21586 = vmatpush3.bf16.msra.mxu0 %v21583_v10 }
 0x515   : > { %21548 = vmatpush3.bf16.xpose.msk.msra.mxu1 %vm23745_vm3, %v21543_v48  ;;  %20170 = vmatprep.mubr.msk.f32.mxu1 %vm592_vm0, %v3036_v32  ;;  %v3402_v38 = vpop.permute.xlu1 %3401 }
 0x516   : > { %21557 = vmatprep.subr.msk.bf16.mxu1 %vm23745_vm3, %v21555_v40 }
 0x519   : > { %v22362_v14 = vpop.permute.xlu1 %22361 }
 0x51a   : > { %v22364_v33 = vunpack.i.h.bf16 %v22362_v14  ;;  %v22363_v50 = vunpack.i.l.bf16 %v22362_v14 }
 0x51c   : > { %20171 = vmatmul.mubr.msk.f32.vlgmr.msra.gmra.mrb[40].mxu1 %vm592_vm0, %v3038_v35  ;;  %v24320_v24 = vpack.c.bf16 %v22364_v33, %v22363_v50  ;;  %v3596_v33 = vmul.f32 0.35355338, %v20207_v20 }
 0x51d   : > { %21560 = vmatpush3.bf16.xpose.msk.msra.mxu1 %vm23745_vm3, %v21555_v40  ;;  %20184 = vmatprep.mubr.msk.f32.mxu1 %vm592_vm0, %v3218_v54 }
 0x51e   : > { %21569 = vmatprep.subr.msk.bf16.mxu1 %vm23745_vm3, %v21567_v4  ;;  %21592 = vmatprep.subr.bf16.mxu0 %v24320_v24  ;;  %v24380_v5 = vsel %vm775_vm4, %v3596_v33, -1e+30 }
 0x524   : > { %20185 = vmatmul.mubr.msk.f32.vlgmr.msra.gmra.mrb[42].mxu1 %vm592_vm0, %v3220_v18  ;;  %v24345_v18 = vpop.permute.xlu1 %22366 }
 0x525   : > { %21572 = vmatpush3.bf16.xpose.msk.msra.mxu1 %vm23745_vm3, %v21567_v4  ;;  %20198 = vmatprep.mubr.msk.f32.mxu1 %vm592_vm0, %v3400_v52  ;;  %v3587_v4 = vmul.f32 0.35355338, %v24285_v44  ;;  %v3591_v44 = vmul.f32 0.35355338, %v24297_v39 }
 0x527   : > { %v24394_v33 = vsel %vm775_vm4, %v3591_v44, -1e+30 }
 0x52c   : > { %20199 = vmatmul.mubr.msk.f32.vlgmr.msra.gmra.mrb[44].mxu1 %vm592_vm0, %v3402_v38  ;;  %v24349_v38 = vpop.permute.xlu1 %22371 }
 0x530   : > { %v24374_v20 = vpop.permute.xlu1 %22381 }
 0x534   : > { %v24396_v39 = vpop.permute.xlu1 %4889 }
 0x5d2   : > { %v24333_v50 = vpop.f32.mrb[32].mxu1 }
 0x5d3   : > { %28366 = vst [vmem:[#allocation19_spill] sm:$0xff] %v24333_v50  ;;  %v24335_v35 = vpop.f32.mrb[33].mxu1 }
 0x5d4   : > { %28367 = vst [vmem:[#allocation23_spill] sm:$0xff] %v24335_v35 }
 0x5d6   : > { %v24337_v40 = vpop.f32.mrb[34].mxu1 }
 0x5d7   : > { %28368 = vst [vmem:[#allocation33_spill] sm:$0xff] %v24337_v40  ;;  %v24339_v36 = vpop.f32.mrb[35].mxu1 }
 0x5d8   : > { %28369 = vst [vmem:[#allocation34_spill] sm:$0xff] %v24339_v36 }
 0x5da   : > { %v24341_v54 = vpop.f32.mrb[36].mxu1 }
 0x5db   : > { %28370 = vst [vmem:[#allocation35_spill] sm:$0xff] %v24341_v54  ;;  %v24343_v32 = vpop.f32.mrb[37].mxu1  ;;  %v3595_v54 = vmul.f32 0.35355338, %v24307_v8  ;;  %v24408_v8 = vpop.permute.xlu0 %22376 }
 0x5dc   : > { %28371 = vst [vmem:[#allocation36_spill] sm:$0xff] %v24343_v32  ;;  %v3643_v32 = vsel %vm2028_vm5, %v24394_v33, -inf }
 0x5df   : > { %v24418_v28 = vpop.permute.xlu0 %4887 }
 0x5e7   : > { %v20158_v48 = vpop.f32.mrb[38].mxu1 }
 0x5e8   : > { %v3582_v52 = vmul.f32 0.35355338, %v20158_v48  ;;  %v2935_v49 = vpop.f32.mrb[39].mxu1  ;;  %v24370_v48 = vsel %vm775_vm4, %v3588_v55, -1e+30 }
 0x5e9   : > { %v3581_v10 = vmul.f32 0.35355338, %v2935_v49  ;;  %v3646_v49 = vsel %vm2028_vm5, %v24365_v56, -inf  ;;  %v24385_v55 = vsel %vm775_vm4, %v3587_v4, -1e+30 }
 0x5ea   : > { %v24353_v43 = vsel %vm775_vm4, %v3582_v52, -1e+30 }
 0x5eb   : > { %v3616_v22 = vsel %vm2028_vm5, %v24353_v43, -inf  ;;  %v24359_v14 = vsel %vm775_vm4, %v3581_v10, -1e+30 }
 0x5ec   : > { %3617 = vmax.xlane.f32.xlu1 %v3616_v22  ;;  %v3613_v58 = vsel %vm2028_vm5, %v24359_v14, -inf  ;;  %v3634_v22 = vsel %vm2028_vm5, %v24370_v48, -inf }
 0x5ed   : > { %3614 = vmax.xlane.f32.xlu0 %v3613_v58  ;;  %v3658_v58 = vsel %vm2028_vm5, %v24380_v5, -inf }
 0x5ef   : > { %v20172_v52 = vpop.f32.mrb[40].mxu1 }
 0x5f0   : > { %3647 = vmax.xlane.f32.xlu1 %v3646_v49  ;;  %v3117_v10 = vpop.f32.mrb[41].mxu1  ;;  %v3631_v49 = vsel %vm2028_vm5, %v24385_v55, -inf  ;;  %v3586_v45 = vmul.f32 0.35355338, %v20172_v52 }
 0x5f1   : > { %3635 = vmax.xlane.f32.xlu0 %v3634_v22 }
 0x5f2   : > { %v24446_v15 = vsel %vm775_vm4, %v3586_v45, -1e+30 }
 0x5f3   : > { %v3628_v53 = vsel %vm2028_vm5, %v24446_v15, -inf }
 0x5f4   : > { %3659 = vmax.xlane.f32.xlu1 %v3658_v58  ;;  %v24406_v58 = vsel %vm775_vm4, %v3595_v54, -1e+30  ;;  %v24424_v54 = vpop.permute.xlu0 %22386 }
 0x5f5   : > { %3632 = vmax.xlane.f32.xlu0 %v3631_v49  ;;  %v24410_v49 = vpop.permute.xlu1 %4978  ;;  %v3655_v44 = vsel %vm2028_vm5, %v24406_v58, -inf }
 0x5f7   : > { %v24398_v22 = vpop.f32.mrb[42].mxu1 }
 0x5f8   : > { %v24400_v4 = vpop.f32.mrb[43].mxu1  ;;  %v24430_v50 = vpop.permute.xlu0 %4980 }
 0x5f9   : > { %3644 = vmax.xlane.f32.xlu0 %v3643_v32  ;;  %v24420_v9 = vpop.permute.xlu1 %22391 }
 0x5fc   : > { %v24434_v35 = vpop.permute.xlu0 %5069 }
 0x5fd   : > { %3656 = vmax.xlane.f32.xlu0 %v3655_v44  ;;  %v24426_v32 = vpop.permute.xlu1 %5071 }
 0x5ff   : > { %v24414_v40 = vpop.f32.mrb[44].mxu1 }
 0x600   : > { %v24416_v36 = vpop.f32.mrb[45].mxu1 }
 0x601   : > { %v24432_v44 = vpop.permute.xlu1 %5160 }
 0x605   : > { %5251 = vrot.lane.b32.xlu1 %v23863_v46, %s23445_s21  ;;  %v24438_v25 = vpop.permute.xlu1 %5162  ;;  %v24440_v46 = vpop.permute.xlu0 %22396 }
 0x609   : > { %5253 = vrot.lane.b32.xlu1 %v23909_v21, %s23445_s21  ;;  %v3624_v11 = vpop.xlane.xlu1 %3623  ;;  %v3621_v13 = vpop.xlane.xlu0 %3620 }
 0x60a   : > { %v3664_v57 = vsub.f32 %v24271_v29, %v3624_v11  ;;  %v3663_v21 = vsub.f32 %v24277_v12, %v3621_v13 }
 0x60c   : > { %v3683_v6 = vmul.f32 1.442695, %v3664_v57  ;;  %v3681_v26 = vmul.f32 1.442695, %v3663_v21 }
 0x60e   : > { %22859 = vpow2.f32 %v3683_v6 }
 0x60f   : > { %22861 = vpow2.f32 %v3681_v26 }
 0x613   : > { %22401 = vrot.lane.b32.xlu0 %v23845_v2, %s23445_s21  ;;  %v3585_v2 = vmul.f32 0.35355338, %v3117_v10 }
 0x615   : > { %v24454_v11 = vsel %vm775_vm4, %v3585_v2, -1e+30 }
 0x616   : > { %v3625_v21 = vsel %vm2028_vm5, %v24454_v11, -inf }
 0x618   : > { %v24450_v63 = vpop.eup %22859 }
 0x619   : > { %v3718_v6 = vsel %vm2028_vm5, %v24450_v63, 0.0  ;;  %v24460_v45 = vpop.eup %22861 }
 0x61a   : > { %v3715_v13 = vsel %vm2028_vm5, %v24460_v45, 0.0 }
 0x62d   : > { %3629 = vmax.xlane.f32.xlu1 %v3628_v53 }
 0x631   : > { %3719 = vadd.xlane.f32.xlu1 %v3718_v6 }
 0x632   : > { %3626 = vmax.xlane.f32.xlu0 %v3625_v21 }
 0x636   : > { %3716 = vadd.xlane.f32.xlu0 %v3715_v13 }
 0x679   : > { %v24464_v26 = vpop.xlane.xlu1 %3617 }
 0x67a   : > { %v24466_v53 = vpop.xlane.xlu0 %3614 }
 0x67d   : > { %v3648_v2 = vpop.xlane.xlu1 %3647 }
 0x67e   : > { %v3672_v57 = vsub.f32 %v24365_v56, %v3648_v2  ;;  %v3636_v29 = vpop.xlane.xlu0 %3635 }
 0x67f   : > { %v3668_v12 = vsub.f32 %v24370_v48, %v3636_v29 }
 0x680   : > { %v3699_v52 = vmul.f32 1.442695, %v3672_v57 }
 0x681   : > { %v3691_v10 = vmul.f32 1.442695, %v3668_v12 }
 0x682   : > { %v3633_v6 = vpop.xlane.xlu0 %3632 }
 0x683   : > { %22863 = vpow2.f32 %v3691_v10  ;;  %v3667_v21 = vsub.f32 %v24385_v55, %v3633_v6 }
 0x684   : > { %22865 = vpow2.f32 %v3699_v52 }
 0x685   : > { %v3689_v42 = vmul.f32 1.442695, %v3667_v21 }
 0x686   : > { %v3645_v61 = vpop.xlane.xlu0 %3644 }
 0x687   : > { %22867 = vpow2.f32 %v3689_v42  ;;  %v3671_v13 = vsub.f32 %v24394_v33, %v3645_v61  ;;  %v3660_v33 = vpop.xlane.xlu1 %3659 }
 0x688   : > { %v3676_v29 = vsub.f32 %v24380_v5, %v3660_v33  ;;  %v3589_v33 = vmul.f32 0.35355338, %v24400_v4 }
 0x689   : > { %v3697_v37 = vmul.f32 1.442695, %v3671_v13 }
 0x68a   : > { %v3657_v12 = vpop.xlane.xlu0 %3656  ;;  %v3707_v52 = vmul.f32 1.442695, %v3676_v29 }
 0x68b   : > { %22869 = vpow2.f32 %v3697_v37  ;;  %v24492_v57 = vpop.permute.xlu1 %5251  ;;  %v3675_v10 = vsub.f32 %v24406_v58, %v3657_v12  ;;  %v24513_v12 = vsel %vm775_vm4, %v3589_v33, -1e+30 }
 0x68c   : > { %22871 = vpow2.f32 %v3707_v52 }
 0x68d   : > { %v24472_v41 = vpop.eup %22863  ;;  %v3705_v21 = vmul.f32 1.442695, %v3675_v10 }
 0x68e   : > { %v3730_v56 = vsel %vm2028_vm5, %v24472_v41, 0.0  ;;  %v24476_v48 = vpop.eup %22865  ;;  %v24498_v13 = vpop.permute.xlu0 %22401 }
 0x68f   : > { %3731 = vadd.xlane.f32.xlu1 %v3730_v56  ;;  %v3742_v55 = vsel %vm2028_vm5, %v24476_v48, 0.0  ;;  %v24496_v6 = vpop.permute.xlu1 %5253  ;;  %22873 = vpow2.f32 %v3705_v21  ;;  %v22369_v21 = vunpack.i.h.bf16 %v24345_v18 }
 0x691   : > { %v24478_v2 = vpop.eup %22867 }
 0x692   : > { %v3727_v42 = vsel %vm2028_vm5, %v24478_v2, 0.0 }
 0x693   : > { %3743 = vadd.xlane.f32.xlu1 %v3742_v55  ;;  %3728 = vadd.xlane.f32.xlu0 %v3727_v42 }
 0x695   : > { %v24484_v61 = vpop.eup %22869 }
 0x696   : > { %v3739_v37 = vsel %vm2028_vm5, %v24484_v61, 0.0 }
 0x697   : > { %3740 = vadd.xlane.f32.xlu0 %v3739_v37 }
 0x6a4   : > { %5342 = vrot.lane.b32.xlu1 %v23835_v27, %s23445_s21  ;;  %v24502_v27 = vpop.eup %22871 }
 0x6a5   : > { %v3754_v5 = vsel %vm2028_vm5, %v24502_v27, 0.0  ;;  %v24506_v58 = vpop.eup %22873 }
 0x6a6   : > { %v3751_v29 = vsel %vm2028_vm5, %v24506_v58, 0.0 }
 0x6ad   : > { %22406 = vrot.lane.b32.xlu0 %v23871_v51, %s23445_s21 }
 0x6ba   : > { %v24500_v56 = vpop.xlane.xlu1 %3629 }
 0x6be   : > { %v3720_v42 = vpop.xlane.xlu1 %3719 }
 0x6bf   : > { %v3627_v55 = vpop.xlane.xlu0 %3626  ;;  %22875 = vrcp.f32 %v3720_v42  ;;  %v22368_v42 = vunpack.i.l.bf16 %v24345_v18  ;;  %v3590_v18 = vmul.f32 0.35355338, %v24398_v22 }
 0x6c1   : > { %v21599_v33 = vpack.c.bf16 %v22369_v21, %v22368_v42  ;;  %v3661_v21 = vsub.f32 %v24359_v14, %v24466_v53  ;;  %v3666_v14 = vsub.f32 %v24446_v15, %v24500_v56 }
 0x6c3   : > { %v3717_v37 = vpop.xlane.xlu0 %3716 }
 0x6c4   : > { %22877 = vrcp.f32 %v3717_v37  ;;  %v3637_v37 = vsel %vm2028_vm5, %v24513_v12, -inf }
 0x6c8   : > { %3755 = vadd.xlane.f32.xlu1 %v3754_v5 }
 0x6c9   : > { %v22876_v52 = vpop.eup %22875 }
 0x6ca   : > { %v3776_v5 = vmul.f32 %v22876_v52, %v24450_v63 }
 0x6cc   : > { %3752 = vadd.xlane.f32.xlu0 %v3751_v29  ;;  %v3593_v29 = vmul.f32 0.35355338, %v24416_v36 }
 0x6ce   : > { %v22878_v10 = vpop.eup %22877 }
 0x6cf   : > { %v3775_v4 = vmul.f32 %v22878_v10, %v24460_v45  ;;  %v24531_v45 = vsel %vm775_vm4, %v3590_v18, -1e+30 }
 0x6d0   : > { %3638 = vmax.xlane.f32.xlu0 %v3637_v37  ;;  %v3640_v63 = vsel %vm2028_vm5, %v24531_v45, -inf  ;;  %v3662_v37 = vsub.f32 %v24353_v43, %v24464_v26  ;;  %v3594_v43 = vmul.f32 0.35355338, %v24414_v40 }
 0x6d1   : > { %20219 = vmatprep.mubr.msk.f32.mxu0 %vm2028_vm5, %v3775_v4  ;;  %v3677_v4 = vmul.f32 1.442695, %v3661_v21  ;;  %v22378_v21 = vunpack.i.l.bf16 %v24408_v8 }
 0x6d2   : > { %20220 = vmatmul.mubr.msk.f32.vlgmr.msra.gmra.mrb[58].mxu0 %vm2028_vm5, %v3776_v5  ;;  %v3665_v5 = vsub.f32 %v24454_v11, %v3627_v55  ;;  %v22379_v55 = vunpack.i.h.bf16 %v24408_v8  ;;  %v24569_v40 = vsel %vm775_vm4, %v3594_v43, -1e+30 }
 0x6d3   : > { %21594 = vmatpush3.bf16.msra.mxu0 %v24320_v24  ;;  %v24538_v24 = vsel %vm775_vm4, %v3593_v29, -1e+30  ;;  %v3679_v29 = vmul.f32 1.442695, %v3662_v37  ;;  %v3652_v56 = vsel %vm2028_vm5, %v24569_v40, -inf }
 0x6d4   : > { %21600 = vmatprep.subr.bf16.mxu0 %v21599_v33  ;;  %v3649_v52 = vsel %vm2028_vm5, %v24538_v24, -inf  ;;  %v3685_v53 = vmul.f32 1.442695, %v3665_v5  ;;  %v21611_v8 = vpack.c.bf16 %v22379_v55, %v22378_v21 }
 0x6d9   : > { %5344 = vrot.lane.b32.xlu1 %v23883_v60, %s23445_s21 }
 0x6e6   : > { %22411 = vrot.lane.b32.xlu0 %v23897_v3, %s23445_s21 }
 0x6fd   : > { %3641 = vmax.xlane.f32.xlu1 %v3640_v63  ;;  %v22374_v63 = vunpack.i.h.bf16 %v24349_v38 }
 0x705   : > { %3650 = vmax.xlane.f32.xlu0 %v3649_v52 }
 0x70e   : > { %5433 = vrot.lane.b32.xlu1 %v23922_v30, %s23445_s21 }
 0x712   : > { %5435 = vrot.lane.b32.xlu1 %v23947_v47, %s23445_s21 }
 0x71b   : > { %5524 = vrot.lane.b32.xlu0 %v23887_v0, %s23445_s21 }
 0x71c   : > { %v3732_v22 = vpop.xlane.xlu1 %3731 }
 0x71d   : > { %22879 = vrcp.f32 %v3732_v22  ;;  %v22373_v22 = vunpack.i.l.bf16 %v24349_v38  ;;  %v3687_v38 = vmul.f32 1.442695, %v3666_v14 }
 0x71f   : > { %5526 = vrot.lane.b32.xlu0 %v23930_v17, %s23445_s21  ;;  %v21607_v15 = vpack.c.bf16 %v22374_v63, %v22373_v22 }
 0x720   : > { %v3729_v36 = vpop.xlane.xlu0 %3728  ;;  %v3744_v10 = vpop.xlane.xlu1 %3743 }
 0x721   : > { %22881 = vrcp.f32 %v3729_v36 }
 0x722   : > { %22883 = vrcp.f32 %v3744_v10 }
 0x724   : > { %v3741_v42 = vpop.xlane.xlu0 %3740  ;;  %v24594_v63 = vpop.permute.xlu1 %5342 }
 0x725   : > { %22885 = vrcp.f32 %v3741_v42 }
 0x726   : > { %22887 = vpow2.f32 %v3677_v4 }
 0x727   : > { %v22880_v18 = vpop.eup %22879  ;;  %22889 = vpow2.f32 %v3679_v29 }
 0x728   : > { %v3780_v26 = vmul.f32 %v22880_v18, %v24472_v41  ;;  %22891 = vpow2.f32 %v3685_v53  ;;  %v22407_v29 = vpop.permute.xlu0 %22406 }
 0x729   : > { %22893 = vpow2.f32 %v3687_v38 }
 0x72b   : > { %v22882_v52 = vpop.eup %22881 }
 0x72c   : > { %v3779_v36 = vmul.f32 %v22882_v52, %v24478_v2  ;;  %v22884_v10 = vpop.eup %22883 }
 0x72d   : > { %v3784_v41 = vmul.f32 %v22884_v10, %v24476_v48 }
 0x72e   : > { %20233 = vmatprep.mubr.msk.f32.mxu0 %vm2028_vm5, %v3779_v36 }
 0x72f   : > { %v22886_v11 = vpop.eup %22885  ;;  %20234 = vmatmul.mubr.msk.f32.vlgmr.msra.gmra.mrb[60].mxu0 %vm2028_vm5, %v3780_v26  ;;  %v22384_v26 = vunpack.i.h.bf16 %v24374_v20 }
 0x730   : > { %v3783_v2 = vmul.f32 %v22886_v11, %v24484_v61  ;;  %21602 = vmatpush3.bf16.msra.mxu0 %v21599_v33  ;;  %v24576_v42 = vpop.eup %22887  ;;  %v22383_v11 = vunpack.i.l.bf16 %v24374_v20  ;;  %v22389_v20 = vunpack.i.h.bf16 %v24424_v54 }
 0x731   : > { %21608 = vmatprep.subr.bf16.mxu0 %v21607_v15  ;;  %v24580_v61 = vpop.eup %22889  ;;  %v3709_v33 = vsel %vm2028_vm5, %v24576_v42, 0.0 }
 0x732   : > { %20247 = vmatprep.mubr.msk.f32.mxu0 %vm2028_vm5, %v3783_v2  ;;  %v24584_v48 = vpop.eup %22891  ;;  %v3712_v4 = vsel %vm2028_vm5, %v24580_v61, 0.0  ;;  %v21617_v38 = vpack.c.bf16 %v22384_v26, %v22383_v11 }
 0x733   : > { %20248 = vmatmul.mubr.msk.f32.vlgmr.msra.gmra.mrb[62].mxu0 %vm2028_vm5, %v3784_v41  ;;  %v3721_v37 = vsel %vm2028_vm5, %v24584_v48, 0.0  ;;  %v24590_v5 = vpop.eup %22893 }
 0x734   : > { %21610 = vmatpush3.bf16.msra.mxu0 %v21607_v15  ;;  %v3724_v18 = vsel %vm2028_vm5, %v24590_v5, 0.0 }
 0x735   : > { %21613 = vmatprep.subr.msk.bf16.mxu0 %vm23745_vm3, %v21611_v8 }
 0x736   : > { %3653 = vmax.xlane.f32.xlu1 %v3652_v56  ;;  %v22408_v56 = vunpack.i.l.bf16 %v22407_v29 }
 0x73a   : > { %3710 = vadd.xlane.f32.xlu1 %v3709_v33 }
 0x73e   : > { %3722 = vadd.xlane.f32.xlu1 %v3721_v37  ;;  %3713 = vadd.xlane.f32.xlu0 %v3712_v4 }
 0x742   : > { %3725 = vadd.xlane.f32.xlu1 %v3724_v18 }
 0x755   : > { %v3756_v52 = vpop.xlane.xlu1 %3755 }
 0x756   : > { %22895 = vrcp.f32 %v3756_v52 }
 0x759   : > { %v3753_v22 = vpop.xlane.xlu0 %3752 }
 0x75a   : > { %22897 = vrcp.f32 %v3753_v22 }
 0x75d   : > { %v3639_v14 = vpop.xlane.xlu0 %3638 }
 0x75e   : > { %v3669_v53 = vsub.f32 %v24513_v12, %v3639_v14 }
 0x760   : > { %v3693_v36 = vmul.f32 1.442695, %v3669_v53  ;;  %v22896_v10 = vpop.eup %22895 }
 0x761   : > { %v3788_v21 = vmul.f32 %v22896_v10, %v24502_v27  ;;  %v22388_v27 = vunpack.i.l.bf16 %v24424_v54  ;;  %v22393_v54 = vunpack.i.l.bf16 %v24420_v9  ;;  %v28373_v10 = vld [vmem:[#allocation15_spill] sm:$0xff] }
 0x762   : > { %22899 = vpow2.f32 %v3693_v36  ;;  %v28372_v36 = vld [vmem:[#allocation8_spill] sm:$0xff] }
 0x763   : > { %v21623_v15 = vpack.c.bf16 %v22389_v20, %v22388_v27 }
 0x764   : > { %v22898_v43 = vpop.eup %22897 }
 0x765   : > { %v3787_v55 = vmul.f32 %v22898_v43, %v24506_v58  ;;  %v28374_v43 = vld [vmem:[#allocation24_spill] sm:$0xff] }
 0x767   : > { %20261 = vmatprep.mubr.msk.f32.mxu0 %vm2028_vm5, %v3787_v55 }
 0x768   : > { %20262 = vmatmul.mubr.msk.f32.vlgmr.msra.gmra.mrb[64].mxu0 %vm2028_vm5, %v3788_v21 }
 0x769   : > { %21616 = vmatpush3.bf16.xpose.msk.msra.mxu0 %vm23745_vm3, %v21611_v8  ;;  %20320 = vmatprep.mubr.msk.f32.mxu0 %vm592_vm0, %v24418_v28  ;;  %v22394_v28 = vunpack.i.h.bf16 %v24420_v9  ;;  %v22404_v9 = vunpack.i.h.bf16 %v24498_v13 }
 0x76a   : > { %21619 = vmatprep.subr.msk.bf16.mxu0 %vm23745_vm3, %v21617_v38 }
 0x76b   : > { %v21629_v2 = vpack.c.bf16 %v22394_v28, %v22393_v54  ;;  %v28375_v54 = vld [vmem:[#allocation20_spill] sm:$0xff] }
 0x76c   : > { %v24609_v12 = vpop.eup %22899 }
 0x76d   : > { %v3733_v58 = vsel %vm2028_vm5, %v24609_v12, 0.0 }
 0x76e   : > { %3734 = vadd.xlane.f32.xlu1 %v3733_v58 }
 0x770   : > { %20321 = vmatmul.mubr.msk.f32.vlgmr.msra.gmra.mrb[66].mxu0 %vm592_vm0, %v24396_v39  ;;  %v22399_v39 = vunpack.i.h.bf16 %v24440_v46 }
 0x771   : > { %21622 = vmatpush3.bf16.xpose.msk.msra.mxu0 %vm23745_vm3, %v21617_v38  ;;  %20327 = vmatprep.mubr.msk.f32.mxu0 %vm592_vm0, %v24410_v49  ;;  %v22398_v49 = vunpack.i.l.bf16 %v24440_v46 }
 0x772   : > { %21625 = vmatprep.subr.msk.bf16.mxu0 %vm23745_vm3, %v21623_v15 }
 0x773   : > { %v21635_v41 = vpack.c.bf16 %v22399_v39, %v22398_v49 }
 0x778   : > { %20328 = vmatmul.mubr.msk.f32.vlgmr.msra.gmra.mrb[68].mxu0 %vm592_vm0, %v24430_v50  ;;  %v22403_v50 = vunpack.i.l.bf16 %v24498_v13 }
 0x779   : > { %21628 = vmatpush3.bf16.xpose.msk.msra.mxu0 %vm23745_vm3, %v21623_v15  ;;  %20334 = vmatprep.mubr.msk.f32.mxu0 %vm592_vm0, %v24434_v35  ;;  %v5345_v35 = vpop.permute.xlu1 %5344 }
 0x77a   : > { %21631 = vmatprep.subr.msk.bf16.mxu0 %vm23745_vm3, %v21629_v2  ;;  %v21641_v8 = vpack.c.bf16 %v22404_v9, %v22403_v50 }
 0x780   : > { %20335 = vmatmul.mubr.msk.f32.vlgmr.msra.gmra.mrb[70].mxu0 %vm592_vm0, %v24426_v32 }
 0x781   : > { %21634 = vmatpush3.bf16.xpose.msk.msra.mxu0 %vm23745_vm3, %v21629_v2  ;;  %20341 = vmatprep.mubr.msk.f32.mxu0 %vm592_vm0, %v24432_v44  ;;  %v22409_v44 = vunpack.i.h.bf16 %v22407_v29 }
 0x782   : > { %21637 = vmatprep.subr.msk.bf16.mxu0 %vm23745_vm3, %v21635_v41 }
 0x783   : > { %v21647_v33 = vpack.c.bf16 %v22409_v44, %v22408_v56 }
 0x788   : > { %20342 = vmatmul.mubr.msk.f32.vlgmr.msra.gmra.mrb[72].mxu0 %vm592_vm0, %v24438_v25  ;;  %v22412_v25 = vpop.permute.xlu0 %22411 }
 0x789   : > { %21640 = vmatpush3.bf16.xpose.msk.msra.mxu0 %vm23745_vm3, %v21635_v41  ;;  %20348 = vmatprep.mubr.msk.f32.mxu0 %vm592_vm0, %v24492_v57  ;;  %v22414_v57 = vunpack.i.h.bf16 %v22412_v25 }
 0x78a   : > { %21643 = vmatprep.subr.msk.bf16.mxu0 %vm23745_vm3, %v21641_v8  ;;  %v3642_v46 = vpop.xlane.xlu1 %3641 }
 0x78b   : > { %v3670_v32 = vsub.f32 %v24531_v45, %v3642_v46  ;;  %v22413_v45 = vunpack.i.l.bf16 %v22412_v25 }
 0x78d   : > { %v3695_v13 = vmul.f32 1.442695, %v3670_v32  ;;  %v21653_v37 = vpack.c.bf16 %v22414_v57, %v22413_v45 }
 0x78e   : > { %v5434_v4 = vpop.permute.xlu1 %5433 }
 0x78f   : > { %22901 = vpow2.f32 %v3695_v13 }
 0x790   : > { %20349 = vmatmul.mubr.msk.f32.vlgmr.msra.gmra.mrb[74].mxu0 %vm592_vm0, %v24496_v6 }
 0x791   : > { %21646 = vmatpush3.bf16.xpose.msk.msra.mxu0 %vm23745_vm3, %v21641_v8  ;;  %20355 = vmatprep.mubr.msk.f32.mxu0 %vm592_vm0, %v24594_v63 }
 0x792   : > { %21649 = vmatprep.subr.msk.bf16.mxu0 %vm23745_vm3, %v21647_v33  ;;  %v3651_v6 = vpop.xlane.xlu0 %3650  ;;  %v5436_v29 = vpop.permute.xlu1 %5435 }
 0x793   : > { %v3673_v26 = vsub.f32 %v24538_v24, %v3651_v6 }
 0x795   : > { %v3701_v21 = vmul.f32 1.442695, %v3673_v26 }
 0x796   : > { %v5525_v52 = vpop.permute.xlu0 %5524 }
 0x798   : > { %20356 = vmatmul.mubr.msk.f32.vlgmr.msra.gmra.mrb[76].mxu0 %vm592_vm0, %v5345_v35 }
 0x799   : > { %v24663_v18 = vpop.eup %22901  ;;  %21652 = vmatpush3.bf16.xpose.msk.msra.mxu0 %vm23745_vm3, %v21647_v33  ;;  %20362 = vmatprep.mubr.msk.f32.mxu0 %vm592_vm0, %v5434_v4 }
 0x79a   : > { %21655 = vmatprep.subr.msk.bf16.mxu0 %vm23745_vm3, %v21653_v37  ;;  %v3736_v63 = vsel %vm2028_vm5, %v24663_v18, 0.0  ;;  %v5527_v14 = vpop.permute.xlu0 %5526 }
 0x79b   : > { %3737 = vadd.xlane.f32.xlu1 %v3736_v63 }
 0x7a0   : > { %20363 = vmatmul.mubr.msk.f32.vlgmr.msra.gmra.mrb[78].mxu0 %vm592_vm0, %v5436_v29 }
 0x7a1   : > { %21658 = vmatpush3.bf16.xpose.msk.msra.mxu0 %vm23745_vm3, %v21653_v37  ;;  %20369 = vmatprep.mubr.msk.f32.mxu0 %vm592_vm0, %v5525_v52 }
 0x7a5   : > { %v24676_v22 = vpop.f32.mrb[58].mxu0 }
 0x7a6   : > { %v24678_v53 = vpop.f32.mrb[59].mxu0 }
 0x7a8   : > { %20370 = vmatmul.mubr.msk.f32.vlgmr.msra.gmra.mrb[80].mxu0 %vm592_vm0, %v5527_v14 }
 0x7ac   : > { %22416 = vrot.lane.b32.xlu1 %v28372_v36, %s23444_s20 }
 0x7b0   : > { %22421 = vrot.lane.b32.xlu1 %v28373_v10, %s23444_s20 }
 0x7b4   : > { %22431 = vrot.lane.b32.xlu1 %v28374_v43, %s23444_s20 }
 0x7b8   : > { %22441 = vrot.lane.b32.xlu1 %v23821_v16, %s23445_s21 }
 0x7c3   : > { %v3654_v11 = vpop.xlane.xlu1 %3653 }
 0x7c4   : > { %v3674_v55 = vsub.f32 %v24569_v40, %v3654_v11 }
 0x7c6   : > { %v3703_v38 = vmul.f32 1.442695, %v3674_v55 }
 0x7c7   : > { %v3711_v20 = vpop.xlane.xlu1 %3710 }
 0x7c8   : > { %22903 = vpow2.f32 %v3703_v38 }
 0x7c9   : > { %22905 = vrcp.f32 %v3711_v20 }
 0x7ca   : > { %22907 = vpow2.f32 %v3701_v21 }
 0x7cb   : > { %v3714_v50 = vpop.xlane.xlu0 %3713 }
 0x7cc   : > { %22909 = vrcp.f32 %v3714_v50 }
 0x7d2   : > { %v24691_v27 = vpop.eup %22903 }
 0x7d3   : > { %v22906_v58 = vpop.eup %22905  ;;  %v3748_v15 = vsel %vm2028_vm5, %v24691_v27, 0.0 }
 0x7d4   : > { %v24695_v28 = vpop.eup %22907  ;;  %3749 = vadd.xlane.f32.xlu0 %v3748_v15  ;;  %v3773_v24 = vmul.f32 %v22906_v58, %v24576_v42  ;;  %v3723_v42 = vpop.xlane.xlu1 %3722 }
 0x7d5   : > { %v3745_v40 = vsel %vm2028_vm5, %v24695_v28, 0.0  ;;  %22911 = vrcp.f32 %v3723_v42 }
 0x7d6   : > { %20212 = vmatprep.mubr.msk.f32.mxu1 %vm2028_vm5, %v3773_v24  ;;  %v22910_v13 = vpop.eup %22909 }
 0x7d7   : > { %v3774_v37 = vmul.f32 %v22910_v13, %v24580_v61 }
 0x7d8   : > { %3746 = vadd.xlane.f32.xlu0 %v3745_v40  ;;  %v3726_v9 = vpop.xlane.xlu1 %3725 }
 0x7d9   : > { %22913 = vrcp.f32 %v3726_v9 }
 0x7df   : > { %v22912_v25 = vpop.eup %22911 }
 0x7e0   : > { %v3777_v29 = vmul.f32 %v22912_v25, %v24584_v48 }
 0x7e3   : > { %v22914_v6 = vpop.eup %22913 }
 0x7e4   : > { %v3778_v14 = vmul.f32 %v22914_v6, %v24590_v5 }
 0x7ee   : > { %22426 = vrot.lane.b32.xlu0 %v28375_v54, %s23444_s20 }
 0x7f2   : > { %22436 = vrot.lane.b32.xlu0 %v28372_v36, %s23445_s21 }
 0x7fb   : > { %v3735_v35 = vpop.xlane.xlu1 %3734 }
 0x7fc   : > { %22915 = vrcp.f32 %v3735_v35 }
 0x802   : > { %v24705_v2 = vpop.f32.mrb[60].mxu0 }
 0x803   : > { %v24707_v39 = vpop.f32.mrb[61].mxu0 }
 0x806   : > { %v24709_v49 = vpop.f32.mrb[62].mxu0  ;;  %v22916_v52 = vpop.eup %22915 }
 0x807   : > { %v24711_v41 = vpop.f32.mrb[63].mxu0  ;;  %v3781_v11 = vmul.f32 %v22916_v52, %v24609_v12 }
 0x828   : > { %v24713_v8 = vpop.xlane.xlu1 %3737 }
 0x829   : > { %22917 = vrcp.f32 %v24713_v8 }
 0x82c   : > { %v22417_v46 = vpop.permute.xlu1 %22416 }
 0x82d   : > { %v22419_v32 = vunpack.i.h.bf16 %v22417_v46  ;;  %v22418_v44 = vunpack.i.l.bf16 %v22417_v46 }
 0x82f   : > { %v21579_v56 = vpack.c.bf16 %v22419_v32, %v22418_v44 }
 0x830   : > { %v22422_v33 = vpop.permute.xlu1 %22421 }
 0x831   : > { %v22424_v57 = vunpack.i.h.bf16 %v22422_v33  ;;  %v22423_v45 = vunpack.i.l.bf16 %v22422_v33  ;;  %21580 = vmatprep.subr.bf16.mxu1 %v21579_v56 }
 0x832   : > { %21582 = vmatpush3.bf16.msra.mxu1 %v21579_v56 }
 0x833   : > { %v21587_v4 = vpack.c.bf16 %v22424_v57, %v22423_v45 }
 0x834   : > { %v24716_v63 = vpop.permute.xlu1 %22431 }
 0x835   : > { %20213 = vmatmul.mubr.msk.f32.vlgmr.msra.gmra.mrb[46].mxu1 %vm2028_vm5, %v3774_v37  ;;  %21588 = vmatprep.subr.bf16.mxu1 %v21587_v4 }
 0x836   : > { %21590 = vmatpush3.bf16.msra.mxu1 %v21587_v4  ;;  %20226 = vmatprep.mubr.msk.f32.mxu1 %vm2028_vm5, %v3777_v29 }
 0x838   : > { %v22442_v26 = vpop.permute.xlu1 %22441 }
 0x839   : > { %v22444_v55 = vunpack.i.h.bf16 %v22442_v26  ;;  %v22443_v61 = vunpack.i.l.bf16 %v22442_v26  ;;  %20227 = vmatmul.mubr.msk.f32.vlgmr.msra.gmra.mrb[48].mxu1 %vm2028_vm5, %v3778_v14 }
 0x83a   : > { %20240 = vmatprep.mubr.msk.f32.mxu1 %vm2028_vm5, %v3781_v11 }
 0x83b   : > { %v24725_v21 = vpop.f32.mrb[64].mxu0  ;;  %v21663_v48 = vpack.c.bf16 %v22444_v55, %v22443_v61 }
 0x83c   : > { %v24727_v38 = vpop.f32.mrb[65].mxu0 }
 0x83d   : > { %21664 = vmatprep.subr.bf16.mxu0 %v21663_v48 }
 0x83e   : > { %21666 = vmatpush3.bf16.msra.mxu0 %v21663_v48 }
 0x843   : > { %v20322_v20 = vpop.f32.mrb[66].mxu0 }
 0x844   : > { %v5616_v58 = vmul.f32 0.35355338, %v20322_v20  ;;  %v4969_v15 = vpop.f32.mrb[67].mxu0 }
 0x845   : > { %v5615_v5 = vmul.f32 0.35355338, %v4969_v15 }
 0x846   : > { %v24731_v12 = vsel %vm775_vm4, %v5616_v58, -1e+30 }
 0x847   : > { %v24735_v24 = vsel %vm775_vm4, %v5615_v5, -1e+30  ;;  %v5650_v40 = vsel %vm2028_vm5, %v24731_v12, -inf }
 0x848   : > { %5651 = vmax.xlane.f32.xlu0 %v5650_v40  ;;  %v5647_v42 = vsel %vm2028_vm5, %v24735_v24, -inf }
 0x849   : > { %5648 = vmax.xlane.f32.xlu1 %v5647_v42 }
 0x84b   : > { %v20329_v9 = vpop.f32.mrb[68].mxu0 }
 0x84c   : > { %v5618_v50 = vmul.f32 0.35355338, %v20329_v9  ;;  %v5060_v35 = vpop.f32.mrb[69].mxu0  ;;  %v22434_v9 = vunpack.i.h.bf16 %v24716_v63 }
 0x84d   : > { %v5617_v46 = vmul.f32 0.35355338, %v5060_v35 }
 0x84e   : > { %v24743_v32 = vsel %vm775_vm4, %v5618_v50, -1e+30  ;;  %v22433_v50 = vunpack.i.l.bf16 %v24716_v63 }
 0x84f   : > { %v5656_v44 = vsel %vm2028_vm5, %v24743_v32, -inf  ;;  %v24749_v56 = vsel %vm775_vm4, %v5617_v46, -1e+30 }
 0x850   : > { %5657 = vmax.xlane.f32.xlu1 %v5656_v44  ;;  %v5653_v33 = vsel %vm2028_vm5, %v24749_v56, -inf }
 0x853   : > { %v20336_v13 = vpop.f32.mrb[70].mxu0 }
 0x854   : > { %v5620_v25 = vmul.f32 0.35355338, %v20336_v13  ;;  %v5151_v57 = vpop.f32.mrb[71].mxu0  ;;  %5654 = vmax.xlane.f32.xlu1 %v5653_v33 }
 0x855   : > { %v5619_v45 = vmul.f32 0.35355338, %v5151_v57 }
 0x856   : > { %v24755_v37 = vsel %vm775_vm4, %v5620_v25, -1e+30  ;;  %v22918_v25 = vpop.eup %22917 }
 0x857   : > { %v5662_v4 = vsel %vm2028_vm5, %v24755_v37, -inf  ;;  %v24761_v6 = vsel %vm775_vm4, %v5619_v45, -1e+30  ;;  %v21603_v45 = vpack.c.bf16 %v22434_v9, %v22433_v50  ;;  %v3782_v63 = vmul.f32 %v22918_v25, %v24663_v18 }
 0x858   : > { %5663 = vmax.xlane.f32.xlu1 %v5662_v4  ;;  %v5659_v52 = vsel %vm2028_vm5, %v24761_v6, -inf }
 0x85b   : > { %v20343_v29 = vpop.f32.mrb[72].mxu0 }
 0x85c   : > { %v5622_v14 = vmul.f32 0.35355338, %v20343_v29  ;;  %v5242_v26 = vpop.f32.mrb[73].mxu0  ;;  %5660 = vmax.xlane.f32.xlu1 %v5659_v52 }
 0x85e   : > { %v24767_v11 = vsel %vm775_vm4, %v5622_v14, -1e+30  ;;  %22446 = vrot.lane.b32.xlu0 %v28373_v10, %s23445_s21 }
 0x85f   : > { %v5668_v55 = vsel %vm2028_vm5, %v24767_v11, -inf }
 0x860   : > { %5669 = vmax.xlane.f32.xlu1 %v5668_v55 }
 0x861   : > { %v3750_v61 = vpop.xlane.xlu0 %3749 }
 0x863   : > { %v20350_v48 = vpop.f32.mrb[74].mxu0 }
 0x864   : > { %v5624_v20 = vmul.f32 0.35355338, %v20350_v48  ;;  %v5333_v58 = vpop.f32.mrb[75].mxu0 }
 0x865   : > { %v3747_v15 = vpop.xlane.xlu0 %3746 }
 0x866   : > { %v24776_v5 = vsel %vm775_vm4, %v5624_v20, -1e+30  ;;  %22919 = vrcp.f32 %v3747_v15  ;;  %v5621_v15 = vmul.f32 0.35355338, %v5242_v26 }
 0x867   : > { %22921 = vrcp.f32 %v3750_v61  ;;  %v5674_v40 = vsel %vm2028_vm5, %v24776_v5, -inf }
 0x868   : > { %5675 = vmax.xlane.f32.xlu1 %v5674_v40 }
 0x869   : > { %v22427_v42 = vpop.permute.xlu0 %22426 }
 0x86a   : > { %v22429_v8 = vunpack.i.h.bf16 %v22427_v42  ;;  %v22428_v35 = vunpack.i.l.bf16 %v22427_v42  ;;  %v5623_v42 = vmul.f32 0.35355338, %v5333_v58 }
 0x86b   : > { %v20357_v46 = vpop.f32.mrb[76].mxu0 }
 0x86c   : > { %v5626_v44 = vmul.f32 0.35355338, %v20357_v46  ;;  %v5424_v13 = vpop.f32.mrb[77].mxu0  ;;  %v21595_v33 = vpack.c.bf16 %v22429_v8, %v22428_v35  ;;  %v24808_v26 = vsel %vm775_vm4, %v5623_v42, -1e+30 }
 0x86d   : > { %v5625_v35 = vmul.f32 0.35355338, %v5424_v13  ;;  %v5671_v58 = vsel %vm2028_vm5, %v24808_v26, -inf }
 0x86e   : > { %v24784_v57 = vsel %vm775_vm4, %v5626_v44, -1e+30  ;;  %21596 = vmatprep.subr.bf16.mxu1 %v21595_v33 }
 0x86f   : > { %v5680_v4 = vsel %vm2028_vm5, %v24784_v57, -inf  ;;  %21598 = vmatpush3.bf16.msra.mxu1 %v21595_v33  ;;  %v24820_v33 = vsel %vm775_vm4, %v5625_v35, -1e+30 }
 0x870   : > { %v22920_v29 = vpop.eup %22919  ;;  %5681 = vmax.xlane.f32.xlu1 %v5680_v4  ;;  %21604 = vmatprep.subr.bf16.mxu1 %v21603_v45  ;;  %v5677_v13 = vsel %vm2028_vm5, %v24820_v33, -inf }
 0x871   : > { %v22922_v52 = vpop.eup %22921  ;;  %v3785_v14 = vmul.f32 %v22920_v29, %v24695_v28  ;;  %v24802_v28 = vsel %vm775_vm4, %v5621_v15, -1e+30 }
 0x872   : > { %20241 = vmatmul.mubr.msk.f32.vlgmr.msra.gmra.mrb[50].mxu1 %vm2028_vm5, %v3782_v63  ;;  %v3786_v20 = vmul.f32 %v22922_v52, %v24691_v27  ;;  %v5665_v27 = vsel %vm2028_vm5, %v24802_v28, -inf  ;;  %v1297_v52 = vld [vmem:[%s28239_s6 + $0x8] sm:$0xff] }
 0x873   : > { %v20364_v55 = vpop.f32.mrb[78].mxu0  ;;  %21606 = vmatpush3.bf16.msra.mxu1 %v21603_v45  ;;  %20254 = vmatprep.mubr.msk.f32.mxu1 %vm2028_vm5, %v3785_v14  ;;  %v24840_v14 = vld [vmem:[%s28239_s6] sm:$0xff] }
 0x874   : > { %v5628_v61 = vmul.f32 0.35355338, %v20364_v55  ;;  %v5515_v48 = vpop.f32.mrb[79].mxu0  ;;  %20264 = vmatprep.subr.mxu1 %v1297_v52 }
 0x875   : > { %v5627_v25 = vmul.f32 0.35355338, %v5515_v48 }
 0x876   : > { %v24795_v40 = vsel %vm775_vm4, %v5628_v61, -1e+30  ;;  %20255 = vmatmul.mubr.msk.f32.vlgmr.msra.gmra.mrb[52].mxu1 %vm2028_vm5, %v3786_v20  ;;  %v24851_v61 = vpop.permute.xlu0 %22436 }
 0x877   : > { %v5686_v18 = vsel %vm2028_vm5, %v24795_v40, -inf  ;;  %v24826_v45 = vsel %vm775_vm4, %v5627_v25, -1e+30  ;;  %20265 = vmatpush3.msra.mxu1 %v1297_v52 }
 0x878   : > { %5687 = vmax.xlane.f32.xlu1 %v5686_v18  ;;  %v5683_v29 = vsel %vm2028_vm5, %v24826_v45, -inf  ;;  %20290 = vmatprep.subr.mxu1 %v24840_v14 }
 0x87b   : > { %v20371_v9 = vpop.f32.mrb[80].mxu0 }
 0x87c   : > { %v5630_v50 = vmul.f32 0.35355338, %v20371_v9  ;;  %v5606_v8 = vpop.f32.mrb[81].mxu0 }
 0x87d   : > { %5666 = vmax.xlane.f32.xlu0 %v5665_v27  ;;  %v5629_v4 = vmul.f32 0.35355338, %v5606_v8 }
 0x87e   : > { %v24812_v46 = vsel %vm775_vm4, %v5630_v50, -1e+30 }
 0x87f   : > { %v5692_v44 = vsel %vm2028_vm5, %v24812_v46, -inf  ;;  %v24832_v63 = vsel %vm775_vm4, %v5629_v4, -1e+30 }
 0x880   : > { %5693 = vmax.xlane.f32.xlu1 %v5692_v44  ;;  %v5689_v55 = vsel %vm2028_vm5, %v24832_v63, -inf }
 0x881   : > { %5672 = vmax.xlane.f32.xlu0 %v5671_v58 }
 0x885   : > { %5678 = vmax.xlane.f32.xlu0 %v5677_v13 }
 0x889   : > { %5684 = vmax.xlane.f32.xlu0 %v5683_v29 }
 0x88d   : > { %5690 = vmax.xlane.f32.xlu0 %v5689_v55 }
 0x891   : > { %22451 = vrot.lane.b32.xlu1 %v28351_v34, %s23445_s21 }
 0x8a3   : > { %22456 = vrot.lane.b32.xlu0 %v28375_v54, %s23445_s21 }
 0x8a7   : > { %22461 = vrot.lane.b32.xlu0 %v28352_v62, %s23445_s21 }
 0x8d5   : > { %v5652_v48 = vpop.xlane.xlu0 %5651 }
 0x8d6   : > { %v5696_v20 = vsub.f32 %v24731_v12, %v5652_v48  ;;  %v5649_v15 = vpop.xlane.xlu1 %5648 }
 0x8d7   : > { %v5695_v18 = vsub.f32 %v24735_v24, %v5649_v15 }
 0x8d8   : > { %v5713_v42 = vmul.f32 1.442695, %v5696_v20 }
 0x8d9   : > { %v5711_v9 = vmul.f32 1.442695, %v5695_v18 }
 0x8da   : > { %22923 = vpow2.f32 %v5713_v42 }
 0x8db   : > { %22925 = vpow2.f32 %v5711_v9 }
 0x8dd   : > { %v5658_v50 = vpop.xlane.xlu1 %5657 }
 0x8de   : > { %v5698_v8 = vsub.f32 %v24743_v32, %v5658_v50 }
 0x8e0   : > { %v5717_v27 = vmul.f32 1.442695, %v5698_v8 }
 0x8e1   : > { %v5655_v35 = vpop.xlane.xlu1 %5654 }
 0x8e2   : > { %22927 = vpow2.f32 %v5717_v27  ;;  %v5697_v44 = vsub.f32 %v24749_v56, %v5655_v35 }
 0x8e4   : > { %v24857_v58 = vpop.eup %22923  ;;  %v5715_v25 = vmul.f32 1.442695, %v5697_v44 }
 0x8e5   : > { %v24859_v13 = vpop.eup %22925  ;;  %v5664_v12 = vpop.xlane.xlu1 %5663  ;;  %v5746_v24 = vsel %vm2028_vm5, %v24857_v58, 0.0 }
 0x8e6   : > { %22929 = vpow2.f32 %v5715_v25  ;;  %v5700_v4 = vsub.f32 %v24755_v37, %v5664_v12  ;;  %5747 = vadd.xlane.f32.xlu1 %v5746_v24  ;;  %v5743_v32 = vsel %vm2028_vm5, %v24859_v13, 0.0 }
 0x8e7   : > { %5744 = vadd.xlane.f32.xlu0 %v5743_v32 }
 0x8e8   : > { %v5721_v29 = vmul.f32 1.442695, %v5700_v4 }
 0x8e9   : > { %v5661_v52 = vpop.xlane.xlu1 %5660 }
 0x8ea   : > { %22931 = vpow2.f32 %v5721_v29  ;;  %v5699_v56 = vsub.f32 %v24761_v6, %v5661_v52 }
 0x8ec   : > { %v24867_v55 = vpop.eup %22927  ;;  %v5719_v48 = vmul.f32 1.442695, %v5699_v56  ;;  %v24894_v56 = vpop.permute.xlu0 %22446 }
 0x8ed   : > { %v5670_v20 = vpop.xlane.xlu1 %5669  ;;  %v5752_v15 = vsel %vm2028_vm5, %v24867_v55, 0.0 }
 0x8ee   : > { %22933 = vpow2.f32 %v5719_v48  ;;  %v5702_v37 = vsub.f32 %v24767_v11, %v5670_v20  ;;  %5753 = vadd.xlane.f32.xlu1 %v5752_v15  ;;  %v22439_v20 = vunpack.i.h.bf16 %v24851_v61  ;;  %v22438_v15 = vunpack.i.l.bf16 %v24851_v61 }
 0x8f0   : > { %v24872_v18 = vpop.eup %22929  ;;  %v5725_v42 = vmul.f32 1.442695, %v5702_v37 }
 0x8f1   : > { %v5749_v9 = vsel %vm2028_vm5, %v24872_v18, 0.0 }
 0x8f2   : > { %22935 = vpow2.f32 %v5725_v42  ;;  %5750 = vadd.xlane.f32.xlu0 %v5749_v9 }
 0x8f4   : > { %v24876_v6 = vpop.eup %22931 }
 0x8f5   : > { %v5676_v50 = vpop.xlane.xlu1 %5675  ;;  %v5758_v8 = vsel %vm2028_vm5, %v24876_v6, 0.0 }
 0x8f6   : > { %v5704_v27 = vsub.f32 %v24776_v5, %v5676_v50  ;;  %5759 = vadd.xlane.f32.xlu1 %v5758_v8  ;;  %v24902_v8 = vpack.c.bf16 %v22439_v20, %v22438_v15 }
 0x8f8   : > { %v24881_v35 = vpop.eup %22933  ;;  %v5729_v11 = vmul.f32 1.442695, %v5704_v27 }
 0x8f9   : > { %v5755_v44 = vsel %vm2028_vm5, %v24881_v35, 0.0 }
 0x8fa   : > { %22937 = vpow2.f32 %v5729_v11  ;;  %5756 = vadd.xlane.f32.xlu0 %v5755_v44 }
 0x8fc   : > { %v24885_v25 = vpop.eup %22935 }
 0x8fd   : > { %v5682_v12 = vpop.xlane.xlu1 %5681  ;;  %v5764_v24 = vsel %vm2028_vm5, %v24885_v25, 0.0 }
 0x8fe   : > { %v5706_v4 = vsub.f32 %v24784_v57, %v5682_v12  ;;  %5765 = vadd.xlane.f32.xlu1 %v5764_v24 }
 0x900   : > { %v5733_v32 = vmul.f32 1.442695, %v5706_v4 }
 0x902   : > { %22939 = vpow2.f32 %v5733_v32 }
 0x904   : > { %v24890_v5 = vpop.eup %22937 }
 0x905   : > { %v5688_v29 = vpop.xlane.xlu1 %5687  ;;  %v5770_v52 = vsel %vm2028_vm5, %v24890_v5, 0.0 }
 0x906   : > { %v5708_v48 = vsub.f32 %v24795_v40, %v5688_v29  ;;  %5771 = vadd.xlane.f32.xlu1 %v5770_v52 }
 0x908   : > { %v5737_v37 = vmul.f32 1.442695, %v5708_v48  ;;  %v20214_v57 = vpop.f32.mrb[46].mxu1 }
 0x909   : > { %v3869_v42 = vpop.f32.mrb[47].mxu1 }
 0x90a   : > { %22941 = vpow2.f32 %v5737_v37  ;;  %v5667_v9 = vpop.xlane.xlu0 %5666  ;;  %20266 = vmatprep.mubr.msk.f32.mxu1 %vm592_vm0, %v3869_v42 }
 0x90b   : > { %v5701_v50 = vsub.f32 %v24802_v28, %v5667_v9  ;;  %20267 = vmatmul.mubr.msk.f32.vlgmr.msra.gmra.mrb[54].mxu1 %vm592_vm0, %v20214_v57 }
 0x90c   : > { %v24904_v27 = vpop.eup %22939  ;;  %20291 = vmatpush3.msra.mxu1 %v24840_v14  ;;  %v20228_v40 = vpop.f32.mrb[48].mxu1  ;;  %20269 = vmatprep.mubr.msk.f32.mxu1 %vm592_vm0, %v24678_v53 }
 0x90d   : > { %v5723_v61 = vmul.f32 1.442695, %v5701_v50  ;;  %v5694_v11 = vpop.xlane.xlu1 %5693  ;;  %21660 = vmatprep.subr.bf16.mxu1 %v24902_v8  ;;  %v4047_v44 = vpop.f32.mrb[49].mxu1  ;;  %v5776_v28 = vsel %vm2028_vm5, %v24904_v27, 0.0 }
 0x90e   : > { %5777 = vadd.xlane.f32.xlu1 %v5776_v28  ;;  %v5673_v12 = vpop.xlane.xlu0 %5672 }
 0x90f   : > { %22943 = vpow2.f32 %v5723_v61  ;;  %v5703_v24 = vsub.f32 %v24808_v26, %v5673_v12  ;;  %20270 = vmatmul.mubr.msk.f32.gmra.mrb[56].mxu1 %vm592_vm0, %v24676_v22  ;;  %v5710_v22 = vsub.f32 %v24812_v46, %v5694_v11 }
 0x910   : > { %20272 = vmatprep.mubr.msk.f32.mxu1 %vm592_vm0, %v4047_v44 }
 0x911   : > { %v5727_v14 = vmul.f32 1.442695, %v5703_v24  ;;  %v22452_v53 = vpop.permute.xlu1 %22451 }
 0x912   : > { %v22454_v4 = vunpack.i.h.bf16 %v22452_v53  ;;  %v22453_v32 = vunpack.i.l.bf16 %v22452_v53  ;;  %v5679_v29 = vpop.xlane.xlu0 %5678 }
 0x913   : > { %22945 = vpow2.f32 %v5727_v14  ;;  %v5705_v52 = vsub.f32 %v24820_v33, %v5679_v29  ;;  %20273 = vmatmul.mubr.msk.f32.gmra.mrb[58].mxu1 %vm592_vm0, %v20228_v40 }
 0x914   : > { %v24918_v48 = vpop.eup %22941  ;;  %20275 = vmatprep.mubr.msk.f32.mxu1 %vm592_vm0, %v24707_v39  ;;  %v24922_v26 = vpack.c.bf16 %v22454_v4, %v22453_v32  ;;  %v5741_v39 = vmul.f32 1.442695, %v5710_v22  ;;  %v28376_v32 = vld [vmem:[#allocation5_spill] sm:$0xff]  ;;  %v28380_v22 = vld [vmem:[#allocation10_spill] sm:$0xff] }
 0x915   : > { %v5731_v20 = vmul.f32 1.442695, %v5705_v52  ;;  %v5782_v15 = vsel %vm2028_vm5, %v24918_v48, 0.0  ;;  %v28378_v52 = vld [vmem:[#allocation9_spill] sm:$0xff] }
 0x916   : > { %21672 = vmatprep.subr.bf16.mxu0 %v24922_v26  ;;  %5783 = vadd.xlane.f32.xlu1 %v5782_v15  ;;  %v5685_v37 = vpop.xlane.xlu0 %5684  ;;  %v28382_v15 = vld [vmem:[#allocation11_spill] sm:$0xff] }
 0x917   : > { %22947 = vpow2.f32 %v5731_v20  ;;  %v5707_v33 = vsub.f32 %v24826_v45, %v5685_v37  ;;  %20276 = vmatmul.mubr.msk.f32.gmra.mrb[60].mxu1 %vm592_vm0, %v24705_v2  ;;  %v28381_v20 = vld [vmem:[#allocation7_spill] sm:$0xff]  ;;  %v28383_v37 = vld [vmem:[#allocation16_spill] sm:$0xff] }
 0x919   : > { %v24931_v57 = vpop.eup %22943  ;;  %v5735_v42 = vmul.f32 1.442695, %v5707_v33  ;;  %v28384_v33 = vld [vmem:[#allocation22_spill] sm:$0xff] }
 0x91a   : > { %v5691_v9 = vpop.xlane.xlu0 %5690  ;;  %v5761_v46 = vsel %vm2028_vm5, %v24931_v57, 0.0 }
 0x91b   : > { %22949 = vpow2.f32 %v5735_v42  ;;  %v5709_v50 = vsub.f32 %v24832_v63, %v5691_v9  ;;  %5762 = vadd.xlane.f32.xlu0 %v5761_v46  ;;  %v28388_v9 = vld [vmem:[#allocation26_spill] sm:$0xff]  ;;  %v28390_v46 = vld [vmem:[#allocation25_spill] sm:$0xff] }
 0x91c   : > { %22951 = vpow2.f32 %v5741_v39  ;;  %v28385_v39 = vld [vmem:[#allocation3_spill] sm:$0xff] }
 0x91d   : > { %v24936_v40 = vpop.eup %22945  ;;  %v5739_v61 = vmul.f32 1.442695, %v5709_v50  ;;  %v28391_v50 = vld [vmem:[#allocation12_spill] sm:$0xff] }
 0x91e   : > { %v5767_v45 = vsel %vm2028_vm5, %v24936_v40, 0.0 }
 0x91f   : > { %22953 = vpow2.f32 %v5739_v61  ;;  %5768 = vadd.xlane.f32.xlu0 %v5767_v45  ;;  %v28392_v61 = vld [vmem:[#allocation23_spill] sm:$0xff]  ;;  %v28393_v45 = vld [vmem:[#allocation21_spill] sm:$0xff] }
 0x921   : > { %v24940_v2 = vpop.eup %22947 }
 0x922   : > { %v5773_v11 = vsel %vm2028_vm5, %v24940_v2, 0.0 }
 0x923   : > { %5774 = vadd.xlane.f32.xlu0 %v5773_v11  ;;  %v28395_v11 = vld [vmem:[#allocation28_spill] sm:$0xff] }
 0x925   : > { %v24944_v44 = vpop.eup %22949 }
 0x926   : > { %v5779_v63 = vsel %vm2028_vm5, %v24944_v44, 0.0  ;;  %v24948_v28 = vpop.eup %22951 }
 0x927   : > { %5780 = vadd.xlane.f32.xlu1 %v5779_v63  ;;  %v5788_v24 = vsel %vm2028_vm5, %v24948_v28, 0.0  ;;  %v28396_v63 = vld [vmem:[#allocation27_spill] sm:$0xff] }
 0x929   : > { %v24950_v12 = vpop.eup %22953 }
 0x92a   : > { %v5785_v14 = vsel %vm2028_vm5, %v24950_v12, 0.0 }
 0x92b   : > { %5789 = vadd.xlane.f32.xlu1 %v5788_v24  ;;  %5786 = vadd.xlane.f32.xlu0 %v5785_v14  ;;  %v28397_v24 = vld [vmem:[#allocation13_spill] sm:$0xff]  ;;  %v28398_v14 = vld [vmem:[#allocation34_spill] sm:$0xff] }
 0x93c   : > { %22466 = vrot.lane.b32.xlu1 %v28374_v43, %s23445_s21 }
 0x940   : > { %22476 = vrot.lane.b32.xlu1 %v23751_v23, %s23446_s25  ;;  %v28377_v23 = vld [vmem:[#allocation4_spill] sm:$0xff] }
 0x941   : > { %22471 = vrot.lane.b32.xlu0 %v28353_v59, %s23445_s21 }
 0x944   : > { %6728 = vrot.lane.b32.xlu1 %v23713_v1, %s23446_s25 }
 0x945   : > { %22481 = vrot.lane.b32.xlu0 %v23763_v31, %s23446_s25  ;;  %v20242_v53 = vpop.f32.mrb[50].mxu1  ;;  %v28379_v31 = vld [vmem:[#allocation6_spill] sm:$0xff] }
 0x946   : > { %v4225_v4 = vpop.f32.mrb[51].mxu1 }
 0x947   : > { %20278 = vmatprep.mubr.msk.f32.mxu1 %vm592_vm0, %v4225_v4  ;;  %v28401_v4 = vld [vmem:[#allocation29_spill] sm:$0xff] }
 0x948   : > { %22486 = vrot.lane.b32.xlu1 %v28376_v32, %s23446_s25  ;;  %20279 = vmatmul.mubr.msk.f32.gmra.mrb[62].mxu1 %vm592_vm0, %v20242_v53  ;;  %v28399_v53 = vld [vmem:[#allocation33_spill] sm:$0xff] }
 0x949   : > { %6730 = vrot.lane.b32.xlu0 %v28377_v23, %s23446_s25  ;;  %v20256_v29 = vpop.f32.mrb[52].mxu1  ;;  %20281 = vmatprep.mubr.msk.f32.mxu1 %vm592_vm0, %v24711_v41  ;;  %v22449_v41 = vunpack.i.h.bf16 %v24894_v56  ;;  %v28403_v23 = vld [vmem:[#allocation35_spill] sm:$0xff] }
 0x94a   : > { %v4403_v1 = vpop.f32.mrb[53].mxu1 }
 0x94c   : > { %6821 = vrot.lane.b32.xlu1 %v28378_v52, %s23446_s25  ;;  %20282 = vmatmul.mubr.msk.f32.gmra.mrb[64].mxu1 %vm592_vm0, %v24709_v49  ;;  %v22448_v49 = vunpack.i.l.bf16 %v24894_v56  ;;  %v28387_v56 = vld [vmem:[#allocation14_spill] sm:$0xff] }
 0x94d   : > { %6819 = vrot.lane.b32.xlu0 %v28379_v31, %s23446_s25  ;;  %20284 = vmatprep.mubr.msk.f32.mxu1 %vm592_vm0, %v4403_v1  ;;  %v28405_v1 = vld [vmem:[#allocation31_spill] sm:$0xff] }
 0x94e   : > { %v21667_v42 = vpack.c.bf16 %v22449_v41, %v22448_v49 }
 0x950   : > { %6910 = vrot.lane.b32.xlu1 %v28380_v22, %s23446_s25  ;;  %20285 = vmatmul.mubr.msk.f32.gmra.mrb[66].mxu1 %vm592_vm0, %v20256_v29 }
 0x951   : > { %22491 = vrot.lane.b32.xlu0 %v28381_v20, %s23446_s25  ;;  %20287 = vmatprep.mubr.msk.f32.mxu1 %vm592_vm0, %v24727_v38  ;;  %v28386_v38 = vld [vmem:[#allocation18_spill] sm:$0xff] }
 0x954   : > { %22496 = vrot.lane.b32.xlu1 %v28382_v15, %s23446_s25  ;;  %20288 = vmatmul.mubr.msk.f32.gmra.mrb[68].mxu1 %vm592_vm0, %v24725_v21  ;;  %v28389_v21 = vld [vmem:[#allocation17_spill] sm:$0xff] }
 0x955   : > { %6912 = vrot.lane.b32.xlu0 %v28383_v37, %s23446_s25  ;;  %20292 = vmatprep.mubr.msk.f32.mxu1 %vm592_vm0, %v28384_v33 }
 0x958   : > { %7001 = vrot.lane.b32.xlu1 %v28385_v39, %s23446_s25  ;;  %20293 = vmatmul.mubr.msk.f32.vlgmr.msra.gmra.mrb[54].mxu1 %vm592_vm0, %v28386_v38 }
 0x959   : > { %22501 = vrot.lane.b32.xlu0 %v28387_v56, %s23446_s25  ;;  %21662 = vmatpush3.bf16.msra.mxu1 %v24902_v8  ;;  %v28394_v8 = vld [vmem:[#allocation19_spill] sm:$0xff] }
 0x95a   : > { %20295 = vmatprep.mubr.msk.f32.mxu1 %vm592_vm0, %v28388_v9  ;;  %21668 = vmatprep.subr.bf16.mxu1 %v21667_v42 }
 0x95c   : > { %7092 = vrot.lane.b32.xlu1 %v28389_v21, %s23446_s25  ;;  %20296 = vmatmul.mubr.msk.f32.gmra.mrb[56].mxu1 %vm592_vm0, %v28390_v46 }
 0x95d   : > { %7003 = vrot.lane.b32.xlu0 %v28391_v50, %s23446_s25  ;;  %20298 = vmatprep.mubr.msk.f32.mxu1 %vm592_vm0, %v28392_v61 }
 0x960   : > { %7094 = vrot.lane.b32.xlu1 %v28393_v45, %s23446_s25  ;;  %20299 = vmatmul.mubr.msk.f32.gmra.mrb[58].mxu1 %vm592_vm0, %v28394_v8 }
 0x961   : > { %22506 = vrot.lane.b32.xlu0 %v23871_v51, %s23446_s25  ;;  %20301 = vmatprep.mubr.msk.f32.mxu1 %vm592_vm0, %v28395_v11  ;;  %v28400_v51 = vld [vmem:[#allocation30_spill] sm:$0xff] }
 0x964   : > { %22511 = vrot.lane.b32.xlu1 %v23897_v3, %s23446_s25  ;;  %20302 = vmatmul.mubr.msk.f32.gmra.mrb[60].mxu1 %vm592_vm0, %v28396_v63  ;;  %v22457_v3 = vpop.permute.xlu0 %22456 }
 0x965   : > { %7183 = vrot.lane.b32.xlu0 %v28397_v24, %s23446_s25  ;;  %20304 = vmatprep.mubr.msk.f32.mxu1 %vm592_vm0, %v28398_v14  ;;  %v22459_v22 = vunpack.i.h.bf16 %v22457_v3  ;;  %v22458_v20 = vunpack.i.l.bf16 %v22457_v3 }
 0x967   : > { %v21675_v15 = vpack.c.bf16 %v22459_v22, %v22458_v20 }
 0x968   : > { %7274 = vrot.lane.b32.xlu1 %v23922_v30, %s23446_s25  ;;  %20305 = vmatmul.mubr.msk.f32.gmra.mrb[62].mxu1 %vm592_vm0, %v28399_v53  ;;  %v28402_v30 = vld [vmem:[#allocation36_spill] sm:$0xff]  ;;  %v22462_v32 = vpop.permute.xlu0 %22461 }
 0x969   : > { %7185 = vrot.lane.b32.xlu0 %v23883_v60, %s23446_s25  ;;  %20307 = vmatprep.mubr.msk.f32.mxu1 %vm592_vm0, %v28400_v51  ;;  %v28404_v60 = vld [vmem:[#allocation32_spill] sm:$0xff]  ;;  %v22464_v56 = vunpack.i.h.bf16 %v22462_v32  ;;  %v22463_v9 = vunpack.i.l.bf16 %v22462_v32 }
 0x96c   : > { %7365 = vrot.lane.b32.xlu1 %v23887_v0, %s23446_s25  ;;  %20308 = vmatmul.mubr.msk.f32.gmra.mrb[64].mxu1 %vm592_vm0, %v28401_v4 }
 0x96d   : > { %7276 = vrot.lane.b32.xlu0 %v23947_v47, %s23446_s25  ;;  %20310 = vmatprep.mubr.msk.f32.mxu1 %vm592_vm0, %v28402_v30 }
 0x970   : > { %20311 = vmatmul.mubr.msk.f32.gmra.mrb[66].mxu1 %vm592_vm0, %v28403_v23 }
 0x971   : > { %7367 = vrot.lane.b32.xlu0 %v23930_v17, %s23446_s25  ;;  %20313 = vmatprep.mubr.msk.f32.mxu1 %vm592_vm0, %v28404_v60 }
 0x973   : > { %v5748_v0 = vpop.xlane.xlu1 %5747 }
 0x974   : > { %22955 = vrcp.f32 %v5748_v0  ;;  %v5745_v29 = vpop.xlane.xlu0 %5744  ;;  %20314 = vmatmul.mubr.msk.f32.gmra.mrb[68].mxu1 %vm592_vm0, %v28405_v1 }
 0x975   : > { %22957 = vrcp.f32 %v5745_v29 }
 0x97b   : > { %v5754_v47 = vpop.xlane.xlu1 %5753 }
 0x97c   : > { %22959 = vrcp.f32 %v5754_v47 }
 0x97e   : > { %v22956_v52 = vpop.eup %22955 }
 0x97f   : > { %v22958_v31 = vpop.eup %22957  ;;  %v5751_v41 = vpop.xlane.xlu0 %5750  ;;  %v5808_v49 = vmul.f32 %v22956_v52, %v24857_v58  ;;  %v21679_v58 = vpack.c.bf16 %v22464_v56, %v22463_v9 }
 0x980   : > { %22961 = vrcp.f32 %v5751_v41  ;;  %v5807_v17 = vmul.f32 %v22958_v31, %v24859_v13 }
 0x982   : > { %20376 = vmatprep.mubr.msk.f32.mxu1 %vm2028_vm5, %v5807_v17 }
 0x983   : > { %20377 = vmatmul.mubr.msk.f32.vlgmr.msra.gmra.mrb[70].mxu1 %vm2028_vm5, %v5808_v49  ;;  %v5760_v37 = vpop.xlane.xlu1 %5759 }
 0x984   : > { %21670 = vmatpush3.bf16.msra.mxu1 %v21667_v42  ;;  %22963 = vrcp.f32 %v5760_v37 }
 0x985   : > { %21676 = vmatprep.subr.bf16.mxu1 %v21675_v15 }
 0x986   : > { %v22960_v39 = vpop.eup %22959 }
 0x987   : > { %v5757_v33 = vpop.xlane.xlu0 %5756  ;;  %v5810_v13 = vmul.f32 %v22960_v39, %v24867_v55 }
 0x988   : > { %22965 = vrcp.f32 %v5757_v33 }
 0x98a   : > { %v22962_v38 = vpop.eup %22961 }
 0x98b   : > { %v5809_v21 = vmul.f32 %v22962_v38, %v24872_v18  ;;  %v5766_v55 = vpop.xlane.xlu1 %5765 }
 0x98c   : > { %22967 = vrcp.f32 %v5766_v55 }
 0x98d   : > { %20383 = vmatprep.mubr.msk.f32.mxu0 %vm2028_vm5, %v5809_v21 }
 0x98e   : > { %20384 = vmatmul.mubr.msk.f32.vlgmr.msra.gmra.mrb[82].mxu0 %vm2028_vm5, %v5810_v13  ;;  %v22964_v42 = vpop.eup %22963 }
 0x98f   : > { %21674 = vmatpush3.bf16.msra.mxu0 %v24922_v26  ;;  %v5812_v61 = vmul.f32 %v22964_v42, %v24876_v6 }
 0x990   : > { %21680 = vmatprep.subr.bf16.mxu0 %v21679_v58 }
 0x992   : > { %v22966_v46 = vpop.eup %22965 }
 0x993   : > { %v5811_v50 = vmul.f32 %v22966_v46, %v24881_v35  ;;  %v5772_v18 = vpop.xlane.xlu1 %5771 }
 0x995   : > { %20390 = vmatprep.mubr.msk.f32.mxu1 %vm2028_vm5, %v5811_v50 }
 0x996   : > { %20391 = vmatmul.mubr.msk.f32.vlgmr.msra.gmra.mrb[72].mxu1 %vm2028_vm5, %v5812_v61  ;;  %v22968_v35 = vpop.eup %22967 }
 0x997   : > { %21678 = vmatpush3.bf16.msra.mxu1 %v21675_v15  ;;  %v5814_v53 = vmul.f32 %v22968_v35, %v24885_v25 }
 0x99b   : > { %v5778_v8 = vpop.xlane.xlu1 %5777 }
 0x9a3   : > { %v5784_v11 = vpop.xlane.xlu1 %5783 }
 0x9a8   : > { %v5763_v45 = vpop.xlane.xlu0 %5762 }
 0x9a9   : > { %22969 = vrcp.f32 %v5763_v45 }
 0x9aa   : > { %22971 = vrcp.f32 %v5772_v18 }
 0x9ac   : > { %v5769_v26 = vpop.xlane.xlu0 %5768 }
 0x9ad   : > { %22973 = vrcp.f32 %v5769_v26 }
 0x9ae   : > { %22975 = vrcp.f32 %v5778_v8 }
 0x9b0   : > { %v5775_v63 = vpop.xlane.xlu0 %5774 }
 0x9b1   : > { %22977 = vrcp.f32 %v5775_v63 }
 0x9b3   : > { %v22970_v6 = vpop.eup %22969 }
 0x9b4   : > { %v5781_v24 = vpop.xlane.xlu1 %5780  ;;  %v5813_v14 = vmul.f32 %v22970_v6, %v24931_v57  ;;  %v22972_v51 = vpop.eup %22971 }
 0x9b5   : > { %22979 = vrcp.f32 %v5781_v24  ;;  %v5816_v60 = vmul.f32 %v22972_v51, %v24890_v5 }
 0x9b6   : > { %22981 = vrcp.f32 %v5784_v11  ;;  %20397 = vmatprep.mubr.msk.f32.mxu0 %vm2028_vm5, %v5813_v14 }
 0x9b7   : > { %v22974_v3 = vpop.eup %22973  ;;  %20398 = vmatmul.mubr.msk.f32.vlgmr.msra.gmra.mrb[84].mxu0 %vm2028_vm5, %v5814_v53 }
 0x9b8   : > { %21682 = vmatpush3.bf16.msra.mxu0 %v21679_v58  ;;  %v5790_v4 = vpop.xlane.xlu1 %5789  ;;  %v5787_v30 = vpop.xlane.xlu0 %5786  ;;  %v5815_v32 = vmul.f32 %v22974_v3, %v24936_v40 }
 0x9b9   : > { %v22976_v23 = vpop.eup %22975  ;;  %22983 = vrcp.f32 %v5790_v4 }
 0x9ba   : > { %22985 = vrcp.f32 %v5787_v30  ;;  %20404 = vmatprep.mubr.msk.f32.mxu1 %vm2028_vm5, %v5815_v32  ;;  %v5818_v1 = vmul.f32 %v22976_v23, %v24904_v27  ;;  %v1298_v27 = vld [vmem:[%s28239_s6 + $0x10] sm:$0xff] }
 0x9bb   : > { %v22978_v25 = vpop.eup %22977  ;;  %20405 = vmatmul.mubr.msk.f32.vlgmr.msra.gmra.mrb[74].mxu1 %vm2028_vm5, %v5816_v60 }
 0x9bc   : > { %v22467_v57 = vpop.permute.xlu1 %22466  ;;  %v22472_v0 = vpop.permute.xlu0 %22471  ;;  %v5817_v29 = vmul.f32 %v22978_v25, %v24940_v2 }
 0x9bd   : > { %v22469_v47 = vunpack.i.h.bf16 %v22467_v57  ;;  %v22468_v52 = vunpack.i.l.bf16 %v22467_v57  ;;  %v22474_v31 = vunpack.i.h.bf16 %v22472_v0  ;;  %v22473_v40 = vunpack.i.l.bf16 %v22472_v0 }
 0x9be   : > { %20411 = vmatprep.mubr.msk.f32.mxu0 %vm2028_vm5, %v5817_v29 }
 0x9bf   : > { %v22980_v22 = vpop.eup %22979  ;;  %20412 = vmatmul.mubr.msk.f32.vlgmr.msra.gmra.mrb[86].mxu0 %vm2028_vm5, %v5818_v1  ;;  %v21683_v5 = vpack.c.bf16 %v22469_v47, %v22468_v52  ;;  %v21687_v20 = vpack.c.bf16 %v22474_v31, %v22473_v40 }
 0x9c0   : > { %v22982_v41 = vpop.eup %22981  ;;  %v22477_v17 = vpop.permute.xlu1 %22476  ;;  %v5819_v15 = vmul.f32 %v22980_v22, %v24944_v44 }
 0x9c1   : > { %v22482_v49 = vpop.permute.xlu0 %22481  ;;  %v22479_v2 = vunpack.i.h.bf16 %v22477_v17  ;;  %v22478_v37 = vunpack.i.l.bf16 %v22477_v17  ;;  %21684 = vmatprep.subr.bf16.mxu1 %v21683_v5  ;;  %21688 = vmatprep.subr.bf16.mxu0 %v21687_v20  ;;  %v5820_v38 = vmul.f32 %v22982_v41, %v24918_v48 }
 0x9c2   : > { %21686 = vmatpush3.bf16.msra.mxu1 %v21683_v5  ;;  %20418 = vmatprep.mubr.msk.f32.mxu1 %vm2028_vm5, %v5819_v15  ;;  %v22484_v58 = vunpack.i.h.bf16 %v22482_v49  ;;  %v22483_v42 = vunpack.i.l.bf16 %v22482_v49 }
 0x9c3   : > { %v22984_v33 = vpop.eup %22983  ;;  %v21691_v39 = vpack.c.bf16 %v22479_v2, %v22478_v37  ;;  %21690 = vmatpush3.bf16.msra.mxu0 %v21687_v20  ;;  %20428 = vmatprep.subr.mxu1 %v1298_v27 }
 0x9c4   : > { %v22986_v56 = vpop.eup %22985  ;;  %v6729_v9 = vpop.permute.xlu1 %6728  ;;  %v5822_v21 = vmul.f32 %v22984_v33, %v24948_v28  ;;  %v21697_v50 = vpack.c.bf16 %v22484_v58, %v22483_v42 }
 0x9c5   : > { %v6731_v44 = vpop.permute.xlu0 %6730  ;;  %20419 = vmatmul.mubr.msk.f32.vlgmr.msra.gmra.mrb[76].mxu1 %vm2028_vm5, %v5820_v38  ;;  %21693 = vmatprep.subr.msk.bf16.mxu0 %vm23745_vm3, %v21691_v39  ;;  %v5821_v13 = vmul.f32 %v22986_v56, %v24950_v12 }
 0x9c6   : > { %20429 = vmatpush3.msra.mxu1 %v1298_v27 }
 0x9c7   : > { %20425 = vmatprep.mubr.msk.f32.mxu0 %vm2028_vm5, %v5821_v13 }
 0x9c8   : > { %20426 = vmatmul.mubr.msk.f32.vlgmr.msra.gmra.mrb[88].mxu0 %vm2028_vm5, %v5822_v21  ;;  %v22487_v48 = vpop.permute.xlu1 %22486 }
 0x9c9   : > { %v6820_v46 = vpop.permute.xlu0 %6819  ;;  %20458 = vmatprep.mubr.msk.f32.mxu0 %vm592_vm0, %v6729_v9  ;;  %v22489_v12 = vunpack.i.h.bf16 %v22487_v48  ;;  %v22488_v55 = vunpack.i.l.bf16 %v22487_v48 }
 0x9cb   : > { %v21703_v8 = vpack.c.bf16 %v22489_v12, %v22488_v55 }
 0x9cc   : > { %21696 = vmatpush3.bf16.xpose.msk.msra.mxu0 %vm23745_vm3, %v21691_v39  ;;  %v6822_v28 = vpop.permute.xlu1 %6821 }
 0x9cd   : > { %v22492_v61 = vpop.permute.xlu0 %22491  ;;  %21699 = vmatprep.subr.msk.bf16.mxu0 %vm23745_vm3, %v21697_v50 }
 0x9ce   : > { %v22494_v6 = vunpack.i.h.bf16 %v22492_v61  ;;  %v22493_v24 = vunpack.i.l.bf16 %v22492_v61 }
 0x9d0   : > { %v6911_v18 = vpop.permute.xlu1 %6910  ;;  %v21709_v51 = vpack.c.bf16 %v22494_v6, %v22493_v24 }
 0x9d1   : > { %v6913_v45 = vpop.permute.xlu0 %6912 }
 0x9d3   : > { %20459 = vmatmul.mubr.msk.f32.vlgmr.msra.gmra.mrb[90].mxu0 %vm592_vm0, %v6731_v44 }
 0x9d4   : > { %21702 = vmatpush3.bf16.xpose.msk.msra.mxu0 %vm23745_vm3, %v21697_v50  ;;  %20465 = vmatprep.mubr.msk.f32.mxu0 %vm592_vm0, %v6820_v46  ;;  %v22497_v26 = vpop.permute.xlu1 %22496 }
 0x9d5   : > { %v22499_v11 = vunpack.i.h.bf16 %v22497_v26  ;;  %v22498_v63 = vunpack.i.l.bf16 %v22497_v26  ;;  %21705 = vmatprep.subr.msk.bf16.mxu0 %vm23745_vm3, %v21703_v8  ;;  %v22502_v35 = vpop.permute.xlu0 %22501 }
 0x9d6   : > { %v22504_v30 = vunpack.i.h.bf16 %v22502_v35  ;;  %v22503_v32 = vunpack.i.l.bf16 %v22502_v35 }
 0x9d7   : > { %v21715_v14 = vpack.c.bf16 %v22499_v11, %v22498_v63 }
 0x9d8   : > { %v7002_v53 = vpop.permute.xlu1 %7001  ;;  %v21721_v25 = vpack.c.bf16 %v22504_v30, %v22503_v32 }
 0x9d9   : > { %21717 = vmatprep.subr.msk.bf16.mxu1 %vm23745_vm3, %v21715_v14  ;;  %v7004_v3 = vpop.permute.xlu0 %7003 }
 0x9db   : > { %20466 = vmatmul.mubr.msk.f32.vlgmr.msra.gmra.mrb[92].mxu0 %vm592_vm0, %v6822_v28 }
 0x9dc   : > { %21708 = vmatpush3.bf16.xpose.msk.msra.mxu0 %vm23745_vm3, %v21703_v8  ;;  %20472 = vmatprep.mubr.msk.f32.mxu0 %vm592_vm0, %v6911_v18  ;;  %v25110_v4 = vpop.permute.xlu1 %7092 }
 0x9dd   : > { %21711 = vmatprep.subr.msk.bf16.mxu0 %vm23745_vm3, %v21709_v51  ;;  %v22507_v60 = vpop.permute.xlu0 %22506 }
 0x9de   : > { %v22509_v20 = vunpack.i.h.bf16 %v22507_v60  ;;  %v22508_v41 = vunpack.i.l.bf16 %v22507_v60 }
 0x9e0   : > { %v25114_v23 = vpop.permute.xlu1 %7094  ;;  %v21727_v15 = vpack.c.bf16 %v22509_v20, %v22508_v41 }
 0x9e1   : > { %v7184_v1 = vpop.permute.xlu0 %7183 }
 0x9e3   : > { %20473 = vmatmul.mubr.msk.f32.vlgmr.msra.gmra.mrb[94].mxu0 %vm592_vm0, %v6913_v45 }
 0x9e4   : > { %21714 = vmatpush3.bf16.xpose.msk.msra.mxu0 %vm23745_vm3, %v21709_v51  ;;  %20479 = vmatprep.mubr.msk.f32.mxu0 %vm592_vm0, %v7002_v53  ;;  %v22512_v57 = vpop.permute.xlu1 %22511 }
 0x9e5   : > { %21723 = vmatprep.subr.msk.bf16.mxu0 %vm23745_vm3, %v21721_v25  ;;  %v22514_v0 = vunpack.i.h.bf16 %v22512_v57  ;;  %v22513_v29 = vunpack.i.l.bf16 %v22512_v57  ;;  %v7186_v31 = vpop.permute.xlu0 %7185 }
 0x9e7   : > { %v21733_v47 = vpack.c.bf16 %v22514_v0, %v22513_v29 }
 0x9e8   : > { %v7275_v52 = vpop.permute.xlu1 %7274 }
 0x9e9   : > { %v7277_v22 = vpop.permute.xlu0 %7276 }
 0x9eb   : > { %20480 = vmatmul.mubr.msk.f32.vlgmr.msra.gmra.mrb[96].mxu0 %vm592_vm0, %v7004_v3 }
 0x9ec   : > { %21726 = vmatpush3.bf16.xpose.msk.msra.mxu0 %vm23745_vm3, %v21721_v25  ;;  %20493 = vmatprep.mubr.msk.f32.mxu0 %vm592_vm0, %v7184_v1  ;;  %v7366_v40 = vpop.permute.xlu1 %7365 }
 0x9ed   : > { %21735 = vmatprep.subr.msk.bf16.mxu0 %vm23745_vm3, %v21733_v47  ;;  %v7368_v5 = vpop.permute.xlu0 %7367 }
 0x9f3   : > { %20494 = vmatmul.mubr.msk.f32.vlgmr.msra.gmra.mrb[98].mxu0 %vm592_vm0, %v7186_v31 }
 0x9f4   : > { %21738 = vmatpush3.bf16.xpose.msk.msra.mxu0 %vm23745_vm3, %v21733_v47  ;;  %20507 = vmatprep.mubr.msk.f32.mxu0 %vm592_vm0, %v7366_v40 }
 0x9fb   : > { %20508 = vmatmul.mubr.msk.f32.vlgmr.msra.gmra.mrb[100].mxu0 %vm592_vm0, %v7368_v5 }
 0xa56   : > { %v20378_v17 = vpop.f32.mrb[70].mxu1 }
 0xa57   : > { %v5901_v49 = vpop.f32.mrb[71].mxu1 }
 0xa58   : > { %20430 = vmatprep.mubr.msk.f32.mxu1 %vm592_vm0, %v5901_v49 }
 0xa59   : > { %20431 = vmatmul.mubr.msk.f32.vlgmr.msra.gmra.mrb[54].mxu1 %vm592_vm0, %v20378_v17 }
 0xa5a   : > { %21720 = vmatpush3.bf16.xpose.msk.msra.mxu1 %vm23745_vm3, %v21715_v14 }
 0xa5b   : > { %21729 = vmatprep.subr.msk.bf16.mxu1 %vm23745_vm3, %v21727_v15 }
 0xa61   : > { %v20385_v27 = vpop.f32.mrb[82].mxu0 }
 0xa62   : > { %v5988_v2 = vpop.f32.mrb[83].mxu0 }
 0xa63   : > { %20433 = vmatprep.mubr.msk.f32.mxu1 %vm592_vm0, %v5988_v2 }
 0xa64   : > { %20434 = vmatmul.mubr.msk.f32.gmra.mrb[56].mxu1 %vm592_vm0, %v20385_v27 }
 0xa69   : > { %v20392_v37 = vpop.f32.mrb[72].mxu1 }
 0xa6a   : > { %v6075_v33 = vpop.f32.mrb[73].mxu1 }
 0xa6b   : > { %20436 = vmatprep.mubr.msk.f32.mxu1 %vm592_vm0, %v6075_v33 }
 0xa6c   : > { %20437 = vmatmul.mubr.msk.f32.gmra.mrb[58].mxu1 %vm592_vm0, %v20392_v37 }
 0xa8a   : > { %v20399_v39 = vpop.f32.mrb[84].mxu0 }
 0xa8b   : > { %v6162_v38 = vpop.f32.mrb[85].mxu0 }
 0xa8c   : > { %20439 = vmatprep.mubr.msk.f32.mxu1 %vm592_vm0, %v6162_v38 }
 0xa8d   : > { %20440 = vmatmul.mubr.msk.f32.gmra.mrb[60].mxu1 %vm592_vm0, %v20399_v39 }
 0xa8e   : > { %v20406_v56 = vpop.f32.mrb[74].mxu1 }
 0xa8f   : > { %v6249_v9 = vpop.f32.mrb[75].mxu1 }
 0xa90   : > { %20442 = vmatprep.mubr.msk.f32.mxu1 %vm592_vm0, %v6249_v9 }
 0xa91   : > { %20443 = vmatmul.mubr.msk.f32.gmra.mrb[62].mxu1 %vm592_vm0, %v20406_v56 }
 0xa92   : > { %v20413_v44 = vpop.f32.mrb[86].mxu0 }
 0xa93   : > { %v6336_v21 = vpop.f32.mrb[87].mxu0 }
 0xa94   : > { %20445 = vmatprep.mubr.msk.f32.mxu1 %vm592_vm0, %v6336_v21 }
 0xa95   : > { %20446 = vmatmul.mubr.msk.f32.gmra.mrb[64].mxu1 %vm592_vm0, %v20413_v44 }
 0xa98   : > { %v20420_v13 = vpop.f32.mrb[76].mxu1 }
 0xa99   : > { %v6423_v58 = vpop.f32.mrb[77].mxu1 }
 0xa9a   : > { %20448 = vmatprep.mubr.msk.f32.mxu1 %vm592_vm0, %v6423_v58 }
 0xa9b   : > { %v20427_v42 = vpop.f32.mrb[88].mxu0  ;;  %20449 = vmatmul.mubr.msk.f32.gmra.mrb[66].mxu1 %vm592_vm0, %v20420_v13 }
 0xa9c   : > { %v6510_v48 = vpop.f32.mrb[89].mxu0 }
 0xa9d   : > { %20451 = vmatprep.mubr.msk.f32.mxu1 %vm592_vm0, %v6510_v48 }
 0xa9f   : > { %20452 = vmatmul.mubr.msk.f32.gmra.mrb[68].mxu1 %vm592_vm0, %v20427_v42 }
 0xaa0   : > { %20486 = vmatprep.mubr.msk.f32.mxu1 %vm592_vm0, %v25110_v4 }
 0xaa3   : > { %20487 = vmatmul.mubr.msk.f32.vlgmr.msra.gmra.mrb[78].mxu1 %vm592_vm0, %v25114_v23 }
 0xaa4   : > { %21732 = vmatpush3.bf16.xpose.msk.msra.mxu1 %vm23745_vm3, %v21727_v15  ;;  %20500 = vmatprep.mubr.msk.f32.mxu1 %vm592_vm0, %v7275_v52 }
 0xaa6   : > { %v20460_v46 = vpop.f32.mrb[90].mxu0 }
 0xaa7   : > { %v7457_v50 = vmul.f32 0.35355338, %v20460_v46  ;;  %v6810_v28 = vpop.f32.mrb[91].mxu0 }
 0xaa8   : > { %v7456_v61 = vmul.f32 0.35355338, %v6810_v28 }
 0xaa9   : > { %v7473_v12 = vsel %vm775_vm4, %v7457_v50, -1e+30 }
 0xaaa   : > { %v7472_v55 = vsel %vm775_vm4, %v7456_v61, -1e+30  ;;  %v7491_v18 = vsel %vm2028_vm5, %v7473_v12, -inf }
 0xaab   : > { %7492 = vmax.xlane.f32.xlu0 %v7491_v18  ;;  %20501 = vmatmul.mubr.msk.f32.vlgmr.msra.gmra.mrb[80].mxu1 %vm592_vm0, %v7277_v22  ;;  %v7488_v45 = vsel %vm2028_vm5, %v7472_v55, -inf }
 0xaac   : > { %7489 = vmax.xlane.f32.xlu1 %v7488_v45 }
 0xaae   : > { %v20467_v8 = vpop.f32.mrb[92].mxu0 }
 0xaaf   : > { %v7459_v26 = vmul.f32 0.35355338, %v20467_v8  ;;  %v6901_v11 = vpop.f32.mrb[93].mxu0 }
 0xab0   : > { %v7458_v63 = vmul.f32 0.35355338, %v6901_v11 }
 0xab1   : > { %v7475_v35 = vsel %vm775_vm4, %v7459_v26, -1e+30 }
 0xab2   : > { %v7474_v6 = vsel %vm775_vm4, %v7458_v63, -1e+30  ;;  %v7497_v24 = vsel %vm2028_vm5, %v7475_v35, -inf }
 0xab3   : > { %7498 = vmax.xlane.f32.xlu1 %v7497_v24  ;;  %v7494_v14 = vsel %vm2028_vm5, %v7474_v6, -inf }
 0xab4   : > { %7495 = vmax.xlane.f32.xlu0 %v7494_v14 }
 0xab6   : > { %v20474_v53 = vpop.f32.mrb[94].mxu0 }
 0xab7   : > { %v7461_v51 = vmul.f32 0.35355338, %v20474_v53  ;;  %v6992_v3 = vpop.f32.mrb[95].mxu0 }
 0xab8   : > { %v7460_v4 = vmul.f32 0.35355338, %v6992_v3 }
 0xab9   : > { %v7477_v30 = vsel %vm775_vm4, %v7461_v51, -1e+30 }
 0xaba   : > { %v7476_v32 = vsel %vm775_vm4, %v7460_v4, -1e+30  ;;  %v7503_v23 = vsel %vm2028_vm5, %v7477_v30, -inf }
 0xabb   : > { %7504 = vmax.xlane.f32.xlu1 %v7503_v23  ;;  %v7500_v60 = vsel %vm2028_vm5, %v7476_v32, -inf }
 0xabc   : > { %7501 = vmax.xlane.f32.xlu0 %v7500_v60 }
 0xabe   : > { %v20481_v25 = vpop.f32.mrb[96].mxu0 }
 0xabf   : > { %v7463_v57 = vmul.f32 0.35355338, %v20481_v25  ;;  %v7083_v0 = vpop.f32.mrb[97].mxu0 }
 0xac0   : > { %v7462_v29 = vmul.f32 0.35355338, %v7083_v0 }
 0xac1   : > { %v25181_v1 = vsel %vm775_vm4, %v7463_v57, -1e+30 }
 0xac2   : > { %v25185_v47 = vsel %vm775_vm4, %v7462_v29, -1e+30  ;;  %v7509_v52 = vsel %vm2028_vm5, %v25181_v1, -inf }
 0xac3   : > { %7510 = vmax.xlane.f32.xlu1 %v7509_v52  ;;  %v7506_v31 = vsel %vm2028_vm5, %v25185_v47, -inf }
 0xac4   : > { %7507 = vmax.xlane.f32.xlu0 %v7506_v31 }
 0xac6   : > { %v20495_v40 = vpop.f32.mrb[98].mxu0 }
 0xac7   : > { %v7467_v22 = vmul.f32 0.35355338, %v20495_v40  ;;  %v7265_v5 = vpop.f32.mrb[99].mxu0 }
 0xac8   : > { %v7466_v20 = vmul.f32 0.35355338, %v7265_v5 }
 0xac9   : > { %v25193_v41 = vsel %vm775_vm4, %v7467_v22, -1e+30 }
 0xaca   : > { %v25197_v17 = vsel %vm775_vm4, %v7466_v20, -1e+30  ;;  %v7521_v49 = vsel %vm2028_vm5, %v25193_v41, -inf }
 0xacb   : > { %7522 = vmax.xlane.f32.xlu1 %v7521_v49  ;;  %v7518_v15 = vsel %vm2028_vm5, %v25197_v17, -inf }
 0xacc   : > { %7519 = vmax.xlane.f32.xlu0 %v7518_v15 }
 0xace   : > { %v20509_v27 = vpop.f32.mrb[100].mxu0 }
 0xacf   : > { %v7471_v2 = vmul.f32 0.35355338, %v20509_v27  ;;  %v7447_v37 = vpop.f32.mrb[101].mxu0 }
 0xad0   : > { %v7470_v33 = vmul.f32 0.35355338, %v7447_v37 }
 0xad1   : > { %v25205_v39 = vsel %vm775_vm4, %v7471_v2, -1e+30 }
 0xad2   : > { %v25209_v38 = vsel %vm775_vm4, %v7470_v33, -1e+30  ;;  %v7533_v56 = vsel %vm2028_vm5, %v25205_v39, -inf }
 0xad3   : > { %7534 = vmax.xlane.f32.xlu1 %v7533_v56  ;;  %v7530_v9 = vsel %vm2028_vm5, %v25209_v38, -inf }
 0xad4   : > { %7531 = vmax.xlane.f32.xlu0 %v7530_v9 }
 0xb38   : > { %v7493_v44 = vpop.xlane.xlu0 %7492 }
 0xb39   : > { %v7537_v21 = vsub.f32 %v7473_v12, %v7493_v44  ;;  %v7490_v13 = vpop.xlane.xlu1 %7489 }
 0xb3a   : > { %v7536_v58 = vsub.f32 %v7472_v55, %v7490_v13 }
 0xb3b   : > { %v7554_v42 = vmul.f32 1.442695, %v7537_v21 }
 0xb3c   : > { %v7552_v48 = vmul.f32 1.442695, %v7536_v58 }
 0xb3d   : > { %22987 = vpow2.f32 %v7554_v42 }
 0xb3e   : > { %22989 = vpow2.f32 %v7552_v48 }
 0xb40   : > { %v7499_v46 = vpop.xlane.xlu1 %7498 }
 0xb41   : > { %v7539_v50 = vsub.f32 %v7475_v35, %v7499_v46  ;;  %v7496_v28 = vpop.xlane.xlu0 %7495 }
 0xb42   : > { %v7538_v61 = vsub.f32 %v7474_v6, %v7496_v28 }
 0xb43   : > { %v7558_v18 = vmul.f32 1.442695, %v7539_v50 }
 0xb44   : > { %v7556_v45 = vmul.f32 1.442695, %v7538_v61 }
 0xb45   : > { %22991 = vpow2.f32 %v7558_v18 }
 0xb46   : > { %22993 = vpow2.f32 %v7556_v45 }
 0xb47   : > { %v25215_v8 = vpop.eup %22987 }
 0xb48   : > { %v25217_v26 = vpop.eup %22989  ;;  %v7505_v11 = vpop.xlane.xlu1 %7504  ;;  %v7587_v12 = vsel %vm2028_vm5, %v25215_v8, 0.0 }
 0xb49   : > { %v7541_v55 = vsub.f32 %v7477_v30, %v7505_v11  ;;  %v7502_v63 = vpop.xlane.xlu0 %7501  ;;  %7588 = vadd.xlane.f32.xlu1 %v7587_v12  ;;  %v7584_v35 = vsel %vm2028_vm5, %v25217_v26, 0.0 }
 0xb4a   : > { %v7540_v24 = vsub.f32 %v7476_v32, %v7502_v63  ;;  %7585 = vadd.xlane.f32.xlu0 %v7584_v35 }
 0xb4b   : > { %v7562_v6 = vmul.f32 1.442695, %v7541_v55 }
 0xb4c   : > { %v7560_v14 = vmul.f32 1.442695, %v7540_v24 }
 0xb4d   : > { %22995 = vpow2.f32 %v7562_v6 }
 0xb4e   : > { %22997 = vpow2.f32 %v7560_v14 }
 0xb4f   : > { %v25223_v53 = vpop.eup %22991 }
 0xb50   : > { %v25225_v51 = vpop.eup %22993  ;;  %v7511_v3 = vpop.xlane.xlu1 %7510  ;;  %v7593_v4 = vsel %vm2028_vm5, %v25223_v53, 0.0 }
 0xb51   : > { %v7543_v30 = vsub.f32 %v25181_v1, %v7511_v3  ;;  %v7508_v23 = vpop.xlane.xlu0 %7507  ;;  %7594 = vadd.xlane.f32.xlu1 %v7593_v4  ;;  %v7590_v32 = vsel %vm2028_vm5, %v25225_v51, 0.0 }
 0xb52   : > { %v7542_v60 = vsub.f32 %v25185_v47, %v7508_v23  ;;  %7591 = vadd.xlane.f32.xlu0 %v7590_v32 }
 0xb53   : > { %v7566_v25 = vmul.f32 1.442695, %v7543_v30 }
 0xb54   : > { %v7564_v57 = vmul.f32 1.442695, %v7542_v60 }
 0xb55   : > { %22999 = vpow2.f32 %v7566_v25 }
 0xb56   : > { %23001 = vpow2.f32 %v7564_v57 }
 0xb57   : > { %v25233_v0 = vpop.eup %22995 }
 0xb58   : > { %v25235_v29 = vpop.eup %22997  ;;  %v7523_v52 = vpop.xlane.xlu1 %7522  ;;  %v7599_v1 = vsel %vm2028_vm5, %v25233_v0, 0.0 }
 0xb59   : > { %v7547_v31 = vsub.f32 %v25193_v41, %v7523_v52  ;;  %v7520_v40 = vpop.xlane.xlu0 %7519  ;;  %7600 = vadd.xlane.f32.xlu1 %v7599_v1  ;;  %v7596_v47 = vsel %vm2028_vm5, %v25235_v29, 0.0 }
 0xb5a   : > { %v7546_v22 = vsub.f32 %v25197_v17, %v7520_v40  ;;  %7597 = vadd.xlane.f32.xlu0 %v7596_v47 }
 0xb5b   : > { %v7574_v5 = vmul.f32 1.442695, %v7547_v31 }
 0xb5c   : > { %v7572_v20 = vmul.f32 1.442695, %v7546_v22 }
 0xb5d   : > { %23003 = vpow2.f32 %v7574_v5 }
 0xb5e   : > { %23005 = vpow2.f32 %v7572_v20 }
 0xb5f   : > { %v25243_v49 = vpop.eup %22999 }
 0xb60   : > { %v25245_v15 = vpop.eup %23001  ;;  %v7605_v27 = vsel %vm2028_vm5, %v25243_v49, 0.0  ;;  %v7535_v55 = vpop.xlane.xlu1 %7534 }
 0xb61   : > { %7606 = vadd.xlane.f32.xlu1 %v7605_v27  ;;  %v7602_v41 = vsel %vm2028_vm5, %v25245_v15, 0.0  ;;  %v7532_v63 = vpop.xlane.xlu0 %7531  ;;  %v7551_v35 = vsub.f32 %v25205_v39, %v7535_v55 }
 0xb62   : > { %7603 = vadd.xlane.f32.xlu0 %v7602_v41  ;;  %v7550_v24 = vsub.f32 %v25209_v38, %v7532_v63 }
 0xb63   : > { %v7582_v6 = vmul.f32 1.442695, %v7551_v35 }
 0xb64   : > { %v7580_v14 = vmul.f32 1.442695, %v7550_v24 }
 0xb65   : > { %23007 = vpow2.f32 %v7582_v6 }
 0xb66   : > { %23009 = vpow2.f32 %v7580_v14 }
 0xb67   : > { %v25251_v2 = vpop.eup %23003 }
 0xb68   : > { %v25253_v17 = vpop.eup %23005  ;;  %v7617_v37 = vsel %vm2028_vm5, %v25251_v2, 0.0 }
 0xb69   : > { %7618 = vadd.xlane.f32.xlu1 %v7617_v37  ;;  %v7614_v33 = vsel %vm2028_vm5, %v25253_v17, 0.0 }
 0xb6a   : > { %7615 = vadd.xlane.f32.xlu0 %v7614_v33 }
 0xb6f   : > { %v25277_v3 = vpop.eup %23007 }
 0xb70   : > { %v25279_v4 = vpop.eup %23009 }
 0xb76   : > { %v20488_v56 = vpop.f32.mrb[78].mxu1 }
 0xb77   : > { %v7465_v9 = vmul.f32 0.35355338, %v20488_v56  ;;  %v7174_v44 = vpop.f32.mrb[79].mxu1 }
 0xb78   : > { %v7464_v21 = vmul.f32 0.35355338, %v7174_v44 }
 0xb79   : > { %v7481_v13 = vsel %vm775_vm4, %v7465_v9, -1e+30 }
 0xb7a   : > { %v7480_v58 = vsel %vm775_vm4, %v7464_v21, -1e+30  ;;  %v7515_v42 = vsel %vm2028_vm5, %v7481_v13, -inf }
 0xb7b   : > { %7516 = vmax.xlane.f32.xlu1 %v7515_v42  ;;  %v7512_v48 = vsel %vm2028_vm5, %v7480_v58, -inf }
 0xb7c   : > { %7513 = vmax.xlane.f32.xlu0 %v7512_v48 }
 0xb7e   : > { %v20502_v46 = vpop.f32.mrb[80].mxu1 }
 0xb7f   : > { %v7469_v50 = vmul.f32 0.35355338, %v20502_v46  ;;  %v7356_v28 = vpop.f32.mrb[81].mxu1 }
 0xb80   : > { %v7468_v61 = vmul.f32 0.35355338, %v7356_v28 }
 0xb81   : > { %v7485_v18 = vsel %vm775_vm4, %v7469_v50, -1e+30 }
 0xb82   : > { %v7484_v45 = vsel %vm775_vm4, %v7468_v61, -1e+30  ;;  %v7527_v11 = vsel %vm2028_vm5, %v7485_v18, -inf }
 0xb83   : > { %7528 = vmax.xlane.f32.xlu1 %v7527_v11  ;;  %v7524_v12 = vsel %vm2028_vm5, %v7484_v45, -inf }
 0xb84   : > { %7525 = vmax.xlane.f32.xlu0 %v7524_v12 }
 0xb94   : > { %22521 = vrot.lane.b32.xlu1 %v23821_v16, %s23446_s25  ;;  %v7629_v16 = vsel %vm2028_vm5, %v25277_v3, 0.0 }
 0xb9a   : > { %22516 = vrot.lane.b32.xlu0 %v28372_v36, %s23446_s25  ;;  %v7626_v36 = vsel %vm2028_vm5, %v25279_v4, 0.0 }
 0xbb8   : > { %7630 = vadd.xlane.f32.xlu1 %v7629_v16 }
 0xbb9   : > { %7627 = vadd.xlane.f32.xlu0 %v7626_v36 }
 0xbc9   : > { %22531 = vrot.lane.b32.xlu1 %v28351_v34, %s23446_s25 }
 0xbcf   : > { %22526 = vrot.lane.b32.xlu0 %v28373_v10, %s23446_s25 }
 0xbd3   : > { %22536 = vrot.lane.b32.xlu0 %v28375_v54, %s23446_s25 }
 0xbd6   : > { %v7589_v34 = vpop.xlane.xlu1 %7588 }
 0xbd7   : > { %v7586_v39 = vpop.xlane.xlu0 %7585 }
 0xbd8   : > { %23011 = vrcp.f32 %v7586_v39 }
 0xbde   : > { %v7595_v10 = vpop.xlane.xlu1 %7594 }
 0xbdf   : > { %v7592_v30 = vpop.xlane.xlu0 %7591 }
 0xbe2   : > { %v23012_v38 = vpop.eup %23011 }
 0xbe3   : > { %v7648_v23 = vmul.f32 %v23012_v38, %v25217_v26 }
 0xbe5   : > { %20514 = vmatprep.mubr.msk.f32.mxu1 %vm2028_vm5, %v7648_v23 }
 0xbe6   : > { %v25295_v57 = vpop.xlane.xlu1 %7600 }
 0xbe7   : > { %v7598_v32 = vpop.xlane.xlu0 %7597 }
 0xbe8   : > { %23013 = vrcp.f32 %v7598_v32 }
 0xbee   : > { %v7607_v54 = vpop.xlane.xlu1 %7606 }
 0xbef   : > { %v7604_v52 = vpop.xlane.xlu0 %7603 }
 0xbf2   : > { %v23014_v60 = vpop.eup %23013 }
 0xbf3   : > { %v7652_v25 = vmul.f32 %v23014_v60, %v25235_v29 }
 0xbf5   : > { %20528 = vmatprep.mubr.msk.f32.mxu0 %vm2028_vm5, %v7652_v25 }
 0xbf6   : > { %v25297_v1 = vpop.xlane.xlu1 %7618 }
 0xbf7   : > { %v7616_v31 = vpop.xlane.xlu0 %7615 }
 0xc08   : > { %v7517_v40 = vpop.xlane.xlu1 %7516 }
 0xc09   : > { %v7545_v26 = vsub.f32 %v7481_v13, %v7517_v40  ;;  %v7514_v47 = vpop.xlane.xlu0 %7513 }
 0xc0a   : > { %v7544_v22 = vsub.f32 %v7480_v58, %v7514_v47 }
 0xc0b   : > { %v7570_v5 = vmul.f32 1.442695, %v7545_v26 }
 0xc0c   : > { %v7568_v20 = vmul.f32 1.442695, %v7544_v22 }
 0xc0d   : > { %23015 = vpow2.f32 %v7570_v5 }
 0xc0e   : > { %23017 = vpow2.f32 %v7568_v20 }
 0xc0f   : > { %23019 = vrcp.f32 %v7589_v34 }
 0xc10   : > { %23021 = vrcp.f32 %v7592_v30  ;;  %v7529_v29 = vpop.xlane.xlu1 %7528 }
 0xc11   : > { %v7549_v27 = vsub.f32 %v7485_v18, %v7529_v29  ;;  %v7526_v41 = vpop.xlane.xlu0 %7525  ;;  %23023 = vrcp.f32 %v7595_v10 }
 0xc12   : > { %v7548_v37 = vsub.f32 %v7484_v45, %v7526_v41  ;;  %23025 = vrcp.f32 %v7604_v52 }
 0xc13   : > { %v7578_v33 = vmul.f32 1.442695, %v7549_v27 }
 0xc14   : > { %v7576_v56 = vmul.f32 1.442695, %v7548_v37  ;;  %v22522_v9 = vpop.permute.xlu1 %22521 }
 0xc15   : > { %23027 = vpow2.f32 %v7578_v33  ;;  %v22517_v44 = vpop.permute.xlu0 %22516  ;;  %v22524_v21 = vunpack.i.h.bf16 %v22522_v9  ;;  %v22523_v13 = vunpack.i.l.bf16 %v22522_v9 }
 0xc16   : > { %v22519_v58 = vunpack.i.h.bf16 %v22517_v44  ;;  %v22518_v42 = vunpack.i.l.bf16 %v22517_v44  ;;  %23029 = vpow2.f32 %v7576_v56 }
 0xc17   : > { %v25299_v48 = vpop.eup %23015  ;;  %v21743_v11 = vpack.c.bf16 %v22524_v21, %v22523_v13  ;;  %23031 = vrcp.f32 %v7607_v54 }
 0xc18   : > { %v25301_v46 = vpop.eup %23017  ;;  %v7611_v50 = vsel %vm2028_vm5, %v25299_v48, 0.0  ;;  %v21739_v28 = vpack.c.bf16 %v22519_v58, %v22518_v42  ;;  %23033 = vrcp.f32 %v25295_v57 }
 0xc19   : > { %v23020_v61 = vpop.eup %23019  ;;  %7612 = vadd.xlane.f32.xlu1 %v7611_v50  ;;  %v7608_v18 = vsel %vm2028_vm5, %v25301_v46, 0.0  ;;  %23035 = vrcp.f32 %v7616_v31  ;;  %v1299_v50 = vld [vmem:[%s28239_s6 + $0x18] sm:$0xff] }
 0xc1a   : > { %v23022_v45 = vpop.eup %23021  ;;  %21740 = vmatprep.subr.bf16.mxu1 %v21739_v28  ;;  %7609 = vadd.xlane.f32.xlu0 %v7608_v18  ;;  %v7649_v12 = vmul.f32 %v23020_v61, %v25215_v8  ;;  %23037 = vrcp.f32 %v25297_v1 }
 0xc1b   : > { %21742 = vmatpush3.bf16.msra.mxu1 %v21739_v28  ;;  %v23024_v55 = vpop.eup %23023  ;;  %v7650_v63 = vmul.f32 %v23022_v45, %v25225_v51 }
 0xc1c   : > { %21744 = vmatprep.subr.bf16.mxu1 %v21743_v11  ;;  %v23026_v35 = vpop.eup %23025  ;;  %v7651_v14 = vmul.f32 %v23024_v55, %v25223_v53 }
 0xc1d   : > { %v7654_v8 = vmul.f32 %v23026_v35, %v25245_v15 }
 0xc1e   : > { %20515 = vmatmul.mubr.msk.f32.vlgmr.msra.gmra.mrb[82].mxu1 %vm2028_vm5, %v7649_v12 }
 0xc1f   : > { %v25310_v24 = vpop.eup %23027  ;;  %21746 = vmatpush3.bf16.msra.mxu1 %v21743_v11  ;;  %20521 = vmatprep.mubr.msk.f32.mxu1 %vm2028_vm5, %v7650_v63 }
 0xc20   : > { %v7623_v6 = vsel %vm2028_vm5, %v25310_v24, 0.0  ;;  %v25316_v16 = vpop.eup %23029 }
 0xc21   : > { %7624 = vadd.xlane.f32.xlu1 %v7623_v6  ;;  %v7620_v51 = vsel %vm2028_vm5, %v25316_v16, 0.0 }
 0xc22   : > { %20522 = vmatmul.mubr.msk.f32.vlgmr.msra.gmra.mrb[84].mxu1 %vm2028_vm5, %v7651_v14 }
 0xc23   : > { %20535 = vmatprep.mubr.msk.f32.mxu1 %vm2028_vm5, %v7654_v8 }
 0xc25   : > { %7621 = vadd.xlane.f32.xlu1 %v7620_v51 }
 0xc30   : > { %22541 = vrot.lane.b32.xlu0 %v28352_v62, %s23446_s25  ;;  %v23032_v62 = vpop.eup %23031 }
 0xc31   : > { %v23034_v34 = vpop.eup %23033  ;;  %v7655_v57 = vmul.f32 %v23032_v62, %v25243_v49 }
 0xc32   : > { %v23036_v10 = vpop.eup %23035  ;;  %v7653_v52 = vmul.f32 %v23034_v34, %v25233_v0 }
 0xc33   : > { %v7658_v40 = vmul.f32 %v23036_v10, %v25253_v17  ;;  %v23038_v17 = vpop.eup %23037 }
 0xc34   : > { %22551 = vrot.lane.b32.xlu0 %v28353_v59, %s23446_s25  ;;  %v7659_v9 = vmul.f32 %v23038_v17, %v25251_v2 }
 0xc36   : > { %22546 = vrot.lane.b32.xlu1 %v28374_v43, %s23446_s25 }
 0xc45   : > { %v7631_v53 = vpop.xlane.xlu1 %7630 }
 0xc46   : > { %v7628_v15 = vpop.xlane.xlu0 %7627 }
 0xc47   : > { %23039 = vrcp.f32 %v7628_v15 }
 0xc49   : > { %v22532_v36 = vpop.permute.xlu1 %22531 }
 0xc4a   : > { %v22534_v39 = vunpack.i.h.bf16 %v22532_v36  ;;  %v22533_v38 = vunpack.i.l.bf16 %v22532_v36  ;;  %v22527_v30 = vpop.permute.xlu0 %22526 }
 0xc4b   : > { %v22529_v23 = vunpack.i.h.bf16 %v22527_v30  ;;  %v22528_v32 = vunpack.i.l.bf16 %v22527_v30  ;;  %v25373_v30 = vld [vmem:[%s28240_s7] ss:$0 sm:$0xff] }
 0xc4c   : > { %v21751_v60 = vpack.c.bf16 %v22534_v39, %v22533_v38 }
 0xc4d   : > { %v21747_v25 = vpack.c.bf16 %v22529_v23, %v22528_v32 }
 0xc4e   : > { %v22537_v59 = vpop.permute.xlu0 %22536  ;;  %21752 = vmatprep.subr.bf16.mxu1 %v21751_v60 }
 0xc4f   : > { %v22539_v43 = vunpack.i.h.bf16 %v22537_v59  ;;  %v22538_v54 = vunpack.i.l.bf16 %v22537_v59  ;;  %21748 = vmatprep.subr.bf16.mxu0 %v21747_v25  ;;  %21754 = vmatpush3.bf16.msra.mxu1 %v21751_v60  ;;  %v23420_v59 = vld [vmem:[#allocation2] sm:$0xff] }
 0xc50   : > { %21750 = vmatpush3.bf16.msra.mxu0 %v21747_v25  ;;  %v23419_v25 = vld [vmem:[#allocation2 + $0x8] sm:$0xff] }
 0xc51   : > { %v21755_v31 = vpack.c.bf16 %v22539_v43, %v22538_v54  ;;  %v23040_v27 = vpop.eup %23039 }
 0xc52   : > { %20536 = vmatmul.mubr.msk.f32.vlgmr.msra.gmra.mrb[86].mxu1 %vm2028_vm5, %v7655_v57  ;;  %v7662_v58 = vmul.f32 %v23040_v27, %v25279_v4 }
 0xc53   : > { %20529 = vmatmul.mubr.msk.f32.vlgmr.msra.gmra.mrb[102].mxu0 %vm2028_vm5, %v7653_v52  ;;  %21756 = vmatprep.subr.bf16.mxu0 %v21755_v31 }
 0xc54   : > { %20549 = vmatprep.mubr.msk.f32.mxu1 %vm2028_vm5, %v7658_v40  ;;  %21758 = vmatpush3.bf16.msra.mxu0 %v21755_v31 }
 0xca6   : > { %v7613_v26 = vpop.xlane.xlu1 %7612 }
 0xca7   : > { %23041 = vrcp.f32 %v7613_v26  ;;  %v7610_v47 = vpop.xlane.xlu0 %7609  ;;  %v23421_v26 = vld [vmem:[#allocation2 + $0x18] sm:$0xff] }
 0xca8   : > { %23043 = vrcp.f32 %v7610_v47 }
 0xca9   : > { %23045 = vrcp.f32 %v7631_v53 }
 0xcab   : > { %v22542_v0 = vpop.permute.xlu0 %22541 }
 0xcac   : > { %v22544_v49 = vunpack.i.h.bf16 %v22542_v0  ;;  %v22543_v22 = vunpack.i.l.bf16 %v22542_v0  ;;  %v23422_v0 = vld [vmem:[#allocation2 + $0x10] sm:$0xff] }
 0xcae   : > { %v7625_v5 = vpop.xlane.xlu1 %7624  ;;  %v21759_v20 = vpack.c.bf16 %v22544_v49, %v22543_v22 }
 0xcaf   : > { %v22552_v29 = vpop.permute.xlu0 %22551  ;;  %23047 = vrcp.f32 %v7625_v5 }
 0xcb0   : > { %v22554_v41 = vunpack.i.h.bf16 %v22552_v29  ;;  %v22553_v37 = vunpack.i.l.bf16 %v22552_v29  ;;  %21760 = vmatprep.subr.bf16.mxu1 %v21759_v20 }
 0xcb1   : > { %v23042_v33 = vpop.eup %23041  ;;  %21762 = vmatpush3.bf16.msra.mxu1 %v21759_v20 }
 0xcb2   : > { %v23044_v1 = vpop.eup %23043  ;;  %v7622_v56 = vpop.xlane.xlu1 %7621  ;;  %v21767_v44 = vpack.c.bf16 %v22554_v41, %v22553_v37  ;;  %v7657_v42 = vmul.f32 %v23042_v33, %v25299_v48  ;;  %v23423_v41 = vld [vmem:[#allocation2 + $0x28] sm:$0xff]  ;;  %v23424_v33 = vld [vmem:[#allocation2 + $0x20] sm:$0xff] }
 0xcb3   : > { %v23046_v21 = vpop.eup %23045  ;;  %23049 = vrcp.f32 %v7622_v56  ;;  %v7656_v13 = vmul.f32 %v23044_v1, %v25301_v46 }
 0xcb4   : > { %20550 = vmatmul.mubr.msk.f32.vlgmr.msra.gmra.mrb[88].mxu1 %vm2028_vm5, %v7659_v9  ;;  %21768 = vmatprep.subr.bf16.mxu1 %v21767_v44  ;;  %v7663_v46 = vmul.f32 %v23046_v21, %v25277_v3 }
 0xcb5   : > { %20542 = vmatprep.mubr.msk.f32.mxu0 %vm2028_vm5, %v7656_v13  ;;  %21770 = vmatpush3.bf16.msra.mxu1 %v21767_v44 }
 0xcb6   : > { %v22547_v2 = vpop.permute.xlu1 %22546  ;;  %20563 = vmatprep.mubr.msk.f32.mxu1 %vm2028_vm5, %v7662_v58  ;;  %20543 = vmatmul.mubr.msk.f32.vlgmr.msra.gmra.mrb[104].mxu0 %vm2028_vm5, %v7657_v42  ;;  %v23425_v42 = vld [vmem:[#allocation2 + $0x38] sm:$0xff] }
 0xcb7   : > { %v22549_v28 = vunpack.i.h.bf16 %v22547_v2  ;;  %v22548_v61 = vunpack.i.l.bf16 %v22547_v2  ;;  %20566 = vmatprep.subr.mxu1 %v1299_v50  ;;  %v23426_v2 = vld [vmem:[#allocation2 + $0x30] sm:$0xff] }
 0xcb8   : > { %20564 = vmatmul.mubr.msk.f32.vlgmr.msra.gmra.mrb[90].mxu1 %vm2028_vm5, %v7663_v46 }
 0xcb9   : > { %v21763_v4 = vpack.c.bf16 %v22549_v28, %v22548_v61  ;;  %20567 = vmatpush3.msra.mxu1 %v1299_v50  ;;  %v23048_v48 = vpop.eup %23047 }
 0xcba   : > { %v7661_v11 = vmul.f32 %v23048_v48, %v25310_v24 }
 0xcbb   : > { %21764 = vmatprep.subr.bf16.mxu0 %v21763_v4 }
 0xcbc   : > { %21766 = vmatpush3.bf16.msra.mxu0 %v21763_v4 }
 0xcbd   : > { %v23050_v18 = vpop.eup %23049 }
 0xcbe   : > { %v7660_v45 = vmul.f32 %v23050_v18, %v25316_v16 }
 0xcc0   : > { %20556 = vmatprep.mubr.msk.f32.mxu0 %vm2028_vm5, %v7660_v45 }
 0xcc1   : > { %20557 = vmatmul.mubr.msk.f32.vlgmr.msra.gmra.mrb[106].mxu0 %vm2028_vm5, %v7661_v11  ;;  %v23427_v11 = vld [vmem:[#allocation2 + $0x48] sm:$0xff] }
 0xcf1   : > { %v20516_v3 = vpop.f32.mrb[82].mxu1 }
 0xcf2   : > { %v7742_v12 = vpop.f32.mrb[83].mxu1 }
 0xcf3   : > { %20568 = vmatprep.mubr.msk.f32.mxu1 %vm592_vm0, %v7742_v12 }
 0xcf4   : > { %20569 = vmatmul.mubr.msk.f32.vlgmr.msra.gmra.mrb[54].mxu1 %vm592_vm0, %v20516_v3 }
 0xcf5   : > { %v20523_v55 = vpop.f32.mrb[84].mxu1 }
 0xcf6   : > { %v7829_v63 = vpop.f32.mrb[85].mxu1 }
 0xcf7   : > { %20571 = vmatprep.mubr.msk.f32.mxu1 %vm592_vm0, %v7829_v63 }
 0xcf8   : > { %20572 = vmatmul.mubr.msk.f32.gmra.mrb[56].mxu1 %vm592_vm0, %v20523_v55  ;;  %v23428_v55 = vld [vmem:[#allocation2 + $0x40] sm:$0xff] }
 0xd25   : > { %v20537_v35 = vpop.f32.mrb[86].mxu1 }
 0xd26   : > { %v20530_v6 = vpop.f32.mrb[102].mxu0  ;;  %v8003_v14 = vpop.f32.mrb[87].mxu1 }
 0xd27   : > { %v7916_v24 = vpop.f32.mrb[103].mxu0 }
 0xd28   : > { %20574 = vmatprep.mubr.msk.f32.mxu1 %vm592_vm0, %v7916_v24 }
 0xd29   : > { %20575 = vmatmul.mubr.msk.f32.gmra.mrb[58].mxu1 %vm592_vm0, %v20530_v6 }
 0xd2a   : > { %20577 = vmatprep.mubr.msk.f32.mxu1 %vm592_vm0, %v8003_v14 }
 0xd2d   : > { %20578 = vmatmul.mubr.msk.f32.gmra.mrb[60].mxu1 %vm592_vm0, %v20537_v35 }
 0xd87   : > { %v20551_v16 = vpop.f32.mrb[88].mxu1 }
 0xd88   : > { %v8177_v8 = vpop.f32.mrb[89].mxu1 }
 0xd89   : > { %v20544_v51 = vpop.f32.mrb[104].mxu0 }
 0xd8a   : > { %v8090_v53 = vpop.f32.mrb[105].mxu0 }
 0xd8b   : > { %v20565_v15 = vpop.f32.mrb[90].mxu1  ;;  %20580 = vmatprep.mubr.msk.f32.mxu1 %vm592_vm0, %v8090_v53 }
 0xd8c   : > { %v8351_v36 = vpop.f32.mrb[91].mxu1  ;;  %20581 = vmatmul.mubr.msk.f32.gmra.mrb[62].mxu1 %vm592_vm0, %v20544_v51 }
 0xd8d   : > { %20583 = vmatprep.mubr.msk.f32.mxu1 %vm592_vm0, %v8177_v8  ;;  %v23429_v8 = vld [vmem:[#allocation2 + $0x58] sm:$0xff] }
 0xd90   : > { %20584 = vmatmul.mubr.msk.f32.gmra.mrb[64].mxu1 %vm592_vm0, %v20551_v16 }
 0xd94   : > { %v20558_v39 = vpop.f32.mrb[106].mxu0 }
 0xd95   : > { %v8264_v38 = vpop.f32.mrb[107].mxu0 }
 0xd96   : > { %20586 = vmatprep.mubr.msk.f32.mxu1 %vm592_vm0, %v8264_v38 }
 0xd97   : > { %20587 = vmatmul.mubr.msk.f32.gmra.mrb[66].mxu1 %vm592_vm0, %v20558_v39 }
 0xd98   : > { %20589 = vmatprep.mubr.msk.f32.mxu1 %vm592_vm0, %v8351_v36  ;;  %v23430_v36 = vld [vmem:[#allocation2 + $0x50] sm:$0xff] }
 0xd9b   : > { %20590 = vmatmul.mubr.msk.f32.gmra.mrb[68].mxu1 %vm592_vm0, %v20565_v15 }
 0xdc7   : > { %v20570_v23 = vpop.f32.mrb[54].mxu1 }
 0xdc8   : > { %v8577_v32 = vadd.f32 %v20570_v23, %v25373_v30  ;;  %v8474_v60 = vpop.f32.mrb[55].mxu1 }
 0xdc9   : > { %v8576_v62 = vadd.f32 %v25373_v30, %v8474_v60 }
 0xdca   : > { %v25377_v34 = vadd.f32 %v23419_v25, %v8577_v32 }
 0xdcb   : > { %v25379_v10 = vadd.f32 %v23420_v59, %v8576_v62  ;;  %v20573_v43 = vpop.f32.mrb[56].mxu1 }
 0xdcc   : > { %v8579_v54 = vadd.f32 %v20573_v43, %v25373_v30  ;;  %v8484_v57 = vpop.f32.mrb[57].mxu1  ;;  %v8613_v52 = vsel %vm722_vm1, %v25377_v34, 0.0 }
 0xdcd   : > { %v8578_v31 = vadd.f32 %v25373_v30, %v8484_v57  ;;  %8614 = vadd.xlane.f32.xlu0 %v8613_v52  ;;  %v8610_v40 = vsel %vm722_vm1, %v25379_v10, 0.0  ;;  %v23431_v52 = vld [vmem:[#allocation2 + $0x68] sm:$0xff] }
 0xdce   : > { %v25387_v47 = vadd.f32 %v23421_v26, %v8579_v54  ;;  %8611 = vadd.xlane.f32.xlu1 %v8610_v40  ;;  %v23432_v40 = vld [vmem:[#allocation2 + $0x60] sm:$0xff] }
 0xdcf   : > { %v25389_v49 = vadd.f32 %v23422_v0, %v8578_v31 }
 0xdd0   : > { %v8619_v22 = vsel %vm722_vm1, %v25387_v47, 0.0 }
 0xdd1   : > { %v8616_v5 = vsel %vm722_vm1, %v25389_v49, 0.0 }
 0xdd2   : > { %8620 = vadd.xlane.f32.xlu1 %v8619_v22  ;;  %8617 = vadd.xlane.f32.xlu0 %v8616_v5 }
 0xdfc   : > { %v20576_v20 = vpop.f32.mrb[58].mxu1 }
 0xdfd   : > { %v8581_v17 = vadd.f32 %v20576_v20, %v25373_v30  ;;  %v8494_v29 = vpop.f32.mrb[59].mxu1 }
 0xdfe   : > { %v8580_v27 = vadd.f32 %v25373_v30, %v8494_v29 }
 0xdff   : > { %v25397_v37 = vadd.f32 %v23423_v41, %v8581_v17 }
 0xe00   : > { %v25399_v1 = vadd.f32 %v23424_v33, %v8580_v27  ;;  %v20579_v56 = vpop.f32.mrb[60].mxu1 }
 0xe01   : > { %v8583_v9 = vadd.f32 %v20579_v56, %v25373_v30  ;;  %v8504_v44 = vpop.f32.mrb[61].mxu1  ;;  %v8625_v21 = vsel %vm722_vm1, %v25397_v37, 0.0 }
 0xe02   : > { %v8582_v13 = vadd.f32 %v25373_v30, %v8504_v44  ;;  %8626 = vadd.xlane.f32.xlu1 %v8625_v21  ;;  %v8622_v58 = vsel %vm722_vm1, %v25399_v1, 0.0  ;;  %v23434_v44 = vld [vmem:[#allocation2 + $0x70] sm:$0xff] }
 0xe03   : > { %v25407_v50 = vadd.f32 %v23425_v42, %v8583_v9  ;;  %8623 = vadd.xlane.f32.xlu0 %v8622_v58  ;;  %v23433_v9 = vld [vmem:[#allocation2 + $0x78] sm:$0xff] }
 0xe04   : > { %v25409_v46 = vadd.f32 %v23426_v2, %v8582_v13 }
 0xe05   : > { %v8631_v28 = vsel %vm722_vm1, %v25407_v50, 0.0 }
 0xe06   : > { %8632 = vadd.xlane.f32.xlu1 %v8631_v28  ;;  %v8628_v61 = vsel %vm722_vm1, %v25409_v46, 0.0 }
 0xe07   : > { %8629 = vadd.xlane.f32.xlu0 %v8628_v61 }
 0xe5a   : > { %v8615_v15 = vpop.xlane.xlu0 %8614 }
 0xe5b   : > { %v8612_v16 = vpop.xlane.xlu1 %8611  ;;  %v8660_v60 = vmul.f32 0.03125, %v8615_v15 }
 0xe5c   : > { %v8659_v59 = vmul.f32 0.03125, %v8612_v16 }
 0xe5d   : > { %v25442_v22 = vsub.f32 %v25377_v34, %v8660_v60 }
 0xe5e   : > { %v25448_v27 = vsub.f32 %v25379_v10, %v8659_v59 }
 0xe5f   : > { %v20582_v4 = vpop.f32.mrb[62].mxu1  ;;  %v8621_v43 = vpop.xlane.xlu1 %8620 }
 0xe60   : > { %v8585_v48 = vadd.f32 %v20582_v4, %v25373_v30  ;;  %v8514_v18 = vpop.f32.mrb[63].mxu1  ;;  %v8618_v57 = vpop.xlane.xlu0 %8617  ;;  %v8662_v5 = vmul.f32 0.03125, %v8621_v43  ;;  %v8691_v2 = vmul.f32 %v25448_v27, %v25448_v27 }
 0xe61   : > { %v8584_v45 = vadd.f32 %v25373_v30, %v8514_v18  ;;  %v8661_v41 = vmul.f32 0.03125, %v8618_v57 }
 0xe62   : > { %v25417_v3 = vadd.f32 %v23427_v11, %v8585_v48  ;;  %v25458_v13 = vsub.f32 %v25387_v47, %v8662_v5  ;;  %v8707_v61 = vsel %vm722_vm1, %v8691_v2, 0.0 }
 0xe63   : > { %v20585_v12 = vpop.f32.mrb[64].mxu1  ;;  %v25419_v63 = vadd.f32 %v23428_v55, %v8584_v45  ;;  %v25465_v58 = vsub.f32 %v25389_v49, %v8661_v41 }
 0xe64   : > { %v8587_v35 = vadd.f32 %v20585_v12, %v25373_v30  ;;  %v8524_v6 = vpop.f32.mrb[65].mxu1  ;;  %v8637_v24 = vsel %vm722_vm1, %v25417_v3, 0.0  ;;  %v8694_v28 = vmul.f32 %v25458_v13, %v25458_v13 }
 0xe65   : > { %v8586_v14 = vadd.f32 %v25373_v30, %v8524_v6  ;;  %8638 = vadd.xlane.f32.xlu1 %v8637_v24  ;;  %v8634_v53 = vsel %vm722_vm1, %v25419_v63, 0.0  ;;  %v8693_v49 = vmul.f32 %v25465_v58, %v25465_v58  ;;  %v8864_v24 = vld [vmem:[%s28241_s8 + $0x8] sm:$0xff] }
 0xe66   : > { %v25425_v51 = vadd.f32 %v23429_v8, %v8587_v35  ;;  %8635 = vadd.xlane.f32.xlu0 %v8634_v53  ;;  %v8716_v4 = vsel %vm722_vm1, %v8694_v28, 0.0 }
 0xe67   : > { %v25429_v39 = vadd.f32 %v23430_v36, %v8586_v14  ;;  %v8713_v48 = vsel %vm722_vm1, %v8693_v49, 0.0  ;;  %v8863_v14 = vld [vmem:[%s28241_s8] sm:$0xff]  ;;  %v8865_v36 = vld [vmem:[%s28241_s8 + $0x10] sm:$0xff] }
 0xe68   : > { %v8643_v38 = vsel %vm722_vm1, %v25425_v51, 0.0  ;;  %v21771_v15 = vpack.c.bf16 %v8864_v24, %v8863_v14 }
 0xe69   : > { %v8640_v23 = vsel %vm722_vm1, %v25429_v39, 0.0  ;;  %8644 = vadd.xlane.f32.xlu1 %v8643_v38  ;;  %v8866_v38 = vld [vmem:[%s28241_s8 + $0x18] sm:$0xff] }
 0xe6a   : > { %v20588_v32 = vpop.f32.mrb[66].mxu1  ;;  %8641 = vadd.xlane.f32.xlu0 %v8640_v23  ;;  %21772 = vmatprep.subr.bf16.mxu0 %v21771_v15  ;;  %v21775_v60 = vpack.c.bf16 %v8866_v38, %v8865_v36 }
 0xe6b   : > { %v8589_v62 = vadd.f32 %v20588_v32, %v25373_v30  ;;  %v8534_v25 = vpop.f32.mrb[67].mxu1  ;;  %21774 = vmatpush3.bf16.msra.mxu0 %v21771_v15 }
 0xe6c   : > { %v8588_v54 = vadd.f32 %v25373_v30, %v8534_v25  ;;  %21776 = vmatprep.subr.bf16.mxu0 %v21775_v60 }
 0xe6d   : > { %v25437_v31 = vadd.f32 %v23431_v52, %v8589_v62 }
 0xe6e   : > { %v25439_v26 = vadd.f32 %v23432_v40, %v8588_v54  ;;  %v20591_v0 = vpop.f32.mrb[68].mxu1 }
 0xe6f   : > { %v8591_v20 = vadd.f32 %v20591_v0, %v25373_v30  ;;  %v8544_v17 = vpop.f32.mrb[69].mxu1  ;;  %v8649_v29 = vsel %vm722_vm1, %v25437_v31, 0.0  ;;  %21778 = vmatpush3.bf16.msra.mxu0 %v21775_v60 }
 0xe70   : > { %v8590_v33 = vadd.f32 %v25373_v30, %v8544_v17  ;;  %8650 = vadd.xlane.f32.xlu1 %v8649_v29  ;;  %v8646_v56 = vsel %vm722_vm1, %v25439_v26, 0.0  ;;  %v8692_v30 = vmul.f32 %v25442_v22, %v25442_v22 }
 0xe71   : > { %v25453_v34 = vadd.f32 %v23433_v9, %v8591_v20  ;;  %8647 = vadd.xlane.f32.xlu0 %v8646_v56 }
 0xe72   : > { %v25455_v21 = vadd.f32 %v23434_v44, %v8590_v33  ;;  %v8710_v47 = vsel %vm722_vm1, %v8692_v30, 0.0 }
 0xe73   : > { %v8655_v10 = vsel %vm722_vm1, %v25453_v34, 0.0 }
 0xe74   : > { %8656 = vadd.xlane.f32.xlu1 %v8655_v10  ;;  %v8652_v42 = vsel %vm722_vm1, %v25455_v21, 0.0 }
 0xe75   : > { %8653 = vadd.xlane.f32.xlu0 %v8652_v42 }
 0xe78   : > { %8711 = vadd.xlane.f32.xlu1 %v8710_v47 }
 0xe79   : > { %8708 = vadd.xlane.f32.xlu0 %v8707_v61 }
 0xe7c   : > { %8717 = vadd.xlane.f32.xlu1 %v8716_v4 }
 0xe7d   : > { %8714 = vadd.xlane.f32.xlu0 %v8713_v48 }
 0xe8f   : > { %v8627_v18 = vpop.xlane.xlu1 %8626 }
 0xe90   : > { %v8664_v45 = vmul.f32 0.03125, %v8627_v18  ;;  %v8624_v11 = vpop.xlane.xlu0 %8623 }
 0xe91   : > { %v8663_v12 = vmul.f32 0.03125, %v8624_v11 }
 0xe92   : > { %v25480_v55 = vsub.f32 %v25397_v37, %v8664_v45 }
 0xe93   : > { %v25483_v35 = vsub.f32 %v25399_v1, %v8663_v12  ;;  %v8633_v6 = vpop.xlane.xlu1 %8632 }
 0xe94   : > { %v8666_v16 = vmul.f32 0.03125, %v8633_v6  ;;  %v8630_v8 = vpop.xlane.xlu0 %8629  ;;  %v8696_v53 = vmul.f32 %v25480_v55, %v25480_v55 }
 0xe95   : > { %v8665_v37 = vmul.f32 0.03125, %v8630_v8  ;;  %v8695_v1 = vmul.f32 %v25483_v35, %v25483_v35 }
 0xe96   : > { %v25502_v23 = vsub.f32 %v25407_v50, %v8666_v16  ;;  %v8722_v32 = vsel %vm722_vm1, %v8696_v53, 0.0 }
 0xe97   : > { %v25506_v62 = vsub.f32 %v25409_v46, %v8665_v37  ;;  %8723 = vadd.xlane.f32.xlu1 %v8722_v32  ;;  %v8719_v25 = vsel %vm722_vm1, %v8695_v1, 0.0 }
 0xe98   : > { %8720 = vadd.xlane.f32.xlu0 %v8719_v25  ;;  %v8698_v59 = vmul.f32 %v25502_v23, %v25502_v23 }
 0xe99   : > { %v8697_v50 = vmul.f32 %v25506_v62, %v25506_v62 }
 0xe9a   : > { %v8728_v43 = vsel %vm722_vm1, %v8698_v59, 0.0 }
 0xe9b   : > { %8729 = vadd.xlane.f32.xlu1 %v8728_v43  ;;  %v8725_v54 = vsel %vm722_vm1, %v8697_v50, 0.0 }
 0xe9c   : > { %8726 = vadd.xlane.f32.xlu0 %v8725_v54  ;;  %v25566_v54 = vld [vmem:[%s28245_s12] ss:$0 sm:$0xff] }
 0xef2   : > { %v8639_v46 = vpop.xlane.xlu1 %8638 }
 0xef3   : > { %v8668_v57 = vmul.f32 0.03125, %v8639_v46  ;;  %v8636_v52 = vpop.xlane.xlu0 %8635 }
 0xef4   : > { %v8667_v40 = vmul.f32 0.03125, %v8636_v52 }
 0xef5   : > { %v25516_v0 = vsub.f32 %v25417_v3, %v8668_v57 }
 0xef6   : > { %v25519_v5 = vsub.f32 %v25419_v63, %v8667_v40  ;;  %v8645_v20 = vpop.xlane.xlu1 %8644  ;;  %v25573_v40 = vld [vmem:[%s28246_s13] ss:$0 sm:$0xff] }
 0xef7   : > { %v8670_v17 = vmul.f32 0.03125, %v8645_v20  ;;  %v8642_v29 = vpop.xlane.xlu0 %8641  ;;  %v8700_v41 = vmul.f32 %v25516_v0, %v25516_v0 }
 0xef8   : > { %v8669_v33 = vmul.f32 0.03125, %v8642_v29  ;;  %v8699_v56 = vmul.f32 %v25519_v5, %v25519_v5 }
 0xef9   : > { %v25526_v9 = vsub.f32 %v25425_v51, %v8670_v17  ;;  %v8734_v44 = vsel %vm722_vm1, %v8700_v41, 0.0 }
 0xefa   : > { %v25530_v3 = vsub.f32 %v25429_v39, %v8669_v33  ;;  %8735 = vadd.xlane.f32.xlu1 %v8734_v44  ;;  %v8731_v63 = vsel %vm722_vm1, %v8699_v56, 0.0 }
 0xefb   : > { %8732 = vadd.xlane.f32.xlu0 %v8731_v63  ;;  %v8702_v10 = vmul.f32 %v25526_v9, %v25526_v9 }
 0xefc   : > { %v8701_v42 = vmul.f32 %v25530_v3, %v25530_v3 }
 0xefd   : > { %v8651_v30 = vpop.xlane.xlu1 %8650  ;;  %v8740_v51 = vsel %vm722_vm1, %v8702_v10, 0.0 }
 0xefe   : > { %v8672_v2 = vmul.f32 0.03125, %v8651_v30  ;;  %v8648_v47 = vpop.xlane.xlu0 %8647  ;;  %8741 = vadd.xlane.f32.xlu1 %v8740_v51  ;;  %v8737_v39 = vsel %vm722_vm1, %v8701_v42, 0.0 }
 0xeff   : > { %v8671_v28 = vmul.f32 0.03125, %v8648_v47  ;;  %8738 = vadd.xlane.f32.xlu0 %v8737_v39 }
 0xf00   : > { %v25540_v61 = vsub.f32 %v25437_v31, %v8672_v2 }
 0xf01   : > { %v25543_v49 = vsub.f32 %v25439_v26, %v8671_v28  ;;  %v8657_v4 = vpop.xlane.xlu1 %8656 }
 0xf02   : > { %v8674_v48 = vmul.f32 0.03125, %v8657_v4  ;;  %v8654_v18 = vpop.xlane.xlu0 %8653  ;;  %v8704_v45 = vmul.f32 %v25540_v61, %v25540_v61 }
 0xf03   : > { %v8673_v11 = vmul.f32 0.03125, %v8654_v18  ;;  %v8703_v12 = vmul.f32 %v25543_v49, %v25543_v49 }
 0xf04   : > { %v25550_v6 = vsub.f32 %v25453_v34, %v8674_v48  ;;  %v8746_v31 = vsel %vm722_vm1, %v8704_v45, 0.0 }
 0xf05   : > { %v25554_v14 = vsub.f32 %v25455_v21, %v8673_v11  ;;  %8747 = vadd.xlane.f32.xlu1 %v8746_v31  ;;  %v8712_v26 = vpop.xlane.xlu1 %8711  ;;  %v8743_v24 = vsel %vm722_vm1, %v8703_v12, 0.0  ;;  %v9083_v11 = vld [vmem:[%s28243_s10] sm:$0xff]  ;;  %v9084_v12 = vld [vmem:[%s28243_s10 + $0x8] sm:$0xff]  ;;  %v9085_v31 = vld [vmem:[%s28243_s10 + $0x10] sm:$0xff] }
 0xf06   : > { %v8756_v16 = vmul.f32 0.03125, %v8712_v26  ;;  %8744 = vadd.xlane.f32.xlu0 %v8743_v24  ;;  %v8709_v8 = vpop.xlane.xlu0 %8708  ;;  %v8706_v53 = vmul.f32 %v25550_v6, %v25550_v6  ;;  %v21779_v26 = vpack.c.bf16 %v9084_v12, %v9083_v11  ;;  %v9086_v24 = vld [vmem:[%s28243_s10 + $0x18] sm:$0xff] }
 0xf07   : > { %v8755_v15 = vmul.f32 0.03125, %v8709_v8  ;;  %v8705_v34 = vmul.f32 %v25554_v14, %v25554_v14  ;;  %v9087_v8 = vld [vmem:[%s28243_s10 + $0x20] sm:$0xff] }
 0xf08   : > { %v8772_v37 = vadd.f32 1e-05, %v8756_v16  ;;  %v8752_v1 = vsel %vm722_vm1, %v8706_v53, 0.0  ;;  %v21783_v16 = vpack.c.bf16 %v9086_v24, %v9085_v31  ;;  %v9088_v53 = vld [vmem:[%s28243_s10 + $0x28] sm:$0xff]  ;;  %21780 = vmatprep.subr.bf16.mxu1 %v21779_v26 }
 0xf09   : > { %v8771_v36 = vadd.f32 1e-05, %v8755_v15  ;;  %8753 = vadd.xlane.f32.xlu1 %v8752_v1  ;;  %v8718_v21 = vpop.xlane.xlu1 %8717  ;;  %v8749_v38 = vsel %vm722_vm1, %v8705_v34, 0.0  ;;  %21782 = vmatpush3.bf16.msra.mxu1 %v21779_v26  ;;  %v21787_v34 = vpack.c.bf16 %v9088_v53, %v9087_v8 }
 0xf0a   : > { %23051 = vrsqrt.f32 %v8772_v37  ;;  %v8758_v32 = vmul.f32 0.03125, %v8718_v21  ;;  %8750 = vadd.xlane.f32.xlu0 %v8749_v38  ;;  %v8715_v60 = vpop.xlane.xlu0 %8714  ;;  %21784 = vmatprep.subr.bf16.mxu1 %v21783_v16  ;;  %v9090_v21 = vld [vmem:[%s28243_s10 + $0x38] sm:$0xff] }
 0xf0b   : > { %23053 = vrsqrt.f32 %v8771_v36  ;;  %v8757_v25 = vmul.f32 0.03125, %v8715_v60  ;;  %v9089_v36 = vld [vmem:[%s28243_s10 + $0x30] sm:$0xff] }
 0xf0c   : > { %v8774_v59 = vadd.f32 1e-05, %v8758_v32 }
 0xf0d   : > { %v8773_v50 = vadd.f32 1e-05, %v8757_v25  ;;  %21786 = vmatpush3.bf16.msra.mxu1 %v21783_v16 }
 0xf0e   : > { %23055 = vrsqrt.f32 %v8774_v59  ;;  %21788 = vmatprep.subr.bf16.mxu1 %v21787_v34  ;;  %v21791_v59 = vpack.c.bf16 %v9090_v21, %v9089_v36 }
 0xf0f   : > { %23057 = vrsqrt.f32 %v8773_v50 }
 0xf11   : > { %21790 = vmatpush3.bf16.msra.mxu1 %v21787_v34 }
 0xf12   : > { %21792 = vmatprep.subr.bf16.mxu1 %v21791_v59 }
 0xf14   : > { %v23052_v43 = vpop.eup %23051 }
 0xf15   : > { %v23054_v46 = vpop.eup %23053  ;;  %v8804_v57 = vmul.f32 %v23052_v43, %v25442_v22  ;;  %v9091_v43 = vld [vmem:[%s28243_s10 + $0x40] sm:$0xff]  ;;  %21794 = vmatpush3.bf16.msra.mxu1 %v21791_v59 }
 0xf16   : > { %v8803_v52 = vmul.f32 %v23054_v46, %v25448_v27  ;;  %v9092_v46 = vld [vmem:[%s28243_s10 + $0x48] sm:$0xff] }
 0xf17   : > { %v8826_v20 = vmul.f32 %v25566_v54, %v8804_v57 }
 0xf18   : > { %v23056_v17 = vpop.eup %23055  ;;  %v8825_v29 = vmul.f32 %v25566_v54, %v8803_v52 }
 0xf19   : > { %v23058_v41 = vpop.eup %23057  ;;  %v8806_v33 = vmul.f32 %v23056_v17, %v25458_v13  ;;  %v25583_v27 = vadd.f32 %v25573_v40, %v8826_v20  ;;  %v21795_v17 = vpack.c.bf16 %v9092_v46, %v9091_v43 }
 0xf1a   : > { %v25579_v56 = vadd.f32 %v25573_v40, %v8825_v29  ;;  %v8805_v22 = vmul.f32 %v23058_v41, %v25465_v58  ;;  %v9094_v29 = vld [vmem:[%s28243_s10 + $0x58] sm:$0xff] }
 0xf1b   : > { %v8828_v44 = vmul.f32 %v25566_v54, %v8806_v33  ;;  %21796 = vmatprep.subr.bf16.mxu1 %v21795_v17 }
 0xf1c   : > { %20600 = vmatprep.mubr.msk.f32.mxu0 %vm722_vm1, %v25579_v56  ;;  %v8827_v63 = vmul.f32 %v25566_v54, %v8805_v22  ;;  %21798 = vmatpush3.bf16.msra.mxu1 %v21795_v17 }
 0xf1d   : > { %20601 = vmatmul.mubr.msk.f32.vlgmr.msra.gmra.mrb[108].mxu0 %vm722_vm1, %v25583_v27  ;;  %v25595_v10 = vadd.f32 %v25573_v40, %v8828_v44  ;;  %v9095_v44 = vld [vmem:[%s28243_s10 + $0x60] sm:$0xff] }
 0xf1e   : > { %v25592_v13 = vadd.f32 %v25573_v40, %v8827_v63  ;;  %v9096_v63 = vld [vmem:[%s28243_s10 + $0x68] sm:$0xff] }
 0xf20   : > { %20603 = vmatprep.mubr.msk.f32.mxu0 %vm722_vm1, %v25592_v13 }
 0xf21   : > { %20604 = vmatmul.mubr.msk.f32.gmra.mrb[110].mxu0 %vm722_vm1, %v25595_v10 }
 0xf24   : > { %v8724_v58 = vpop.xlane.xlu1 %8723 }
 0xf25   : > { %v8760_v30 = vmul.f32 0.03125, %v8724_v58  ;;  %v8721_v42 = vpop.xlane.xlu0 %8720  ;;  %v21803_v58 = vpack.c.bf16 %v9096_v63, %v9095_v44 }
 0xf26   : > { %v8759_v2 = vmul.f32 0.03125, %v8721_v42  ;;  %v9098_v42 = vld [vmem:[%s28243_s10 + $0x78] sm:$0xff] }
 0xf27   : > { %v8776_v47 = vadd.f32 1e-05, %v8760_v30  ;;  %v9097_v30 = vld [vmem:[%s28243_s10 + $0x70] sm:$0xff] }
 0xf28   : > { %v8775_v51 = vadd.f32 1e-05, %v8759_v2  ;;  %v8730_v28 = vpop.xlane.xlu1 %8729  ;;  %v21807_v2 = vpack.c.bf16 %v9098_v42, %v9097_v30 }
 0xf29   : > { %23059 = vrsqrt.f32 %v8776_v47  ;;  %v8762_v39 = vmul.f32 0.03125, %v8730_v28  ;;  %v8727_v4 = vpop.xlane.xlu0 %8726 }
 0xf2a   : > { %23061 = vrsqrt.f32 %v8775_v51  ;;  %v8761_v48 = vmul.f32 0.03125, %v8727_v4 }
 0xf2b   : > { %v8778_v18 = vadd.f32 1e-05, %v8762_v39 }
 0xf2c   : > { %v8777_v45 = vadd.f32 1e-05, %v8761_v48 }
 0xf2d   : > { %23063 = vrsqrt.f32 %v8778_v18 }
 0xf2e   : > { %23065 = vrsqrt.f32 %v8777_v45 }
 0xf33   : > { %v23060_v15 = vpop.eup %23059 }
 0xf34   : > { %v23062_v37 = vpop.eup %23061  ;;  %v8808_v1 = vmul.f32 %v23060_v15, %v25480_v55 }
 0xf35   : > { %v8807_v38 = vmul.f32 %v23062_v37, %v25483_v35 }
 0xf36   : > { %v8830_v32 = vmul.f32 %v25566_v54, %v8808_v1 }
 0xf37   : > { %v23064_v60 = vpop.eup %23063  ;;  %v8829_v25 = vmul.f32 %v25566_v54, %v8807_v38 }
 0xf38   : > { %v23066_v50 = vpop.eup %23065  ;;  %v8810_v55 = vmul.f32 %v23064_v60, %v25502_v23  ;;  %v25641_v52 = vadd.f32 %v25573_v40, %v8830_v32 }
 0xf39   : > { %v25637_v35 = vadd.f32 %v25573_v40, %v8829_v25  ;;  %v8809_v57 = vmul.f32 %v23066_v50, %v25506_v62  ;;  %v9093_v62 = vld [vmem:[%s28243_s10 + $0x50] sm:$0xff] }
 0xf3a   : > { %v8832_v20 = vmul.f32 %v25566_v54, %v8810_v55  ;;  %v21799_v22 = vpack.c.bf16 %v9094_v29, %v9093_v62 }
 0xf3b   : > { %20606 = vmatprep.mubr.msk.f32.mxu0 %vm722_vm1, %v25637_v35  ;;  %v8831_v23 = vmul.f32 %v25566_v54, %v8809_v57 }
 0xf3c   : > { %20607 = vmatmul.mubr.msk.f32.gmra.mrb[112].mxu0 %vm722_vm1, %v25641_v52  ;;  %v25659_v33 = vadd.f32 %v25573_v40, %v8832_v20  ;;  %21800 = vmatprep.subr.bf16.mxu1 %v21799_v22 }
 0xf3d   : > { %v25656_v41 = vadd.f32 %v25573_v40, %v8831_v23  ;;  %21802 = vmatpush3.bf16.msra.mxu1 %v21799_v22 }
 0xf3e   : > { %21804 = vmatprep.subr.bf16.mxu1 %v21803_v58 }
 0xf3f   : > { %20609 = vmatprep.mubr.msk.f32.mxu0 %vm722_vm1, %v25656_v41 }
 0xf40   : > { %20610 = vmatmul.mubr.msk.f32.gmra.mrb[114].mxu0 %vm722_vm1, %v25659_v33 }
 0xf41   : > { %21806 = vmatpush3.bf16.msra.mxu1 %v21803_v58 }
 0xf42   : > { %21808 = vmatprep.subr.bf16.mxu1 %v21807_v2 }
 0xf45   : > { %21810 = vmatpush3.bf16.msra.mxu1 %v21807_v2 }
 0xf87   : > { %v8736_v47 = vpop.xlane.xlu1 %8735 }
 0xf88   : > { %v8764_v51 = vmul.f32 0.03125, %v8736_v47  ;;  %v8733_v28 = vpop.xlane.xlu0 %8732 }
 0xf89   : > { %v8763_v39 = vmul.f32 0.03125, %v8733_v28 }
 0xf8a   : > { %v8780_v4 = vadd.f32 1e-05, %v8764_v51 }
 0xf8b   : > { %v8779_v48 = vadd.f32 1e-05, %v8763_v39  ;;  %v8742_v18 = vpop.xlane.xlu1 %8741 }
 0xf8c   : > { %23067 = vrsqrt.f32 %v8780_v4  ;;  %v8766_v45 = vmul.f32 0.03125, %v8742_v18  ;;  %v8739_v11 = vpop.xlane.xlu0 %8738 }
 0xf8d   : > { %23069 = vrsqrt.f32 %v8779_v48  ;;  %v8765_v12 = vmul.f32 0.03125, %v8739_v11 }
 0xf8e   : > { %v8782_v31 = vadd.f32 1e-05, %v8766_v45 }
 0xf8f   : > { %v8781_v26 = vadd.f32 1e-05, %v8765_v12 }
 0xf90   : > { %23071 = vrsqrt.f32 %v8782_v31 }
 0xf91   : > { %23073 = vrsqrt.f32 %v8781_v26 }
 0xf92   : > { %v8748_v24 = vpop.xlane.xlu1 %8747 }
 0xf93   : > { %v8768_v16 = vmul.f32 0.03125, %v8748_v24  ;;  %v8745_v8 = vpop.xlane.xlu0 %8744 }
 0xf94   : > { %v8767_v53 = vmul.f32 0.03125, %v8745_v8 }
 0xf95   : > { %v8784_v15 = vadd.f32 1e-05, %v8768_v16 }
 0xf96   : > { %v8783_v34 = vadd.f32 1e-05, %v8767_v53  ;;  %v8754_v37 = vpop.xlane.xlu1 %8753  ;;  %v23068_v1 = vpop.eup %23067 }
 0xf97   : > { %23075 = vrsqrt.f32 %v8784_v15  ;;  %v8770_v36 = vmul.f32 0.03125, %v8754_v37  ;;  %v8751_v21 = vpop.xlane.xlu0 %8750  ;;  %v23070_v38 = vpop.eup %23069  ;;  %v8812_v60 = vmul.f32 %v23068_v1, %v25516_v0 }
 0xf98   : > { %23077 = vrsqrt.f32 %v8783_v34  ;;  %v8769_v32 = vmul.f32 0.03125, %v8751_v21  ;;  %v8811_v59 = vmul.f32 %v23070_v38, %v25519_v5 }
 0xf99   : > { %v8786_v25 = vadd.f32 1e-05, %v8770_v36  ;;  %v8834_v55 = vmul.f32 %v25566_v54, %v8812_v60 }
 0xf9a   : > { %v8785_v50 = vadd.f32 1e-05, %v8769_v32  ;;  %v23072_v43 = vpop.eup %23071  ;;  %v8833_v46 = vmul.f32 %v25566_v54, %v8811_v59 }
 0xf9b   : > { %23079 = vrsqrt.f32 %v8786_v25  ;;  %v23074_v57 = vpop.eup %23073  ;;  %v8814_v20 = vmul.f32 %v23072_v43, %v25526_v9  ;;  %v25687_v0 = vadd.f32 %v25573_v40, %v8834_v55 }
 0xf9c   : > { %23081 = vrsqrt.f32 %v8785_v50  ;;  %v25683_v23 = vadd.f32 %v25573_v40, %v8833_v46  ;;  %v8813_v17 = vmul.f32 %v23074_v57, %v25530_v3 }
 0xf9d   : > { %v8836_v5 = vmul.f32 %v25566_v54, %v8814_v20 }
 0xf9e   : > { %20612 = vmatprep.mubr.msk.f32.mxu0 %vm722_vm1, %v25683_v23  ;;  %v8835_v62 = vmul.f32 %v25566_v54, %v8813_v17 }
 0xf9f   : > { %20613 = vmatmul.mubr.msk.f32.gmra.mrb[116].mxu0 %vm722_vm1, %v25687_v0  ;;  %v25699_v3 = vadd.f32 %v25573_v40, %v8836_v5 }
 0xfa0   : > { %v25696_v9 = vadd.f32 %v25573_v40, %v8835_v62 }
 0xfa1   : > { %v23076_v29 = vpop.eup %23075 }
 0xfa2   : > { %v23078_v22 = vpop.eup %23077  ;;  %v8816_v44 = vmul.f32 %v23076_v29, %v25540_v61  ;;  %20615 = vmatprep.mubr.msk.f32.mxu0 %vm722_vm1, %v25696_v9 }
 0xfa3   : > { %v8815_v63 = vmul.f32 %v23078_v22, %v25543_v49  ;;  %20616 = vmatmul.mubr.msk.f32.gmra.mrb[118].mxu0 %vm722_vm1, %v25699_v3 }
 0xfa4   : > { %v8838_v58 = vmul.f32 %v25566_v54, %v8816_v44 }
 0xfa5   : > { %v23080_v30 = vpop.eup %23079  ;;  %v8837_v42 = vmul.f32 %v25566_v54, %v8815_v63 }
 0xfa6   : > { %v23082_v2 = vpop.eup %23081  ;;  %v8818_v47 = vmul.f32 %v23080_v30, %v25550_v6  ;;  %v25715_v28 = vadd.f32 %v25573_v40, %v8838_v58 }
 0xfa7   : > { %v25711_v51 = vadd.f32 %v25573_v40, %v8837_v42  ;;  %v8817_v61 = vmul.f32 %v23082_v2, %v25554_v14  ;;  %v18644_v14 = vld [vmem:[%s28242_s9] ss:$0 sm:$0xff] }
 0xfa8   : > { %v8840_v49 = vmul.f32 %v25566_v54, %v8818_v47 }
 0xfa9   : > { %20618 = vmatprep.mubr.msk.f32.mxu0 %vm722_vm1, %v25711_v51  ;;  %v8839_v39 = vmul.f32 %v25566_v54, %v8817_v61 }
 0xfaa   : > { %20619 = vmatmul.mubr.msk.f32.gmra.mrb[120].mxu0 %vm722_vm1, %v25715_v28  ;;  %v25727_v4 = vadd.f32 %v25573_v40, %v8840_v49 }
 0xfab   : > { %v25724_v6 = vadd.f32 %v25573_v40, %v8839_v39 }
 0xfad   : > { %20621 = vmatprep.mubr.msk.f32.mxu0 %vm722_vm1, %v25724_v6 }
 0xfae   : > { %20622 = vmatmul.mubr.msk.f32.gmra.mrb[122].mxu0 %vm722_vm1, %v25727_v4 }
 0xff0   : > { %v20602_v54 = vpop.f32.mrb[108].mxu0 }
 0xff1   : > { %v8994_v48 = vadd.f32 %v20602_v54, %v18644_v14  ;;  %v8988_v18 = vpop.f32.mrb[109].mxu0 }
 0xff2   : > { %v8989_v45 = vadd.f32 %v18644_v14, %v8988_v18 }
 0xff3   : > { %v9068_v31 = vmax.f32 %v8994_v48, 0.0 }
 0xff4   : > { %v9067_v11 = vmax.f32 %v8989_v45, 0.0  ;;  %v20605_v12 = vpop.f32.mrb[110].mxu0  ;;  %v25739_v45 = vld [vmem:[%s28244_s11] ss:$0 sm:$0xff] }
 0xff5   : > { %v9004_v26 = vadd.f32 %v20605_v12, %v18644_v14  ;;  %v8998_v40 = vpop.f32.mrb[111].mxu0 }
 0xff6   : > { %v8999_v24 = vadd.f32 %v18644_v14, %v8998_v40  ;;  %20656 = vmatprep.mubr.f32.mxu1 %v9067_v11 }
 0xff7   : > { %20657 = vmatmul.mubr.f32.vlgmr.msra.gmra.mrb[92].mxu1 %v9068_v31  ;;  %v9070_v8 = vmax.f32 %v9004_v26, 0.0 }
 0xff8   : > { %v9069_v16 = vmax.f32 %v8999_v24, 0.0 }
 0xffa   : > { %20659 = vmatprep.mubr.f32.mxu1 %v9069_v16 }
 0xffb   : > { %20660 = vmatmul.mubr.f32.gmra.mrb[94].mxu1 %v9070_v8 }
0x100f   : > { %v20608_v53 = vpop.f32.mrb[112].mxu0 }
0x1010   : > { %v9014_v15 = vadd.f32 %v20608_v53, %v18644_v14  ;;  %v9008_v34 = vpop.f32.mrb[113].mxu0 }
0x1011   : > { %v9009_v37 = vadd.f32 %v18644_v14, %v9008_v34 }
0x1012   : > { %v9072_v21 = vmax.f32 %v9014_v15, 0.0 }
0x1013   : > { %v9071_v1 = vmax.f32 %v9009_v37, 0.0  ;;  %v20611_v36 = vpop.f32.mrb[114].mxu0 }
0x1014   : > { %v9024_v38 = vadd.f32 %v20611_v36, %v18644_v14  ;;  %v9018_v32 = vpop.f32.mrb[115].mxu0 }
0x1015   : > { %v9019_v60 = vadd.f32 %v18644_v14, %v9018_v32  ;;  %20662 = vmatprep.mubr.f32.mxu1 %v9071_v1 }
0x1016   : > { %20663 = vmatmul.mubr.f32.gmra.mrb[96].mxu1 %v9072_v21  ;;  %v9074_v59 = vmax.f32 %v9024_v38, 0.0 }
0x1017   : > { %v9073_v25 = vmax.f32 %v9019_v60, 0.0 }
0x1019   : > { %20665 = vmatprep.mubr.f32.mxu1 %v9073_v25 }
0x101a   : > { %20666 = vmatmul.mubr.f32.gmra.mrb[98].mxu1 %v9074_v59 }
0x1072   : > { %v20614_v50 = vpop.f32.mrb[116].mxu0 }
0x1073   : > { %v9034_v55 = vadd.f32 %v20614_v50, %v18644_v14  ;;  %v9028_v43 = vpop.f32.mrb[117].mxu0 }
0x1074   : > { %v9029_v46 = vadd.f32 %v18644_v14, %v9028_v43 }
0x1075   : > { %v9076_v17 = vmax.f32 %v9034_v55, 0.0 }
0x1076   : > { %v9075_v57 = vmax.f32 %v9029_v46, 0.0  ;;  %v20617_v20 = vpop.f32.mrb[118].mxu0 }
0x1077   : > { %v9044_v5 = vadd.f32 %v20617_v20, %v18644_v14  ;;  %v9038_v62 = vpop.f32.mrb[119].mxu0 }
0x1078   : > { %v9039_v29 = vadd.f32 %v18644_v14, %v9038_v62  ;;  %20668 = vmatprep.mubr.f32.mxu1 %v9075_v57 }
0x1079   : > { %20669 = vmatmul.mubr.f32.gmra.mrb[100].mxu1 %v9076_v17  ;;  %v9078_v44 = vmax.f32 %v9044_v5, 0.0 }
0x107a   : > { %v9077_v22 = vmax.f32 %v9039_v29, 0.0 }
0x107c   : > { %20671 = vmatprep.mubr.f32.mxu1 %v9077_v22 }
0x107d   : > { %v20620_v63 = vpop.f32.mrb[120].mxu0  ;;  %20672 = vmatmul.mubr.f32.gmra.mrb[102].mxu1 %v9078_v44 }
0x107e   : > { %v9054_v58 = vadd.f32 %v20620_v63, %v18644_v14  ;;  %v9048_v30 = vpop.f32.mrb[121].mxu0 }
0x107f   : > { %v9049_v42 = vadd.f32 %v18644_v14, %v9048_v30 }
0x1080   : > { %v9080_v61 = vmax.f32 %v9054_v58, 0.0 }
0x1081   : > { %v9079_v2 = vmax.f32 %v9049_v42, 0.0  ;;  %v20623_v47 = vpop.f32.mrb[122].mxu0 }
0x1082   : > { %v9064_v49 = vadd.f32 %v20623_v47, %v18644_v14  ;;  %v9058_v39 = vpop.f32.mrb[123].mxu0 }
0x1083   : > { %v9059_v54 = vadd.f32 %v18644_v14, %v9058_v39  ;;  %20674 = vmatprep.mubr.f32.mxu1 %v9079_v2 }
0x1084   : > { %20675 = vmatmul.mubr.f32.gmra.mrb[104].mxu1 %v9080_v61  ;;  %v9082_v18 = vmax.f32 %v9064_v49, 0.0 }
0x1085   : > { %v9081_v48 = vmax.f32 %v9059_v54, 0.0 }
0x1087   : > { %20677 = vmatprep.mubr.f32.mxu1 %v9081_v48 }
0x1088   : > { %20678 = vmatmul.mubr.f32.gmra.mrb[106].mxu1 %v9082_v18 }
0x10ca   : > { %v20658_v11 = vpop.f32.mrb[92].mxu1 }
0x10cb   : > { %v9178_v12 = vadd.f32 %v20658_v11, %v25739_v45  ;;  %v9172_v31 = vpop.f32.mrb[93].mxu1 }
0x10cc   : > { %v9173_v26 = vadd.f32 %v25739_v45, %v9172_v31 }
0x10cd   : > { %v25744_v40 = vadd.f32 %v9178_v12, %v25583_v27 }
0x10ce   : > { %v25747_v14 = vadd.f32 %v9173_v26, %v25579_v56  ;;  %v20661_v24 = vpop.f32.mrb[94].mxu1 }
0x10cf   : > { %v9188_v16 = vadd.f32 %v20661_v24, %v25739_v45  ;;  %v9182_v8 = vpop.f32.mrb[95].mxu1  ;;  %v9272_v53 = vsel %vm722_vm1, %v25744_v40, 0.0 }
0x10d0   : > { %v9183_v15 = vadd.f32 %v25739_v45, %v9182_v8  ;;  %9273 = vadd.xlane.f32.xlu1 %v9272_v53  ;;  %v9269_v34 = vsel %vm722_vm1, %v25747_v14, 0.0 }
0x10d1   : > { %v25756_v37 = vadd.f32 %v9188_v16, %v25595_v10  ;;  %9270 = vadd.xlane.f32.xlu0 %v9269_v34 }
0x10d2   : > { %v25759_v56 = vadd.f32 %v9183_v15, %v25592_v13 }
0x10d3   : > { %v9278_v27 = vsel %vm722_vm1, %v25756_v37, 0.0 }
0x10d4   : > { %9279 = vadd.xlane.f32.xlu1 %v9278_v27  ;;  %v9275_v1 = vsel %vm722_vm1, %v25759_v56, 0.0 }
0x10d5   : > { %9276 = vadd.xlane.f32.xlu0 %v9275_v1 }
0x10e9   : > { %v20664_v36 = vpop.f32.mrb[96].mxu1 }
0x10ea   : > { %v9198_v21 = vadd.f32 %v20664_v36, %v25739_v45  ;;  %v9192_v38 = vpop.f32.mrb[97].mxu1 }
0x10eb   : > { %v9193_v32 = vadd.f32 %v25739_v45, %v9192_v38 }
0x10ec   : > { %v25768_v10 = vadd.f32 %v9198_v21, %v25641_v52 }
0x10ed   : > { %v25771_v13 = vadd.f32 %v9193_v32, %v25637_v35  ;;  %v20667_v60 = vpop.f32.mrb[98].mxu1 }
0x10ee   : > { %v9208_v25 = vadd.f32 %v20667_v60, %v25739_v45  ;;  %v9202_v59 = vpop.f32.mrb[99].mxu1  ;;  %v9284_v50 = vsel %vm722_vm1, %v25768_v10, 0.0 }
0x10ef   : > { %v9203_v55 = vadd.f32 %v25739_v45, %v9202_v59  ;;  %9285 = vadd.xlane.f32.xlu1 %v9284_v50  ;;  %v9281_v43 = vsel %vm722_vm1, %v25771_v13, 0.0 }
0x10f0   : > { %v25780_v46 = vadd.f32 %v9208_v25, %v25659_v33  ;;  %9282 = vadd.xlane.f32.xlu0 %v9281_v43 }
0x10f1   : > { %v25783_v35 = vadd.f32 %v9203_v55, %v25656_v41 }
0x10f2   : > { %v9290_v52 = vsel %vm722_vm1, %v25780_v46, 0.0 }
0x10f3   : > { %9291 = vadd.xlane.f32.xlu1 %v9290_v52  ;;  %v9287_v57 = vsel %vm722_vm1, %v25783_v35, 0.0 }
0x10f4   : > { %9288 = vadd.xlane.f32.xlu0 %v9287_v57 }
0x114c   : > { %v20670_v20 = vpop.f32.mrb[100].mxu1 }
0x114d   : > { %v9218_v17 = vadd.f32 %v20670_v20, %v25739_v45  ;;  %v9212_v5 = vpop.f32.mrb[101].mxu1 }
0x114e   : > { %v9213_v62 = vadd.f32 %v25739_v45, %v9212_v5  ;;  %v18665_v5 = vld [vmem:[%s28237_s4 + $0x68] sm:$0xff] }
0x114f   : > { %v25792_v33 = vadd.f32 %v9218_v17, %v25687_v0  ;;  %v18664_v17 = vld [vmem:[%s28237_s4 + $0x60] sm:$0xff] }
0x1150   : > { %v25795_v41 = vadd.f32 %v9213_v62, %v25683_v23  ;;  %v20673_v29 = vpop.f32.mrb[102].mxu1  ;;  %v18686_v62 = vld [vmem:[%s28237_s4 + $0x80] sm:$0xff] }
0x1151   : > { %v9228_v22 = vadd.f32 %v20673_v29, %v25739_v45  ;;  %v9222_v44 = vpop.f32.mrb[103].mxu1  ;;  %v9296_v63 = vsel %vm722_vm1, %v25792_v33, 0.0 }
0x1152   : > { %v9223_v58 = vadd.f32 %v25739_v45, %v9222_v44  ;;  %9297 = vadd.xlane.f32.xlu1 %v9296_v63  ;;  %v9293_v30 = vsel %vm722_vm1, %v25795_v41, 0.0  ;;  %v18687_v44 = vld [vmem:[%s28237_s4 + $0x88] sm:$0xff] }
0x1153   : > { %v25804_v42 = vadd.f32 %v9228_v22, %v25699_v3  ;;  %9294 = vadd.xlane.f32.xlu0 %v9293_v30  ;;  %v21819_v30 = vpack.c.bf16 %v18687_v44, %v18686_v62 }
0x1154   : > { %v25807_v23 = vadd.f32 %v9223_v58, %v25696_v9 }
0x1155   : > { %v9302_v0 = vsel %vm722_vm1, %v25804_v42, 0.0  ;;  %21820 = vmatprep.subr.bf16.mxu1 %v21819_v30 }
0x1156   : > { %9303 = vadd.xlane.f32.xlu1 %v9302_v0  ;;  %v9299_v47 = vsel %vm722_vm1, %v25807_v23, 0.0  ;;  %21822 = vmatpush3.bf16.msra.mxu1 %v21819_v30 }
0x1157   : > { %v20676_v2 = vpop.f32.mrb[104].mxu1  ;;  %9300 = vadd.xlane.f32.xlu0 %v9299_v47 }
0x1158   : > { %v9238_v61 = vadd.f32 %v20676_v2, %v25739_v45  ;;  %v9232_v49 = vpop.f32.mrb[105].mxu1 }
0x1159   : > { %v9233_v39 = vadd.f32 %v25739_v45, %v9232_v49  ;;  %v18666_v49 = vld [vmem:[%s28237_s4 + $0x70] sm:$0xff] }
0x115a   : > { %v25816_v3 = vadd.f32 %v9238_v61, %v25715_v28 }
0x115b   : > { %v25819_v9 = vadd.f32 %v9233_v39, %v25711_v51  ;;  %v20679_v54 = vpop.f32.mrb[106].mxu1  ;;  %v18667_v39 = vld [vmem:[%s28237_s4 + $0x78] sm:$0xff] }
0x115c   : > { %v9248_v48 = vadd.f32 %v20679_v54, %v25739_v45  ;;  %v9242_v18 = vpop.f32.mrb[107].mxu1  ;;  %v9308_v11 = vsel %vm722_vm1, %v25816_v3, 0.0  ;;  %v21815_v54 = vpack.c.bf16 %v18667_v39, %v18666_v49 }
0x115d   : > { %v9243_v12 = vadd.f32 %v25739_v45, %v9242_v18  ;;  %v9274_v31 = vpop.xlane.xlu1 %9273  ;;  %9309 = vadd.xlane.f32.xlu1 %v9308_v11  ;;  %v9305_v26 = vsel %vm722_vm1, %v25819_v9, 0.0 }
0x115e   : > { %v25828_v28 = vadd.f32 %v9248_v48, %v25727_v4  ;;  %v9318_v24 = vmul.f32 0.03125, %v9274_v31  ;;  %9306 = vadd.xlane.f32.xlu0 %v9305_v26  ;;  %v9271_v51 = vpop.xlane.xlu0 %9270  ;;  %v18689_v48 = vld [vmem:[%s28237_s4 + $0x98] sm:$0xff] }
0x115f   : > { %v25831_v16 = vadd.f32 %v9243_v12, %v25724_v6  ;;  %v9317_v8 = vmul.f32 0.03125, %v9271_v51 }
0x1160   : > { %v25834_v53 = vsub.f32 %v25744_v40, %v9318_v24  ;;  %v9314_v45 = vsel %vm722_vm1, %v25828_v28, 0.0 }
0x1161   : > { %v25839_v15 = vsub.f32 %v25747_v14, %v9317_v8  ;;  %v9280_v34 = vpop.xlane.xlu1 %9279  ;;  %9315 = vadd.xlane.f32.xlu1 %v9314_v45  ;;  %v9311_v4 = vsel %vm722_vm1, %v25831_v16, 0.0 }
0x1162   : > { %v9320_v27 = vmul.f32 0.03125, %v9280_v34  ;;  %9312 = vadd.xlane.f32.xlu0 %v9311_v4  ;;  %v9277_v1 = vpop.xlane.xlu0 %9276  ;;  %v9350_v6 = vmul.f32 %v25834_v53, %v25834_v53 }
0x1163   : > { %v9319_v36 = vmul.f32 0.03125, %v9277_v1  ;;  %v9349_v40 = vmul.f32 %v25839_v15, %v25839_v15 }
0x1164   : > { %v25848_v21 = vsub.f32 %v25756_v37, %v9320_v27  ;;  %v9368_v14 = vsel %vm722_vm1, %v9350_v6, 0.0 }
0x1165   : > { %v25852_v38 = vsub.f32 %v25759_v56, %v9319_v36  ;;  %9369 = vadd.xlane.f32.xlu1 %v9368_v14  ;;  %v9365_v32 = vsel %vm722_vm1, %v9349_v40, 0.0 }
0x1166   : > { %9366 = vadd.xlane.f32.xlu0 %v9365_v32  ;;  %v9352_v60 = vmul.f32 %v25848_v21, %v25848_v21 }
0x1167   : > { %v9351_v25 = vmul.f32 %v25852_v38, %v25852_v38 }
0x1168   : > { %v9374_v59 = vsel %vm722_vm1, %v9352_v60, 0.0 }
0x1169   : > { %9375 = vadd.xlane.f32.xlu1 %v9374_v59  ;;  %v9371_v37 = vsel %vm722_vm1, %v9351_v25, 0.0 }
0x116a   : > { %9372 = vadd.xlane.f32.xlu0 %v9371_v37 }
0x117c   : > { %v9286_v50 = vpop.xlane.xlu1 %9285 }
0x117d   : > { %v9322_v55 = vmul.f32 0.03125, %v9286_v50  ;;  %v9283_v56 = vpop.xlane.xlu0 %9282 }
0x117e   : > { %v9321_v43 = vmul.f32 0.03125, %v9283_v56 }
0x117f   : > { %v25862_v52 = vsub.f32 %v25768_v10, %v9322_v55 }
0x1180   : > { %v25865_v57 = vsub.f32 %v25771_v13, %v9321_v43  ;;  %v9292_v20 = vpop.xlane.xlu1 %9291  ;;  %v21811_v13 = vpack.c.bf16 %v18665_v5, %v18664_v17 }
0x1181   : > { %v9324_v29 = vmul.f32 0.03125, %v9292_v20  ;;  %v9289_v22 = vpop.xlane.xlu0 %9288  ;;  %v9354_v10 = vmul.f32 %v25862_v52, %v25862_v52 }
0x1182   : > { %v9323_v63 = vmul.f32 0.03125, %v9289_v22  ;;  %v9353_v58 = vmul.f32 %v25865_v57, %v25865_v57  ;;  %21812 = vmatprep.subr.bf16.mxu0 %v21811_v13 }
0x1183   : > { %v25884_v0 = vsub.f32 %v25780_v46, %v9324_v29  ;;  %v9380_v2 = vsel %vm722_vm1, %v9354_v10, 0.0  ;;  %v18688_v46 = vld [vmem:[%s28237_s4 + $0x90] sm:$0xff]  ;;  %21814 = vmatpush3.bf16.msra.mxu0 %v21811_v13 }
0x1184   : > { %v25888_v47 = vsub.f32 %v25783_v35, %v9323_v63  ;;  %9381 = vadd.xlane.f32.xlu1 %v9380_v2  ;;  %v9377_v61 = vsel %vm722_vm1, %v9353_v58, 0.0  ;;  %v21823_v11 = vpack.c.bf16 %v18689_v48, %v18688_v46  ;;  %21816 = vmatprep.subr.bf16.mxu0 %v21815_v54 }
0x1185   : > { %9378 = vadd.xlane.f32.xlu0 %v9377_v61  ;;  %v9356_v35 = vmul.f32 %v25884_v0, %v25884_v0 }
0x1186   : > { %v9355_v18 = vmul.f32 %v25888_v47, %v25888_v47  ;;  %21824 = vmatprep.subr.bf16.mxu1 %v21823_v11 }
0x1187   : > { %v9386_v12 = vsel %vm722_vm1, %v9356_v35, 0.0  ;;  %21818 = vmatpush3.bf16.msra.mxu0 %v21815_v54  ;;  %21826 = vmatpush3.bf16.msra.mxu1 %v21823_v11 }
0x1188   : > { %9387 = vadd.xlane.f32.xlu1 %v9386_v12  ;;  %v9383_v31 = vsel %vm722_vm1, %v9355_v18, 0.0 }
0x1189   : > { %9384 = vadd.xlane.f32.xlu0 %v9383_v31  ;;  %v25960_v31 = vld [vmem:[%s28247_s14] ss:$0 sm:$0xff] }
0x11df   : > { %v9298_v26 = vpop.xlane.xlu1 %9297 }
0x11e0   : > { %v9326_v24 = vmul.f32 0.03125, %v9298_v26  ;;  %v9295_v51 = vpop.xlane.xlu0 %9294 }
0x11e1   : > { %v9325_v8 = vmul.f32 0.03125, %v9295_v51 }
0x11e2   : > { %v25910_v45 = vsub.f32 %v25792_v33, %v9326_v24 }
0x11e3   : > { %v25913_v34 = vsub.f32 %v25795_v41, %v9325_v8  ;;  %v9304_v4 = vpop.xlane.xlu1 %9303 }
0x11e4   : > { %v9328_v27 = vmul.f32 0.03125, %v9304_v4  ;;  %v9301_v1 = vpop.xlane.xlu0 %9300  ;;  %v9358_v6 = vmul.f32 %v25910_v45, %v25910_v45  ;;  %v25968_v4 = vld [vmem:[%s28248_s15] ss:$0 sm:$0xff] }
0x11e5   : > { %v9327_v36 = vmul.f32 0.03125, %v9301_v1  ;;  %v9357_v40 = vmul.f32 %v25913_v34, %v25913_v34 }
0x11e6   : > { %v25920_v14 = vsub.f32 %v25804_v42, %v9328_v27  ;;  %v9392_v32 = vsel %vm722_vm1, %v9358_v6, 0.0 }
0x11e7   : > { %v25924_v33 = vsub.f32 %v25807_v23, %v9327_v36  ;;  %9393 = vadd.xlane.f32.xlu1 %v9392_v32  ;;  %v9389_v41 = vsel %vm722_vm1, %v9357_v40, 0.0 }
0x11e8   : > { %9390 = vadd.xlane.f32.xlu0 %v9389_v41  ;;  %v9360_v60 = vmul.f32 %v25920_v14, %v25920_v14 }
0x11e9   : > { %v9359_v59 = vmul.f32 %v25924_v33, %v25924_v33 }
0x11ea   : > { %v9310_v25 = vpop.xlane.xlu1 %9309  ;;  %v9398_v42 = vsel %vm722_vm1, %v9360_v60, 0.0 }
0x11eb   : > { %v9330_v37 = vmul.f32 0.03125, %v9310_v25  ;;  %v9307_v50 = vpop.xlane.xlu0 %9306  ;;  %9399 = vadd.xlane.f32.xlu1 %v9398_v42  ;;  %v9395_v23 = vsel %vm722_vm1, %v9359_v59, 0.0 }
0x11ec   : > { %v9329_v55 = vmul.f32 0.03125, %v9307_v50  ;;  %9396 = vadd.xlane.f32.xlu0 %v9395_v23  ;;  %v18708_v23 = vld [vmem:[%s28237_s4 + $0xa0] sm:$0xff] }
0x11ed   : > { %v25934_v56 = vsub.f32 %v25816_v3, %v9330_v37 }
0x11ee   : > { %v25937_v43 = vsub.f32 %v25819_v9, %v9329_v55  ;;  %v9316_v20 = vpop.xlane.xlu1 %9315 }
0x11ef   : > { %v9332_v17 = vmul.f32 0.03125, %v9316_v20  ;;  %v9313_v5 = vpop.xlane.xlu0 %9312  ;;  %v9362_v62 = vmul.f32 %v25934_v56, %v25934_v56  ;;  %v18709_v20 = vld [vmem:[%s28237_s4 + $0xa8] sm:$0xff] }
0x11f0   : > { %v9331_v29 = vmul.f32 0.03125, %v9313_v5  ;;  %v9361_v22 = vmul.f32 %v25937_v43, %v25937_v43 }
0x11f1   : > { %v25944_v10 = vsub.f32 %v25828_v28, %v9332_v17  ;;  %v9404_v3 = vsel %vm722_vm1, %v9362_v62, 0.0  ;;  %v21827_v62 = vpack.c.bf16 %v18709_v20, %v18708_v23 }
0x11f2   : > { %v25948_v13 = vsub.f32 %v25831_v16, %v9331_v29  ;;  %9405 = vadd.xlane.f32.xlu1 %v9404_v3  ;;  %v9370_v9 = vpop.xlane.xlu1 %9369  ;;  %v9401_v44 = vsel %vm722_vm1, %v9361_v22, 0.0 }
0x11f3   : > { %v9414_v63 = vmul.f32 0.03125, %v9370_v9  ;;  %9402 = vadd.xlane.f32.xlu0 %v9401_v44  ;;  %v9367_v58 = vpop.xlane.xlu0 %9366  ;;  %v9364_v30 = vmul.f32 %v25944_v10, %v25944_v10  ;;  %21828 = vmatprep.subr.bf16.mxu0 %v21827_v62  ;;  %v18710_v9 = vld [vmem:[%s28237_s4 + $0xb0] sm:$0xff]  ;;  %v18711_v44 = vld [vmem:[%s28237_s4 + $0xb8] sm:$0xff] }
0x11f4   : > { %v9413_v2 = vmul.f32 0.03125, %v9367_v58  ;;  %v9363_v28 = vmul.f32 %v25948_v13, %v25948_v13 }
0x11f5   : > { %v9430_v61 = vadd.f32 1e-05, %v9414_v63  ;;  %v9410_v49 = vsel %vm722_vm1, %v9364_v30, 0.0  ;;  %v21831_v63 = vpack.c.bf16 %v18711_v44, %v18710_v9 }
0x11f6   : > { %v9429_v39 = vadd.f32 1e-05, %v9413_v2  ;;  %9411 = vadd.xlane.f32.xlu1 %v9410_v49  ;;  %v9376_v16 = vpop.xlane.xlu1 %9375  ;;  %v9407_v46 = vsel %vm722_vm1, %v9363_v28, 0.0 }
0x11f7   : > { %23083 = vrsqrt.f32 %v9430_v61  ;;  %v9416_v35 = vmul.f32 0.03125, %v9376_v16  ;;  %9408 = vadd.xlane.f32.xlu0 %v9407_v46  ;;  %v9373_v54 = vpop.xlane.xlu0 %9372 }
0x11f8   : > { %23085 = vrsqrt.f32 %v9429_v39  ;;  %v9415_v48 = vmul.f32 0.03125, %v9373_v54 }
0x11f9   : > { %v9432_v18 = vadd.f32 1e-05, %v9416_v35 }
0x11fa   : > { %v9431_v11 = vadd.f32 1e-05, %v9415_v48 }
0x11fb   : > { %23087 = vrsqrt.f32 %v9432_v18 }
0x11fc   : > { %23089 = vrsqrt.f32 %v9431_v11 }
0x1201   : > { %v23084_v12 = vpop.eup %23083 }
0x1202   : > { %v23086_v26 = vpop.eup %23085  ;;  %v9462_v24 = vmul.f32 %v23084_v12, %v25834_v53 }
0x1203   : > { %v9461_v51 = vmul.f32 %v23086_v26, %v25839_v15 }
0x1204   : > { %v9484_v8 = vmul.f32 %v25960_v31, %v9462_v24 }
0x1205   : > { %v23088_v27 = vpop.eup %23087  ;;  %v9483_v1 = vmul.f32 %v25960_v31, %v9461_v51 }
0x1206   : > { %v23090_v6 = vpop.eup %23089  ;;  %v9464_v36 = vmul.f32 %v23088_v27, %v25848_v21  ;;  %v25977_v15 = vadd.f32 %v25968_v4, %v9484_v8 }
0x1207   : > { %v25973_v40 = vadd.f32 %v25968_v4, %v9483_v1  ;;  %v9463_v53 = vmul.f32 %v23090_v6, %v25852_v38 }
0x1208   : > { %28407 = vst [vmem:[#allocation15_spill] sm:$0xff] %v25977_v15  ;;  %v9486_v32 = vmul.f32 %v25960_v31, %v9464_v36 }
0x1209   : > { %28406 = vst [vmem:[#allocation8_spill] sm:$0xff] %v25973_v40  ;;  %20688 = vmatprep.mubr.msk.f32.mxu0 %vm722_vm1, %v25973_v40  ;;  %20720 = vmatprep.mubr.msk.f32.mxu1 %vm722_vm1, %v25973_v40  ;;  %v9485_v41 = vmul.f32 %v25960_v31, %v9463_v53 }
0x120a   : > { %20689 = vmatmul.mubr.msk.f32.vlgmr.msra.gmra.mrb[124].mxu0 %vm722_vm1, %v25977_v15  ;;  %20721 = vmatmul.mubr.msk.f32.vlgmr.msra.gmra.mrb[108].mxu1 %vm722_vm1, %v25977_v15  ;;  %v25993_v38 = vadd.f32 %v25968_v4, %v9486_v32 }
0x120b   : > { %v25990_v21 = vadd.f32 %v25968_v4, %v9485_v41  ;;  %21830 = vmatpush3.bf16.msra.mxu0 %v21827_v62 }
0x120c   : > { %28409 = vst [vmem:[#allocation20_spill] sm:$0xff] %v25993_v38  ;;  %21832 = vmatprep.subr.bf16.mxu0 %v21831_v63 }
0x120d   : > { %28408 = vst [vmem:[#allocation24_spill] sm:$0xff] %v25990_v21  ;;  %20691 = vmatprep.mubr.msk.f32.mxu0 %vm722_vm1, %v25990_v21  ;;  %20723 = vmatprep.mubr.msk.f32.mxu1 %vm722_vm1, %v25990_v21 }
0x120e   : > { %20692 = vmatmul.mubr.msk.f32.gmra.mrb[126].mxu0 %vm722_vm1, %v25993_v38  ;;  %20724 = vmatmul.mubr.msk.f32.gmra.mrb[110].mxu1 %vm722_vm1, %v25993_v38 }
0x120f   : > { %21834 = vmatpush3.bf16.msra.mxu0 %v21831_v63 }
0x1211   : > { %v9382_v60 = vpop.xlane.xlu1 %9381 }
0x1212   : > { %v9418_v25 = vmul.f32 0.03125, %v9382_v60  ;;  %v9379_v59 = vpop.xlane.xlu0 %9378 }
0x1213   : > { %v9417_v37 = vmul.f32 0.03125, %v9379_v59 }
0x1214   : > { %v9434_v50 = vadd.f32 1e-05, %v9418_v25 }
0x1215   : > { %v9433_v42 = vadd.f32 1e-05, %v9417_v37  ;;  %v9388_v55 = vpop.xlane.xlu1 %9387 }
0x1216   : > { %23091 = vrsqrt.f32 %v9434_v50  ;;  %v9420_v17 = vmul.f32 0.03125, %v9388_v55  ;;  %v9385_v5 = vpop.xlane.xlu0 %9384 }
0x1217   : > { %23093 = vrsqrt.f32 %v9433_v42  ;;  %v9419_v29 = vmul.f32 0.03125, %v9385_v5 }
0x1218   : > { %v9436_v22 = vadd.f32 1e-05, %v9420_v17 }
0x1219   : > { %v9435_v3 = vadd.f32 1e-05, %v9419_v29 }
0x121a   : > { %23095 = vrsqrt.f32 %v9436_v22 }
0x121b   : > { %23097 = vrsqrt.f32 %v9435_v3 }
0x1220   : > { %v23092_v58 = vpop.eup %23091 }
0x1221   : > { %v23094_v30 = vpop.eup %23093  ;;  %v9466_v2 = vmul.f32 %v23092_v58, %v25862_v52 }
0x1222   : > { %v9465_v28 = vmul.f32 %v23094_v30, %v25865_v57 }
0x1223   : > { %v9488_v61 = vmul.f32 %v25960_v31, %v9466_v2 }
0x1224   : > { %v23096_v49 = vpop.eup %23095  ;;  %v9487_v39 = vmul.f32 %v25960_v31, %v9465_v28 }
0x1225   : > { %v23098_v16 = vpop.eup %23097  ;;  %v9468_v46 = vmul.f32 %v23096_v49, %v25884_v0  ;;  %v26025_v48 = vadd.f32 %v25968_v4, %v9488_v61 }
0x1226   : > { %v26021_v35 = vadd.f32 %v25968_v4, %v9487_v39  ;;  %v9467_v54 = vmul.f32 %v23098_v16, %v25888_v47 }
0x1227   : > { %28411 = vst [vmem:[#allocation4_spill] sm:$0xff] %v26025_v48  ;;  %v9490_v52 = vmul.f32 %v25960_v31, %v9468_v46 }
0x1228   : > { %28410 = vst [vmem:[#allocation5_spill] sm:$0xff] %v26021_v35  ;;  %20694 = vmatprep.mubr.msk.f32.mxu0 %vm722_vm1, %v26021_v35  ;;  %20726 = vmatprep.mubr.msk.f32.mxu1 %vm722_vm1, %v26021_v35  ;;  %v9489_v57 = vmul.f32 %v25960_v31, %v9467_v54 }
0x1229   : > { %20695 = vmatmul.mubr.msk.f32.gmra.mrb[128].mxu0 %vm722_vm1, %v26025_v48  ;;  %20727 = vmatmul.mubr.msk.f32.gmra.mrb[112].mxu1 %vm722_vm1, %v26025_v48  ;;  %v26041_v47 = vadd.f32 %v25968_v4, %v9490_v52 }
0x122a   : > { %v26038_v0 = vadd.f32 %v25968_v4, %v9489_v57 }
0x122b   : > { %28413 = vst [vmem:[#allocation6_spill] sm:$0xff] %v26041_v47 }
0x122c   : > { %28412 = vst [vmem:[#allocation9_spill] sm:$0xff] %v26038_v0  ;;  %20697 = vmatprep.mubr.msk.f32.mxu0 %vm722_vm1, %v26038_v0  ;;  %20729 = vmatprep.mubr.msk.f32.mxu1 %vm722_vm1, %v26038_v0 }
0x122d   : > { %20698 = vmatmul.mubr.msk.f32.gmra.mrb[130].mxu0 %vm722_vm1, %v26041_v47  ;;  %20730 = vmatmul.mubr.msk.f32.gmra.mrb[114].mxu1 %vm722_vm1, %v26041_v47 }
0x1274   : > { %v9394_v18 = vpop.xlane.xlu1 %9393 }
0x1275   : > { %v9422_v11 = vmul.f32 0.03125, %v9394_v18  ;;  %v9391_v12 = vpop.xlane.xlu0 %9390 }
0x1276   : > { %v9421_v26 = vmul.f32 0.03125, %v9391_v12 }
0x1277   : > { %v9438_v24 = vadd.f32 1e-05, %v9422_v11 }
0x1278   : > { %v9437_v51 = vadd.f32 1e-05, %v9421_v26  ;;  %v9400_v8 = vpop.xlane.xlu1 %9399 }
0x1279   : > { %23099 = vrsqrt.f32 %v9438_v24  ;;  %v9424_v27 = vmul.f32 0.03125, %v9400_v8  ;;  %v9397_v1 = vpop.xlane.xlu0 %9396 }
0x127a   : > { %23101 = vrsqrt.f32 %v9437_v51  ;;  %v9423_v6 = vmul.f32 0.03125, %v9397_v1 }
0x127b   : > { %v9440_v36 = vadd.f32 1e-05, %v9424_v27 }
0x127c   : > { %v9439_v53 = vadd.f32 1e-05, %v9423_v6 }
0x127d   : > { %23103 = vrsqrt.f32 %v9440_v36 }
0x127e   : > { %23105 = vrsqrt.f32 %v9439_v53 }
0x127f   : > { %v9406_v32 = vpop.xlane.xlu1 %9405 }
0x1280   : > { %v9426_v41 = vmul.f32 0.03125, %v9406_v32  ;;  %v9403_v60 = vpop.xlane.xlu0 %9402 }
0x1281   : > { %v9425_v25 = vmul.f32 0.03125, %v9403_v60 }
0x1282   : > { %v9442_v59 = vadd.f32 1e-05, %v9426_v41 }
0x1283   : > { %v9441_v37 = vadd.f32 1e-05, %v9425_v25  ;;  %v9412_v50 = vpop.xlane.xlu1 %9411  ;;  %v23100_v42 = vpop.eup %23099 }
0x1284   : > { %23107 = vrsqrt.f32 %v9442_v59  ;;  %v9428_v55 = vmul.f32 0.03125, %v9412_v50  ;;  %v9409_v23 = vpop.xlane.xlu0 %9408  ;;  %v23102_v20 = vpop.eup %23101  ;;  %v9470_v5 = vmul.f32 %v23100_v42, %v25910_v45 }
0x1285   : > { %23109 = vrsqrt.f32 %v9441_v37  ;;  %v9427_v17 = vmul.f32 0.03125, %v9409_v23  ;;  %v9469_v29 = vmul.f32 %v23102_v20, %v25913_v34 }
0x1286   : > { %v9444_v62 = vadd.f32 1e-05, %v9428_v55  ;;  %v9492_v3 = vmul.f32 %v25960_v31, %v9470_v5 }
0x1287   : > { %v9443_v22 = vadd.f32 1e-05, %v9427_v17  ;;  %v23104_v9 = vpop.eup %23103  ;;  %v9491_v44 = vmul.f32 %v25960_v31, %v9469_v29 }
0x1288   : > { %23111 = vrsqrt.f32 %v9444_v62  ;;  %v23106_v63 = vpop.eup %23105  ;;  %v9472_v58 = vmul.f32 %v23104_v9, %v25920_v14  ;;  %v26061_v45 = vadd.f32 %v25968_v4, %v9492_v3 }
0x1289   : > { %23113 = vrsqrt.f32 %v9443_v22  ;;  %v26057_v30 = vadd.f32 %v25968_v4, %v9491_v44  ;;  %v9471_v2 = vmul.f32 %v23106_v63, %v25924_v33 }
0x128a   : > { %28415 = vst [vmem:[#allocation7_spill] sm:$0xff] %v26061_v45  ;;  %v9494_v34 = vmul.f32 %v25960_v31, %v9472_v58 }
0x128b   : > { %28414 = vst [vmem:[#allocation10_spill] sm:$0xff] %v26057_v30  ;;  %20700 = vmatprep.mubr.msk.f32.mxu0 %vm722_vm1, %v26057_v30  ;;  %20732 = vmatprep.mubr.msk.f32.mxu1 %vm722_vm1, %v26057_v30  ;;  %v9493_v28 = vmul.f32 %v25960_v31, %v9471_v2 }
0x128c   : > { %20701 = vmatmul.mubr.msk.f32.gmra.mrb[132].mxu0 %vm722_vm1, %v26061_v45  ;;  %20733 = vmatmul.mubr.msk.f32.gmra.mrb[116].mxu1 %vm722_vm1, %v26061_v45  ;;  %v26077_v49 = vadd.f32 %v25968_v4, %v9494_v34 }
0x128d   : > { %v26074_v33 = vadd.f32 %v25968_v4, %v9493_v28 }
0x128e   : > { %v23108_v14 = vpop.eup %23107  ;;  %28417 = vst [vmem:[#allocation16_spill] sm:$0xff] %v26077_v49 }
0x128f   : > { %28416 = vst [vmem:[#allocation11_spill] sm:$0xff] %v26074_v33  ;;  %v23110_v61 = vpop.eup %23109  ;;  %v9474_v39 = vmul.f32 %v23108_v14, %v25934_v56  ;;  %20703 = vmatprep.mubr.msk.f32.mxu0 %vm722_vm1, %v26074_v33  ;;  %20735 = vmatprep.mubr.msk.f32.mxu1 %vm722_vm1, %v26074_v33 }
0x1290   : > { %v9473_v16 = vmul.f32 %v23110_v61, %v25937_v43  ;;  %20704 = vmatmul.mubr.msk.f32.gmra.mrb[134].mxu0 %vm722_vm1, %v26077_v49  ;;  %20736 = vmatmul.mubr.msk.f32.gmra.mrb[118].mxu1 %vm722_vm1, %v26077_v49 }
0x1291   : > { %v9496_v46 = vmul.f32 %v25960_v31, %v9474_v39 }
0x1292   : > { %v23112_v54 = vpop.eup %23111  ;;  %v9495_v52 = vmul.f32 %v25960_v31, %v9473_v16 }
0x1293   : > { %v23114_v56 = vpop.eup %23113  ;;  %v9476_v57 = vmul.f32 %v23112_v54, %v25944_v10  ;;  %v26097_v43 = vadd.f32 %v25968_v4, %v9496_v46 }
0x1294   : > { %v26093_v18 = vadd.f32 %v25968_v4, %v9495_v52  ;;  %v9475_v11 = vmul.f32 %v23114_v56, %v25948_v13 }
0x1295   : > { %28419 = vst [vmem:[#allocation3_spill] sm:$0xff] %v26097_v43  ;;  %v9498_v12 = vmul.f32 %v25960_v31, %v9476_v57 }
0x1296   : > { %28418 = vst [vmem:[#allocation22_spill] sm:$0xff] %v26093_v18  ;;  %20706 = vmatprep.mubr.msk.f32.mxu0 %vm722_vm1, %v26093_v18  ;;  %20738 = vmatprep.mubr.msk.f32.mxu1 %vm722_vm1, %v26093_v18  ;;  %v9497_v26 = vmul.f32 %v25960_v31, %v9475_v11  ;;  %v26158_v31 = vld [vmem:[%s28238_s5 + $0x4] ss:$0 sm:$0xff] }
0x1297   : > { %20707 = vmatmul.mubr.msk.f32.gmra.mrb[136].mxu0 %vm722_vm1, %v26097_v43  ;;  %20739 = vmatmul.mubr.msk.f32.gmra.mrb[120].mxu1 %vm722_vm1, %v26097_v43  ;;  %v26113_v13 = vadd.f32 %v25968_v4, %v9498_v12 }
0x1298   : > { %v26110_v10 = vadd.f32 %v25968_v4, %v9497_v26  ;;  %v26163_v4 = vld [vmem:[%s28238_s5 + $0x3] ss:$0 sm:$0xff] }
0x1299   : > { %28421 = vst [vmem:[#allocation14_spill] sm:$0xff] %v26113_v13 }
0x129a   : > { %28420 = vst [vmem:[#allocation18_spill] sm:$0xff] %v26110_v10  ;;  %20709 = vmatprep.mubr.msk.f32.mxu0 %vm722_vm1, %v26110_v10  ;;  %20741 = vmatprep.mubr.msk.f32.mxu1 %vm722_vm1, %v26110_v10 }
0x129b   : > { %20710 = vmatmul.mubr.msk.f32.gmra.mrb[138].mxu0 %vm722_vm1, %v26113_v13  ;;  %20742 = vmatmul.mubr.msk.f32.gmra.mrb[122].mxu1 %vm722_vm1, %v26113_v13 }
0x129c   : > { %20752 = vmatprep.mubr.msk.f32.mxu0 %vm722_vm1, %v25973_v40 }
0x129f   : > { %20753 = vmatmul.mubr.msk.f32.vlgmr.msra.gmra.mrb[140].mxu0 %vm722_vm1, %v25977_v15 }
0x12a0   : > { %20755 = vmatprep.mubr.msk.f32.mxu0 %vm722_vm1, %v25990_v21 }
0x12a3   : > { %20756 = vmatmul.mubr.msk.f32.gmra.mrb[142].mxu0 %vm722_vm1, %v25993_v38 }
0x12a4   : > { %20758 = vmatprep.mubr.msk.f32.mxu0 %vm722_vm1, %v26021_v35 }
0x12a7   : > { %20759 = vmatmul.mubr.msk.f32.gmra.mrb[144].mxu0 %vm722_vm1, %v26025_v48 }
0x12a8   : > { %20761 = vmatprep.mubr.msk.f32.mxu0 %vm722_vm1, %v26038_v0 }
0x12ab   : > { %20762 = vmatmul.mubr.msk.f32.gmra.mrb[146].mxu0 %vm722_vm1, %v26041_v47 }
0x12ac   : > { %20764 = vmatprep.mubr.msk.f32.mxu0 %vm722_vm1, %v26057_v30 }
0x12af   : > { %20765 = vmatmul.mubr.msk.f32.gmra.mrb[148].mxu0 %vm722_vm1, %v26061_v45 }
0x12b0   : > { %20767 = vmatprep.mubr.msk.f32.mxu0 %vm722_vm1, %v26074_v33 }
0x12b3   : > { %20768 = vmatmul.mubr.msk.f32.gmra.mrb[150].mxu0 %vm722_vm1, %v26077_v49 }
0x12b4   : > { %20770 = vmatprep.mubr.msk.f32.mxu0 %vm722_vm1, %v26093_v18 }
0x12b7   : > { %20771 = vmatmul.mubr.msk.f32.gmra.mrb[152].mxu0 %vm722_vm1, %v26097_v43 }
0x12b8   : > { %20773 = vmatprep.mubr.msk.f32.mxu0 %vm722_vm1, %v26110_v10 }
0x12bb   : > { %20774 = vmatmul.mubr.msk.f32.gmra.mrb[154].mxu0 %vm722_vm1, %v26113_v13 }
0x12dd   : > { %v20690_v24 = vpop.f32.mrb[124].mxu0  ;;  %v20722_v51 = vpop.f32.mrb[108].mxu1 }
0x12de   : > { %v9812_v8 = vadd.f32 %v20722_v51, %v26158_v31  ;;  %v9648_v27 = vpop.f32.mrb[125].mxu0  ;;  %v9806_v1 = vpop.f32.mrb[109].mxu1  ;;  %v26192_v20 = vadd.f32 %v20690_v24, %v26163_v4 }
0x12df   : > { %v26167_v6 = vadd.f32 %v26163_v4, %v9648_v27  ;;  %v9807_v36 = vadd.f32 %v26158_v31, %v9806_v1 }
0x12e0   : > { %28425 = vst [vmem:[#allocation12_spill] sm:$0xff] %v26192_v20 }
0x12e1   : > { %28422 = vst [vmem:[#allocation26_spill] sm:$0xff] %v26167_v6  ;;  %v20693_v53 = vpop.f32.mrb[126].mxu0  ;;  %v20725_v32 = vpop.f32.mrb[110].mxu1  ;;  %20780 = vmatprep.mubr.msk.f32.mxu1 %vm592_vm0, %v26167_v6  ;;  %v21835_v41 = vpack.c.bf16 %v9812_v8, %v9807_v36  ;;  %v26172_v60 = vpack.i.bf16 %v9812_v8, %v9807_v36 }
0x12e2   : > { %v9822_v25 = vadd.f32 %v20725_v32, %v26158_v31  ;;  %v9658_v59 = vpop.f32.mrb[127].mxu0  ;;  %v9816_v37 = vpop.f32.mrb[111].mxu1  ;;  %v26197_v17 = vadd.f32 %v20693_v53, %v26163_v4 }
0x12e3   : > { %v26176_v50 = vadd.f32 %v26163_v4, %v9658_v59  ;;  %v9817_v42 = vadd.f32 %v26158_v31, %v9816_v37  ;;  %21837 = vmatprep.subr.msk.bf16.mxu1 %vm23745_vm3, %v21835_v41 }
0x12e4   : > { %21840 = vmatpush3.bf16.xpose.msk.msra.mxu1 %vm23745_vm3, %v21835_v41  ;;  %28426 = vst [vmem:[#allocation23_spill] sm:$0xff] %v26197_v17 }
0x12e5   : > { %28423 = vst [vmem:[#allocation17_spill] sm:$0xff] %v26176_v50  ;;  %20787 = vmatprep.mubr.msk.f32.mxu0 %vm592_vm0, %v26176_v50  ;;  %v21841_v55 = vpack.c.bf16 %v9822_v25, %v9817_v42  ;;  %v26185_v23 = vpack.i.bf16 %v9822_v25, %v9817_v42 }
0x12e7   : > { %28424 = vst [vmem:[#allocation25_spill] sm:$0xff] %v26185_v23  ;;  %21843 = vmatprep.subr.msk.bf16.mxu0 %vm23745_vm3, %v21841_v55 }
0x12e8   : > { %21846 = vmatpush3.bf16.xpose.msk.msra.mxu0 %vm23745_vm3, %v21841_v55 }
0x12eb   : > { %20781 = vmatmul.mubr.msk.f32.vlgmr.msra.gmra.mrb[124].mxu1 %vm592_vm0, %v26192_v20 }
0x12ef   : > { %20788 = vmatmul.mubr.msk.f32.vlgmr.msra.gmra.mrb[156].mxu0 %vm592_vm0, %v26197_v17 }
0x12fc   : > { %v20696_v5 = vpop.f32.mrb[128].mxu0  ;;  %v20728_v62 = vpop.f32.mrb[112].mxu1 }
0x12fd   : > { %v9832_v29 = vadd.f32 %v20728_v62, %v26158_v31  ;;  %v9668_v22 = vpop.f32.mrb[129].mxu0  ;;  %v9826_v3 = vpop.f32.mrb[113].mxu1  ;;  %v26228_v52 = vadd.f32 %v20696_v5, %v26163_v4 }
0x12fe   : > { %v26203_v9 = vadd.f32 %v26163_v4, %v9668_v22  ;;  %v9827_v44 = vadd.f32 %v26158_v31, %v9826_v3 }
0x12ff   : > { %28431 = vst [vmem:[#allocation13_spill] sm:$0xff] %v26228_v52 }
0x1300   : > { %28427 = vst [vmem:[#allocation21_spill] sm:$0xff] %v26203_v9  ;;  %v20699_v63 = vpop.f32.mrb[130].mxu0  ;;  %v20731_v58 = vpop.f32.mrb[114].mxu1  ;;  %20794 = vmatprep.mubr.msk.f32.mxu1 %vm592_vm0, %v26203_v9  ;;  %v21847_v2 = vpack.c.bf16 %v9832_v29, %v9827_v44  ;;  %v26208_v34 = vpack.i.bf16 %v9832_v29, %v9827_v44 }
0x1301   : > { %v9842_v28 = vadd.f32 %v20731_v58, %v26158_v31  ;;  %v9678_v14 = vpop.f32.mrb[131].mxu0  ;;  %v9836_v61 = vpop.f32.mrb[115].mxu1  ;;  %v26233_v56 = vadd.f32 %v20699_v63, %v26163_v4 }
0x1302   : > { %28428 = vst [vmem:[#allocation19_spill] sm:$0xff] %v26208_v34  ;;  %v26212_v39 = vadd.f32 %v26163_v4, %v9678_v14  ;;  %v9837_v16 = vadd.f32 %v26158_v31, %v9836_v61  ;;  %21849 = vmatprep.subr.msk.bf16.mxu1 %vm23745_vm3, %v21847_v2 }
0x1303   : > { %21852 = vmatpush3.bf16.xpose.msk.msra.mxu1 %vm23745_vm3, %v21847_v2  ;;  %28432 = vst [vmem:[#allocation34_spill] sm:$0xff] %v26233_v56 }
0x1304   : > { %28429 = vst [vmem:[#allocation28_spill] sm:$0xff] %v26212_v39  ;;  %20801 = vmatprep.mubr.msk.f32.mxu0 %vm592_vm0, %v26212_v39  ;;  %v21853_v46 = vpack.c.bf16 %v9842_v28, %v9837_v16  ;;  %v26221_v54 = vpack.i.bf16 %v9842_v28, %v9837_v16 }
0x1306   : > { %28430 = vst [vmem:[#allocation27_spill] sm:$0xff] %v26221_v54  ;;  %21855 = vmatprep.subr.msk.bf16.mxu0 %vm23745_vm3, %v21853_v46 }
0x1307   : > { %21858 = vmatpush3.bf16.xpose.msk.msra.mxu0 %vm23745_vm3, %v21853_v46 }
0x130a   : > { %20795 = vmatmul.mubr.msk.f32.vlgmr.msra.gmra.mrb[126].mxu1 %vm592_vm0, %v26228_v52 }
0x130e   : > { %20802 = vmatmul.mubr.msk.f32.vlgmr.msra.gmra.mrb[158].mxu0 %vm592_vm0, %v26233_v56 }
0x135f   : > { %v20702_v57 = vpop.f32.mrb[132].mxu0  ;;  %v20734_v11 = vpop.f32.mrb[116].mxu1 }
0x1360   : > { %v9852_v12 = vadd.f32 %v20734_v11, %v26158_v31  ;;  %v9688_v26 = vpop.f32.mrb[133].mxu0  ;;  %v9846_v24 = vpop.f32.mrb[117].mxu1  ;;  %v26265_v44 = vadd.f32 %v20702_v57, %v26163_v4 }
0x1361   : > { %v26239_v51 = vadd.f32 %v26163_v4, %v9688_v26  ;;  %v9847_v8 = vadd.f32 %v26158_v31, %v9846_v24  ;;  %v26290_v24 = vld [vmem:[%s28238_s5 + $0x5] ss:$0 sm:$0xff] }
0x1362   : > { %28436 = vst [vmem:[#allocation36_spill] sm:$0xff] %v26265_v44 }
0x1363   : > { %28433 = vst [vmem:[#allocation33_spill] sm:$0xff] %v26239_v51  ;;  %v20705_v27 = vpop.f32.mrb[134].mxu0  ;;  %v20737_v1 = vpop.f32.mrb[118].mxu1  ;;  %20808 = vmatprep.mubr.msk.f32.mxu1 %vm592_vm0, %v26239_v51  ;;  %v21859_v36 = vpack.c.bf16 %v9852_v12, %v9847_v8  ;;  %v26244_v53 = vpack.i.bf16 %v9852_v12, %v9847_v8 }
0x1364   : > { %v9862_v32 = vadd.f32 %v20737_v1, %v26158_v31  ;;  %v9698_v41 = vpop.f32.mrb[135].mxu0  ;;  %v9856_v25 = vpop.f32.mrb[119].mxu1  ;;  %v26279_v57 = vadd.f32 %v20705_v27, %v26163_v4 }
0x1365   : > { %28434 = vst [vmem:[#allocation30_spill] sm:$0xff] %v26244_v53  ;;  %v26248_v59 = vadd.f32 %v26163_v4, %v9698_v41  ;;  %v9857_v37 = vadd.f32 %v26158_v31, %v9856_v25  ;;  %21861 = vmatprep.subr.msk.bf16.mxu1 %vm23745_vm3, %v21859_v36 }
0x1366   : > { %21864 = vmatpush3.bf16.xpose.msk.msra.mxu1 %vm23745_vm3, %v21859_v36  ;;  %28438 = vst [vmem:[#allocation32_spill] sm:$0xff] %v26279_v57 }
0x1367   : > { %20815 = vmatprep.mubr.msk.f32.mxu0 %vm592_vm0, %v26248_v59  ;;  %v21865_v42 = vpack.c.bf16 %v9862_v32, %v9857_v37  ;;  %v26257_v55 = vpack.i.bf16 %v9862_v32, %v9857_v37 }
0x1369   : > { %28435 = vst [vmem:[#allocation29_spill] sm:$0xff] %v26257_v55  ;;  %21867 = vmatprep.subr.msk.bf16.mxu0 %vm23745_vm3, %v21865_v42 }
0x136a   : > { %v20708_v5 = vpop.f32.mrb[136].mxu0  ;;  %v20740_v62 = vpop.f32.mrb[120].mxu1  ;;  %21870 = vmatpush3.bf16.xpose.msk.msra.mxu0 %vm23745_vm3, %v21865_v42 }
0x136b   : > { %v9872_v29 = vadd.f32 %v20740_v62, %v26158_v31  ;;  %v9708_v22 = vpop.f32.mrb[137].mxu0  ;;  %v9866_v3 = vpop.f32.mrb[121].mxu1  ;;  %v26305_v41 = vadd.f32 %v20708_v5, %v26163_v4 }
0x136c   : > { %v26268_v63 = vadd.f32 %v26163_v4, %v9708_v22  ;;  %v9867_v58 = vadd.f32 %v26158_v31, %v9866_v3 }
0x136d   : > { %20809 = vmatmul.mubr.msk.f32.vlgmr.msra.gmra.mrb[128].mxu1 %vm592_vm0, %v26265_v44  ;;  %28440 = vst [vmem:[#allocation37_spill] sm:$0xff] %v26305_v41 }
0x136e   : > { %28437 = vst [vmem:[#allocation35_spill] sm:$0xff] %v26268_v63  ;;  %v20711_v2 = vpop.f32.mrb[138].mxu0  ;;  %v20743_v28 = vpop.f32.mrb[122].mxu1  ;;  %v21871_v14 = vpack.c.bf16 %v9872_v29, %v9867_v58  ;;  %v26273_v61 = vpack.i.bf16 %v9872_v29, %v9867_v58  ;;  %20822 = vmatprep.mubr.msk.f32.mxu1 %vm592_vm0, %v26268_v63 }
0x136f   : > { %v9882_v16 = vadd.f32 %v20743_v28, %v26158_v31  ;;  %v9718_v46 = vpop.f32.mrb[139].mxu0  ;;  %v9876_v11 = vpop.f32.mrb[123].mxu1  ;;  %v26316_v3 = vadd.f32 %v20711_v2, %v26163_v4 }
0x1370   : > { %v26282_v12 = vadd.f32 %v26163_v4, %v9718_v46  ;;  %v9877_v26 = vadd.f32 %v26158_v31, %v9876_v11  ;;  %21873 = vmatprep.subr.msk.bf16.mxu1 %vm23745_vm3, %v21871_v14 }
0x1371   : > { %21876 = vmatpush3.bf16.xpose.msk.msra.mxu1 %vm23745_vm3, %v21871_v14  ;;  %20816 = vmatmul.mubr.msk.f32.vlgmr.msra.gmra.mrb[160].mxu0 %vm592_vm0, %v26279_v57 }
0x1372   : > { %28439 = vst [vmem:[#allocation31_spill] sm:$0xff] %v26282_v12  ;;  %v20754_v8 = vpop.f32.mrb[140].mxu0  ;;  %v21877_v27 = vpack.c.bf16 %v9882_v16, %v9877_v26  ;;  %v26296_v1 = vpack.i.bf16 %v9882_v16, %v9877_v26  ;;  %20829 = vmatprep.mubr.msk.f32.mxu0 %vm592_vm0, %v26282_v12 }
0x1373   : > { %v9970_v31 = vadd.f32 %v20754_v8, %v26290_v24  ;;  %v9964_v36 = vpop.f32.mrb[141].mxu0 }
0x1374   : > { %v9965_v32 = vadd.f32 %v26290_v24, %v9964_v36  ;;  %21879 = vmatprep.subr.msk.bf16.mxu0 %vm23745_vm3, %v21877_v27 }
0x1375   : > { %21882 = vmatpush3.bf16.xpose.msk.msra.mxu0 %vm23745_vm3, %v21877_v27 }
0x1376   : > { %v20757_v25 = vpop.f32.mrb[142].mxu0  ;;  %v21883_v37 = vpack.c.bf16 %v9970_v31, %v9965_v32  ;;  %v26309_v42 = vpack.i.bf16 %v9970_v31, %v9965_v32 }
0x1377   : > { %v9980_v62 = vadd.f32 %v20757_v25, %v26290_v24  ;;  %v9974_v29 = vpop.f32.mrb[143].mxu0 }
0x1378   : > { %28441 = vst [vmem:[#allocation38_spill] sm:$0xff] %v26309_v42  ;;  %v9975_v22 = vadd.f32 %v26290_v24, %v9974_v29  ;;  %20823 = vmatmul.mubr.msk.f32.vlgmr.msra.gmra.mrb[130].mxu1 %vm592_vm0, %v26305_v41  ;;  %21884 = vmatprep.subr.bf16.mxu1 %v21883_v37 }
0x1379   : > { %21886 = vmatpush3.bf16.msra.mxu1 %v21883_v37 }
0x137a   : > { %v20760_v5 = vpop.f32.mrb[144].mxu0  ;;  %v21887_v58 = vpack.c.bf16 %v9980_v62, %v9975_v22  ;;  %v26318_v28 = vpack.i.bf16 %v9980_v62, %v9975_v22 }
0x137b   : > { %v9990_v14 = vadd.f32 %v20760_v5, %v26290_v24  ;;  %v9984_v16 = vpop.f32.mrb[145].mxu0 }
0x137c   : > { %v9985_v46 = vadd.f32 %v26290_v24, %v9984_v16  ;;  %20830 = vmatmul.mubr.msk.f32.vlgmr.msra.gmra.mrb[162].mxu0 %vm592_vm0, %v26316_v3  ;;  %21888 = vmatprep.subr.bf16.mxu0 %v21887_v58 }
0x137d   : > { %21890 = vmatpush3.bf16.msra.mxu0 %v21887_v58 }
0x137e   : > { %v20763_v11 = vpop.f32.mrb[146].mxu0  ;;  %v26324_v26 = vpack.c.bf16 %v9990_v14, %v9985_v46  ;;  %v26326_v4 = vpack.i.bf16 %v9990_v14, %v9985_v46 }
0x137f   : > { %v10000_v2 = vadd.f32 %v20763_v11, %v26290_v24  ;;  %v9994_v8 = vpop.f32.mrb[147].mxu0 }
0x1380   : > { %28442 = vst [vmem:[#allocation39_spill] sm:$0xff] %v26324_v26  ;;  %28443 = vst [vmem:[#allocation40_spill] sm:$0xff] %v26326_v4  ;;  %v9995_v27 = vadd.f32 %v26290_v24, %v9994_v8  ;;  %21892 = vmatprep.subr.bf16.mxu1 %v26324_v26 }
0x1382   : > { %v20766_v31 = vpop.f32.mrb[148].mxu0  ;;  %v26331_v36 = vpack.c.bf16 %v10000_v2, %v9995_v27  ;;  %v26333_v32 = vpack.i.bf16 %v10000_v2, %v9995_v27 }
0x1383   : > { %v10010_v25 = vadd.f32 %v20766_v31, %v26290_v24  ;;  %v10004_v37 = vpop.f32.mrb[149].mxu0 }
0x1384   : > { %v10005_v62 = vadd.f32 %v26290_v24, %v10004_v37  ;;  %21896 = vmatprep.subr.bf16.mxu0 %v26331_v36 }
0x1386   : > { %v20769_v29 = vpop.f32.mrb[150].mxu0  ;;  %v26338_v22 = vpack.c.bf16 %v10010_v25, %v10005_v62  ;;  %v26340_v5 = vpack.i.bf16 %v10010_v25, %v10005_v62 }
0x1387   : > { %v10020_v58 = vadd.f32 %v20769_v29, %v26290_v24  ;;  %v10014_v14 = vpop.f32.mrb[151].mxu0 }
0x1388   : > { %28444 = vst [vmem:[#allocation41_spill] sm:$0xff] %v26338_v22  ;;  %28445 = vst [vmem:[#allocation42_spill] sm:$0xff] %v26340_v5  ;;  %v10015_v16 = vadd.f32 %v26290_v24, %v10014_v14 }
0x138a   : > { %v20772_v46 = vpop.f32.mrb[152].mxu0  ;;  %v26344_v11 = vpack.c.bf16 %v10020_v58, %v10015_v16  ;;  %v26346_v2 = vpack.i.bf16 %v10020_v58, %v10015_v16 }
0x138b   : > { %v10030_v8 = vadd.f32 %v20772_v46, %v26290_v24  ;;  %v10024_v27 = vpop.f32.mrb[153].mxu0 }
0x138c   : > { %v10025_v31 = vadd.f32 %v26290_v24, %v10024_v27 }
0x138e   : > { %v20775_v37 = vpop.f32.mrb[154].mxu0  ;;  %v26350_v10 = vpack.c.bf16 %v10030_v8, %v10025_v31  ;;  %v26352_v25 = vpack.i.bf16 %v10030_v8, %v10025_v31 }
0x138f   : > { %v10040_v62 = vadd.f32 %v20775_v37, %v26290_v24  ;;  %v10034_v29 = vpop.f32.mrb[155].mxu0 }
0x1390   : > { %28446 = vst [vmem:[#allocation43_spill] sm:$0xff] %v26350_v10  ;;  %28447 = vst [vmem:[#allocation44_spill] sm:$0xff] %v26352_v25  ;;  %v10035_v14 = vadd.f32 %v26290_v24, %v10034_v29 }
0x1392   : > { %v26356_v13 = vpack.c.bf16 %v10040_v62, %v10035_v14  ;;  %v26358_v18 = vpack.i.bf16 %v10040_v62, %v10035_v14 }
0x1394   : > { %28448 = vst [vmem:[#allocation45_spill] sm:$0xff] %v26358_v18 }
0x13be   : > { %v26360_v58 = vpop.f32.mrb[124].mxu1 }
0x13bf   : > { %v26362_v16 = vpop.f32.mrb[125].mxu1 }
0x13c2   : > { %v20789_v46 = vpop.f32.mrb[156].mxu0 }
0x13c3   : > { %v10747_v27 = vmul.f32 0.35355338, %v20789_v46  ;;  %v10213_v43 = vpop.f32.mrb[157].mxu0 }
0x13c4   : > { %v10746_v33 = vmul.f32 0.35355338, %v10213_v43 }
0x13c5   : > { %v10763_v8 = vsel %vm775_vm4, %v10747_v27, -1e+30 }
0x13c6   : > { %v10762_v31 = vsel %vm775_vm4, %v10746_v33, -1e+30  ;;  %v10785_v24 = vsel %vm2028_vm5, %v10763_v8, -inf }
0x13c7   : > { %10786 = vmax.xlane.f32.xlu1 %v10785_v24  ;;  %v10782_v37 = vsel %vm2028_vm5, %v10762_v31, -inf }
0x13c8   : > { %10783 = vmax.xlane.f32.xlu0 %v10782_v37 }
0x13dd   : > { %v26370_v62 = vpop.f32.mrb[126].mxu1 }
0x13de   : > { %v26372_v29 = vpop.f32.mrb[127].mxu1 }
0x13e1   : > { %v20803_v14 = vpop.f32.mrb[158].mxu0 }
0x13e2   : > { %v10751_v46 = vmul.f32 0.35355338, %v20803_v14  ;;  %v10387_v49 = vpop.f32.mrb[159].mxu0 }
0x13e3   : > { %v10750_v43 = vmul.f32 0.35355338, %v10387_v49 }
0x13e4   : > { %v10767_v27 = vsel %vm775_vm4, %v10751_v46, -1e+30 }
0x13e5   : > { %v10766_v33 = vsel %vm775_vm4, %v10750_v43, -1e+30  ;;  %v10797_v30 = vsel %vm2028_vm5, %v10767_v27, -inf }
0x13e6   : > { %10798 = vmax.xlane.f32.xlu1 %v10797_v30  ;;  %v10794_v24 = vsel %vm2028_vm5, %v10766_v33, -inf }
0x13e7   : > { %10795 = vmax.xlane.f32.xlu0 %v10794_v24 }
0x1440   : > { %v26380_v37 = vpop.f32.mrb[128].mxu1 }
0x1441   : > { %v26382_v45 = vpop.f32.mrb[129].mxu1 }
0x1444   : > { %v20817_v0 = vpop.f32.mrb[160].mxu0 }
0x1445   : > { %v10755_v14 = vmul.f32 0.35355338, %v20817_v0  ;;  %v10561_v47 = vpop.f32.mrb[161].mxu0 }
0x1446   : > { %v10754_v49 = vmul.f32 0.35355338, %v10561_v47 }
0x1447   : > { %v10771_v46 = vsel %vm775_vm4, %v10755_v14, -1e+30 }
0x1448   : > { %v10770_v43 = vsel %vm775_vm4, %v10754_v49, -1e+30  ;;  %v10809_v35 = vsel %vm2028_vm5, %v10771_v46, -inf }
0x1449   : > { %10810 = vmax.xlane.f32.xlu1 %v10809_v35  ;;  %v10806_v30 = vsel %vm2028_vm5, %v10770_v43, -inf }
0x144a   : > { %10807 = vmax.xlane.f32.xlu0 %v10806_v30 }
0x144b   : > { %v26390_v24 = vpop.f32.mrb[130].mxu1 }
0x144c   : > { %v26392_v48 = vpop.f32.mrb[131].mxu1 }
0x144f   : > { %v20831_v21 = vpop.f32.mrb[162].mxu0 }
0x1450   : > { %v10759_v0 = vmul.f32 0.35355338, %v20831_v21  ;;  %v10735_v38 = vpop.f32.mrb[163].mxu0 }
0x1451   : > { %v10758_v47 = vmul.f32 0.35355338, %v10735_v38 }
0x1452   : > { %v26396_v14 = vsel %vm775_vm4, %v10759_v0, -1e+30 }
0x1453   : > { %v26400_v49 = vsel %vm775_vm4, %v10758_v47, -1e+30  ;;  %v10821_v35 = vsel %vm2028_vm5, %v26396_v14, -inf }
0x1454   : > { %v10787_v40 = vpop.xlane.xlu1 %10786  ;;  %10822 = vmax.xlane.f32.xlu1 %v10821_v35  ;;  %v10818_v30 = vsel %vm2028_vm5, %v26400_v49, -inf }
0x1455   : > { %v10827_v15 = vsub.f32 %v10763_v8, %v10787_v40  ;;  %v10784_v21 = vpop.xlane.xlu0 %10783  ;;  %10819 = vmax.xlane.f32.xlu0 %v10818_v30 }
0x1456   : > { %v10826_v38 = vsub.f32 %v10762_v31, %v10784_v21 }
0x1457   : > { %v10846_v4 = vmul.f32 1.442695, %v10827_v15 }
0x1458   : > { %v10844_v25 = vmul.f32 1.442695, %v10826_v38 }
0x1459   : > { %23115 = vpow2.f32 %v10846_v4 }
0x145a   : > { %23117 = vpow2.f32 %v10844_v25 }
0x1463   : > { %v23116_v0 = vpop.eup %23115 }
0x1464   : > { %v23118_v5 = vpop.eup %23117  ;;  %v10881_v47 = vsel %vm2028_vm5, %v23116_v0, 0.0 }
0x1465   : > { %10882 = vadd.xlane.f32.xlu1 %v10881_v47  ;;  %v10878_v42 = vsel %vm2028_vm5, %v23118_v5, 0.0 }
0x1466   : > { %10879 = vadd.xlane.f32.xlu0 %v10878_v42 }
0x1473   : > { %v10799_v35 = vpop.xlane.xlu1 %10798 }
0x1474   : > { %v10831_v10 = vsub.f32 %v10767_v27, %v10799_v35  ;;  %v10796_v22 = vpop.xlane.xlu0 %10795 }
0x1475   : > { %v10830_v26 = vsub.f32 %v10766_v33, %v10796_v22 }
0x1476   : > { %v10854_v40 = vmul.f32 1.442695, %v10831_v10 }
0x1477   : > { %v10852_v8 = vmul.f32 1.442695, %v10830_v26 }
0x1478   : > { %23119 = vpow2.f32 %v10854_v40 }
0x1479   : > { %23121 = vpow2.f32 %v10852_v8 }
0x1482   : > { %v23120_v15 = vpop.eup %23119 }
0x1483   : > { %v23122_v31 = vpop.eup %23121  ;;  %v10893_v4 = vsel %vm2028_vm5, %v23120_v15, 0.0 }
0x1484   : > { %10894 = vadd.xlane.f32.xlu1 %v10893_v4  ;;  %v10890_v25 = vsel %vm2028_vm5, %v23122_v31, 0.0 }
0x1485   : > { %10891 = vadd.xlane.f32.xlu0 %v10890_v25 }
0x14d6   : > { %v10811_v30 = vpop.xlane.xlu1 %10810 }
0x14d7   : > { %v10835_v21 = vsub.f32 %v10771_v46, %v10811_v30  ;;  %v10808_v38 = vpop.xlane.xlu0 %10807 }
0x14d8   : > { %v10834_v42 = vsub.f32 %v10770_v43, %v10808_v38 }
0x14d9   : > { %v10862_v47 = vmul.f32 1.442695, %v10835_v21 }
0x14da   : > { %v10860_v27 = vmul.f32 1.442695, %v10834_v42 }
0x14db   : > { %23123 = vpow2.f32 %v10862_v47 }
0x14dc   : > { %23125 = vpow2.f32 %v10860_v27 }
0x14e1   : > { %v10823_v35 = vpop.xlane.xlu1 %10822 }
0x14e2   : > { %v10820_v46 = vpop.xlane.xlu0 %10819  ;;  %v10839_v21 = vsub.f32 %v26396_v14, %v10823_v35 }
0x14e3   : > { %v10838_v38 = vsub.f32 %v26400_v49, %v10820_v46  ;;  %v10749_v46 = vmul.f32 0.35355338, %v26370_v62 }
0x14e4   : > { %v10870_v42 = vmul.f32 1.442695, %v10839_v21 }
0x14e5   : > { %v26410_v10 = vpop.eup %23123  ;;  %v10868_v47 = vmul.f32 1.442695, %v10838_v38 }
0x14e6   : > { %v26412_v26 = vpop.eup %23125  ;;  %v10905_v22 = vsel %vm2028_vm5, %v26410_v10, 0.0 }
0x14e7   : > { %10906 = vadd.xlane.f32.xlu1 %v10905_v22  ;;  %v10902_v33 = vsel %vm2028_vm5, %v26412_v26, 0.0 }
0x14e8   : > { %10903 = vadd.xlane.f32.xlu0 %v10902_v33 }
0x14f2   : > { %v10883_v40 = vpop.xlane.xlu1 %10882 }
0x14f3   : > { %23127 = vrcp.f32 %v10883_v40  ;;  %v10880_v43 = vpop.xlane.xlu0 %10879 }
0x14f4   : > { %23129 = vrcp.f32 %v10880_v43 }
0x14f5   : > { %23131 = vpow2.f32 %v10870_v42 }
0x14f6   : > { %23133 = vpow2.f32 %v10868_v47 }
0x14f8   : > { %22561 = vrot.lane.b32.xlu1 %v26221_v54, %s23444_s20 }
0x14fd   : > { %v23128_v8 = vpop.eup %23127 }
0x14fe   : > { %v23130_v4 = vpop.eup %23129  ;;  %22556 = vrot.lane.b32.xlu0 %v26185_v23, %s23444_s20  ;;  %v10939_v30 = vmul.f32 %v23128_v8, %v23116_v0  ;;  %v10748_v8 = vmul.f32 0.35355338, %v26372_v29 }
0x14ff   : > { %v10938_v25 = vmul.f32 %v23130_v4, %v23118_v5  ;;  %v26428_v0 = vpop.eup %23131 }
0x1500   : > { %v26430_v22 = vpop.eup %23133  ;;  %v26483_v62 = vsel %vm775_vm4, %v10748_v8, -1e+30 }
0x1501   : > { %20843 = vmatprep.mubr.msk.f32.mxu0 %vm2028_vm5, %v10938_v25  ;;  %v10914_v14 = vsel %vm2028_vm5, %v26430_v22, 0.0  ;;  %v10788_v38 = vsel %vm2028_vm5, %v26483_v62, -inf }
0x1502   : > { %20844 = vmatmul.mubr.msk.f32.vlgmr.msra.gmra.mrb[164].mxu0 %vm2028_vm5, %v10939_v30  ;;  %v10752_v30 = vmul.f32 0.35355338, %v26382_v45  ;;  %v10756_v45 = vmul.f32 0.35355338, %v26392_v48 }
0x1503   : > { %21898 = vmatpush3.bf16.msra.mxu0 %v26331_v36  ;;  %v10917_v36 = vsel %vm2028_vm5, %v26428_v0, 0.0 }
0x1504   : > { %21904 = vmatprep.subr.bf16.mxu0 %v26344_v11  ;;  %v26497_v42 = vsel %vm775_vm4, %v10752_v30, -1e+30 }
0x1511   : > { %v10895_v27 = vpop.xlane.xlu1 %10894 }
0x1512   : > { %23135 = vrcp.f32 %v10895_v27  ;;  %v10892_v5 = vpop.xlane.xlu0 %10891 }
0x1513   : > { %23137 = vrcp.f32 %v10892_v5  ;;  %v26510_v5 = vsel %vm775_vm4, %v10756_v45, -1e+30 }
0x151c   : > { %v23136_v33 = vpop.eup %23135  ;;  %10918 = vadd.xlane.f32.xlu1 %v10917_v36 }
0x151d   : > { %v23138_v40 = vpop.eup %23137  ;;  %10915 = vadd.xlane.f32.xlu0 %v10914_v14  ;;  %v10943_v35 = vmul.f32 %v23136_v33, %v23120_v15  ;;  %v10745_v15 = vmul.f32 0.35355338, %v26360_v58  ;;  %v10753_v58 = vmul.f32 0.35355338, %v26380_v37  ;;  %v10757_v37 = vmul.f32 0.35355338, %v26390_v24 }
0x151e   : > { %v10942_v49 = vmul.f32 %v23138_v40, %v23122_v31  ;;  %v10800_v24 = vsel %vm2028_vm5, %v26497_v42, -inf  ;;  %v10812_v33 = vsel %vm2028_vm5, %v26510_v5, -inf }
0x151f   : > { %v26469_v43 = vsel %vm775_vm4, %v10745_v15, -1e+30  ;;  %v26490_v21 = vsel %vm775_vm4, %v10753_v58, -1e+30  ;;  %v26504_v27 = vsel %vm775_vm4, %v10757_v37, -1e+30 }
0x1520   : > { %20857 = vmatprep.mubr.msk.f32.mxu0 %vm2028_vm5, %v10942_v49  ;;  %v10779_v25 = vsel %vm2028_vm5, %v26469_v43, -inf  ;;  %v10803_v47 = vsel %vm2028_vm5, %v26490_v21, -inf  ;;  %v10815_v48 = vsel %vm2028_vm5, %v26504_v27, -inf }
0x1521   : > { %20858 = vmatmul.mubr.msk.f32.vlgmr.msra.gmra.mrb[166].mxu0 %vm2028_vm5, %v10943_v35 }
0x1522   : > { %21906 = vmatpush3.bf16.msra.mxu0 %v26344_v11  ;;  %v10744_v11 = vmul.f32 0.35355338, %v26362_v16  ;;  %v26476_v16 = vsel %vm775_vm4, %v10749_v46, -1e+30 }
0x1523   : > { %21912 = vmatprep.subr.bf16.mxu0 %v26356_v13  ;;  %v10791_v29 = vsel %vm2028_vm5, %v26476_v16, -inf }
0x1524   : > { %v26464_v31 = vsel %vm775_vm4, %v10744_v11, -1e+30 }
0x1525   : > { %v10776_v4 = vsel %vm2028_vm5, %v26464_v31, -inf }
0x152d   : > { %11691 = vrot.lane.b32.xlu1 %v26176_v50, %s23444_s20 }
0x1531   : > { %22566 = vrot.lane.b32.xlu1 %v26257_v55, %s23444_s20 }
0x1533   : > { %11693 = vrot.lane.b32.xlu0 %v26197_v17, %s23444_s20 }
0x1535   : > { %11875 = vrot.lane.b32.xlu1 %v26233_v56, %s23444_s20 }
0x1537   : > { %11873 = vrot.lane.b32.xlu0 %v26212_v39, %s23444_s20 }
0x1539   : > { %22571 = vrot.lane.b32.xlu1 %v26296_v1, %s23444_s20 }
0x153b   : > { %12055 = vrot.lane.b32.xlu0 %v26248_v59, %s23444_s20 }
0x153d   : > { %12237 = vrot.lane.b32.xlu1 %v26282_v12, %s23444_s20 }
0x153f   : > { %12057 = vrot.lane.b32.xlu0 %v26279_v57, %s23444_s20 }
0x1543   : > { %12239 = vrot.lane.b32.xlu0 %v26316_v3, %s23444_s20 }
0x1561   : > { %10777 = vmax.xlane.f32.xlu1 %v10776_v4 }
0x1562   : > { %10780 = vmax.xlane.f32.xlu0 %v10779_v25 }
0x1565   : > { %10792 = vmax.xlane.f32.xlu1 %v10791_v29 }
0x1566   : > { %10789 = vmax.xlane.f32.xlu0 %v10788_v38 }
0x1569   : > { %10804 = vmax.xlane.f32.xlu1 %v10803_v47 }
0x156a   : > { %10801 = vmax.xlane.f32.xlu0 %v10800_v24 }
0x156d   : > { %10816 = vmax.xlane.f32.xlu1 %v10815_v48 }
0x156e   : > { %10813 = vmax.xlane.f32.xlu0 %v10812_v33 }
0x1574   : > { %v10907_v36 = vpop.xlane.xlu1 %10906 }
0x1575   : > { %23139 = vrcp.f32 %v10907_v36  ;;  %v10904_v40 = vpop.xlane.xlu0 %10903 }
0x1576   : > { %23141 = vrcp.f32 %v10904_v40 }
0x1578   : > { %v22562_v58 = vpop.permute.xlu1 %22561 }
0x1579   : > { %v22557_v14 = vpop.permute.xlu0 %22556  ;;  %v22564_v38 = vunpack.i.h.bf16 %v22562_v58 }
0x157a   : > { %v22559_v11 = vunpack.i.h.bf16 %v22557_v14  ;;  %v22558_v15 = vunpack.i.l.bf16 %v22557_v14 }
0x157c   : > { %v21921_v4 = vpack.c.bf16 %v22559_v11, %v22558_v15 }
0x157f   : > { %v23140_v49 = vpop.eup %23139 }
0x1580   : > { %v23142_v35 = vpop.eup %23141  ;;  %v10947_v8 = vmul.f32 %v23140_v49, %v26410_v10  ;;  %v22563_v10 = vunpack.i.l.bf16 %v22562_v58 }
0x1581   : > { %v10946_v46 = vmul.f32 %v23142_v35, %v26412_v26 }
0x1583   : > { %20871 = vmatprep.mubr.msk.f32.mxu0 %vm2028_vm5, %v10946_v46 }
0x1584   : > { %20872 = vmatmul.mubr.msk.f32.vlgmr.msra.gmra.mrb[168].mxu0 %vm2028_vm5, %v10947_v8 }
0x1585   : > { %21914 = vmatpush3.bf16.msra.mxu0 %v26356_v13  ;;  %v21933_v13 = vpack.c.bf16 %v22564_v38, %v22563_v10 }
0x1586   : > { %21923 = vmatprep.subr.msk.bf16.mxu0 %vm23745_vm3, %v21921_v4 }
0x15a9   : > { %v10919_v25 = vpop.xlane.xlu1 %10918 }
0x15aa   : > { %23143 = vrcp.f32 %v10919_v25  ;;  %v10916_v30 = vpop.xlane.xlu0 %10915 }
0x15ab   : > { %23145 = vrcp.f32 %v10916_v30 }
0x15ad   : > { %v11692_v29 = vpop.permute.xlu1 %11691 }
0x15ae   : > { %v11694_v48 = vpop.permute.xlu0 %11693 }
0x15b1   : > { %v22567_v45 = vpop.permute.xlu1 %22566 }
0x15b2   : > { %v22569_v36 = vunpack.i.h.bf16 %v22567_v45  ;;  %v22568_v40 = vunpack.i.l.bf16 %v22567_v45  ;;  %v11874_v14 = vpop.permute.xlu0 %11873 }
0x15b4   : > { %v23144_v37 = vpop.eup %23143 }
0x15b5   : > { %v23146_v26 = vpop.eup %23145  ;;  %v10951_v24 = vmul.f32 %v23144_v37, %v26428_v0  ;;  %v11876_v33 = vpop.permute.xlu1 %11875 }
0x15b6   : > { %v10950_v47 = vmul.f32 %v23146_v26, %v26430_v22  ;;  %v21945_v22 = vpack.c.bf16 %v22569_v36, %v22568_v40  ;;  %v12056_v11 = vpop.permute.xlu0 %12055 }
0x15b8   : > { %20885 = vmatprep.mubr.msk.f32.mxu0 %vm2028_vm5, %v10950_v47 }
0x15b9   : > { %20886 = vmatmul.mubr.msk.f32.vlgmr.msra.gmra.mrb[170].mxu0 %vm2028_vm5, %v10951_v24  ;;  %v22572_v0 = vpop.permute.xlu1 %22571 }
0x15ba   : > { %21926 = vmatpush3.bf16.xpose.msk.msra.mxu0 %vm23745_vm3, %v21921_v4  ;;  %20899 = vmatprep.mubr.msk.f32.mxu0 %vm592_vm0, %v11692_v29  ;;  %v22574_v49 = vunpack.i.h.bf16 %v22572_v0  ;;  %v22573_v35 = vunpack.i.l.bf16 %v22572_v0  ;;  %v12058_v46 = vpop.permute.xlu0 %12057 }
0x15bb   : > { %21935 = vmatprep.subr.msk.bf16.mxu0 %vm23745_vm3, %v21933_v13 }
0x15bc   : > { %v21957_v15 = vpack.c.bf16 %v22574_v49, %v22573_v35 }
0x15bd   : > { %v12238_v8 = vpop.permute.xlu1 %12237 }
0x15be   : > { %v12240_v25 = vpop.permute.xlu0 %12239 }
0x15c1   : > { %20900 = vmatmul.mubr.msk.f32.vlgmr.msra.gmra.mrb[172].mxu0 %vm592_vm0, %v11694_v48 }
0x15c2   : > { %21938 = vmatpush3.bf16.xpose.msk.msra.mxu0 %vm23745_vm3, %v21933_v13  ;;  %20913 = vmatprep.mubr.msk.f32.mxu0 %vm592_vm0, %v11874_v14 }
0x15c3   : > { %21947 = vmatprep.subr.msk.bf16.mxu0 %vm23745_vm3, %v21945_v22 }
0x15c9   : > { %20914 = vmatmul.mubr.msk.f32.vlgmr.msra.gmra.mrb[174].mxu0 %vm592_vm0, %v11876_v33 }
0x15ca   : > { %21950 = vmatpush3.bf16.xpose.msk.msra.mxu0 %vm23745_vm3, %v21945_v22  ;;  %20927 = vmatprep.mubr.msk.f32.mxu0 %vm592_vm0, %v12056_v11 }
0x15cb   : > { %21959 = vmatprep.subr.msk.bf16.mxu0 %vm23745_vm3, %v21957_v15 }
0x15d1   : > { %20928 = vmatmul.mubr.msk.f32.vlgmr.msra.gmra.mrb[176].mxu0 %vm592_vm0, %v12058_v46 }
0x15d2   : > { %21962 = vmatpush3.bf16.xpose.msk.msra.mxu0 %vm23745_vm3, %v21957_v15  ;;  %20941 = vmatprep.mubr.msk.f32.mxu0 %vm592_vm0, %v12238_v8 }
0x15d5   : > { %v26548_v4 = vpop.f32.mrb[164].mxu0 }
0x15d6   : > { %28449 = vst [vmem:[#allocation46_spill] sm:$0xff] %v26548_v4  ;;  %v26550_v58 = vpop.f32.mrb[165].mxu0 }
0x15d9   : > { %20942 = vmatmul.mubr.msk.f32.vlgmr.msra.gmra.mrb[178].mxu0 %vm592_vm0, %v12240_v25 }
0x15ee   : > { %v10778_v30 = vpop.xlane.xlu1 %10777 }
0x15ef   : > { %v10824_v29 = vsub.f32 %v26464_v31, %v10778_v30  ;;  %v10781_v37 = vpop.xlane.xlu0 %10780 }
0x15f0   : > { %v10825_v26 = vsub.f32 %v26469_v43, %v10781_v37 }
0x15f1   : > { %v10840_v38 = vmul.f32 1.442695, %v10824_v29 }
0x15f2   : > { %v10842_v10 = vmul.f32 1.442695, %v10825_v26  ;;  %v10793_v45 = vpop.xlane.xlu1 %10792 }
0x15f3   : > { %23147 = vpow2.f32 %v10840_v38  ;;  %v10829_v47 = vsub.f32 %v26476_v16, %v10793_v45  ;;  %v10790_v13 = vpop.xlane.xlu0 %10789 }
0x15f4   : > { %v26556_v24 = vpop.f32.mrb[166].mxu0  ;;  %23149 = vpow2.f32 %v10842_v10  ;;  %v10828_v48 = vsub.f32 %v26483_v62, %v10790_v13 }
0x15f5   : > { %28450 = vst [vmem:[#allocation47_spill] sm:$0xff] %v26556_v24  ;;  %v26559_v33 = vpop.f32.mrb[167].mxu0  ;;  %v10850_v36 = vmul.f32 1.442695, %v10829_v47 }
0x15f6   : > { %28451 = vst [vmem:[#allocation48_spill] sm:$0xff] %v26559_v33  ;;  %v10848_v40 = vmul.f32 1.442695, %v10828_v48  ;;  %v10805_v31 = vpop.xlane.xlu1 %10804 }
0x15f7   : > { %23151 = vpow2.f32 %v10850_v36  ;;  %v10833_v43 = vsub.f32 %v26490_v21, %v10805_v31  ;;  %v10802_v22 = vpop.xlane.xlu0 %10801 }
0x15f8   : > { %23153 = vpow2.f32 %v10848_v40  ;;  %v10832_v14 = vsub.f32 %v26497_v42, %v10802_v22 }
0x15f9   : > { %v10858_v0 = vmul.f32 1.442695, %v10833_v43 }
0x15fa   : > { %v10856_v16 = vmul.f32 1.442695, %v10832_v14  ;;  %v10817_v49 = vpop.xlane.xlu1 %10816 }
0x15fb   : > { %23155 = vpow2.f32 %v10858_v0  ;;  %v10837_v35 = vsub.f32 %v26504_v27, %v10817_v49  ;;  %v10814_v11 = vpop.xlane.xlu0 %10813 }
0x15fc   : > { %23157 = vpow2.f32 %v10856_v16  ;;  %v10836_v62 = vsub.f32 %v26510_v5, %v10814_v11 }
0x15fd   : > { %v26565_v15 = vpop.eup %23147  ;;  %v10866_v46 = vmul.f32 1.442695, %v10837_v35 }
0x15fe   : > { %v26567_v8 = vpop.eup %23149  ;;  %v10864_v21 = vmul.f32 1.442695, %v10836_v62  ;;  %v10872_v25 = vsel %vm2028_vm5, %v26565_v15, 0.0 }
0x15ff   : > { %23159 = vpow2.f32 %v10866_v46  ;;  %10873 = vadd.xlane.f32.xlu0 %v10872_v25  ;;  %v10875_v42 = vsel %vm2028_vm5, %v26567_v8, 0.0 }
0x1600   : > { %23161 = vpow2.f32 %v10864_v21  ;;  %10876 = vadd.xlane.f32.xlu1 %v10875_v42 }
0x1601   : > { %v26573_v27 = vpop.eup %23151 }
0x1602   : > { %v26575_v30 = vpop.eup %23153  ;;  %v10887_v5 = vsel %vm2028_vm5, %v26573_v27, 0.0 }
0x1603   : > { %v10884_v29 = vsel %vm2028_vm5, %v26575_v30, 0.0 }
0x1604   : > { %10888 = vadd.xlane.f32.xlu1 %v10887_v5  ;;  %10885 = vadd.xlane.f32.xlu0 %v10884_v29 }
0x1605   : > { %v26581_v37 = vpop.eup %23155 }
0x1606   : > { %v26583_v26 = vpop.eup %23157  ;;  %v10899_v38 = vsel %vm2028_vm5, %v26581_v37, 0.0 }
0x1607   : > { %v10896_v10 = vsel %vm2028_vm5, %v26583_v26, 0.0 }
0x1608   : > { %10900 = vadd.xlane.f32.xlu1 %v10899_v38  ;;  %10897 = vadd.xlane.f32.xlu0 %v10896_v10  ;;  %v28456_v10 = vld [vmem:[#allocation39_spill] sm:$0xff] }
0x1609   : > { %v26589_v45 = vpop.eup %23159 }
0x160a   : > { %v26591_v47 = vpop.eup %23161  ;;  %v10911_v13 = vsel %vm2028_vm5, %v26589_v45, 0.0 }
0x160b   : > { %v10908_v48 = vsel %vm2028_vm5, %v26591_v47, 0.0 }
0x160c   : > { %10912 = vadd.xlane.f32.xlu1 %v10911_v13  ;;  %10909 = vadd.xlane.f32.xlu0 %v10908_v48 }
0x161d   : > { %22581 = vrot.lane.b32.xlu1 %v26208_v34, %s23444_s20 }
0x1621   : > { %11600 = vrot.lane.b32.xlu1 %v26167_v6, %s23444_s20 }
0x1622   : > { %22576 = vrot.lane.b32.xlu0 %v26172_v60, %s23444_s20 }
0x1625   : > { %22586 = vrot.lane.b32.xlu1 %v26244_v53, %s23444_s20 }
0x1626   : > { %11602 = vrot.lane.b32.xlu0 %v26192_v20, %s23444_s20 }
0x1629   : > { %11784 = vrot.lane.b32.xlu1 %v26228_v52, %s23444_s20 }
0x162a   : > { %11782 = vrot.lane.b32.xlu0 %v26203_v9, %s23444_s20 }
0x162d   : > { %11964 = vrot.lane.b32.xlu1 %v26239_v51, %s23444_s20 }
0x162e   : > { %22591 = vrot.lane.b32.xlu0 %v26273_v61, %s23444_s20 }
0x1631   : > { %12146 = vrot.lane.b32.xlu1 %v26268_v63, %s23444_s20 }
0x1632   : > { %11966 = vrot.lane.b32.xlu0 %v26265_v44, %s23444_s20 }
0x1635   : > { %22601 = vrot.lane.b32.xlu1 %v26333_v32, %s23444_s20 }
0x1636   : > { %12148 = vrot.lane.b32.xlu0 %v26305_v41, %s23444_s20 }
0x1639   : > { %22606 = vrot.lane.b32.xlu1 %v26346_v2, %s23444_s20 }
0x163a   : > { %22596 = vrot.lane.b32.xlu0 %v26318_v28, %s23444_s20 }
0x163d   : > { %22616 = vrot.lane.b32.xlu1 %v26172_v60, %s23445_s21 }
0x163e   : > { %22611 = vrot.lane.b32.xlu0 %v26358_v18, %s23444_s20 }
0x1641   : > { %13634 = vrot.lane.b32.xlu1 %v26167_v6, %s23445_s21 }
0x1642   : > { %22621 = vrot.lane.b32.xlu0 %v26185_v23, %s23445_s21 }
0x1645   : > { %22626 = vrot.lane.b32.xlu1 %v26208_v34, %s23445_s21 }
0x1646   : > { %13636 = vrot.lane.b32.xlu0 %v26192_v20, %s23445_s21 }
0x1649   : > { %13727 = vrot.lane.b32.xlu1 %v26197_v17, %s23445_s21 }
0x164a   : > { %13725 = vrot.lane.b32.xlu0 %v26176_v50, %s23445_s21 }
0x164d   : > { %13816 = vrot.lane.b32.xlu1 %v26203_v9, %s23445_s21 }
0x164e   : > { %22631 = vrot.lane.b32.xlu0 %v26221_v54, %s23445_s21 }
0x1651   : > { %22636 = vrot.lane.b32.xlu1 %v26244_v53, %s23445_s21 }
0x1652   : > { %13818 = vrot.lane.b32.xlu0 %v26228_v52, %s23445_s21 }
0x1656   : > { %13907 = vrot.lane.b32.xlu0 %v26212_v39, %s23445_s21 }
0x1657   : > { %v26653_v36 = vpop.f32.mrb[168].mxu0 }
0x1658   : > { %28452 = vst [vmem:[#allocation49_spill] sm:$0xff] %v26653_v36  ;;  %v26655_v40 = vpop.f32.mrb[169].mxu0 }
0x1659   : > { %28453 = vst [vmem:[#allocation50_spill] sm:$0xff] %v26655_v40 }
0x165a   : > { %13909 = vrot.lane.b32.xlu0 %v26233_v56, %s23445_s21 }
0x168c   : > { %v26659_v31 = vpop.f32.mrb[170].mxu0  ;;  %v10874_v43 = vpop.xlane.xlu0 %10873 }
0x168d   : > { %28454 = vst [vmem:[#allocation51_spill] sm:$0xff] %v26659_v31  ;;  %23163 = vrcp.f32 %v10874_v43  ;;  %v26661_v22 = vpop.f32.mrb[171].mxu0  ;;  %v10877_v14 = vpop.xlane.xlu1 %10876  ;;  %v28457_v43 = vld [vmem:[#allocation41_spill] sm:$0xff] }
0x168e   : > { %28455 = vst [vmem:[#allocation52_spill] sm:$0xff] %v26661_v22  ;;  %23165 = vrcp.f32 %v10877_v14 }
0x1691   : > { %v10889_v0 = vpop.xlane.xlu1 %10888  ;;  %v10886_v16 = vpop.xlane.xlu0 %10885 }
0x1692   : > { %23167 = vrcp.f32 %v10889_v0 }
0x1693   : > { %23169 = vrcp.f32 %v10886_v16 }
0x1694   : > { %v26663_v49 = vpop.f32.mrb[172].mxu0 }
0x1695   : > { %v26665_v35 = vpop.f32.mrb[173].mxu0  ;;  %v10901_v11 = vpop.xlane.xlu1 %10900 }
0x1696   : > { %23171 = vrcp.f32 %v10901_v11  ;;  %v10898_v62 = vpop.xlane.xlu0 %10897 }
0x1697   : > { %v23164_v46 = vpop.eup %23163  ;;  %23173 = vrcp.f32 %v10898_v62 }
0x1698   : > { %v23166_v21 = vpop.eup %23165  ;;  %v10936_v25 = vmul.f32 %v23164_v46, %v26565_v15 }
0x1699   : > { %v10913_v42 = vpop.xlane.xlu1 %10912  ;;  %v10937_v5 = vmul.f32 %v23166_v21, %v26567_v8 }
0x169a   : > { %23175 = vrcp.f32 %v10913_v42  ;;  %v10910_v29 = vpop.xlane.xlu0 %10909  ;;  %20836 = vmatprep.mubr.msk.f32.mxu1 %vm2028_vm5, %v10936_v25 }
0x169b   : > { %23177 = vrcp.f32 %v10910_v29  ;;  %20837 = vmatmul.mubr.msk.f32.vlgmr.msra.gmra.mrb[132].mxu1 %vm2028_vm5, %v10937_v5 }
0x169c   : > { %v23168_v38 = vpop.eup %23167  ;;  %21894 = vmatpush3.bf16.msra.mxu1 %v28456_v10  ;;  %v26672_v13 = vpop.f32.mrb[174].mxu0 }
0x169d   : > { %v23170_v48 = vpop.eup %23169  ;;  %21900 = vmatprep.subr.bf16.mxu1 %v28457_v43  ;;  %v26675_v14 = vpop.f32.mrb[175].mxu0  ;;  %v10941_v8 = vmul.f32 %v23168_v38, %v26573_v27  ;;  %v28458_v27 = vld [vmem:[#allocation43_spill] sm:$0xff] }
0x169e   : > { %v22582_v15 = vpop.permute.xlu1 %22581  ;;  %v22577_v0 = vpop.permute.xlu0 %22576  ;;  %v10940_v16 = vmul.f32 %v23170_v48, %v26575_v30 }
0x169f   : > { %v22579_v46 = vunpack.i.h.bf16 %v22577_v0  ;;  %v22578_v21 = vunpack.i.l.bf16 %v22577_v0 }
0x16a0   : > { %v23172_v11 = vpop.eup %23171  ;;  %20850 = vmatprep.mubr.msk.f32.mxu1 %vm2028_vm5, %v10940_v16 }
0x16a1   : > { %v23174_v62 = vpop.eup %23173  ;;  %20851 = vmatmul.mubr.msk.f32.vlgmr.msra.gmra.mrb[134].mxu1 %vm2028_vm5, %v10941_v8  ;;  %v10945_v42 = vmul.f32 %v23172_v11, %v26581_v37  ;;  %v21915_v48 = vpack.c.bf16 %v22579_v46, %v22578_v21  ;;  %v22584_v11 = vunpack.i.h.bf16 %v22582_v15 }
0x16a2   : > { %v11601_v25 = vpop.permute.xlu1 %11600  ;;  %21902 = vmatpush3.bf16.msra.mxu1 %v28457_v43  ;;  %v11603_v5 = vpop.permute.xlu0 %11602  ;;  %v10944_v29 = vmul.f32 %v23174_v62, %v26583_v26  ;;  %v22583_v62 = vunpack.i.l.bf16 %v22582_v15 }
0x16a3   : > { %21908 = vmatprep.subr.bf16.mxu1 %v28458_v27 }
0x16a4   : > { %v23176_v38 = vpop.eup %23175  ;;  %20864 = vmatprep.mubr.msk.f32.mxu1 %vm2028_vm5, %v10944_v29  ;;  %v26686_v30 = vpop.f32.mrb[176].mxu0  ;;  %v21927_v29 = vpack.c.bf16 %v22584_v11, %v22583_v62 }
0x16a5   : > { %v23178_v10 = vpop.eup %23177  ;;  %20865 = vmatmul.mubr.msk.f32.vlgmr.msra.gmra.mrb[136].mxu1 %vm2028_vm5, %v10945_v42  ;;  %v26689_v8 = vpop.f32.mrb[177].mxu0  ;;  %v10949_v37 = vmul.f32 %v23176_v38, %v26589_v45 }
0x16a6   : > { %v22587_v0 = vpop.permute.xlu1 %22586  ;;  %21910 = vmatpush3.bf16.msra.mxu1 %v28458_v27  ;;  %v11783_v43 = vpop.permute.xlu0 %11782  ;;  %v10948_v26 = vmul.f32 %v23178_v10, %v26591_v47 }
0x16a7   : > { %21917 = vmatprep.subr.msk.bf16.mxu1 %vm23745_vm3, %v21915_v48  ;;  %v22589_v38 = vunpack.i.h.bf16 %v22587_v0  ;;  %v22588_v10 = vunpack.i.l.bf16 %v22587_v0 }
0x16a8   : > { %20878 = vmatprep.mubr.msk.f32.mxu1 %vm2028_vm5, %v10948_v26 }
0x16a9   : > { %20879 = vmatmul.mubr.msk.f32.vlgmr.msra.gmra.mrb[138].mxu1 %vm2028_vm5, %v10949_v37 }
0x16aa   : > { %v11785_v16 = vpop.permute.xlu1 %11784  ;;  %20892 = vmatprep.mubr.msk.f32.mxu1 %vm592_vm0, %v11601_v25  ;;  %v22592_v46 = vpop.permute.xlu0 %22591  ;;  %v21939_v25 = vpack.c.bf16 %v22589_v38, %v22588_v10 }
0x16ab   : > { %v22594_v0 = vunpack.i.h.bf16 %v22592_v46  ;;  %v22593_v62 = vunpack.i.l.bf16 %v22592_v46 }
0x16ac   : > { %v26699_v21 = vpop.f32.mrb[178].mxu0 }
0x16ad   : > { %v26701_v45 = vpop.f32.mrb[179].mxu0 }
0x16ae   : > { %v11965_v42 = vpop.permute.xlu1 %11964  ;;  %v11967_v47 = vpop.permute.xlu0 %11966 }
0x16af   : > { %21920 = vmatpush3.bf16.xpose.msk.msra.mxu1 %vm23745_vm3, %v21915_v48 }
0x16b0   : > { %21929 = vmatprep.subr.msk.bf16.mxu1 %vm23745_vm3, %v21927_v29 }
0x16b2   : > { %v12147_v27 = vpop.permute.xlu1 %12146  ;;  %v12149_v15 = vpop.permute.xlu0 %12148 }
0x16b6   : > { %v22602_v37 = vpop.permute.xlu1 %22601  ;;  %20893 = vmatmul.mubr.msk.f32.vlgmr.msra.gmra.mrb[140].mxu1 %vm592_vm0, %v11603_v5  ;;  %v22597_v26 = vpop.permute.xlu0 %22596  ;;  %v21951_v5 = vpack.c.bf16 %v22594_v0, %v22593_v62 }
0x16b7   : > { %v22604_v56 = vunpack.i.h.bf16 %v22602_v37  ;;  %v22603_v31 = vunpack.i.l.bf16 %v22602_v37  ;;  %v22599_v39 = vunpack.i.h.bf16 %v22597_v26  ;;  %v22598_v11 = vunpack.i.l.bf16 %v22597_v26  ;;  %21932 = vmatpush3.bf16.xpose.msk.msra.mxu1 %vm23745_vm3, %v21927_v29  ;;  %20906 = vmatprep.mubr.msk.f32.mxu1 %vm592_vm0, %v11783_v43 }
0x16b8   : > { %21941 = vmatprep.subr.msk.bf16.mxu1 %vm23745_vm3, %v21939_v25  ;;  %v12330_v37 = vmul.f32 0.35355338, %v26665_v35 }
0x16b9   : > { %v21967_v48 = vpack.c.bf16 %v22599_v39, %v22598_v11  ;;  %v26713_v38 = vpack.c.bf16 %v22604_v56, %v22603_v31 }
0x16ba   : > { %v26764_v62 = vsel %vm775_vm4, %v12330_v37, -1e+30 }
0x16bb   : > { %21968 = vmatprep.subr.bf16.mxu0 %v21967_v48 }
0x16bc   : > { %21970 = vmatpush3.bf16.msra.mxu0 %v21967_v48 }
0x16bd   : > { %21976 = vmatprep.subr.bf16.mxu0 %v26713_v38 }
0x16be   : > { %20907 = vmatmul.mubr.msk.f32.vlgmr.msra.gmra.mrb[142].mxu1 %vm592_vm0, %v11785_v16 }
0x16bf   : > { %21944 = vmatpush3.bf16.xpose.msk.msra.mxu1 %vm23745_vm3, %v21939_v25  ;;  %20920 = vmatprep.mubr.msk.f32.mxu1 %vm592_vm0, %v11965_v42 }
0x16c0   : > { %21953 = vmatprep.subr.msk.bf16.mxu1 %vm23745_vm3, %v21951_v5 }
0x16c6   : > { %20921 = vmatmul.mubr.msk.f32.vlgmr.msra.gmra.mrb[144].mxu1 %vm592_vm0, %v11967_v47 }
0x16c7   : > { %21956 = vmatpush3.bf16.xpose.msk.msra.mxu1 %vm23745_vm3, %v21951_v5  ;;  %20934 = vmatprep.mubr.msk.f32.mxu1 %vm592_vm0, %v12147_v27  ;;  %v12331_v27 = vmul.f32 0.35355338, %v26663_v49  ;;  %v12334_v49 = vmul.f32 0.35355338, %v26675_v14  ;;  %v12335_v5 = vmul.f32 0.35355338, %v26672_v13 }
0x16c8   : > { %v12338_v14 = vmul.f32 0.35355338, %v26689_v8  ;;  %v12339_v13 = vmul.f32 0.35355338, %v26686_v30 }
0x16c9   : > { %v26757_v0 = vsel %vm775_vm4, %v12331_v27, -1e+30  ;;  %v26771_v27 = vsel %vm775_vm4, %v12334_v49, -1e+30  ;;  %v26778_v37 = vsel %vm775_vm4, %v12335_v5, -1e+30 }
0x16ca   : > { %v26785_v49 = vsel %vm775_vm4, %v12338_v14, -1e+30  ;;  %v12381_v8 = vsel %vm2028_vm5, %v26778_v37, -inf  ;;  %v12343_v5 = vmul.f32 0.35355338, %v26699_v21 }
0x16ce   : > { %20935 = vmatmul.mubr.msk.f32.vlgmr.msra.gmra.mrb[146].mxu1 %vm592_vm0, %v12149_v15 }
0x176e   : > { %v26727_v39 = vpop.f32.mrb[132].mxu1 }
0x176f   : > { %v26729_v56 = vpop.f32.mrb[133].mxu1 }
0x1774   : > { %v26731_v31 = vpop.f32.mrb[134].mxu1 }
0x1775   : > { %28459 = vst [vmem:[#allocation39_spill] sm:$0xff] %v26731_v31  ;;  %v26733_v43 = vpop.f32.mrb[135].mxu1 }
0x1776   : > { %28460 = vst [vmem:[#allocation41_spill] sm:$0xff] %v26733_v43 }
0x1778   : > { %v26735_v16 = vpop.f32.mrb[136].mxu1 }
0x1779   : > { %28461 = vst [vmem:[#allocation43_spill] sm:$0xff] %v26735_v16  ;;  %v26737_v46 = vpop.f32.mrb[137].mxu1 }
0x177a   : > { %28462 = vst [vmem:[#allocation53_spill] sm:$0xff] %v26737_v46 }
0x177c   : > { %v26739_v42 = vpop.f32.mrb[138].mxu1 }
0x177d   : > { %28463 = vst [vmem:[#allocation54_spill] sm:$0xff] %v26739_v42  ;;  %v26741_v29 = vpop.f32.mrb[139].mxu1 }
0x177e   : > { %28464 = vst [vmem:[#allocation55_spill] sm:$0xff] %v26741_v29 }
0x1789   : > { %v20894_v47 = vpop.f32.mrb[140].mxu1 }
0x178a   : > { %v12329_v10 = vmul.f32 0.35355338, %v20894_v47  ;;  %v11682_v15 = vpop.f32.mrb[141].mxu1 }
0x178b   : > { %v12328_v25 = vmul.f32 0.35355338, %v11682_v15 }
0x178c   : > { %v26747_v26 = vsel %vm775_vm4, %v12329_v10, -1e+30  ;;  %v12369_v10 = vsel %vm2028_vm5, %v26757_v0, -inf }
0x178d   : > { %v26751_v11 = vsel %vm775_vm4, %v12328_v25, -1e+30  ;;  %v12363_v48 = vsel %vm2028_vm5, %v26747_v26, -inf  ;;  %v12366_v25 = vsel %vm2028_vm5, %v26764_v62, -inf }
0x178e   : > { %12364 = vmax.xlane.f32.xlu0 %v12363_v48  ;;  %v12360_v35 = vsel %vm2028_vm5, %v26751_v11, -inf  ;;  %v12378_v48 = vsel %vm2028_vm5, %v26771_v27, -inf }
0x178f   : > { %12361 = vmax.xlane.f32.xlu1 %v12360_v35  ;;  %v26791_v35 = vsel %vm775_vm4, %v12339_v13, -1e+30 }
0x1790   : > { %v12393_v14 = vsel %vm2028_vm5, %v26791_v35, -inf }
0x1791   : > { %v20908_v47 = vpop.f32.mrb[142].mxu1 }
0x1792   : > { %v11864_v15 = vpop.f32.mrb[143].mxu1  ;;  %12370 = vmax.xlane.f32.xlu0 %v12369_v10  ;;  %v12390_v10 = vsel %vm2028_vm5, %v26785_v49, -inf }
0x1793   : > { %12367 = vmax.xlane.f32.xlu1 %v12366_v25 }
0x1796   : > { %12379 = vmax.xlane.f32.xlu0 %v12378_v48  ;;  %v26804_v48 = vsel %vm775_vm4, %v12343_v5, -1e+30  ;;  %v12333_v5 = vmul.f32 0.35355338, %v20908_v47 }
0x1797   : > { %12382 = vmax.xlane.f32.xlu1 %v12381_v8  ;;  %v12405_v21 = vsel %vm2028_vm5, %v26804_v48, -inf }
0x1799   : > { %v26794_v30 = vpop.f32.mrb[144].mxu1 }
0x179a   : > { %v26798_v25 = vpop.f32.mrb[145].mxu1  ;;  %12391 = vmax.xlane.f32.xlu0 %v12390_v10  ;;  %v12332_v10 = vmul.f32 0.35355338, %v11864_v15  ;;  %v26837_v15 = vpop.permute.xlu0 %22611 }
0x179b   : > { %12394 = vmax.xlane.f32.xlu1 %v12393_v14  ;;  %v12342_v14 = vmul.f32 0.35355338, %v26701_v45 }
0x179c   : > { %v26825_v22 = vsel %vm775_vm4, %v12332_v10, -1e+30  ;;  %v26841_v10 = vpop.permute.xlu1 %22606 }
0x179d   : > { %v12372_v47 = vsel %vm2028_vm5, %v26825_v22, -inf }
0x179f   : > { %12406 = vmax.xlane.f32.xlu1 %v12405_v21  ;;  %v26821_v21 = vsel %vm775_vm4, %v12333_v5, -1e+30  ;;  %v26839_v5 = vpop.permute.xlu0 %22621 }
0x17a0   : > { %v26845_v52 = vpop.permute.xlu1 %22616 }
0x17a1   : > { %v26808_v13 = vpop.f32.mrb[146].mxu1 }
0x17a2   : > { %v26810_v8 = vpop.f32.mrb[147].mxu1 }
0x17b0   : > { %13998 = vrot.lane.b32.xlu0 %v26239_v51, %s23445_s21  ;;  %22641 = vrot.lane.b32.xlu1 %v26257_v55, %s23445_s21  ;;  %v12375_v51 = vsel %vm2028_vm5, %v26821_v21, -inf  ;;  %v26831_v55 = vsel %vm775_vm4, %v12342_v14, -1e+30 }
0x17b1   : > { %v12402_v45 = vsel %vm2028_vm5, %v26831_v55, -inf }
0x17b4   : > { %14000 = vrot.lane.b32.xlu0 %v26265_v44, %s23445_s21  ;;  %v26843_v44 = vpop.permute.xlu0 %13636 }
0x17b8   : > { %v26847_v14 = vpop.permute.xlu0 %13725 }
0x17bc   : > { %v26851_v42 = vpop.permute.xlu0 %22631 }
0x17c0   : > { %v26855_v53 = vpop.permute.xlu0 %13818 }
0x17c4   : > { %v26859_v29 = vpop.permute.xlu0 %13907 }
0x17c8   : > { %v26863_v36 = vpop.permute.xlu0 %13909 }
0x17d3   : > { %12376 = vmax.xlane.f32.xlu0 %v12375_v51  ;;  %v26849_v51 = vpop.permute.xlu1 %13634 }
0x17d4   : > { %12373 = vmax.xlane.f32.xlu1 %v12372_v47 }
0x17d7   : > { %12403 = vmax.xlane.f32.xlu0 %v12402_v45  ;;  %v26853_v47 = vpop.permute.xlu1 %22626 }
0x17db   : > { %v26857_v45 = vpop.permute.xlu1 %13727 }
0x17df   : > { %v26861_v54 = vpop.permute.xlu1 %13816 }
0x17e3   : > { %v26865_v9 = vpop.permute.xlu1 %22636 }
0x181b   : > { %v26867_v40 = vpop.xlane.xlu0 %12364 }
0x181c   : > { %v26869_v50 = vpop.xlane.xlu1 %12361 }
0x181f   : > { %v12371_v16 = vpop.xlane.xlu0 %12370 }
0x1820   : > { %v12411_v17 = vsub.f32 %v26757_v0, %v12371_v16  ;;  %v12368_v46 = vpop.xlane.xlu1 %12367 }
0x1821   : > { %v12410_v20 = vsub.f32 %v26764_v62, %v12368_v46 }
0x1822   : > { %v12430_v24 = vmul.f32 1.442695, %v12411_v17 }
0x1823   : > { %v12428_v34 = vmul.f32 1.442695, %v12410_v20  ;;  %v12380_v33 = vpop.xlane.xlu0 %12379 }
0x1824   : > { %23179 = vpow2.f32 %v12430_v24  ;;  %v12414_v23 = vsub.f32 %v26771_v27, %v12380_v33  ;;  %v12383_v31 = vpop.xlane.xlu1 %12382 }
0x1825   : > { %23181 = vpow2.f32 %v12428_v34  ;;  %v12415_v6 = vsub.f32 %v26778_v37, %v12383_v31 }
0x1826   : > { %v12436_v43 = vmul.f32 1.442695, %v12414_v23 }
0x1827   : > { %v12438_v18 = vmul.f32 1.442695, %v12415_v6  ;;  %v12392_v31 = vpop.xlane.xlu0 %12391 }
0x1828   : > { %23183 = vpow2.f32 %v12436_v43  ;;  %v12395_v4 = vpop.xlane.xlu1 %12394  ;;  %v12418_v43 = vsub.f32 %v26785_v49, %v12392_v31 }
0x1829   : > { %23185 = vpow2.f32 %v12438_v18  ;;  %v12419_v16 = vsub.f32 %v26791_v35, %v12395_v4 }
0x182a   : > { %v12444_v62 = vmul.f32 1.442695, %v12418_v43 }
0x182b   : > { %v12446_v0 = vmul.f32 1.442695, %v12419_v16 }
0x182c   : > { %v12407_v27 = vpop.xlane.xlu1 %12406 }
0x182d   : > { %23187 = vpow2.f32 %v12446_v0  ;;  %v12423_v37 = vsub.f32 %v26804_v48, %v12407_v27  ;;  %v12336_v0 = vmul.f32 0.35355338, %v26798_v25 }
0x182e   : > { %v26876_v46 = vpop.eup %23179  ;;  %23189 = vpow2.f32 %v12444_v62 }
0x182f   : > { %v26878_v20 = vpop.eup %23181  ;;  %v12465_v17 = vsel %vm2028_vm5, %v26876_v46, 0.0  ;;  %v12454_v35 = vmul.f32 1.442695, %v12423_v37  ;;  %v12337_v37 = vmul.f32 0.35355338, %v26794_v30 }
0x1830   : > { %12466 = vadd.xlane.f32.xlu1 %v12465_v17  ;;  %v12462_v34 = vsel %vm2028_vm5, %v26878_v20, 0.0 }
0x1831   : > { %12463 = vadd.xlane.f32.xlu0 %v12462_v34  ;;  %23191 = vpow2.f32 %v12454_v35  ;;  %v26909_v34 = vsel %vm775_vm4, %v12336_v0, -1e+30  ;;  %v26933_v0 = vsel %vm775_vm4, %v12337_v37, -1e+30 }
0x1832   : > { %v26884_v6 = vpop.eup %23183  ;;  %v12384_v49 = vsel %vm2028_vm5, %v26909_v34, -inf }
0x1833   : > { %v26886_v23 = vpop.eup %23185  ;;  %v12474_v18 = vsel %vm2028_vm5, %v26884_v6, 0.0 }
0x1834   : > { %v12477_v4 = vsel %vm2028_vm5, %v26886_v23, 0.0 }
0x1835   : > { %12478 = vadd.xlane.f32.xlu1 %v12477_v4  ;;  %12475 = vadd.xlane.f32.xlu0 %v12474_v18  ;;  %v26917_v4 = vpop.permute.xlu0 %13998 }
0x1837   : > { %v26892_v24 = vpop.eup %23187 }
0x1838   : > { %v12489_v33 = vsel %vm2028_vm5, %v26892_v24, 0.0  ;;  %v26902_v16 = vpop.eup %23189 }
0x1839   : > { %12490 = vadd.xlane.f32.xlu1 %v12489_v33  ;;  %v12486_v17 = vsel %vm2028_vm5, %v26902_v16, 0.0  ;;  %v26919_v25 = vpop.permute.xlu0 %14000 }
0x183b   : > { %v26913_v18 = vpop.eup %23191 }
0x183c   : > { %v12501_v48 = vsel %vm2028_vm5, %v26913_v18, 0.0 }
0x184a   : > { %22646 = vrot.lane.b32.xlu1 %v26273_v61, %s23445_s21 }
0x184b   : > { %14089 = vrot.lane.b32.xlu0 %v26248_v59, %s23445_s21 }
0x1860   : > { %v12377_v33 = vpop.xlane.xlu0 %12376 }
0x1864   : > { %v12404_v31 = vpop.xlane.xlu0 %12403 }
0x1865   : > { %v12422_v43 = vsub.f32 %v26831_v55, %v12404_v31 }
0x1867   : > { %v12452_v62 = vmul.f32 1.442695, %v12422_v43 }
0x1869   : > { %23193 = vpow2.f32 %v12452_v62 }
0x186a   : > { %12487 = vadd.xlane.f32.xlu0 %v12486_v17  ;;  %v12340_v17 = vmul.f32 0.35355338, %v26810_v8 }
0x186c   : > { %v26940_v55 = vsel %vm775_vm4, %v12340_v17, -1e+30 }
0x186d   : > { %v12396_v30 = vsel %vm2028_vm5, %v26940_v55, -inf }
0x186e   : > { %12385 = vmax.xlane.f32.xlu1 %v12384_v49  ;;  %v12387_v49 = vsel %vm2028_vm5, %v26933_v0, -inf }
0x1872   : > { %12502 = vadd.xlane.f32.xlu1 %v12501_v48  ;;  %v26944_v48 = vpop.permute.xlu1 %22641 }
0x1873   : > { %v26926_v27 = vpop.eup %23193 }
0x1874   : > { %v12498_v35 = vsel %vm2028_vm5, %v26926_v27, 0.0 }
0x1876   : > { %v12374_v31 = vpop.xlane.xlu1 %12373 }
0x1880   : > { %14091 = vrot.lane.b32.xlu0 %v26279_v57, %s23445_s21 }
0x1883   : > { %22651 = vrot.lane.b32.xlu1 %v26296_v1, %s23445_s21 }
0x189f   : > { %12499 = vadd.xlane.f32.xlu0 %v12498_v35  ;;  %v12408_v35 = vsub.f32 %v26751_v11, %v26869_v50  ;;  %v22613_v50 = vunpack.i.l.bf16 %v26837_v15 }
0x18a1   : > { %v12424_v57 = vmul.f32 1.442695, %v12408_v35 }
0x18a3   : > { %12388 = vmax.xlane.f32.xlu0 %v12387_v49 }
0x18a7   : > { %12397 = vmax.xlane.f32.xlu1 %v12396_v30  ;;  %v22609_v30 = vunpack.i.h.bf16 %v26841_v10 }
0x18b8   : > { %14271 = vrot.lane.b32.xlu1 %v26282_v12, %s23445_s21  ;;  %v22608_v12 = vunpack.i.l.bf16 %v26841_v10  ;;  %v12413_v10 = vsub.f32 %v26821_v21, %v12377_v33 }
0x18b9   : > { %14180 = vrot.lane.b32.xlu0 %v26268_v63, %s23445_s21  ;;  %v12412_v63 = vsub.f32 %v26825_v22, %v12374_v31 }
0x18ba   : > { %v21983_v11 = vpack.c.bf16 %v22609_v30, %v22608_v12  ;;  %v12409_v30 = vsub.f32 %v26747_v26, %v26867_v40 }
0x18bb   : > { %v12432_v35 = vmul.f32 1.442695, %v12412_v63 }
0x18bd   : > { %v12467_v8 = vpop.xlane.xlu1 %12466  ;;  %14182 = vrot.lane.b32.xlu0 %v26305_v41, %s23445_s21 }
0x18be   : > { %23195 = vrcp.f32 %v12467_v8  ;;  %v12464_v43 = vpop.xlane.xlu0 %12463 }
0x18bf   : > { %23197 = vrcp.f32 %v12464_v43 }
0x18c2   : > { %v12479_v62 = vpop.xlane.xlu1 %12478  ;;  %v12476_v37 = vpop.xlane.xlu0 %12475 }
0x18c3   : > { %23199 = vrcp.f32 %v12479_v62 }
0x18c4   : > { %23201 = vrcp.f32 %v12476_v37  ;;  %v22614_v37 = vunpack.i.h.bf16 %v26837_v15 }
0x18c5   : > { %23203 = vpow2.f32 %v12424_v57  ;;  %v12341_v57 = vmul.f32 0.35355338, %v26808_v13 }
0x18c6   : > { %23205 = vpow2.f32 %v12432_v35  ;;  %v21991_v15 = vpack.c.bf16 %v22614_v37, %v22613_v50  ;;  %v12491_v33 = vpop.xlane.xlu1 %12490  ;;  %v26990_v31 = vpop.permute.xlu0 %14089  ;;  %v12426_v37 = vmul.f32 1.442695, %v12409_v30  ;;  %v22618_v35 = vunpack.i.l.bf16 %v26845_v52 }
0x18c7   : > { %v26974_v12 = vsel %vm775_vm4, %v12341_v57, -1e+30  ;;  %v28466_v57 = vld [vmem:[#allocation42_spill] sm:$0xff] }
0x18c8   : > { %v23196_v17 = vpop.eup %23195 }
0x18c9   : > { %v23198_v49 = vpop.eup %23197  ;;  %v12523_v43 = vmul.f32 %v23196_v17, %v26876_v46 }
0x18ca   : > { %v12522_v8 = vmul.f32 %v23198_v49, %v26878_v20  ;;  %v12434_v20 = vmul.f32 1.442695, %v12413_v10  ;;  %v26992_v17 = vpop.permute.xlu1 %22646  ;;  %v22619_v10 = vunpack.i.h.bf16 %v26845_v52 }
0x18cc   : > { %20955 = vmatprep.mubr.msk.f32.mxu0 %vm2028_vm5, %v12522_v8  ;;  %23207 = vpow2.f32 %v12434_v20  ;;  %v21995_v40 = vpack.c.bf16 %v22619_v10, %v22618_v35  ;;  %v28468_v10 = vld [vmem:[#allocation40_spill] sm:$0xff] }
0x18cd   : > { %v23200_v62 = vpop.eup %23199  ;;  %20956 = vmatmul.mubr.msk.f32.vlgmr.msra.gmra.mrb[180].mxu0 %vm2028_vm5, %v12523_v43  ;;  %23209 = vrcp.f32 %v12491_v33 }
0x18ce   : > { %v23202_v41 = vpop.eup %23201  ;;  %21978 = vmatpush3.bf16.msra.mxu0 %v26713_v38  ;;  %v12527_v22 = vmul.f32 %v23200_v62, %v26886_v23  ;;  %v12399_v38 = vsel %vm2028_vm5, %v26974_v12, -inf }
0x18cf   : > { %21984 = vmatprep.subr.bf16.mxu0 %v21983_v11  ;;  %v12526_v46 = vmul.f32 %v23202_v41, %v26884_v6  ;;  %v26970_v63 = vpop.eup %23203 }
0x18d0   : > { %v12456_v41 = vsel %vm2028_vm5, %v26970_v63, 0.0  ;;  %v26980_v21 = vpop.eup %23205 }
0x18d1   : > { %20969 = vmatprep.mubr.msk.f32.mxu0 %vm2028_vm5, %v12526_v46  ;;  %v12468_v13 = vsel %vm2028_vm5, %v26980_v21, 0.0 }
0x18d2   : > { %20970 = vmatmul.mubr.msk.f32.vlgmr.msra.gmra.mrb[182].mxu0 %vm2028_vm5, %v12527_v22 }
0x18d3   : > { %21986 = vmatpush3.bf16.msra.mxu0 %v21983_v11 }
0x18d4   : > { %21992 = vmatprep.subr.bf16.mxu0 %v21991_v15 }
0x18d6   : > { %v26984_v6 = vpop.eup %23207 }
0x18d7   : > { %v12471_v23 = vsel %vm2028_vm5, %v26984_v6, 0.0  ;;  %v23210_v50 = vpop.eup %23209 }
0x18d8   : > { %v12531_v46 = vmul.f32 %v23210_v50, %v26892_v24  ;;  %v22623_v50 = vunpack.i.l.bf16 %v26839_v5 }
0x18dc   : > { %12457 = vadd.xlane.f32.xlu1 %v12456_v41  ;;  %12400 = vmax.xlane.f32.xlu0 %v12399_v38  ;;  %v28467_v38 = vld [vmem:[#allocation44_spill] sm:$0xff] }
0x18e0   : > { %12469 = vadd.xlane.f32.xlu1 %v12468_v13 }
0x18e4   : > { %12472 = vadd.xlane.f32.xlu1 %v12471_v23 }
0x18f2   : > { %14273 = vrot.lane.b32.xlu0 %v26316_v3, %s23445_s21 }
0x18f7   : > { %v12488_v49 = vpop.xlane.xlu0 %12487 }
0x18f8   : > { %23211 = vrcp.f32 %v12488_v49 }
0x18fb   : > { %v12386_v8 = vpop.xlane.xlu1 %12385  ;;  %v27015_v20 = vpop.permute.xlu0 %14091 }
0x18fc   : > { %v12416_v43 = vsub.f32 %v26909_v34, %v12386_v8 }
0x18fe   : > { %v12440_v62 = vmul.f32 1.442695, %v12416_v43 }
0x1900   : > { %23213 = vpow2.f32 %v12440_v62 }
0x1901   : > { %23215 = vpow2.f32 %v12426_v37  ;;  %v22624_v37 = vunpack.i.h.bf16 %v26839_v5 }
0x1902   : > { %v23212_v11 = vpop.eup %23211 }
0x1903   : > { %v12530_v22 = vmul.f32 %v23212_v11, %v26902_v16  ;;  %v28465_v16 = vld [vmem:[#allocation38_spill] sm:$0xff] }
0x1905   : > { %20983 = vmatprep.mubr.msk.f32.mxu0 %vm2028_vm5, %v12530_v22  ;;  %v22001_v22 = vpack.c.bf16 %v22624_v37, %v22623_v50 }
0x1906   : > { %20984 = vmatmul.mubr.msk.f32.vlgmr.msra.gmra.mrb[184].mxu0 %vm2028_vm5, %v12531_v46 }
0x1907   : > { %21994 = vmatpush3.bf16.msra.mxu0 %v21991_v15  ;;  %v12503_v15 = vpop.xlane.xlu1 %12502 }
0x1908   : > { %21997 = vmatprep.subr.msk.bf16.mxu0 %vm23745_vm3, %v21995_v40  ;;  %23217 = vrcp.f32 %v12503_v15 }
0x190a   : > { %v27005_v26 = vpop.eup %23213 }
0x190b   : > { %v12480_v34 = vsel %vm2028_vm5, %v27005_v26, 0.0  ;;  %v27009_v52 = vpop.eup %23215  ;;  %v27021_v13 = vpop.permute.xlu1 %22651 }
0x190c   : > { %12481 = vadd.xlane.f32.xlu1 %v12480_v34  ;;  %v12459_v24 = vsel %vm2028_vm5, %v27009_v52, 0.0 }
0x1911   : > { %12460 = vadd.xlane.f32.xlu0 %v12459_v24 }
0x1912   : > { %v23218_v43 = vpop.eup %23217 }
0x1913   : > { %v12535_v35 = vmul.f32 %v23218_v43, %v26913_v18  ;;  %v22628_v18 = vunpack.i.l.bf16 %v26853_v47 }
0x1927   : > { %22656 = vrot.lane.b32.xlu0 %v28465_v16, %s23444_s20 }
0x192b   : > { %22666 = vrot.lane.b32.xlu0 %v28466_v57, %s23444_s20 }
0x192c   : > { %v12500_v41 = vpop.xlane.xlu0 %12499 }
0x192d   : > { %23219 = vrcp.f32 %v12500_v41 }
0x192f   : > { %22671 = vrot.lane.b32.xlu0 %v28467_v38, %s23444_s20 }
0x1930   : > { %v12389_v23 = vpop.xlane.xlu0 %12388 }
0x1931   : > { %v12417_v33 = vsub.f32 %v26933_v0, %v12389_v23 }
0x1933   : > { %v12442_v49 = vmul.f32 1.442695, %v12417_v33  ;;  %22676 = vrot.lane.b32.xlu0 %v28465_v16, %s23445_s21 }
0x1934   : > { %v12398_v30 = vpop.xlane.xlu1 %12397 }
0x1935   : > { %23221 = vpow2.f32 %v12442_v49  ;;  %v12420_v8 = vsub.f32 %v26940_v55, %v12398_v30 }
0x1937   : > { %v23220_v62 = vpop.eup %23219  ;;  %v12448_v11 = vmul.f32 1.442695, %v12420_v8  ;;  %22686 = vrot.lane.b32.xlu0 %v28468_v10, %s23445_s21 }
0x1938   : > { %v12534_v0 = vmul.f32 %v23220_v62, %v26926_v27  ;;  %v22629_v27 = vunpack.i.h.bf16 %v26853_v47  ;;  %v22634_v47 = vunpack.i.h.bf16 %v26851_v42 }
0x1939   : > { %23223 = vpow2.f32 %v12448_v11 }
0x193a   : > { %20997 = vmatprep.mubr.msk.f32.mxu0 %vm2028_vm5, %v12534_v0  ;;  %v22007_v34 = vpack.c.bf16 %v22629_v27, %v22628_v18 }
0x193b   : > { %20998 = vmatmul.mubr.msk.f32.vlgmr.msra.gmra.mrb[186].mxu0 %vm2028_vm5, %v12535_v35 }
0x193c   : > { %22000 = vmatpush3.bf16.xpose.msk.msra.mxu0 %vm23745_vm3, %v21995_v40  ;;  %21056 = vmatprep.mubr.msk.f32.mxu0 %vm592_vm0, %v26849_v51  ;;  %v22633_v40 = vunpack.i.l.bf16 %v26851_v42  ;;  %v22643_v42 = vunpack.i.l.bf16 %v26944_v48 }
0x193d   : > { %22003 = vmatprep.subr.msk.bf16.mxu0 %vm23745_vm3, %v22001_v22 }
0x193e   : > { %v22013_v24 = vpack.c.bf16 %v22634_v47, %v22633_v40 }
0x193f   : > { %v27041_v5 = vpop.eup %23221 }
0x1940   : > { %v12483_v55 = vsel %vm2028_vm5, %v27041_v5, 0.0 }
0x1941   : > { %12484 = vadd.xlane.f32.xlu1 %v12483_v55 }
0x1943   : > { %v27047_v46 = vpop.eup %23223  ;;  %21057 = vmatmul.mubr.msk.f32.vlgmr.msra.gmra.mrb[188].mxu0 %vm592_vm0, %v26843_v44  ;;  %v22639_v44 = vunpack.i.h.bf16 %v26865_v9 }
0x1944   : > { %22006 = vmatpush3.bf16.xpose.msk.msra.mxu0 %vm23745_vm3, %v22001_v22  ;;  %21063 = vmatprep.mubr.msk.f32.mxu0 %vm592_vm0, %v26847_v14  ;;  %v12492_v51 = vsel %vm2028_vm5, %v27047_v46, 0.0  ;;  %v22638_v14 = vunpack.i.l.bf16 %v26865_v9  ;;  %v22649_v9 = vunpack.i.h.bf16 %v26992_v17 }
0x1945   : > { %22009 = vmatprep.subr.msk.bf16.mxu0 %vm23745_vm3, %v22007_v34  ;;  %12493 = vadd.xlane.f32.xlu1 %v12492_v51 }
0x1946   : > { %v22019_v15 = vpack.c.bf16 %v22639_v44, %v22638_v14 }
0x194b   : > { %21064 = vmatmul.mubr.msk.f32.vlgmr.msra.gmra.mrb[190].mxu0 %vm592_vm0, %v26857_v45 }
0x194c   : > { %22012 = vmatpush3.bf16.xpose.msk.msra.mxu0 %vm23745_vm3, %v22007_v34  ;;  %21070 = vmatprep.mubr.msk.f32.mxu0 %vm592_vm0, %v26861_v54  ;;  %v22644_v54 = vunpack.i.h.bf16 %v26944_v48  ;;  %v22654_v48 = vunpack.i.h.bf16 %v27021_v13 }
0x194d   : > { %22015 = vmatprep.subr.msk.bf16.mxu0 %vm23745_vm3, %v22013_v24 }
0x194e   : > { %v22025_v45 = vpack.c.bf16 %v22644_v54, %v22643_v42 }
0x1953   : > { %21071 = vmatmul.mubr.msk.f32.vlgmr.msra.gmra.mrb[192].mxu0 %vm592_vm0, %v26855_v53  ;;  %v22648_v53 = vunpack.i.l.bf16 %v26992_v17  ;;  %v22653_v17 = vunpack.i.l.bf16 %v27021_v13 }
0x1954   : > { %22018 = vmatpush3.bf16.xpose.msk.msra.mxu0 %vm23745_vm3, %v22013_v24  ;;  %21077 = vmatprep.mubr.msk.f32.mxu0 %vm592_vm0, %v26859_v29  ;;  %v14181_v29 = vpop.permute.xlu0 %14180 }
0x1955   : > { %22021 = vmatprep.subr.msk.bf16.mxu0 %vm23745_vm3, %v22019_v15  ;;  %v22031_v41 = vpack.c.bf16 %v22649_v9, %v22648_v53  ;;  %v22037_v49 = vpack.c.bf16 %v22654_v48, %v22653_v17 }
0x195b   : > { %21078 = vmatmul.mubr.msk.f32.vlgmr.msra.gmra.mrb[194].mxu0 %vm592_vm0, %v26863_v36  ;;  %v14272_v36 = vpop.permute.xlu1 %14271 }
0x195c   : > { %22024 = vmatpush3.bf16.xpose.msk.msra.mxu0 %vm23745_vm3, %v22019_v15  ;;  %21084 = vmatprep.mubr.msk.f32.mxu0 %vm592_vm0, %v26917_v4  ;;  %v14183_v4 = vpop.permute.xlu0 %14182 }
0x195d   : > { %22027 = vmatprep.subr.msk.bf16.mxu0 %vm23745_vm3, %v22025_v45 }
0x1963   : > { %21085 = vmatmul.mubr.msk.f32.vlgmr.msra.gmra.mrb[196].mxu0 %vm592_vm0, %v26919_v25 }
0x1964   : > { %22030 = vmatpush3.bf16.xpose.msk.msra.mxu0 %vm23745_vm3, %v22025_v45  ;;  %21091 = vmatprep.mubr.msk.f32.mxu0 %vm592_vm0, %v26990_v31 }
0x1965   : > { %22033 = vmatprep.subr.msk.bf16.mxu0 %vm23745_vm3, %v22031_v41 }
0x1969   : > { %v12458_v23 = vpop.xlane.xlu1 %12457  ;;  %v12401_v33 = vpop.xlane.xlu0 %12400 }
0x196a   : > { %23225 = vrcp.f32 %v12458_v23  ;;  %v12421_v25 = vsub.f32 %v26974_v12, %v12401_v33 }
0x196b   : > { %21092 = vmatmul.mubr.msk.f32.vlgmr.msra.gmra.mrb[198].mxu0 %vm592_vm0, %v27015_v20 }
0x196c   : > { %v12450_v30 = vmul.f32 1.442695, %v12421_v25  ;;  %22036 = vmatpush3.bf16.xpose.msk.msra.mxu0 %vm23745_vm3, %v22031_v41  ;;  %21098 = vmatprep.mubr.msk.f32.mxu0 %vm592_vm0, %v14181_v29 }
0x196d   : > { %22039 = vmatprep.subr.msk.bf16.mxu0 %vm23745_vm3, %v22037_v49  ;;  %v14274_v8 = vpop.permute.xlu0 %14273  ;;  %v12470_v43 = vpop.xlane.xlu1 %12469 }
0x196e   : > { %23227 = vpow2.f32 %v12450_v30 }
0x196f   : > { %23229 = vrcp.f32 %v12470_v43 }
0x1971   : > { %v12473_v24 = vpop.xlane.xlu1 %12472 }
0x1973   : > { %21099 = vmatmul.mubr.msk.f32.vlgmr.msra.gmra.mrb[200].mxu0 %vm592_vm0, %v14183_v4 }
0x1974   : > { %v23226_v31 = vpop.eup %23225  ;;  %22042 = vmatpush3.bf16.xpose.msk.msra.mxu0 %vm23745_vm3, %v22037_v49  ;;  %21105 = vmatprep.mubr.msk.f32.mxu0 %vm592_vm0, %v14272_v36 }
0x1975   : > { %v12520_v12 = vmul.f32 %v23226_v31, %v26970_v63 }
0x1977   : > { %20948 = vmatprep.mubr.msk.f32.mxu1 %vm2028_vm5, %v12520_v12 }
0x1978   : > { %v27115_v20 = vpop.eup %23227 }
0x1979   : > { %v12495_v13 = vsel %vm2028_vm5, %v27115_v20, 0.0  ;;  %v23230_v18 = vpop.eup %23229 }
0x197a   : > { %12496 = vadd.xlane.f32.xlu1 %v12495_v13  ;;  %v12524_v51 = vmul.f32 %v23230_v18, %v26980_v21 }
0x197b   : > { %21106 = vmatmul.mubr.msk.f32.vlgmr.msra.gmra.mrb[202].mxu0 %vm592_vm0, %v14274_v8 }
0x198b   : > { %22661 = vrot.lane.b32.xlu1 %v28468_v10, %s23444_s20 }
0x198f   : > { %22681 = vrot.lane.b32.xlu1 %v26318_v28, %s23445_s21 }
0x1999   : > { %v12482_v44 = vpop.xlane.xlu1 %12481 }
0x199e   : > { %v12461_v63 = vpop.xlane.xlu0 %12460 }
0x199f   : > { %23231 = vrcp.f32 %v12461_v63 }
0x19a0   : > { %v27124_v62 = vpop.f32.mrb[180].mxu0  ;;  %23233 = vrcp.f32 %v12473_v24 }
0x19a1   : > { %v27126_v37 = vpop.f32.mrb[181].mxu0  ;;  %23235 = vrcp.f32 %v12482_v44 }
0x19a2   : > { %v22657_v50 = vpop.permute.xlu0 %22656 }
0x19a3   : > { %v22659_v11 = vunpack.i.h.bf16 %v22657_v50  ;;  %v22658_v0 = vunpack.i.l.bf16 %v22657_v50 }
0x19a5   : > { %v27128_v35 = vpop.f32.mrb[182].mxu0  ;;  %v21963_v22 = vpack.c.bf16 %v22659_v11, %v22658_v0 }
0x19a6   : > { %v27130_v27 = vpop.f32.mrb[183].mxu0  ;;  %v22667_v54 = vpop.permute.xlu0 %22666 }
0x19a7   : > { %21964 = vmatprep.subr.bf16.mxu1 %v21963_v22  ;;  %v22668_v21 = vunpack.i.l.bf16 %v22667_v54 }
0x19a8   : > { %21966 = vmatpush3.bf16.msra.mxu1 %v21963_v22 }
0x19a9   : > { %v23232_v55 = vpop.eup %23231 }
0x19aa   : > { %v12521_v34 = vmul.f32 %v23232_v55, %v27009_v52  ;;  %v22669_v52 = vunpack.i.h.bf16 %v22667_v54  ;;  %v22672_v29 = vpop.permute.xlu0 %22671  ;;  %v23234_v4 = vpop.eup %23233 }
0x19ab   : > { %v23236_v33 = vpop.eup %23235  ;;  %v22674_v25 = vunpack.i.h.bf16 %v22672_v29  ;;  %v22673_v49 = vunpack.i.l.bf16 %v22672_v29  ;;  %v12525_v12 = vmul.f32 %v23234_v4, %v26984_v6 }
0x19ac   : > { %20949 = vmatmul.mubr.msk.f32.vlgmr.msra.gmra.mrb[148].mxu1 %vm2028_vm5, %v12521_v34  ;;  %v21979_v23 = vpack.c.bf16 %v22669_v52, %v22668_v21  ;;  %v12528_v43 = vmul.f32 %v23236_v33, %v27005_v26  ;;  %v18731_v26 = vld [vmem:[%s28239_s6 + $0x28] sm:$0xff] }
0x19ad   : > { %20962 = vmatprep.mubr.msk.f32.mxu1 %vm2028_vm5, %v12524_v51  ;;  %v21987_v50 = vpack.c.bf16 %v22674_v25, %v22673_v49 }
0x19ce   : > { %v12485_v14 = vpop.xlane.xlu1 %12484 }
0x19cf   : > { %23237 = vrcp.f32 %v12485_v14  ;;  %v27171_v14 = vld [vmem:[%s28239_s6 + $0x20] sm:$0xff] }
0x19d2   : > { %v12494_v15 = vpop.xlane.xlu1 %12493 }
0x19d3   : > { %23239 = vrcp.f32 %v12494_v15 }
0x19d9   : > { %v27136_v47 = vpop.f32.mrb[184].mxu0  ;;  %v23238_v8 = vpop.eup %23237 }
0x19da   : > { %v27138_v40 = vpop.f32.mrb[185].mxu0  ;;  %v12529_v0 = vmul.f32 %v23238_v8, %v27041_v5 }
0x19dd   : > { %v23240_v63 = vpop.eup %23239 }
0x19de   : > { %v12532_v55 = vmul.f32 %v23240_v63, %v27047_v46 }
0x1a07   : > { %v12497_v42 = vpop.xlane.xlu1 %12496 }
0x1a08   : > { %23241 = vrcp.f32 %v12497_v42 }
0x1a0b   : > { %v22662_v45 = vpop.permute.xlu1 %22661 }
0x1a0c   : > { %v22664_v9 = vunpack.i.h.bf16 %v22662_v45  ;;  %v22663_v53 = vunpack.i.l.bf16 %v22662_v45 }
0x1a0e   : > { %v27140_v41 = vpop.f32.mrb[186].mxu0  ;;  %v21971_v36 = vpack.c.bf16 %v22664_v9, %v22663_v53 }
0x1a0f   : > { %v27142_v48 = vpop.f32.mrb[187].mxu0  ;;  %v22682_v17 = vpop.permute.xlu1 %22681 }
0x1a10   : > { %v22684_v30 = vunpack.i.h.bf16 %v22682_v17  ;;  %v22683_v31 = vunpack.i.l.bf16 %v22682_v17  ;;  %21972 = vmatprep.subr.bf16.mxu1 %v21971_v36 }
0x1a11   : > { %21974 = vmatpush3.bf16.msra.mxu1 %v21971_v36 }
0x1a12   : > { %21980 = vmatprep.subr.bf16.mxu1 %v21979_v23  ;;  %v22047_v13 = vpack.c.bf16 %v22684_v30, %v22683_v31  ;;  %v23242_v22 = vpop.eup %23241 }
0x1a13   : > { %v12533_v24 = vmul.f32 %v23242_v22, %v27115_v20 }
0x1a14   : > { %20963 = vmatmul.mubr.msk.f32.vlgmr.msra.gmra.mrb[150].mxu1 %vm2028_vm5, %v12525_v12  ;;  %22048 = vmatprep.subr.bf16.mxu0 %v22047_v13 }
0x1a15   : > { %21982 = vmatpush3.bf16.msra.mxu1 %v21979_v23  ;;  %20976 = vmatprep.mubr.msk.f32.mxu1 %vm2028_vm5, %v12528_v43 }
0x1a16   : > { %v21058_v11 = vpop.f32.mrb[188].mxu0  ;;  %22050 = vmatpush3.bf16.msra.mxu0 %v22047_v13  ;;  %21988 = vmatprep.subr.bf16.mxu1 %v21987_v50 }
0x1a17   : > { %v14363_v18 = vmul.f32 0.35355338, %v21058_v11  ;;  %v13716_v6 = vpop.f32.mrb[189].mxu0 }
0x1a18   : > { %v14362_v34 = vmul.f32 0.35355338, %v13716_v6  ;;  %20977 = vmatmul.mubr.msk.f32.vlgmr.msra.gmra.mrb[152].mxu1 %vm2028_vm5, %v12529_v0 }
0x1a19   : > { %v27156_v51 = vsel %vm775_vm4, %v14363_v18, -1e+30  ;;  %21990 = vmatpush3.bf16.msra.mxu1 %v21987_v50  ;;  %20990 = vmatprep.mubr.msk.f32.mxu1 %vm2028_vm5, %v12532_v55 }
0x1a1a   : > { %v27161_v5 = vsel %vm775_vm4, %v14362_v34, -1e+30  ;;  %v14397_v46 = vsel %vm2028_vm5, %v27156_v51, -inf  ;;  %21000 = vmatprep.subr.mxu1 %v18731_v26 }
0x1a1b   : > { %14398 = vmax.xlane.f32.xlu0 %v14397_v46  ;;  %v14394_v44 = vsel %vm2028_vm5, %v27161_v5, -inf }
0x1a1c   : > { %14395 = vmax.xlane.f32.xlu1 %v14394_v44  ;;  %20991 = vmatmul.mubr.msk.f32.vlgmr.msra.gmra.mrb[154].mxu1 %vm2028_vm5, %v12533_v24 }
0x1a1d   : > { %21001 = vmatpush3.msra.mxu1 %v18731_v26 }
0x1a1e   : > { %v21065_v15 = vpop.f32.mrb[190].mxu0  ;;  %21026 = vmatprep.subr.mxu1 %v27171_v14 }
0x1a1f   : > { %v14365_v54 = vmul.f32 0.35355338, %v21065_v15  ;;  %v13807_v42 = vpop.f32.mrb[191].mxu0 }
0x1a20   : > { %v14364_v20 = vmul.f32 0.35355338, %v13807_v42 }
0x1a21   : > { %v27177_v52 = vsel %vm775_vm4, %v14365_v54, -1e+30 }
0x1a22   : > { %v27181_v21 = vsel %vm775_vm4, %v14364_v20, -1e+30  ;;  %v14403_v45 = vsel %vm2028_vm5, %v27177_v52, -inf }
0x1a23   : > { %14404 = vmax.xlane.f32.xlu1 %v14403_v45  ;;  %v14400_v9 = vsel %vm2028_vm5, %v27181_v21, -inf }
0x1a24   : > { %14401 = vmax.xlane.f32.xlu0 %v14400_v9 }
0x1a26   : > { %v21072_v53 = vpop.f32.mrb[192].mxu0 }
0x1a27   : > { %v14367_v29 = vmul.f32 0.35355338, %v21072_v53  ;;  %v13898_v36 = vpop.f32.mrb[193].mxu0 }
0x1a28   : > { %v14366_v4 = vmul.f32 0.35355338, %v13898_v36 }
0x1a29   : > { %v27189_v17 = vsel %vm775_vm4, %v14367_v29, -1e+30 }
0x1a2a   : > { %v27193_v23 = vsel %vm775_vm4, %v14366_v4, -1e+30  ;;  %v14409_v33 = vsel %vm2028_vm5, %v27189_v17, -inf }
0x1a2b   : > { %14410 = vmax.xlane.f32.xlu1 %v14409_v33  ;;  %v14406_v25 = vsel %vm2028_vm5, %v27193_v23, -inf }
0x1a2c   : > { %14407 = vmax.xlane.f32.xlu0 %v14406_v25 }
0x1a2e   : > { %v21079_v49 = vpop.f32.mrb[194].mxu0 }
0x1a2f   : > { %v14369_v30 = vmul.f32 0.35355338, %v21079_v49  ;;  %v13989_v31 = vpop.f32.mrb[195].mxu0 }
0x1a30   : > { %v14368_v12 = vmul.f32 0.35355338, %v13989_v31 }
0x1a31   : > { %v27201_v13 = vsel %vm775_vm4, %v14369_v30, -1e+30 }
0x1a32   : > { %v27205_v8 = vsel %vm775_vm4, %v14368_v12, -1e+30  ;;  %v14415_v43 = vsel %vm2028_vm5, %v27201_v13, -inf }
0x1a33   : > { %14416 = vmax.xlane.f32.xlu1 %v14415_v43  ;;  %v14412_v63 = vsel %vm2028_vm5, %v27205_v8, -inf }
0x1a34   : > { %14413 = vmax.xlane.f32.xlu0 %v14412_v63 }
0x1a36   : > { %v21086_v50 = vpop.f32.mrb[196].mxu0 }
0x1a37   : > { %v14371_v11 = vmul.f32 0.35355338, %v21086_v50  ;;  %v14080_v0 = vpop.f32.mrb[197].mxu0 }
0x1a38   : > { %v14370_v22 = vmul.f32 0.35355338, %v14080_v0  ;;  %v22677_v0 = vpop.permute.xlu0 %22676 }
0x1a39   : > { %v27213_v18 = vsel %vm775_vm4, %v14371_v11, -1e+30 }
0x1a3a   : > { %v27217_v6 = vsel %vm775_vm4, %v14370_v22, -1e+30  ;;  %v14421_v55 = vsel %vm2028_vm5, %v27213_v18, -inf  ;;  %v22679_v22 = vunpack.i.h.bf16 %v22677_v0 }
0x1a3b   : > { %14422 = vmax.xlane.f32.xlu1 %v14421_v55  ;;  %v14418_v26 = vsel %vm2028_vm5, %v27217_v6, -inf  ;;  %v22678_v55 = vunpack.i.l.bf16 %v22677_v0 }
0x1a3c   : > { %14419 = vmax.xlane.f32.xlu0 %v14418_v26 }
0x1a3e   : > { %v21093_v34 = vpop.f32.mrb[198].mxu0 }
0x1a3f   : > { %v14373_v46 = vmul.f32 0.35355338, %v21093_v34  ;;  %v14171_v24 = vpop.f32.mrb[199].mxu0 }
0x1a40   : > { %v14372_v44 = vmul.f32 0.35355338, %v14171_v24  ;;  %v27275_v24 = vpop.permute.xlu0 %22686 }
0x1a41   : > { %v27225_v15 = vsel %vm775_vm4, %v14373_v46, -1e+30  ;;  %v27267_v46 = vpack.c.bf16 %v22679_v22, %v22678_v55 }
0x1a42   : > { %v27229_v54 = vsel %vm775_vm4, %v14372_v44, -1e+30  ;;  %v14427_v42 = vsel %vm2028_vm5, %v27225_v15, -inf }
0x1a43   : > { %14428 = vmax.xlane.f32.xlu1 %v14427_v42  ;;  %v14424_v20 = vsel %vm2028_vm5, %v27229_v54, -inf }
0x1a44   : > { %14425 = vmax.xlane.f32.xlu0 %v14424_v20 }
0x1a46   : > { %v21100_v45 = vpop.f32.mrb[200].mxu0 }
0x1a47   : > { %v14375_v9 = vmul.f32 0.35355338, %v21100_v45  ;;  %v14262_v53 = vpop.f32.mrb[201].mxu0 }
0x1a48   : > { %v14374_v29 = vmul.f32 0.35355338, %v14262_v53 }
0x1a49   : > { %v27237_v36 = vsel %vm775_vm4, %v14375_v9, -1e+30 }
0x1a4a   : > { %v27241_v4 = vsel %vm775_vm4, %v14374_v29, -1e+30  ;;  %v14433_v33 = vsel %vm2028_vm5, %v27237_v36, -inf }
0x1a4b   : > { %14434 = vmax.xlane.f32.xlu1 %v14433_v33  ;;  %v14430_v25 = vsel %vm2028_vm5, %v27241_v4, -inf }
0x1a4c   : > { %14431 = vmax.xlane.f32.xlu0 %v14430_v25 }
0x1a4e   : > { %v21107_v49 = vpop.f32.mrb[202].mxu0 }
0x1a4f   : > { %v14377_v30 = vmul.f32 0.35355338, %v21107_v49  ;;  %v14353_v31 = vpop.f32.mrb[203].mxu0 }
0x1a50   : > { %v14376_v12 = vmul.f32 0.35355338, %v14353_v31 }
0x1a51   : > { %v27249_v43 = vsel %vm775_vm4, %v14377_v30, -1e+30 }
0x1a52   : > { %v27253_v63 = vsel %vm775_vm4, %v14376_v12, -1e+30  ;;  %v14439_v50 = vsel %vm2028_vm5, %v27249_v43, -inf }
0x1a53   : > { %14440 = vmax.xlane.f32.xlu1 %v14439_v50  ;;  %v14436_v11 = vsel %vm2028_vm5, %v27253_v63, -inf }
0x1a54   : > { %14437 = vmax.xlane.f32.xlu0 %v14436_v11 }
0x1a64   : > { %22691 = vrot.lane.b32.xlu1 %v26333_v32, %s23445_s21 }
0x1a6a   : > { %22696 = vrot.lane.b32.xlu0 %v28466_v57, %s23445_s21 }
0x1a6e   : > { %22701 = vrot.lane.b32.xlu0 %v26346_v2, %s23445_s21 }
0x1a7f   : > { %v20950_v26 = vpop.f32.mrb[148].mxu1 }
0x1a80   : > { %v12616_v34 = vpop.f32.mrb[149].mxu1 }
0x1a81   : > { %21002 = vmatprep.mubr.msk.f32.mxu1 %vm592_vm0, %v12616_v34 }
0x1a82   : > { %21003 = vmatmul.mubr.msk.f32.vlgmr.msra.gmra.mrb[156].mxu1 %vm592_vm0, %v20950_v26 }
0x1a83   : > { %21027 = vmatpush3.msra.mxu1 %v27171_v14  ;;  %21005 = vmatprep.mubr.msk.f32.mxu1 %vm592_vm0, %v27126_v37 }
0x1a84   : > { %22044 = vmatprep.subr.bf16.mxu1 %v27267_v46 }
0x1a86   : > { %21006 = vmatmul.mubr.msk.f32.gmra.mrb[158].mxu1 %vm592_vm0, %v27124_v62 }
0x1aa8   : > { %v14399_v44 = vpop.xlane.xlu0 %14398 }
0x1aa9   : > { %v14443_v42 = vsub.f32 %v27156_v51, %v14399_v44  ;;  %v14396_v20 = vpop.xlane.xlu1 %14395 }
0x1aaa   : > { %v14442_v45 = vsub.f32 %v27161_v5, %v14396_v20 }
0x1aab   : > { %v14460_v9 = vmul.f32 1.442695, %v14443_v42 }
0x1aac   : > { %v14458_v53 = vmul.f32 1.442695, %v14442_v45 }
0x1aad   : > { %23243 = vpow2.f32 %v14460_v9 }
0x1aae   : > { %23245 = vpow2.f32 %v14458_v53 }
0x1ab0   : > { %v14405_v14 = vpop.xlane.xlu1 %14404 }
0x1ab1   : > { %v14445_v37 = vsub.f32 %v27177_v52, %v14405_v14  ;;  %v14402_v29 = vpop.xlane.xlu0 %14401 }
0x1ab2   : > { %v14444_v33 = vsub.f32 %v27181_v21, %v14402_v29 }
0x1ab3   : > { %v14464_v25 = vmul.f32 1.442695, %v14445_v37 }
0x1ab4   : > { %v14462_v62 = vmul.f32 1.442695, %v14444_v33 }
0x1ab5   : > { %23247 = vpow2.f32 %v14464_v25 }
0x1ab6   : > { %23249 = vpow2.f32 %v14462_v62 }
0x1ab7   : > { %v27281_v49 = vpop.eup %23243 }
0x1ab8   : > { %v27283_v51 = vpop.eup %23245  ;;  %v14411_v30 = vpop.xlane.xlu1 %14410  ;;  %v14493_v5 = vsel %vm2028_vm5, %v27281_v49, 0.0 }
0x1ab9   : > { %v14447_v31 = vsub.f32 %v27189_v17, %v14411_v30  ;;  %14494 = vadd.xlane.f32.xlu1 %v14493_v5  ;;  %v14408_v12 = vpop.xlane.xlu0 %14407  ;;  %v14490_v52 = vsel %vm2028_vm5, %v27283_v51, 0.0 }
0x1aba   : > { %v14446_v21 = vsub.f32 %v27193_v23, %v14408_v12  ;;  %14491 = vadd.xlane.f32.xlu0 %v14490_v52 }
0x1abb   : > { %v14468_v50 = vmul.f32 1.442695, %v14447_v31 }
0x1abc   : > { %v14466_v11 = vmul.f32 1.442695, %v14446_v21 }
0x1abd   : > { %23251 = vpow2.f32 %v14468_v50 }
0x1abe   : > { %23253 = vpow2.f32 %v14466_v11 }
0x1abf   : > { %v27291_v0 = vpop.eup %23247 }
0x1ac0   : > { %v27293_v22 = vpop.eup %23249  ;;  %v14417_v55 = vpop.xlane.xlu1 %14416  ;;  %v14499_v17 = vsel %vm2028_vm5, %v27291_v0, 0.0 }
0x1ac1   : > { %v14449_v26 = vsub.f32 %v27201_v13, %v14417_v55  ;;  %14500 = vadd.xlane.f32.xlu1 %v14499_v17  ;;  %v14414_v34 = vpop.xlane.xlu0 %14413  ;;  %v14496_v23 = vsel %vm2028_vm5, %v27293_v22, 0.0 }
0x1ac2   : > { %v14448_v44 = vsub.f32 %v27205_v8, %v14414_v34  ;;  %14497 = vadd.xlane.f32.xlu0 %v14496_v23 }
0x1ac3   : > { %v14472_v42 = vmul.f32 1.442695, %v14449_v26 }
0x1ac4   : > { %v14470_v20 = vmul.f32 1.442695, %v14448_v44 }
0x1ac5   : > { %23255 = vpow2.f32 %v14472_v42 }
0x1ac6   : > { %23257 = vpow2.f32 %v14470_v20 }
0x1ac7   : > { %v27301_v45 = vpop.eup %23251 }
0x1ac8   : > { %v27303_v9 = vpop.eup %23253  ;;  %v14423_v53 = vpop.xlane.xlu1 %14422  ;;  %v14505_v13 = vsel %vm2028_vm5, %v27301_v45, 0.0 }
0x1ac9   : > { %v14451_v14 = vsub.f32 %v27213_v18, %v14423_v53  ;;  %14506 = vadd.xlane.f32.xlu1 %v14505_v13  ;;  %v14420_v37 = vpop.xlane.xlu0 %14419  ;;  %v14502_v8 = vsel %vm2028_vm5, %v27303_v9, 0.0 }
0x1aca   : > { %v14450_v29 = vsub.f32 %v27217_v6, %v14420_v37  ;;  %14503 = vadd.xlane.f32.xlu0 %v14502_v8 }
0x1acb   : > { %v14476_v33 = vmul.f32 1.442695, %v14451_v14 }
0x1acc   : > { %v14474_v25 = vmul.f32 1.442695, %v14450_v29 }
0x1acd   : > { %23259 = vpow2.f32 %v14476_v33 }
0x1ace   : > { %23261 = vpow2.f32 %v14474_v25 }
0x1acf   : > { %v27311_v62 = vpop.eup %23255 }
0x1ad0   : > { %v27313_v30 = vpop.eup %23257  ;;  %v14429_v5 = vpop.xlane.xlu1 %14428  ;;  %v14511_v18 = vsel %vm2028_vm5, %v27311_v62, 0.0 }
0x1ad1   : > { %v14453_v31 = vsub.f32 %v27225_v15, %v14429_v5  ;;  %14512 = vadd.xlane.f32.xlu1 %v14511_v18  ;;  %v14426_v12 = vpop.xlane.xlu0 %14425  ;;  %v14508_v6 = vsel %vm2028_vm5, %v27313_v30, 0.0 }
0x1ad2   : > { %v14452_v52 = vsub.f32 %v27229_v54, %v14426_v12  ;;  %14509 = vadd.xlane.f32.xlu0 %v14508_v6 }
0x1ad3   : > { %v14480_v21 = vmul.f32 1.442695, %v14453_v31 }
0x1ad4   : > { %v14478_v50 = vmul.f32 1.442695, %v14452_v52 }
0x1ad5   : > { %23263 = vpow2.f32 %v14480_v21 }
0x1ad6   : > { %23265 = vpow2.f32 %v14478_v50 }
0x1ad7   : > { %v27321_v11 = vpop.eup %23259 }
0x1ad8   : > { %v27323_v55 = vpop.eup %23261  ;;  %v14435_v17 = vpop.xlane.xlu1 %14434  ;;  %v14517_v15 = vsel %vm2028_vm5, %v27321_v11, 0.0 }
0x1ad9   : > { %v14455_v26 = vsub.f32 %v27237_v36, %v14435_v17  ;;  %14518 = vadd.xlane.f32.xlu1 %v14517_v15  ;;  %v14432_v34 = vpop.xlane.xlu0 %14431  ;;  %v14514_v54 = vsel %vm2028_vm5, %v27323_v55, 0.0 }
0x1ada   : > { %v14454_v23 = vsub.f32 %v27241_v4, %v14432_v34  ;;  %14515 = vadd.xlane.f32.xlu0 %v14514_v54 }
0x1adb   : > { %v14484_v44 = vmul.f32 1.442695, %v14455_v26 }
0x1adc   : > { %v14482_v42 = vmul.f32 1.442695, %v14454_v23 }
0x1add   : > { %23267 = vpow2.f32 %v14484_v44  ;;  %v22688_v44 = vunpack.i.l.bf16 %v27275_v24 }
0x1ade   : > { %23269 = vpow2.f32 %v14482_v42  ;;  %v28478_v42 = vld [vmem:[#allocation12_spill] sm:$0xff] }
0x1adf   : > { %v27331_v20 = vpop.eup %23263 }
0x1ae0   : > { %v27333_v53 = vpop.eup %23265  ;;  %v14441_v13 = vpop.xlane.xlu1 %14440  ;;  %v14523_v36 = vsel %vm2028_vm5, %v27331_v20, 0.0 }
0x1ae1   : > { %v14457_v14 = vsub.f32 %v27249_v43, %v14441_v13  ;;  %14524 = vadd.xlane.f32.xlu1 %v14523_v36  ;;  %v14438_v37 = vpop.xlane.xlu0 %14437  ;;  %v14520_v4 = vsel %vm2028_vm5, %v27333_v53, 0.0  ;;  %v28479_v13 = vld [vmem:[#allocation53_spill] sm:$0xff]  ;;  %v28480_v36 = vld [vmem:[#allocation23_spill] sm:$0xff] }
0x1ae2   : > { %v14456_v8 = vsub.f32 %v27253_v63, %v14438_v37  ;;  %14521 = vadd.xlane.f32.xlu0 %v14520_v4  ;;  %v28482_v37 = vld [vmem:[#allocation17_spill] sm:$0xff]  ;;  %v28483_v4 = vld [vmem:[#allocation50_spill] sm:$0xff] }
0x1ae3   : > { %v14488_v29 = vmul.f32 1.442695, %v14457_v14  ;;  %v28481_v14 = vld [vmem:[#allocation43_spill] sm:$0xff] }
0x1ae4   : > { %v14486_v33 = vmul.f32 1.442695, %v14456_v8  ;;  %v22692_v25 = vpop.permute.xlu1 %22691  ;;  %v28484_v8 = vld [vmem:[#allocation21_spill] sm:$0xff] }
0x1ae5   : > { %23271 = vpow2.f32 %v14488_v29  ;;  %v22694_v5 = vunpack.i.h.bf16 %v22692_v25  ;;  %v22693_v18 = vunpack.i.l.bf16 %v22692_v25  ;;  %v28485_v29 = vld [vmem:[#allocation49_spill] sm:$0xff]  ;;  %v28487_v25 = vld [vmem:[#allocation55_spill] sm:$0xff] }
0x1ae6   : > { %23273 = vpow2.f32 %v14486_v33  ;;  %v28486_v33 = vld [vmem:[#allocation27_spill] sm:$0xff] }
0x1ae7   : > { %v27341_v31 = vpop.eup %23267  ;;  %v20964_v12 = vpop.f32.mrb[150].mxu1  ;;  %v27343_v6 = vpack.c.bf16 %v22694_v5, %v22693_v18  ;;  %v28488_v5 = vld [vmem:[#allocation30_spill] sm:$0xff] }
0x1ae8   : > { %v14529_v43 = vsel %vm2028_vm5, %v27341_v31, 0.0  ;;  %v12794_v52 = vpop.f32.mrb[151].mxu1  ;;  %v27347_v21 = vpop.eup %23269  ;;  %v28489_v18 = vld [vmem:[#allocation54_spill] sm:$0xff] }
0x1ae9   : > { %22056 = vmatprep.subr.bf16.mxu0 %v27343_v6  ;;  %14530 = vadd.xlane.f32.xlu1 %v14529_v43  ;;  %v14526_v50 = vsel %vm2028_vm5, %v27347_v21, 0.0  ;;  %v28491_v43 = vld [vmem:[#allocation52_spill] sm:$0xff] }
0x1aea   : > { %21008 = vmatprep.mubr.msk.f32.mxu1 %vm592_vm0, %v12794_v52  ;;  %v28492_v52 = vld [vmem:[#allocation28_spill] sm:$0xff] }
0x1aeb   : > { %21009 = vmatmul.mubr.msk.f32.gmra.mrb[160].mxu1 %vm592_vm0, %v20964_v12  ;;  %v20978_v63 = vpop.f32.mrb[152].mxu1  ;;  %v28490_v12 = vld [vmem:[#allocation13_spill] sm:$0xff] }
0x1aec   : > { %21011 = vmatprep.mubr.msk.f32.mxu1 %vm592_vm0, %v27130_v27  ;;  %v12972_v17 = vpop.f32.mrb[153].mxu1 }
0x1aed   : > { %14527 = vadd.xlane.f32.xlu1 %v14526_v50  ;;  %v28494_v50 = vld [vmem:[#allocation29_spill] sm:$0xff] }
0x1aef   : > { %v27356_v15 = vpop.eup %23271  ;;  %21012 = vmatmul.mubr.msk.f32.gmra.mrb[162].mxu1 %vm592_vm0, %v27128_v35  ;;  %v20992_v26 = vpop.f32.mrb[154].mxu1  ;;  %v22689_v35 = vunpack.i.h.bf16 %v27275_v24  ;;  %v28477_v24 = vld [vmem:[#allocation47_spill] sm:$0xff] }
0x1af0   : > { %v27360_v34 = vpop.eup %23273  ;;  %21014 = vmatprep.mubr.msk.f32.mxu1 %vm592_vm0, %v12972_v17  ;;  %v14535_v54 = vsel %vm2028_vm5, %v27356_v15, 0.0  ;;  %v13150_v23 = vpop.f32.mrb[155].mxu1  ;;  %v28495_v17 = vld [vmem:[#allocation34_spill] sm:$0xff] }
0x1af1   : > { %14536 = vadd.xlane.f32.xlu1 %v14535_v54  ;;  %v14532_v27 = vsel %vm2028_vm5, %v27360_v34, 0.0  ;;  %v28497_v54 = vld [vmem:[#allocation33_spill] sm:$0xff] }
0x1af2   : > { %14533 = vadd.xlane.f32.xlu0 %v14532_v27  ;;  %v28500_v27 = vld [vmem:[#allocation31_spill] sm:$0xff] }
0x1af3   : > { %21015 = vmatmul.mubr.msk.f32.gmra.mrb[164].mxu1 %vm592_vm0, %v20978_v63  ;;  %v28493_v63 = vld [vmem:[#allocation51_spill] sm:$0xff] }
0x1af4   : > { %21017 = vmatprep.mubr.msk.f32.mxu1 %vm592_vm0, %v27138_v40  ;;  %v28469_v40 = vld [vmem:[#allocation46_spill] sm:$0xff] }
0x1af7   : > { %21018 = vmatmul.mubr.msk.f32.gmra.mrb[166].mxu1 %vm592_vm0, %v27136_v47  ;;  %v22051_v47 = vpack.c.bf16 %v22689_v35, %v22688_v44  ;;  %v28501_v35 = vld [vmem:[#allocation37_spill] sm:$0xff]  ;;  %v22697_v44 = vpop.permute.xlu0 %22696 }
0x1af8   : > { %21020 = vmatprep.mubr.msk.f32.mxu1 %vm592_vm0, %v13150_v23  ;;  %v28498_v23 = vld [vmem:[#allocation35_spill] sm:$0xff] }
0x1afb   : > { %21021 = vmatmul.mubr.msk.f32.gmra.mrb[168].mxu1 %vm592_vm0, %v20992_v26  ;;  %v28496_v26 = vld [vmem:[#allocation36_spill] sm:$0xff] }
0x1afc   : > { %21023 = vmatprep.mubr.msk.f32.mxu1 %vm592_vm0, %v27142_v48  ;;  %v28473_v48 = vld [vmem:[#allocation39_spill] sm:$0xff] }
0x1aff   : > { %21024 = vmatmul.mubr.msk.f32.gmra.mrb[170].mxu1 %vm592_vm0, %v27140_v41  ;;  %v28471_v41 = vld [vmem:[#allocation41_spill] sm:$0xff] }
0x1b00   : > { %21028 = vmatprep.mubr.msk.f32.mxu1 %vm592_vm0, %v26729_v56  ;;  %v28470_v56 = vld [vmem:[#allocation45_spill] sm:$0xff] }
0x1b02   : > { %22706 = vrot.lane.b32.xlu1 %v28467_v38, %s23445_s21 }
0x1b03   : > { %21029 = vmatmul.mubr.msk.f32.vlgmr.msra.gmra.mrb[156].mxu1 %vm592_vm0, %v26727_v39  ;;  %v28472_v39 = vld [vmem:[#allocation26_spill] sm:$0xff] }
0x1b04   : > { %22046 = vmatpush3.bf16.msra.mxu1 %v27267_v46  ;;  %21031 = vmatprep.mubr.msk.f32.mxu1 %vm592_vm0, %v26550_v58  ;;  %v28474_v58 = vld [vmem:[#allocation25_spill] sm:$0xff]  ;;  %v28475_v46 = vld [vmem:[#allocation48_spill] sm:$0xff] }
0x1b05   : > { %22052 = vmatprep.subr.bf16.mxu1 %v22051_v47 }
0x1b06   : > { %22716 = vrot.lane.b32.xlu1 %v26172_v60, %s23446_s25  ;;  %v28476_v60 = vld [vmem:[#allocation19_spill] sm:$0xff] }
0x1b07   : > { %21032 = vmatmul.mubr.msk.f32.gmra.mrb[158].mxu1 %vm592_vm0, %v28469_v40 }
0x1b08   : > { %22711 = vrot.lane.b32.xlu0 %v28470_v56, %s23445_s21  ;;  %21034 = vmatprep.mubr.msk.f32.mxu1 %vm592_vm0, %v28471_v41 }
0x1b0a   : > { %15475 = vrot.lane.b32.xlu1 %v28472_v39, %s23446_s25 }
0x1b0b   : > { %21035 = vmatmul.mubr.msk.f32.gmra.mrb[160].mxu1 %vm592_vm0, %v28473_v48 }
0x1b0c   : > { %22721 = vrot.lane.b32.xlu0 %v28474_v58, %s23446_s25  ;;  %21037 = vmatprep.mubr.msk.f32.mxu1 %vm592_vm0, %v28475_v46  ;;  %v22699_v46 = vunpack.i.h.bf16 %v22697_v44 }
0x1b0e   : > { %22726 = vrot.lane.b32.xlu1 %v28476_v60, %s23446_s25  ;;  %v22698_v60 = vunpack.i.l.bf16 %v22697_v44 }
0x1b0f   : > { %21038 = vmatmul.mubr.msk.f32.gmra.mrb[162].mxu1 %vm592_vm0, %v28477_v24 }
0x1b10   : > { %15477 = vrot.lane.b32.xlu0 %v28478_v42, %s23446_s25  ;;  %21040 = vmatprep.mubr.msk.f32.mxu1 %vm592_vm0, %v28479_v13  ;;  %v22059_v13 = vpack.c.bf16 %v22699_v46, %v22698_v60 }
0x1b12   : > { %15568 = vrot.lane.b32.xlu1 %v28480_v36, %s23446_s25 }
0x1b13   : > { %21041 = vmatmul.mubr.msk.f32.gmra.mrb[164].mxu1 %vm592_vm0, %v28481_v14 }
0x1b14   : > { %15566 = vrot.lane.b32.xlu0 %v28482_v37, %s23446_s25  ;;  %21043 = vmatprep.mubr.msk.f32.mxu1 %vm592_vm0, %v28483_v4 }
0x1b16   : > { %15657 = vrot.lane.b32.xlu1 %v28484_v8, %s23446_s25 }
0x1b17   : > { %21044 = vmatmul.mubr.msk.f32.gmra.mrb[166].mxu1 %vm592_vm0, %v28485_v29 }
0x1b18   : > { %22731 = vrot.lane.b32.xlu0 %v28486_v33, %s23446_s25  ;;  %21046 = vmatprep.mubr.msk.f32.mxu1 %vm592_vm0, %v28487_v25 }
0x1b1a   : > { %22736 = vrot.lane.b32.xlu1 %v28488_v5, %s23446_s25 }
0x1b1b   : > { %21047 = vmatmul.mubr.msk.f32.gmra.mrb[168].mxu1 %vm592_vm0, %v28489_v18 }
0x1b1c   : > { %15659 = vrot.lane.b32.xlu0 %v28490_v12, %s23446_s25  ;;  %21049 = vmatprep.mubr.msk.f32.mxu1 %vm592_vm0, %v28491_v43 }
0x1b1e   : > { %15748 = vrot.lane.b32.xlu1 %v28492_v52, %s23446_s25 }
0x1b1f   : > { %21050 = vmatmul.mubr.msk.f32.gmra.mrb[170].mxu1 %vm592_vm0, %v28493_v63 }
0x1b20   : > { %22741 = vrot.lane.b32.xlu0 %v28494_v50, %s23446_s25 }
0x1b22   : > { %22746 = vrot.lane.b32.xlu1 %v26273_v61, %s23446_s25  ;;  %v28499_v61 = vld [vmem:[#allocation32_spill] sm:$0xff] }
0x1b24   : > { %15750 = vrot.lane.b32.xlu0 %v28495_v17, %s23446_s25 }
0x1b26   : > { %15841 = vrot.lane.b32.xlu1 %v28496_v26, %s23446_s25 }
0x1b28   : > { %15839 = vrot.lane.b32.xlu0 %v28497_v54, %s23446_s25 }
0x1b2a   : > { %15930 = vrot.lane.b32.xlu1 %v26248_v59, %s23446_s25  ;;  %v22702_v59 = vpop.permute.xlu0 %22701 }
0x1b2b   : > { %v22704_v4 = vunpack.i.h.bf16 %v22702_v59  ;;  %v22703_v8 = vunpack.i.l.bf16 %v22702_v59 }
0x1b2c   : > { %22751 = vrot.lane.b32.xlu0 %v26296_v1, %s23446_s25 }
0x1b2d   : > { %v22063_v33 = vpack.c.bf16 %v22704_v4, %v22703_v8 }
0x1b2e   : > { %16021 = vrot.lane.b32.xlu1 %v28498_v23, %s23446_s25 }
0x1b30   : > { %15932 = vrot.lane.b32.xlu0 %v28499_v61, %s23446_s25 }
0x1b32   : > { %16112 = vrot.lane.b32.xlu1 %v28500_v27, %s23446_s25 }
0x1b34   : > { %16023 = vrot.lane.b32.xlu0 %v28501_v35, %s23446_s25 }
0x1b38   : > { %16114 = vrot.lane.b32.xlu0 %v26316_v3, %s23446_s25 }
0x1b46   : > { %v14495_v40 = vpop.xlane.xlu1 %14494 }
0x1b47   : > { %23275 = vrcp.f32 %v14495_v40  ;;  %v14492_v1 = vpop.xlane.xlu0 %14491 }
0x1b48   : > { %23277 = vrcp.f32 %v14492_v1 }
0x1b4e   : > { %v14501_v41 = vpop.xlane.xlu1 %14500 }
0x1b4f   : > { %23279 = vrcp.f32 %v14501_v41  ;;  %v14498_v39 = vpop.xlane.xlu0 %14497 }
0x1b50   : > { %23281 = vrcp.f32 %v14498_v39 }
0x1b51   : > { %v23276_v48 = vpop.eup %23275 }
0x1b52   : > { %v23278_v58 = vpop.eup %23277  ;;  %v14555_v42 = vmul.f32 %v23276_v48, %v27281_v49 }
0x1b53   : > { %v14554_v24 = vmul.f32 %v23278_v58, %v27283_v51 }
0x1b55   : > { %21112 = vmatprep.mubr.msk.f32.mxu1 %vm2028_vm5, %v14554_v24  ;;  %v18732_v24 = vld [vmem:[%s28239_s6 + $0x30] sm:$0xff] }
0x1b56   : > { %v14507_v3 = vpop.xlane.xlu1 %14506  ;;  %21113 = vmatmul.mubr.msk.f32.vlgmr.msra.gmra.mrb[172].mxu1 %vm2028_vm5, %v14555_v42 }
0x1b57   : > { %23283 = vrcp.f32 %v14507_v3  ;;  %22054 = vmatpush3.bf16.msra.mxu1 %v22051_v47  ;;  %v14504_v36 = vpop.xlane.xlu0 %14503 }
0x1b58   : > { %23285 = vrcp.f32 %v14504_v36  ;;  %22060 = vmatprep.subr.bf16.mxu1 %v22059_v13 }
0x1b59   : > { %v23280_v14 = vpop.eup %23279 }
0x1b5a   : > { %v23282_v37 = vpop.eup %23281  ;;  %v14557_v51 = vmul.f32 %v23280_v14, %v27291_v0 }
0x1b5b   : > { %v14556_v29 = vmul.f32 %v23282_v37, %v27293_v22 }
0x1b5d   : > { %21119 = vmatprep.mubr.msk.f32.mxu0 %vm2028_vm5, %v14556_v29 }
0x1b5e   : > { %v14513_v49 = vpop.xlane.xlu1 %14512  ;;  %21120 = vmatmul.mubr.msk.f32.vlgmr.msra.gmra.mrb[204].mxu0 %vm2028_vm5, %v14557_v51 }
0x1b5f   : > { %23287 = vrcp.f32 %v14513_v49  ;;  %22058 = vmatpush3.bf16.msra.mxu0 %v27343_v6  ;;  %v14510_v47 = vpop.xlane.xlu0 %14509 }
0x1b60   : > { %23289 = vrcp.f32 %v14510_v47  ;;  %22064 = vmatprep.subr.bf16.mxu0 %v22063_v33 }
0x1b61   : > { %v23284_v25 = vpop.eup %23283 }
0x1b62   : > { %v23286_v5 = vpop.eup %23285  ;;  %v14559_v22 = vmul.f32 %v23284_v25, %v27301_v45 }
0x1b63   : > { %v14558_v18 = vmul.f32 %v23286_v5, %v27303_v9 }
0x1b65   : > { %21126 = vmatprep.mubr.msk.f32.mxu1 %vm2028_vm5, %v14558_v18 }
0x1b66   : > { %v14519_v0 = vpop.xlane.xlu1 %14518  ;;  %21127 = vmatmul.mubr.msk.f32.vlgmr.msra.gmra.mrb[174].mxu1 %vm2028_vm5, %v14559_v22 }
0x1b67   : > { %23291 = vrcp.f32 %v14519_v0  ;;  %22062 = vmatpush3.bf16.msra.mxu1 %v22059_v13  ;;  %v14516_v12 = vpop.xlane.xlu0 %14515 }
0x1b68   : > { %23293 = vrcp.f32 %v14516_v12 }
0x1b69   : > { %v23288_v43 = vpop.eup %23287 }
0x1b6a   : > { %v23290_v6 = vpop.eup %23289  ;;  %v14561_v63 = vmul.f32 %v23288_v43, %v27311_v62 }
0x1b6b   : > { %v14560_v52 = vmul.f32 %v23290_v6, %v27313_v30 }
0x1b6d   : > { %21133 = vmatprep.mubr.msk.f32.mxu0 %vm2028_vm5, %v14560_v52 }
0x1b6e   : > { %v14525_v9 = vpop.xlane.xlu1 %14524  ;;  %21134 = vmatmul.mubr.msk.f32.vlgmr.msra.gmra.mrb[206].mxu0 %vm2028_vm5, %v14561_v63 }
0x1b6f   : > { %23295 = vrcp.f32 %v14525_v9  ;;  %22066 = vmatpush3.bf16.msra.mxu0 %v22063_v33  ;;  %v14522_v45 = vpop.xlane.xlu0 %14521 }
0x1b70   : > { %23297 = vrcp.f32 %v14522_v45 }
0x1b71   : > { %v23292_v50 = vpop.eup %23291 }
0x1b72   : > { %v23294_v17 = vpop.eup %23293  ;;  %v14563_v54 = vmul.f32 %v23292_v50, %v27321_v11 }
0x1b73   : > { %v14562_v26 = vmul.f32 %v23294_v17, %v27323_v55 }
0x1b75   : > { %21140 = vmatprep.mubr.msk.f32.mxu1 %vm2028_vm5, %v14562_v26 }
0x1b76   : > { %v14531_v30 = vpop.xlane.xlu1 %14530  ;;  %21141 = vmatmul.mubr.msk.f32.vlgmr.msra.gmra.mrb[176].mxu1 %vm2028_vm5, %v14563_v54 }
0x1b79   : > { %v23296_v62 = vpop.eup %23295 }
0x1b7a   : > { %v23298_v23 = vpop.eup %23297  ;;  %v14528_v61 = vpop.xlane.xlu1 %14527  ;;  %v14565_v35 = vmul.f32 %v23296_v62, %v27331_v20 }
0x1b7b   : > { %23299 = vrcp.f32 %v14528_v61  ;;  %v14564_v27 = vmul.f32 %v23298_v23, %v27333_v53 }
0x1b7c   : > { %23301 = vrcp.f32 %v14531_v30 }
0x1b7d   : > { %21147 = vmatprep.mubr.msk.f32.mxu0 %vm2028_vm5, %v14564_v27 }
0x1b7e   : > { %v14537_v44 = vpop.xlane.xlu1 %14536  ;;  %21148 = vmatmul.mubr.msk.f32.vlgmr.msra.gmra.mrb[208].mxu0 %vm2028_vm5, %v14565_v35 }
0x1b7f   : > { %23303 = vrcp.f32 %v14537_v44  ;;  %v14534_v11 = vpop.xlane.xlu0 %14533 }
0x1b80   : > { %23305 = vrcp.f32 %v14534_v11 }
0x1b82   : > { %v22707_v55 = vpop.permute.xlu1 %22706 }
0x1b83   : > { %v22709_v59 = vunpack.i.h.bf16 %v22707_v55  ;;  %v22708_v40 = vunpack.i.l.bf16 %v22707_v55  ;;  %v22712_v1 = vpop.permute.xlu0 %22711 }
0x1b84   : > { %v22714_v41 = vunpack.i.h.bf16 %v22712_v1  ;;  %v22713_v39 = vunpack.i.l.bf16 %v22712_v1 }
0x1b85   : > { %v23300_v48 = vpop.eup %23299  ;;  %v22067_v58 = vpack.c.bf16 %v22709_v59, %v22708_v40 }
0x1b86   : > { %v23302_v53 = vpop.eup %23301  ;;  %v22717_v46 = vpop.permute.xlu1 %22716  ;;  %v14566_v20 = vmul.f32 %v23300_v48, %v27347_v21  ;;  %v22071_v60 = vpack.c.bf16 %v22714_v41, %v22713_v39 }
0x1b87   : > { %v22719_v42 = vunpack.i.h.bf16 %v22717_v46  ;;  %v22718_v3 = vunpack.i.l.bf16 %v22717_v46  ;;  %v22722_v13 = vpop.permute.xlu0 %22721  ;;  %22068 = vmatprep.subr.bf16.mxu1 %v22067_v58  ;;  %v14567_v37 = vmul.f32 %v23302_v53, %v27341_v31 }
0x1b88   : > { %22070 = vmatpush3.bf16.msra.mxu1 %v22067_v58  ;;  %21154 = vmatprep.mubr.msk.f32.mxu1 %vm2028_vm5, %v14566_v20  ;;  %v22724_v49 = vunpack.i.h.bf16 %v22722_v13  ;;  %v22723_v33 = vunpack.i.l.bf16 %v22722_v13 }
0x1b89   : > { %v23304_v36 = vpop.eup %23303  ;;  %v22075_v14 = vpack.c.bf16 %v22719_v42, %v22718_v3  ;;  %22072 = vmatprep.subr.bf16.mxu0 %v22071_v60  ;;  %21164 = vmatprep.subr.mxu1 %v18732_v24 }
0x1b8a   : > { %v23306_v4 = vpop.eup %23305  ;;  %22074 = vmatpush3.bf16.msra.mxu0 %v22071_v60  ;;  %v15476_v21 = vpop.permute.xlu1 %15475  ;;  %v14569_v51 = vmul.f32 %v23304_v36, %v27356_v15  ;;  %v22081_v25 = vpack.c.bf16 %v22724_v49, %v22723_v33 }
0x1b8b   : > { %v15478_v8 = vpop.permute.xlu0 %15477  ;;  %21155 = vmatmul.mubr.msk.f32.vlgmr.msra.gmra.mrb[178].mxu1 %vm2028_vm5, %v14567_v37  ;;  %22077 = vmatprep.subr.msk.bf16.mxu0 %vm23745_vm3, %v22075_v14  ;;  %v14568_v29 = vmul.f32 %v23306_v4, %v27360_v34 }
0x1b8c   : > { %21165 = vmatpush3.msra.mxu1 %v18732_v24 }
0x1b8d   : > { %21161 = vmatprep.mubr.msk.f32.mxu0 %vm2028_vm5, %v14568_v29 }
0x1b8e   : > { %v22727_v31 = vpop.permute.xlu1 %22726  ;;  %21162 = vmatmul.mubr.msk.f32.vlgmr.msra.gmra.mrb[210].mxu0 %vm2028_vm5, %v14569_v51 }
0x1b8f   : > { %v15567_v47 = vpop.permute.xlu0 %15566  ;;  %21194 = vmatprep.mubr.msk.f32.mxu0 %vm592_vm0, %v15476_v21  ;;  %v22729_v15 = vunpack.i.h.bf16 %v22727_v31  ;;  %v22728_v34 = vunpack.i.l.bf16 %v22727_v31 }
0x1b91   : > { %v22087_v12 = vpack.c.bf16 %v22729_v15, %v22728_v34 }
0x1b92   : > { %v15569_v5 = vpop.permute.xlu1 %15568 }
0x1b93   : > { %22080 = vmatpush3.bf16.xpose.msk.msra.mxu0 %vm23745_vm3, %v22075_v14  ;;  %v22732_v18 = vpop.permute.xlu0 %22731 }
0x1b94   : > { %22083 = vmatprep.subr.msk.bf16.mxu0 %vm23745_vm3, %v22081_v25  ;;  %v22734_v45 = vunpack.i.h.bf16 %v22732_v18  ;;  %v22733_v50 = vunpack.i.l.bf16 %v22732_v18 }
0x1b96   : > { %v15658_v22 = vpop.permute.xlu1 %15657  ;;  %v22093_v54 = vpack.c.bf16 %v22734_v45, %v22733_v50 }
0x1b97   : > { %v15660_v0 = vpop.permute.xlu0 %15659 }
0x1b9a   : > { %21195 = vmatmul.mubr.msk.f32.vlgmr.msra.gmra.mrb[212].mxu0 %vm592_vm0, %v15478_v8  ;;  %v22737_v43 = vpop.permute.xlu1 %22736 }
0x1b9b   : > { %v22739_v6 = vunpack.i.h.bf16 %v22737_v43  ;;  %v22738_v52 = vunpack.i.l.bf16 %v22737_v43  ;;  %22086 = vmatpush3.bf16.xpose.msk.msra.mxu0 %vm23745_vm3, %v22081_v25  ;;  %21201 = vmatprep.mubr.msk.f32.mxu0 %vm592_vm0, %v15567_v47  ;;  %v22742_v63 = vpop.permute.xlu0 %22741 }
0x1b9c   : > { %22089 = vmatprep.subr.msk.bf16.mxu0 %vm23745_vm3, %v22087_v12  ;;  %v22744_v23 = vunpack.i.h.bf16 %v22742_v63  ;;  %v22743_v61 = vunpack.i.l.bf16 %v22742_v63 }
0x1b9d   : > { %v22099_v9 = vpack.c.bf16 %v22739_v6, %v22738_v52 }
0x1b9e   : > { %v15749_v17 = vpop.permute.xlu1 %15748  ;;  %v22105_v35 = vpack.c.bf16 %v22744_v23, %v22743_v61 }
0x1b9f   : > { %v15751_v26 = vpop.permute.xlu0 %15750  ;;  %22101 = vmatprep.subr.msk.bf16.mxu1 %vm23745_vm3, %v22099_v9 }
0x1ba2   : > { %21202 = vmatmul.mubr.msk.f32.vlgmr.msra.gmra.mrb[214].mxu0 %vm592_vm0, %v15569_v5  ;;  %v22747_v30 = vpop.permute.xlu1 %22746 }
0x1ba3   : > { %22092 = vmatpush3.bf16.xpose.msk.msra.mxu0 %vm23745_vm3, %v22087_v12  ;;  %21208 = vmatprep.mubr.msk.f32.mxu0 %vm592_vm0, %v15658_v22  ;;  %v27522_v62 = vpop.permute.xlu0 %15839  ;;  %v22749_v53 = vunpack.i.h.bf16 %v22747_v30  ;;  %v22748_v46 = vunpack.i.l.bf16 %v22747_v30 }
0x1ba4   : > { %22095 = vmatprep.subr.msk.bf16.mxu0 %vm23745_vm3, %v22093_v54 }
0x1ba5   : > { %v22111_v24 = vpack.c.bf16 %v22749_v53, %v22748_v46 }
0x1ba6   : > { %v15842_v27 = vpop.permute.xlu1 %15841 }
0x1ba7   : > { %v22752_v44 = vpop.permute.xlu0 %22751 }
0x1ba8   : > { %v22754_v11 = vunpack.i.h.bf16 %v22752_v44  ;;  %v22753_v55 = vunpack.i.l.bf16 %v22752_v44 }
0x1baa   : > { %21209 = vmatmul.mubr.msk.f32.vlgmr.msra.gmra.mrb[216].mxu0 %vm592_vm0, %v15660_v0  ;;  %v15931_v59 = vpop.permute.xlu1 %15930  ;;  %v22117_v40 = vpack.c.bf16 %v22754_v11, %v22753_v55 }
0x1bab   : > { %22098 = vmatpush3.bf16.xpose.msk.msra.mxu0 %vm23745_vm3, %v22093_v54  ;;  %21215 = vmatprep.mubr.msk.f32.mxu0 %vm592_vm0, %v15749_v17  ;;  %v15933_v41 = vpop.permute.xlu0 %15932 }
0x1bac   : > { %22107 = vmatprep.subr.msk.bf16.mxu0 %vm23745_vm3, %v22105_v35 }
0x1bae   : > { %v16022_v1 = vpop.permute.xlu1 %16021 }
0x1baf   : > { %v16024_v48 = vpop.permute.xlu0 %16023 }
0x1bb2   : > { %21216 = vmatmul.mubr.msk.f32.vlgmr.msra.gmra.mrb[218].mxu0 %vm592_vm0, %v15751_v26  ;;  %v16113_v39 = vpop.permute.xlu1 %16112 }
0x1bb3   : > { %22110 = vmatpush3.bf16.xpose.msk.msra.mxu0 %vm23745_vm3, %v22105_v35  ;;  %21229 = vmatprep.mubr.msk.f32.mxu0 %vm592_vm0, %v15931_v59  ;;  %v16115_v58 = vpop.permute.xlu0 %16114 }
0x1bb4   : > { %22119 = vmatprep.subr.msk.bf16.mxu0 %vm23745_vm3, %v22117_v40 }
0x1bba   : > { %21230 = vmatmul.mubr.msk.f32.vlgmr.msra.gmra.mrb[220].mxu0 %vm592_vm0, %v15933_v41 }
0x1bbb   : > { %22122 = vmatpush3.bf16.xpose.msk.msra.mxu0 %vm23745_vm3, %v22117_v40  ;;  %21243 = vmatprep.mubr.msk.f32.mxu0 %vm592_vm0, %v16113_v39 }
0x1bc2   : > { %21244 = vmatmul.mubr.msk.f32.vlgmr.msra.gmra.mrb[222].mxu0 %vm592_vm0, %v16115_v58 }
0x1c29   : > { %v21114_v20 = vpop.f32.mrb[172].mxu1 }
0x1c2a   : > { %v14648_v60 = vpop.f32.mrb[173].mxu1 }
0x1c2b   : > { %21166 = vmatprep.mubr.msk.f32.mxu1 %vm592_vm0, %v14648_v60 }
0x1c2c   : > { %21167 = vmatmul.mubr.msk.f32.vlgmr.msra.gmra.mrb[156].mxu1 %vm592_vm0, %v21114_v20 }
0x1c2d   : > { %22104 = vmatpush3.bf16.xpose.msk.msra.mxu1 %vm23745_vm3, %v22099_v9 }
0x1c2e   : > { %22113 = vmatprep.subr.msk.bf16.mxu1 %vm23745_vm3, %v22111_v24 }
0x1c31   : > { %v21121_v42 = vpop.f32.mrb[204].mxu0 }
0x1c32   : > { %v14735_v3 = vpop.f32.mrb[205].mxu0 }
0x1c33   : > { %21169 = vmatprep.mubr.msk.f32.mxu1 %vm592_vm0, %v14735_v3 }
0x1c34   : > { %21170 = vmatmul.mubr.msk.f32.gmra.mrb[158].mxu1 %vm592_vm0, %v21121_v42 }
0x1c39   : > { %v21128_v13 = vpop.f32.mrb[174].mxu1 }
0x1c3a   : > { %v14822_v36 = vpop.f32.mrb[175].mxu1 }
0x1c3b   : > { %21172 = vmatprep.mubr.msk.f32.mxu1 %vm592_vm0, %v14822_v36 }
0x1c3c   : > { %21173 = vmatmul.mubr.msk.f32.gmra.mrb[160].mxu1 %vm592_vm0, %v21128_v13 }
0x1c41   : > { %v21135_v14 = vpop.f32.mrb[206].mxu0 }
0x1c42   : > { %v14909_v37 = vpop.f32.mrb[207].mxu0 }
0x1c43   : > { %21175 = vmatprep.mubr.msk.f32.mxu1 %vm592_vm0, %v14909_v37 }
0x1c44   : > { %21176 = vmatmul.mubr.msk.f32.gmra.mrb[162].mxu1 %vm592_vm0, %v21135_v14 }
0x1c49   : > { %v21142_v4 = vpop.f32.mrb[176].mxu1 }
0x1c4a   : > { %v14996_v21 = vpop.f32.mrb[177].mxu1 }
0x1c4b   : > { %21178 = vmatprep.mubr.msk.f32.mxu1 %vm592_vm0, %v14996_v21 }
0x1c4c   : > { %21179 = vmatmul.mubr.msk.f32.gmra.mrb[164].mxu1 %vm592_vm0, %v21142_v4 }
0x1c51   : > { %v21149_v8 = vpop.f32.mrb[208].mxu0 }
0x1c52   : > { %v15083_v29 = vpop.f32.mrb[209].mxu0 }
0x1c53   : > { %21181 = vmatprep.mubr.msk.f32.mxu1 %vm592_vm0, %v15083_v29 }
0x1c54   : > { %21182 = vmatmul.mubr.msk.f32.gmra.mrb[166].mxu1 %vm592_vm0, %v21149_v8 }
0x1c5e   : > { %v21156_v51 = vpop.f32.mrb[178].mxu1 }
0x1c5f   : > { %v15170_v49 = vpop.f32.mrb[179].mxu1 }
0x1c60   : > { %21184 = vmatprep.mubr.msk.f32.mxu1 %vm592_vm0, %v15170_v49 }
0x1c61   : > { %v21163_v33 = vpop.f32.mrb[210].mxu0  ;;  %21185 = vmatmul.mubr.msk.f32.gmra.mrb[168].mxu1 %vm592_vm0, %v21156_v51 }
0x1c62   : > { %v15257_v31 = vpop.f32.mrb[211].mxu0 }
0x1c63   : > { %21187 = vmatprep.mubr.msk.f32.mxu1 %vm592_vm0, %v15257_v31 }
0x1c65   : > { %21188 = vmatmul.mubr.msk.f32.gmra.mrb[170].mxu1 %vm592_vm0, %v21163_v33 }
0x1c66   : > { %21222 = vmatprep.mubr.msk.f32.mxu1 %vm592_vm0, %v27522_v62 }
0x1c69   : > { %21223 = vmatmul.mubr.msk.f32.vlgmr.msra.gmra.mrb[180].mxu1 %vm592_vm0, %v15842_v27 }
0x1c6a   : > { %22116 = vmatpush3.bf16.xpose.msk.msra.mxu1 %vm23745_vm3, %v22111_v24  ;;  %21236 = vmatprep.mubr.msk.f32.mxu1 %vm592_vm0, %v16022_v1 }
0x1c6d   : > { %v21196_v47 = vpop.f32.mrb[212].mxu0 }
0x1c6e   : > { %v16204_v25 = vmul.f32 0.35355338, %v21196_v47  ;;  %v15557_v5 = vpop.f32.mrb[213].mxu0 }
0x1c6f   : > { %v16203_v18 = vmul.f32 0.35355338, %v15557_v5 }
0x1c70   : > { %v16220_v15 = vsel %vm775_vm4, %v16204_v25, -1e+30 }
0x1c71   : > { %v16219_v34 = vsel %vm775_vm4, %v16203_v18, -1e+30  ;;  %21237 = vmatmul.mubr.msk.f32.vlgmr.msra.gmra.mrb[182].mxu1 %vm592_vm0, %v16024_v48  ;;  %v16238_v22 = vsel %vm2028_vm5, %v16220_v15, -inf }
0x1c72   : > { %16239 = vmax.xlane.f32.xlu0 %v16238_v22  ;;  %v16235_v19 = vsel %vm2028_vm5, %v16219_v34, -inf }
0x1c73   : > { %16236 = vmax.xlane.f32.xlu1 %v16235_v19 }
0x1c75   : > { %v21203_v0 = vpop.f32.mrb[214].mxu0 }
0x1c76   : > { %v16206_v12 = vmul.f32 0.35355338, %v21203_v0  ;;  %v15648_v43 = vpop.f32.mrb[215].mxu0 }
0x1c77   : > { %v16205_v6 = vmul.f32 0.35355338, %v15648_v43 }
0x1c78   : > { %v16222_v52 = vsel %vm775_vm4, %v16206_v12, -1e+30 }
0x1c79   : > { %v16221_v63 = vsel %vm775_vm4, %v16205_v6, -1e+30  ;;  %v16244_v9 = vsel %vm2028_vm5, %v16222_v52, -inf }
0x1c7a   : > { %16245 = vmax.xlane.f32.xlu1 %v16244_v9  ;;  %v16241_v45 = vsel %vm2028_vm5, %v16221_v63, -inf }
0x1c7b   : > { %16242 = vmax.xlane.f32.xlu0 %v16241_v45 }
0x1c7d   : > { %v21210_v50 = vpop.f32.mrb[216].mxu0 }
0x1c7e   : > { %v16208_v17 = vmul.f32 0.35355338, %v21210_v50  ;;  %v15739_v26 = vpop.f32.mrb[217].mxu0 }
0x1c7f   : > { %v16207_v54 = vmul.f32 0.35355338, %v15739_v26 }
0x1c80   : > { %v16224_v30 = vsel %vm775_vm4, %v16208_v17, -1e+30 }
0x1c81   : > { %v16223_v62 = vsel %vm775_vm4, %v16207_v54, -1e+30  ;;  %v16250_v23 = vsel %vm2028_vm5, %v16224_v30, -inf }
0x1c82   : > { %16251 = vmax.xlane.f32.xlu1 %v16250_v23  ;;  %v16247_v61 = vsel %vm2028_vm5, %v16223_v62, -inf }
0x1c83   : > { %16248 = vmax.xlane.f32.xlu0 %v16247_v61 }
0x1c85   : > { %v21217_v27 = vpop.f32.mrb[218].mxu0 }
0x1c86   : > { %v16210_v35 = vmul.f32 0.35355338, %v21217_v27  ;;  %v15830_v44 = vpop.f32.mrb[219].mxu0 }
0x1c87   : > { %v16209_v11 = vmul.f32 0.35355338, %v15830_v44 }
0x1c88   : > { %v27588_v55 = vsel %vm775_vm4, %v16210_v35, -1e+30 }
0x1c89   : > { %v27592_v59 = vsel %vm775_vm4, %v16209_v11, -1e+30  ;;  %v16256_v40 = vsel %vm2028_vm5, %v27588_v55, -inf }
0x1c8a   : > { %16257 = vmax.xlane.f32.xlu1 %v16256_v40  ;;  %v16253_v1 = vsel %vm2028_vm5, %v27592_v59, -inf }
0x1c8b   : > { %16254 = vmax.xlane.f32.xlu0 %v16253_v1 }
0x1c8d   : > { %v21231_v41 = vpop.f32.mrb[220].mxu0 }
0x1c8e   : > { %v16214_v39 = vmul.f32 0.35355338, %v21231_v41  ;;  %v16012_v48 = vpop.f32.mrb[221].mxu0 }
0x1c8f   : > { %v16213_v58 = vmul.f32 0.35355338, %v16012_v48 }
0x1c90   : > { %v27600_v53 = vsel %vm775_vm4, %v16214_v39, -1e+30 }
0x1c91   : > { %v27604_v46 = vsel %vm775_vm4, %v16213_v58, -1e+30  ;;  %v16268_v20 = vsel %vm2028_vm5, %v27600_v53, -inf }
0x1c92   : > { %16269 = vmax.xlane.f32.xlu1 %v16268_v20  ;;  %v16265_v60 = vsel %vm2028_vm5, %v27604_v46, -inf }
0x1c93   : > { %16266 = vmax.xlane.f32.xlu0 %v16265_v60 }
0x1c95   : > { %v21245_v24 = vpop.f32.mrb[222].mxu0 }
0x1c96   : > { %v16218_v42 = vmul.f32 0.35355338, %v21245_v24  ;;  %v16194_v3 = vpop.f32.mrb[223].mxu0 }
0x1c97   : > { %v16217_v13 = vmul.f32 0.35355338, %v16194_v3 }
0x1c98   : > { %v27612_v36 = vsel %vm775_vm4, %v16218_v42, -1e+30 }
0x1c99   : > { %v27616_v14 = vsel %vm775_vm4, %v16217_v13, -1e+30  ;;  %v16280_v37 = vsel %vm2028_vm5, %v27612_v36, -inf }
0x1c9a   : > { %16281 = vmax.xlane.f32.xlu1 %v16280_v37  ;;  %v16277_v4 = vsel %vm2028_vm5, %v27616_v14, -inf }
0x1c9b   : > { %16278 = vmax.xlane.f32.xlu0 %v16277_v4 }
0x1cff   : > { %v16240_v21 = vpop.xlane.xlu0 %16239 }
0x1d00   : > { %v16284_v8 = vsub.f32 %v16220_v15, %v16240_v21  ;;  %v16237_v29 = vpop.xlane.xlu1 %16236 }
0x1d01   : > { %v16283_v51 = vsub.f32 %v16219_v34, %v16237_v29 }
0x1d02   : > { %v16301_v49 = vmul.f32 1.442695, %v16284_v8 }
0x1d03   : > { %v16299_v33 = vmul.f32 1.442695, %v16283_v51 }
0x1d04   : > { %23307 = vpow2.f32 %v16301_v49 }
0x1d05   : > { %23309 = vpow2.f32 %v16299_v33 }
0x1d07   : > { %v16246_v31 = vpop.xlane.xlu1 %16245 }
0x1d08   : > { %v16286_v47 = vsub.f32 %v16222_v52, %v16246_v31  ;;  %v16243_v25 = vpop.xlane.xlu0 %16242 }
0x1d09   : > { %v16285_v5 = vsub.f32 %v16221_v63, %v16243_v25 }
0x1d0a   : > { %v16305_v18 = vmul.f32 1.442695, %v16286_v47 }
0x1d0b   : > { %v16303_v22 = vmul.f32 1.442695, %v16285_v5 }
0x1d0c   : > { %23311 = vpow2.f32 %v16305_v18 }
0x1d0d   : > { %23313 = vpow2.f32 %v16303_v22 }
0x1d0e   : > { %v27622_v19 = vpop.eup %23307 }
0x1d0f   : > { %v27624_v0 = vpop.eup %23309  ;;  %v16252_v12 = vpop.xlane.xlu1 %16251  ;;  %v16334_v15 = vsel %vm2028_vm5, %v27622_v19, 0.0 }
0x1d10   : > { %v16288_v34 = vsub.f32 %v16224_v30, %v16252_v12  ;;  %v16249_v43 = vpop.xlane.xlu0 %16248  ;;  %16335 = vadd.xlane.f32.xlu1 %v16334_v15  ;;  %v16331_v6 = vsel %vm2028_vm5, %v27624_v0, 0.0 }
0x1d11   : > { %v16287_v52 = vsub.f32 %v16223_v62, %v16249_v43  ;;  %16332 = vadd.xlane.f32.xlu0 %v16331_v6 }
0x1d12   : > { %v16309_v63 = vmul.f32 1.442695, %v16288_v34 }
0x1d13   : > { %v16307_v9 = vmul.f32 1.442695, %v16287_v52 }
0x1d14   : > { %23315 = vpow2.f32 %v16309_v63 }
0x1d15   : > { %23317 = vpow2.f32 %v16307_v9 }
0x1d16   : > { %v27630_v45 = vpop.eup %23311 }
0x1d17   : > { %v27632_v50 = vpop.eup %23313  ;;  %v16258_v17 = vpop.xlane.xlu1 %16257  ;;  %v16340_v26 = vsel %vm2028_vm5, %v27630_v45, 0.0 }
0x1d18   : > { %v16290_v54 = vsub.f32 %v27588_v55, %v16258_v17  ;;  %v16255_v30 = vpop.xlane.xlu0 %16254  ;;  %16341 = vadd.xlane.f32.xlu1 %v16340_v26  ;;  %v16337_v62 = vsel %vm2028_vm5, %v27632_v50, 0.0 }
0x1d19   : > { %v16289_v23 = vsub.f32 %v27592_v59, %v16255_v30  ;;  %16338 = vadd.xlane.f32.xlu0 %v16337_v62 }
0x1d1a   : > { %v16313_v61 = vmul.f32 1.442695, %v16290_v54 }
0x1d1b   : > { %v16311_v27 = vmul.f32 1.442695, %v16289_v23 }
0x1d1c   : > { %23319 = vpow2.f32 %v16313_v61 }
0x1d1d   : > { %23321 = vpow2.f32 %v16311_v27 }
0x1d1e   : > { %v27640_v35 = vpop.eup %23315 }
0x1d1f   : > { %v27642_v44 = vpop.eup %23317  ;;  %v16270_v11 = vpop.xlane.xlu1 %16269  ;;  %v16346_v55 = vsel %vm2028_vm5, %v27640_v35, 0.0 }
0x1d20   : > { %v16294_v40 = vsub.f32 %v27600_v53, %v16270_v11  ;;  %v16267_v1 = vpop.xlane.xlu0 %16266  ;;  %16347 = vadd.xlane.f32.xlu1 %v16346_v55  ;;  %v16343_v59 = vsel %vm2028_vm5, %v27642_v44, 0.0 }
0x1d21   : > { %v16293_v41 = vsub.f32 %v27604_v46, %v16267_v1  ;;  %16344 = vadd.xlane.f32.xlu0 %v16343_v59 }
0x1d22   : > { %v16321_v39 = vmul.f32 1.442695, %v16294_v40 }
0x1d23   : > { %v16319_v48 = vmul.f32 1.442695, %v16293_v41 }
0x1d24   : > { %23323 = vpow2.f32 %v16321_v39 }
0x1d25   : > { %23325 = vpow2.f32 %v16319_v48 }
0x1d26   : > { %v27650_v58 = vpop.eup %23319 }
0x1d27   : > { %v27652_v20 = vpop.eup %23321  ;;  %v16352_v60 = vsel %vm2028_vm5, %v27650_v58, 0.0  ;;  %v16282_v15 = vpop.xlane.xlu1 %16281 }
0x1d28   : > { %16353 = vadd.xlane.f32.xlu1 %v16352_v60  ;;  %v16349_v53 = vsel %vm2028_vm5, %v27652_v20, 0.0  ;;  %v16279_v34 = vpop.xlane.xlu0 %16278  ;;  %v16298_v43 = vsub.f32 %v27612_v36, %v16282_v15 }
0x1d29   : > { %16350 = vadd.xlane.f32.xlu0 %v16349_v53  ;;  %v16297_v6 = vsub.f32 %v27616_v14, %v16279_v34 }
0x1d2a   : > { %v16329_v7 = vmul.f32 1.442695, %v16298_v43 }
0x1d2b   : > { %v16327_v52 = vmul.f32 1.442695, %v16297_v6 }
0x1d2c   : > { %23327 = vpow2.f32 %v16329_v7 }
0x1d2d   : > { %23329 = vpow2.f32 %v16327_v52 }
0x1d2e   : > { %v27658_v24 = vpop.eup %23323 }
0x1d2f   : > { %v27660_v46 = vpop.eup %23325  ;;  %v16364_v42 = vsel %vm2028_vm5, %v27658_v24, 0.0 }
0x1d30   : > { %16365 = vadd.xlane.f32.xlu1 %v16364_v42  ;;  %v16361_v3 = vsel %vm2028_vm5, %v27660_v46, 0.0 }
0x1d31   : > { %16362 = vadd.xlane.f32.xlu0 %v16361_v3 }
0x1d36   : > { %v27684_v63 = vpop.eup %23327 }
0x1d37   : > { %v27686_v9 = vpop.eup %23329 }
0x1d3c   : > { %v21224_v13 = vpop.f32.mrb[180].mxu1 }
0x1d3d   : > { %v16212_v37 = vmul.f32 0.35355338, %v21224_v13  ;;  %v15921_v4 = vpop.f32.mrb[181].mxu1 }
0x1d3e   : > { %v16211_v21 = vmul.f32 0.35355338, %v15921_v4 }
0x1d3f   : > { %v16228_v8 = vsel %vm775_vm4, %v16212_v37, -1e+30 }
0x1d40   : > { %v16227_v29 = vsel %vm775_vm4, %v16211_v21, -1e+30  ;;  %v16262_v51 = vsel %vm2028_vm5, %v16228_v8, -inf }
0x1d41   : > { %16263 = vmax.xlane.f32.xlu1 %v16262_v51  ;;  %v16259_v49 = vsel %vm2028_vm5, %v16227_v29, -inf }
0x1d42   : > { %16260 = vmax.xlane.f32.xlu0 %v16259_v49 }
0x1d44   : > { %v21238_v33 = vpop.f32.mrb[182].mxu1 }
0x1d45   : > { %v16216_v31 = vmul.f32 0.35355338, %v21238_v33  ;;  %v16103_v47 = vpop.f32.mrb[183].mxu1 }
0x1d46   : > { %v16215_v25 = vmul.f32 0.35355338, %v16103_v47 }
0x1d47   : > { %v16232_v5 = vsel %vm775_vm4, %v16216_v31, -1e+30 }
0x1d48   : > { %v16231_v18 = vsel %vm775_vm4, %v16215_v25, -1e+30  ;;  %v16274_v22 = vsel %vm2028_vm5, %v16232_v5, -inf }
0x1d49   : > { %16275 = vmax.xlane.f32.xlu1 %v16274_v22  ;;  %v16271_v12 = vsel %vm2028_vm5, %v16231_v18, -inf }
0x1d4a   : > { %16272 = vmax.xlane.f32.xlu0 %v16271_v12 }
0x1d5a   : > { %22761 = vrot.lane.b32.xlu1 %v26318_v28, %s23446_s25  ;;  %v16376_v28 = vsel %vm2028_vm5, %v27684_v63, 0.0 }
0x1d60   : > { %22756 = vrot.lane.b32.xlu0 %v28465_v16, %s23446_s25  ;;  %v16373_v16 = vsel %vm2028_vm5, %v27686_v9, 0.0 }
0x1d7e   : > { %16377 = vadd.xlane.f32.xlu1 %v16376_v28 }
0x1d7f   : > { %16374 = vadd.xlane.f32.xlu0 %v16373_v16 }
0x1d8f   : > { %22771 = vrot.lane.b32.xlu1 %v26333_v32, %s23446_s25 }
0x1d95   : > { %22766 = vrot.lane.b32.xlu0 %v28468_v10, %s23446_s25 }
0x1d99   : > { %22776 = vrot.lane.b32.xlu0 %v28466_v57, %s23446_s25 }
0x1d9d   : > { %v16336_v62 = vpop.xlane.xlu1 %16335 }
0x1d9e   : > { %v16333_v36 = vpop.xlane.xlu0 %16332 }
0x1d9f   : > { %23331 = vrcp.f32 %v16333_v36 }
0x1da5   : > { %v16342_v10 = vpop.xlane.xlu1 %16341 }
0x1da6   : > { %v16339_v17 = vpop.xlane.xlu0 %16338 }
0x1da9   : > { %v23332_v14 = vpop.eup %23331 }
0x1daa   : > { %v16395_v26 = vmul.f32 %v23332_v14, %v27624_v0 }
0x1dac   : > { %21250 = vmatprep.mubr.msk.f32.mxu1 %vm2028_vm5, %v16395_v26 }
0x1dad   : > { %v27702_v23 = vpop.xlane.xlu1 %16347 }
0x1dae   : > { %v16345_v54 = vpop.xlane.xlu0 %16344 }
0x1daf   : > { %23333 = vrcp.f32 %v16345_v54 }
0x1db5   : > { %v16354_v57 = vpop.xlane.xlu1 %16353 }
0x1db6   : > { %v16351_v61 = vpop.xlane.xlu0 %16350 }
0x1db9   : > { %v23334_v30 = vpop.eup %23333 }
0x1dba   : > { %v16399_v32 = vmul.f32 %v23334_v30, %v27642_v44 }
0x1dbc   : > { %21264 = vmatprep.mubr.msk.f32.mxu0 %vm2028_vm5, %v16399_v32 }
0x1dbd   : > { %v27704_v27 = vpop.xlane.xlu1 %16365 }
0x1dbe   : > { %v16363_v11 = vpop.xlane.xlu0 %16362 }
0x1dce   : > { %v16264_v55 = vpop.xlane.xlu1 %16263 }
0x1dcf   : > { %v16292_v0 = vsub.f32 %v16228_v8, %v16264_v55  ;;  %v16261_v40 = vpop.xlane.xlu0 %16260 }
0x1dd0   : > { %v16291_v1 = vsub.f32 %v16227_v29, %v16261_v40 }
0x1dd1   : > { %v16317_v59 = vmul.f32 1.442695, %v16292_v0 }
0x1dd2   : > { %v16315_v41 = vmul.f32 1.442695, %v16291_v1 }
0x1dd3   : > { %23335 = vpow2.f32 %v16317_v59 }
0x1dd4   : > { %23337 = vpow2.f32 %v16315_v41 }
0x1dd5   : > { %23339 = vrcp.f32 %v16336_v62 }
0x1dd6   : > { %23341 = vrcp.f32 %v16339_v17  ;;  %v16276_v44 = vpop.xlane.xlu1 %16275 }
0x1dd7   : > { %v16296_v39 = vsub.f32 %v16232_v5, %v16276_v44  ;;  %v16273_v48 = vpop.xlane.xlu0 %16272  ;;  %23343 = vrcp.f32 %v16342_v10 }
0x1dd8   : > { %v16295_v60 = vsub.f32 %v16231_v18, %v16273_v48  ;;  %23345 = vrcp.f32 %v16351_v61 }
0x1dd9   : > { %v16325_v53 = vmul.f32 1.442695, %v16296_v39 }
0x1dda   : > { %v16323_v42 = vmul.f32 1.442695, %v16295_v60  ;;  %v22762_v3 = vpop.permute.xlu1 %22761 }
0x1ddb   : > { %23347 = vpow2.f32 %v16325_v53  ;;  %v22757_v13 = vpop.permute.xlu0 %22756  ;;  %v22764_v37 = vunpack.i.h.bf16 %v22762_v3  ;;  %v22763_v4 = vunpack.i.l.bf16 %v22762_v3 }
0x1ddc   : > { %v22759_v21 = vunpack.i.h.bf16 %v22757_v13  ;;  %v22758_v8 = vunpack.i.l.bf16 %v22757_v13  ;;  %23349 = vpow2.f32 %v16323_v42 }
0x1ddd   : > { %v27706_v29 = vpop.eup %23335  ;;  %v22127_v5 = vpack.c.bf16 %v22764_v37, %v22763_v4  ;;  %23351 = vrcp.f32 %v16354_v57 }
0x1dde   : > { %v27708_v51 = vpop.eup %23337  ;;  %v22123_v49 = vpack.c.bf16 %v22759_v21, %v22758_v8  ;;  %v16358_v33 = vsel %vm2028_vm5, %v27706_v29, 0.0  ;;  %23353 = vrcp.f32 %v27702_v23  ;;  %v18733_v21 = vld [vmem:[%s28239_s6 + $0x38] sm:$0xff] }
0x1ddf   : > { %v23340_v31 = vpop.eup %23339  ;;  %16359 = vadd.xlane.f32.xlu1 %v16358_v33  ;;  %v16355_v47 = vsel %vm2028_vm5, %v27708_v51, 0.0  ;;  %23355 = vrcp.f32 %v16363_v11 }
0x1de0   : > { %v23342_v25 = vpop.eup %23341  ;;  %22124 = vmatprep.subr.bf16.mxu1 %v22123_v49  ;;  %16356 = vadd.xlane.f32.xlu0 %v16355_v47  ;;  %v16396_v18 = vmul.f32 %v23340_v31, %v27622_v19  ;;  %23357 = vrcp.f32 %v27704_v27 }
0x1de1   : > { %22126 = vmatpush3.bf16.msra.mxu1 %v22123_v49  ;;  %v23344_v22 = vpop.eup %23343  ;;  %v16397_v12 = vmul.f32 %v23342_v25, %v27632_v50 }
0x1de2   : > { %22128 = vmatprep.subr.bf16.mxu1 %v22127_v5  ;;  %v23346_v15 = vpop.eup %23345  ;;  %v16398_v43 = vmul.f32 %v23344_v22, %v27630_v45 }
0x1de3   : > { %v16401_v19 = vmul.f32 %v23346_v15, %v27652_v20 }
0x1de4   : > { %21251 = vmatmul.mubr.msk.f32.vlgmr.msra.gmra.mrb[184].mxu1 %vm2028_vm5, %v16396_v18 }
0x1de5   : > { %v27717_v34 = vpop.eup %23347  ;;  %22130 = vmatpush3.bf16.msra.mxu1 %v22127_v5  ;;  %21257 = vmatprep.mubr.msk.f32.mxu1 %vm2028_vm5, %v16397_v12 }
0x1de6   : > { %v16370_v6 = vsel %vm2028_vm5, %v27717_v34, 0.0  ;;  %v27723_v7 = vpop.eup %23349 }
0x1de7   : > { %16371 = vadd.xlane.f32.xlu1 %v16370_v6  ;;  %v16367_v50 = vsel %vm2028_vm5, %v27723_v7, 0.0 }
0x1de8   : > { %21258 = vmatmul.mubr.msk.f32.vlgmr.msra.gmra.mrb[186].mxu1 %vm2028_vm5, %v16398_v43 }
0x1de9   : > { %21271 = vmatprep.mubr.msk.f32.mxu1 %vm2028_vm5, %v16401_v19 }
0x1deb   : > { %16368 = vadd.xlane.f32.xlu1 %v16367_v50 }
0x1df6   : > { %22781 = vrot.lane.b32.xlu0 %v26346_v2, %s23446_s25  ;;  %v23352_v2 = vpop.eup %23351 }
0x1df7   : > { %v23354_v30 = vpop.eup %23353  ;;  %v16402_v10 = vmul.f32 %v23352_v2, %v27650_v58 }
0x1df8   : > { %v23356_v62 = vpop.eup %23355  ;;  %v16400_v23 = vmul.f32 %v23354_v30, %v27640_v35 }
0x1df9   : > { %v16405_v61 = vmul.f32 %v23356_v62, %v27660_v46  ;;  %v23358_v46 = vpop.eup %23357 }
0x1dfa   : > { %22791 = vrot.lane.b32.xlu0 %v28470_v56, %s23446_s25  ;;  %v16406_v60 = vmul.f32 %v23358_v46, %v27658_v24 }
0x1dfc   : > { %22786 = vrot.lane.b32.xlu1 %v28467_v38, %s23446_s25 }
0x1e0b   : > { %v16378_v45 = vpop.xlane.xlu1 %16377 }
0x1e0c   : > { %v16375_v20 = vpop.xlane.xlu0 %16374 }
0x1e0d   : > { %23359 = vrcp.f32 %v16375_v20 }
0x1e0f   : > { %v22772_v52 = vpop.permute.xlu1 %22771 }
0x1e10   : > { %v22774_v28 = vunpack.i.h.bf16 %v22772_v52  ;;  %v22773_v16 = vunpack.i.l.bf16 %v22772_v52  ;;  %v22767_v36 = vpop.permute.xlu0 %22766 }
0x1e11   : > { %v22769_v14 = vunpack.i.h.bf16 %v22767_v36  ;;  %v22768_v17 = vunpack.i.l.bf16 %v22767_v36 }
0x1e12   : > { %v22135_v26 = vpack.c.bf16 %v22774_v28, %v22773_v16  ;;  %v27780_v28 = vld [vmem:[%s28240_s7 + $0x1] ss:$0 sm:$0xff] }
0x1e13   : > { %v22131_v54 = vpack.c.bf16 %v22769_v14, %v22768_v17 }
0x1e14   : > { %v22777_v56 = vpop.permute.xlu0 %22776  ;;  %22136 = vmatprep.subr.bf16.mxu1 %v22135_v26 }
0x1e15   : > { %v22779_v38 = vunpack.i.h.bf16 %v22777_v56  ;;  %v22778_v32 = vunpack.i.l.bf16 %v22777_v56  ;;  %22132 = vmatprep.subr.bf16.mxu0 %v22131_v54  ;;  %22138 = vmatpush3.bf16.msra.mxu1 %v22135_v26  ;;  %v28502_v26 = vld [vmem:[#allocation15_spill] sm:$0xff] }
0x1e16   : > { %22134 = vmatpush3.bf16.msra.mxu0 %v22131_v54  ;;  %v28503_v54 = vld [vmem:[#allocation8_spill] sm:$0xff] }
0x1e17   : > { %v22139_v57 = vpack.c.bf16 %v22779_v38, %v22778_v32  ;;  %v23360_v41 = vpop.eup %23359 }
0x1e18   : > { %21272 = vmatmul.mubr.msk.f32.vlgmr.msra.gmra.mrb[188].mxu1 %vm2028_vm5, %v16402_v10  ;;  %v16409_v4 = vmul.f32 %v23360_v41, %v27686_v9 }
0x1e19   : > { %21265 = vmatmul.mubr.msk.f32.vlgmr.msra.gmra.mrb[224].mxu0 %vm2028_vm5, %v16400_v23  ;;  %22140 = vmatprep.subr.bf16.mxu0 %v22139_v57 }
0x1e1a   : > { %21285 = vmatprep.mubr.msk.f32.mxu1 %vm2028_vm5, %v16405_v61  ;;  %22142 = vmatpush3.bf16.msra.mxu0 %v22139_v57  ;;  %v28504_v57 = vld [vmem:[#allocation20_spill] sm:$0xff] }
0x1e6c   : > { %v16360_v11 = vpop.xlane.xlu1 %16359 }
0x1e6d   : > { %23361 = vrcp.f32 %v16360_v11  ;;  %v16357_v58 = vpop.xlane.xlu0 %16356  ;;  %v28505_v11 = vld [vmem:[#allocation24_spill] sm:$0xff] }
0x1e6e   : > { %23363 = vrcp.f32 %v16357_v58 }
0x1e6f   : > { %23365 = vrcp.f32 %v16378_v45 }
0x1e71   : > { %v22782_v35 = vpop.permute.xlu0 %22781 }
0x1e72   : > { %v22784_v55 = vunpack.i.h.bf16 %v22782_v35  ;;  %v22783_v0 = vunpack.i.l.bf16 %v22782_v35 }
0x1e74   : > { %v22143_v40 = vpack.c.bf16 %v22784_v55, %v22783_v0  ;;  %v16372_v1 = vpop.xlane.xlu1 %16371 }
0x1e75   : > { %v22792_v59 = vpop.permute.xlu0 %22791  ;;  %23367 = vrcp.f32 %v16372_v1 }
0x1e76   : > { %v22794_v44 = vunpack.i.h.bf16 %v22792_v59  ;;  %v22793_v39 = vunpack.i.l.bf16 %v22792_v59  ;;  %22144 = vmatprep.subr.bf16.mxu1 %v22143_v40  ;;  %v28506_v59 = vld [vmem:[#allocation4_spill] sm:$0xff] }
0x1e77   : > { %v23362_v48 = vpop.eup %23361  ;;  %22146 = vmatpush3.bf16.msra.mxu1 %v22143_v40 }
0x1e78   : > { %v23364_v27 = vpop.eup %23363  ;;  %v22151_v53 = vpack.c.bf16 %v22794_v44, %v22793_v39  ;;  %v16369_v42 = vpop.xlane.xlu1 %16368  ;;  %v16404_v37 = vmul.f32 %v23362_v48, %v27706_v29  ;;  %v28507_v44 = vld [vmem:[#allocation5_spill] sm:$0xff] }
0x1e79   : > { %v23366_v3 = vpop.eup %23365  ;;  %23369 = vrcp.f32 %v16369_v42  ;;  %v16403_v13 = vmul.f32 %v23364_v27, %v27708_v51 }
0x1e7a   : > { %21286 = vmatmul.mubr.msk.f32.vlgmr.msra.gmra.mrb[190].mxu1 %vm2028_vm5, %v16406_v60  ;;  %22152 = vmatprep.subr.bf16.mxu1 %v22151_v53  ;;  %v16410_v24 = vmul.f32 %v23366_v3, %v27684_v63 }
0x1e7b   : > { %21278 = vmatprep.mubr.msk.f32.mxu0 %vm2028_vm5, %v16403_v13  ;;  %22154 = vmatpush3.bf16.msra.mxu1 %v22151_v53  ;;  %v28508_v13 = vld [vmem:[#allocation6_spill] sm:$0xff] }
0x1e7c   : > { %v22787_v8 = vpop.permute.xlu1 %22786  ;;  %21299 = vmatprep.mubr.msk.f32.mxu1 %vm2028_vm5, %v16409_v4  ;;  %21279 = vmatmul.mubr.msk.f32.vlgmr.msra.gmra.mrb[226].mxu0 %vm2028_vm5, %v16404_v37  ;;  %v28509_v4 = vld [vmem:[#allocation9_spill] sm:$0xff] }
0x1e7d   : > { %v22789_v29 = vunpack.i.h.bf16 %v22787_v8  ;;  %v22788_v51 = vunpack.i.l.bf16 %v22787_v8  ;;  %21302 = vmatprep.subr.mxu1 %v18733_v21 }
0x1e7e   : > { %21300 = vmatmul.mubr.msk.f32.vlgmr.msra.gmra.mrb[192].mxu1 %vm2028_vm5, %v16410_v24 }
0x1e7f   : > { %v22147_v9 = vpack.c.bf16 %v22789_v29, %v22788_v51  ;;  %21303 = vmatpush3.msra.mxu1 %v18733_v21  ;;  %v23368_v49 = vpop.eup %23367 }
0x1e80   : > { %v16408_v63 = vmul.f32 %v23368_v49, %v27717_v34 }
0x1e81   : > { %22148 = vmatprep.subr.bf16.mxu0 %v22147_v9 }
0x1e82   : > { %22150 = vmatpush3.bf16.msra.mxu0 %v22147_v9 }
0x1e83   : > { %v23370_v33 = vpop.eup %23369 }
0x1e84   : > { %v16407_v31 = vmul.f32 %v23370_v33, %v27723_v7  ;;  %v28510_v33 = vld [vmem:[#allocation7_spill] sm:$0xff] }
0x1e86   : > { %21292 = vmatprep.mubr.msk.f32.mxu0 %vm2028_vm5, %v16407_v31 }
0x1e87   : > { %21293 = vmatmul.mubr.msk.f32.vlgmr.msra.gmra.mrb[228].mxu0 %vm2028_vm5, %v16408_v63 }
0x1eb7   : > { %v21252_v47 = vpop.f32.mrb[184].mxu1 }
0x1eb8   : > { %v16489_v25 = vpop.f32.mrb[185].mxu1 }
0x1eb9   : > { %21304 = vmatprep.mubr.msk.f32.mxu1 %vm592_vm0, %v16489_v25 }
0x1eba   : > { %21305 = vmatmul.mubr.msk.f32.vlgmr.msra.gmra.mrb[156].mxu1 %vm592_vm0, %v21252_v47  ;;  %v28511_v47 = vld [vmem:[#allocation10_spill] sm:$0xff] }
0x1ebb   : > { %v21259_v5 = vpop.f32.mrb[186].mxu1 }
0x1ebc   : > { %v16576_v18 = vpop.f32.mrb[187].mxu1 }
0x1ebd   : > { %21307 = vmatprep.mubr.msk.f32.mxu1 %vm592_vm0, %v16576_v18 }
0x1ebe   : > { %21308 = vmatmul.mubr.msk.f32.gmra.mrb[158].mxu1 %vm592_vm0, %v21259_v5 }
0x1eeb   : > { %v21273_v22 = vpop.f32.mrb[188].mxu1 }
0x1eec   : > { %v21266_v12 = vpop.f32.mrb[224].mxu0  ;;  %v16750_v15 = vpop.f32.mrb[189].mxu1 }
0x1eed   : > { %v16663_v34 = vpop.f32.mrb[225].mxu0 }
0x1eee   : > { %21310 = vmatprep.mubr.msk.f32.mxu1 %vm592_vm0, %v16663_v34  ;;  %v28512_v34 = vld [vmem:[#allocation16_spill] sm:$0xff] }
0x1eef   : > { %21311 = vmatmul.mubr.msk.f32.gmra.mrb[160].mxu1 %vm592_vm0, %v21266_v12 }
0x1ef0   : > { %21313 = vmatprep.mubr.msk.f32.mxu1 %vm592_vm0, %v16750_v15 }
0x1ef3   : > { %21314 = vmatmul.mubr.msk.f32.gmra.mrb[162].mxu1 %vm592_vm0, %v21273_v22 }
0x1f4d   : > { %v21287_v43 = vpop.f32.mrb[190].mxu1 }
0x1f4e   : > { %v16924_v6 = vpop.f32.mrb[191].mxu1 }
0x1f4f   : > { %v21280_v7 = vpop.f32.mrb[226].mxu0 }
0x1f50   : > { %v16837_v19 = vpop.f32.mrb[227].mxu0 }
0x1f51   : > { %v21301_v50 = vpop.f32.mrb[192].mxu1  ;;  %21316 = vmatprep.mubr.msk.f32.mxu1 %vm592_vm0, %v16837_v19  ;;  %v28513_v19 = vld [vmem:[#allocation11_spill] sm:$0xff] }
0x1f52   : > { %v17098_v45 = vpop.f32.mrb[193].mxu1  ;;  %21317 = vmatmul.mubr.msk.f32.gmra.mrb[164].mxu1 %vm592_vm0, %v21280_v7 }
0x1f53   : > { %21319 = vmatprep.mubr.msk.f32.mxu1 %vm592_vm0, %v16924_v6 }
0x1f56   : > { %21320 = vmatmul.mubr.msk.f32.gmra.mrb[166].mxu1 %vm592_vm0, %v21287_v43 }
0x1f5a   : > { %v21294_v20 = vpop.f32.mrb[228].mxu0 }
0x1f5b   : > { %v17011_v52 = vpop.f32.mrb[229].mxu0 }
0x1f5c   : > { %21322 = vmatprep.mubr.msk.f32.mxu1 %vm592_vm0, %v17011_v52 }
0x1f5d   : > { %21323 = vmatmul.mubr.msk.f32.gmra.mrb[168].mxu1 %vm592_vm0, %v21294_v20 }
0x1f5e   : > { %21325 = vmatprep.mubr.msk.f32.mxu1 %vm592_vm0, %v17098_v45 }
0x1f61   : > { %21326 = vmatmul.mubr.msk.f32.gmra.mrb[170].mxu1 %vm592_vm0, %v21301_v50 }
0x1f8d   : > { %v21306_v16 = vpop.f32.mrb[156].mxu1 }
0x1f8e   : > { %v17325_v36 = vadd.f32 %v21306_v16, %v27780_v28  ;;  %v17221_v14 = vpop.f32.mrb[157].mxu1 }
0x1f8f   : > { %v17324_v17 = vadd.f32 %v27780_v28, %v17221_v14 }
0x1f90   : > { %v27785_v2 = vadd.f32 %v17325_v36, %v28502_v26 }
0x1f91   : > { %v27788_v30 = vadd.f32 %v17324_v17, %v28503_v54  ;;  %v21309_v56 = vpop.f32.mrb[158].mxu1 }
0x1f92   : > { %v17327_v62 = vadd.f32 %v21309_v56, %v27780_v28  ;;  %v17231_v38 = vpop.f32.mrb[159].mxu1  ;;  %v17363_v32 = vsel %vm722_vm1, %v27785_v2, 0.0 }
0x1f93   : > { %v17326_v10 = vadd.f32 %v27780_v28, %v17231_v38  ;;  %17364 = vadd.xlane.f32.xlu0 %v17363_v32  ;;  %v17360_v23 = vsel %vm722_vm1, %v27788_v30, 0.0  ;;  %v28515_v32 = vld [vmem:[#allocation22_spill] sm:$0xff] }
0x1f94   : > { %v27797_v61 = vadd.f32 %v17327_v62, %v28504_v57  ;;  %17361 = vadd.xlane.f32.xlu1 %v17360_v23  ;;  %v28514_v62 = vld [vmem:[#allocation3_spill] sm:$0xff] }
0x1f95   : > { %v27800_v58 = vadd.f32 %v17326_v10, %v28505_v11 }
0x1f96   : > { %v17369_v35 = vsel %vm722_vm1, %v27797_v61, 0.0 }
0x1f97   : > { %v17366_v55 = vsel %vm722_vm1, %v27800_v58, 0.0 }
0x1f98   : > { %17370 = vadd.xlane.f32.xlu1 %v17369_v35  ;;  %17367 = vadd.xlane.f32.xlu0 %v17366_v55 }
0x1fc2   : > { %v21312_v0 = vpop.f32.mrb[160].mxu1 }
0x1fc3   : > { %v17329_v40 = vadd.f32 %v21312_v0, %v27780_v28  ;;  %v17241_v1 = vpop.f32.mrb[161].mxu1 }
0x1fc4   : > { %v17328_v46 = vadd.f32 %v27780_v28, %v17241_v1 }
0x1fc5   : > { %v27809_v41 = vadd.f32 %v17329_v40, %v28506_v59 }
0x1fc6   : > { %v27812_v39 = vadd.f32 %v17328_v46, %v28507_v44  ;;  %v21315_v48 = vpop.f32.mrb[162].mxu1  ;;  %v28516_v44 = vld [vmem:[#allocation14_spill] sm:$0xff] }
0x1fc7   : > { %v17331_v27 = vadd.f32 %v21315_v48, %v27780_v28  ;;  %v17251_v60 = vpop.f32.mrb[163].mxu1  ;;  %v17375_v53 = vsel %vm722_vm1, %v27809_v41, 0.0  ;;  %v28517_v48 = vld [vmem:[#allocation18_spill] sm:$0xff] }
0x1fc8   : > { %v17330_v42 = vadd.f32 %v27780_v28, %v17251_v60  ;;  %17376 = vadd.xlane.f32.xlu1 %v17375_v53  ;;  %v17372_v3 = vsel %vm722_vm1, %v27812_v39, 0.0 }
0x1fc9   : > { %v27821_v37 = vadd.f32 %v17331_v27, %v28508_v13  ;;  %17373 = vadd.xlane.f32.xlu0 %v17372_v3 }
0x1fca   : > { %v27824_v21 = vadd.f32 %v17330_v42, %v28509_v4 }
0x1fcb   : > { %v17381_v24 = vsel %vm722_vm1, %v27821_v37, 0.0 }
0x1fcc   : > { %17382 = vadd.xlane.f32.xlu1 %v17381_v24  ;;  %v17378_v8 = vsel %vm722_vm1, %v27824_v21, 0.0 }
0x1fcd   : > { %17379 = vadd.xlane.f32.xlu0 %v17378_v8 }
0x2020   : > { %v17365_v7 = vpop.xlane.xlu0 %17364 }
0x2021   : > { %v17362_v15 = vpop.xlane.xlu1 %17361  ;;  %v17409_v16 = vmul.f32 0.03125, %v17365_v7  ;;  %v18999_v7 = vld [vmem:[%s28241_s8 + $0x38] sm:$0xff] }
0x2022   : > { %v17408_v17 = vmul.f32 0.03125, %v17362_v15 }
0x2023   : > { %v27863_v57 = vsub.f32 %v27785_v2, %v17409_v16 }
0x2024   : > { %v27869_v40 = vsub.f32 %v27788_v30, %v17408_v17 }
0x2025   : > { %v21318_v29 = vpop.f32.mrb[164].mxu1  ;;  %v17371_v26 = vpop.xlane.xlu1 %17370 }
0x2026   : > { %v17333_v51 = vadd.f32 %v21318_v29, %v27780_v28  ;;  %v17261_v9 = vpop.f32.mrb[165].mxu1  ;;  %v17368_v56 = vpop.xlane.xlu0 %17367  ;;  %v17411_v11 = vmul.f32 0.03125, %v17371_v26  ;;  %v17440_v3 = vmul.f32 %v27869_v40, %v27869_v40 }
0x2027   : > { %v17332_v49 = vadd.f32 %v27780_v28, %v17261_v9  ;;  %v17410_v1 = vmul.f32 0.03125, %v17368_v56 }
0x2028   : > { %v27833_v31 = vadd.f32 %v17333_v51, %v28510_v33  ;;  %v27881_v60 = vsub.f32 %v27797_v61, %v17411_v11  ;;  %v17456_v4 = vsel %vm722_vm1, %v17440_v3, 0.0 }
0x2029   : > { %v21321_v63 = vpop.f32.mrb[166].mxu1  ;;  %v27836_v25 = vadd.f32 %v17332_v49, %v28511_v47  ;;  %v27888_v53 = vsub.f32 %v27800_v58, %v17410_v1 }
0x202a   : > { %v17335_v5 = vadd.f32 %v21321_v63, %v27780_v28  ;;  %v17271_v18 = vpop.f32.mrb[167].mxu1  ;;  %v17387_v12 = vsel %vm722_vm1, %v27833_v31, 0.0  ;;  %v17443_v13 = vmul.f32 %v27881_v60, %v27881_v60 }
0x202b   : > { %v17334_v22 = vadd.f32 %v27780_v28, %v17271_v18  ;;  %17388 = vadd.xlane.f32.xlu1 %v17387_v12  ;;  %v17384_v6 = vsel %vm722_vm1, %v27836_v25, 0.0  ;;  %v17442_v58 = vmul.f32 %v27888_v53, %v27888_v53  ;;  %v18997_v18 = vld [vmem:[%s28241_s8 + $0x28] sm:$0xff] }
0x202c   : > { %v27843_v43 = vadd.f32 %v17335_v5, %v28512_v34  ;;  %17385 = vadd.xlane.f32.xlu0 %v17384_v6  ;;  %v17465_v24 = vsel %vm722_vm1, %v17443_v13, 0.0  ;;  %v18996_v5 = vld [vmem:[%s28241_s8 + $0x20] sm:$0xff]  ;;  %v18998_v6 = vld [vmem:[%s28241_s8 + $0x30] sm:$0xff] }
0x202d   : > { %v27848_v50 = vadd.f32 %v17334_v22, %v28513_v19  ;;  %v17462_v8 = vsel %vm722_vm1, %v17442_v58, 0.0  ;;  %v22155_v34 = vpack.c.bf16 %v18997_v18, %v18996_v5 }
0x202e   : > { %v17393_v45 = vsel %vm722_vm1, %v27843_v43, 0.0 }
0x202f   : > { %v17390_v20 = vsel %vm722_vm1, %v27848_v50, 0.0  ;;  %17394 = vadd.xlane.f32.xlu1 %v17393_v45  ;;  %22156 = vmatprep.subr.bf16.mxu0 %v22155_v34 }
0x2030   : > { %v21324_v52 = vpop.f32.mrb[168].mxu1  ;;  %17391 = vadd.xlane.f32.xlu0 %v17390_v20  ;;  %v22159_v20 = vpack.c.bf16 %v18999_v7, %v18998_v6  ;;  %22158 = vmatpush3.bf16.msra.mxu0 %v22155_v34 }
0x2031   : > { %v17337_v36 = vadd.f32 %v21324_v52, %v27780_v28  ;;  %v17281_v14 = vpop.f32.mrb[169].mxu1 }
0x2032   : > { %v17336_v54 = vadd.f32 %v27780_v28, %v17281_v14  ;;  %22160 = vmatprep.subr.bf16.mxu0 %v22159_v20 }
0x2033   : > { %v27857_v38 = vadd.f32 %v17337_v36, %v28514_v62 }
0x2034   : > { %v27860_v10 = vadd.f32 %v17336_v54, %v28515_v32  ;;  %v21327_v23 = vpop.f32.mrb[170].mxu1  ;;  %22162 = vmatpush3.bf16.msra.mxu0 %v22159_v20 }
0x2035   : > { %v17339_v35 = vadd.f32 %v21327_v23, %v27780_v28  ;;  %v17291_v55 = vpop.f32.mrb[171].mxu1  ;;  %v17399_v0 = vsel %vm722_vm1, %v27857_v38, 0.0 }
0x2036   : > { %v17338_v46 = vadd.f32 %v27780_v28, %v17291_v55  ;;  %17400 = vadd.xlane.f32.xlu1 %v17399_v0  ;;  %v17396_v59 = vsel %vm722_vm1, %v27860_v10, 0.0  ;;  %v17441_v28 = vmul.f32 %v27863_v57, %v27863_v57 }
0x2037   : > { %v27875_v2 = vadd.f32 %v17339_v35, %v28516_v44  ;;  %17397 = vadd.xlane.f32.xlu0 %v17396_v59 }
0x2038   : > { %v27878_v27 = vadd.f32 %v17338_v46, %v28517_v48  ;;  %v17459_v61 = vsel %vm722_vm1, %v17441_v28, 0.0 }
0x2039   : > { %v17405_v30 = vsel %vm722_vm1, %v27875_v2, 0.0 }
0x203a   : > { %17406 = vadd.xlane.f32.xlu1 %v17405_v30  ;;  %v17402_v42 = vsel %vm722_vm1, %v27878_v27, 0.0 }
0x203b   : > { %17403 = vadd.xlane.f32.xlu0 %v17402_v42 }
0x203e   : > { %17460 = vadd.xlane.f32.xlu1 %v17459_v61 }
0x203f   : > { %17457 = vadd.xlane.f32.xlu0 %v17456_v4 }
0x2042   : > { %17466 = vadd.xlane.f32.xlu1 %v17465_v24 }
0x2043   : > { %17463 = vadd.xlane.f32.xlu0 %v17462_v8 }
0x2055   : > { %v17377_v29 = vpop.xlane.xlu1 %17376 }
0x2056   : > { %v17413_v51 = vmul.f32 0.03125, %v17377_v29  ;;  %v17374_v9 = vpop.xlane.xlu0 %17373 }
0x2057   : > { %v17412_v49 = vmul.f32 0.03125, %v17374_v9 }
0x2058   : > { %v27903_v33 = vsub.f32 %v27809_v41, %v17413_v51 }
0x2059   : > { %v27906_v63 = vsub.f32 %v27812_v39, %v17412_v49  ;;  %v17383_v47 = vpop.xlane.xlu1 %17382 }
0x205a   : > { %v17415_v22 = vmul.f32 0.03125, %v17383_v47  ;;  %v17380_v12 = vpop.xlane.xlu0 %17379  ;;  %v17445_v15 = vmul.f32 %v27903_v33, %v27903_v33 }
0x205b   : > { %v17414_v41 = vmul.f32 0.03125, %v17380_v12  ;;  %v17444_v39 = vmul.f32 %v27906_v63, %v27906_v63 }
0x205c   : > { %v27925_v19 = vsub.f32 %v27821_v37, %v17415_v22  ;;  %v17471_v45 = vsel %vm722_vm1, %v17445_v15, 0.0 }
0x205d   : > { %v27929_v52 = vsub.f32 %v27824_v21, %v17414_v41  ;;  %17472 = vadd.xlane.f32.xlu1 %v17471_v45  ;;  %v17468_v16 = vsel %vm722_vm1, %v17444_v39, 0.0 }
0x205e   : > { %17469 = vadd.xlane.f32.xlu0 %v17468_v16  ;;  %v17447_v36 = vmul.f32 %v27925_v19, %v27925_v19 }
0x205f   : > { %v17446_v37 = vmul.f32 %v27929_v52, %v27929_v52 }
0x2060   : > { %v17477_v14 = vsel %vm722_vm1, %v17447_v36, 0.0 }
0x2061   : > { %17478 = vadd.xlane.f32.xlu1 %v17477_v14  ;;  %v17474_v17 = vsel %vm722_vm1, %v17446_v37, 0.0  ;;  %v27989_v37 = vld [vmem:[%s28245_s12 + $0x1] ss:$0 sm:$0xff] }
0x2062   : > { %17475 = vadd.xlane.f32.xlu0 %v17474_v17 }
0x20b8   : > { %v17389_v21 = vpop.xlane.xlu1 %17388 }
0x20b9   : > { %v17417_v26 = vmul.f32 0.03125, %v17389_v21  ;;  %v17386_v54 = vpop.xlane.xlu0 %17385 }
0x20ba   : > { %v17416_v56 = vmul.f32 0.03125, %v17386_v54 }
0x20bb   : > { %v27939_v62 = vsub.f32 %v27833_v31, %v17417_v26  ;;  %v27996_v26 = vld [vmem:[%s28246_s13 + $0x1] ss:$0 sm:$0xff] }
0x20bc   : > { %v27942_v32 = vsub.f32 %v27836_v25, %v17416_v56  ;;  %v17395_v23 = vpop.xlane.xlu1 %17394 }
0x20bd   : > { %v17419_v11 = vmul.f32 0.03125, %v17395_v23  ;;  %v17392_v35 = vpop.xlane.xlu0 %17391  ;;  %v17449_v55 = vmul.f32 %v27939_v62, %v27939_v62 }
0x20be   : > { %v17418_v0 = vmul.f32 0.03125, %v17392_v35  ;;  %v17448_v1 = vmul.f32 %v27942_v32, %v27942_v32 }
0x20bf   : > { %v27949_v46 = vsub.f32 %v27843_v43, %v17419_v11  ;;  %v17483_v59 = vsel %vm722_vm1, %v17449_v55, 0.0 }
0x20c0   : > { %v27953_v31 = vsub.f32 %v27848_v50, %v17418_v0  ;;  %17484 = vadd.xlane.f32.xlu1 %v17483_v59  ;;  %v17480_v25 = vsel %vm722_vm1, %v17448_v1, 0.0 }
0x20c1   : > { %17481 = vadd.xlane.f32.xlu0 %v17480_v25  ;;  %v17451_v44 = vmul.f32 %v27949_v46, %v27949_v46 }
0x20c2   : > { %v17450_v30 = vmul.f32 %v27953_v31, %v27953_v31 }
0x20c3   : > { %v17401_v48 = vpop.xlane.xlu1 %17400  ;;  %v17489_v43 = vsel %vm722_vm1, %v17451_v44, 0.0 }
0x20c4   : > { %v17421_v28 = vmul.f32 0.03125, %v17401_v48  ;;  %v17398_v42 = vpop.xlane.xlu0 %17397  ;;  %17490 = vadd.xlane.f32.xlu1 %v17489_v43  ;;  %v17486_v50 = vsel %vm722_vm1, %v17450_v30, 0.0 }
0x20c5   : > { %v17420_v3 = vmul.f32 0.03125, %v17398_v42  ;;  %17487 = vadd.xlane.f32.xlu0 %v17486_v50 }
0x20c6   : > { %v27963_v61 = vsub.f32 %v27857_v38, %v17421_v28 }
0x20c7   : > { %v27966_v13 = vsub.f32 %v27860_v10, %v17420_v3  ;;  %v17407_v4 = vpop.xlane.xlu1 %17406 }
0x20c8   : > { %v17423_v58 = vmul.f32 0.03125, %v17407_v4  ;;  %v17404_v24 = vpop.xlane.xlu0 %17403  ;;  %v17453_v8 = vmul.f32 %v27963_v61, %v27963_v61 }
0x20c9   : > { %v17422_v29 = vmul.f32 0.03125, %v17404_v24  ;;  %v17452_v51 = vmul.f32 %v27966_v13, %v27966_v13  ;;  %v19018_v24 = vld [vmem:[%s28243_s10 + $0x80] sm:$0xff] }
0x20ca   : > { %v27973_v9 = vsub.f32 %v27875_v2, %v17423_v58  ;;  %v17495_v38 = vsel %vm722_vm1, %v17453_v8, 0.0  ;;  %v19019_v8 = vld [vmem:[%s28243_s10 + $0x88] sm:$0xff] }
0x20cb   : > { %v27977_v49 = vsub.f32 %v27878_v27, %v17422_v29  ;;  %17496 = vadd.xlane.f32.xlu1 %v17495_v38  ;;  %v17461_v10 = vpop.xlane.xlu1 %17460  ;;  %v17492_v47 = vsel %vm722_vm1, %v17452_v51, 0.0  ;;  %v19020_v29 = vld [vmem:[%s28243_s10 + $0x90] sm:$0xff]  ;;  %v22163_v51 = vpack.c.bf16 %v19019_v8, %v19018_v24  ;;  %v19021_v38 = vld [vmem:[%s28243_s10 + $0x98] sm:$0xff] }
0x20cc   : > { %v17505_v5 = vmul.f32 0.03125, %v17461_v10  ;;  %17493 = vadd.xlane.f32.xlu0 %v17492_v47  ;;  %v17458_v18 = vpop.xlane.xlu0 %17457  ;;  %v17455_v22 = vmul.f32 %v27973_v9, %v27973_v9  ;;  %v22167_v10 = vpack.c.bf16 %v19021_v38, %v19020_v29  ;;  %v19022_v47 = vld [vmem:[%s28243_s10 + $0xa0] sm:$0xff] }
0x20cd   : > { %v17504_v12 = vmul.f32 0.03125, %v17458_v18  ;;  %v17454_v2 = vmul.f32 %v27977_v49, %v27977_v49  ;;  %22164 = vmatprep.subr.bf16.mxu1 %v22163_v51 }
0x20ce   : > { %v17521_v15 = vadd.f32 1e-05, %v17505_v5  ;;  %v17501_v34 = vsel %vm722_vm1, %v17455_v22, 0.0  ;;  %v19023_v5 = vld [vmem:[%s28243_s10 + $0xa8] sm:$0xff]  ;;  %22166 = vmatpush3.bf16.msra.mxu1 %v22163_v51 }
0x20cf   : > { %v17520_v41 = vadd.f32 1e-05, %v17504_v12  ;;  %17502 = vadd.xlane.f32.xlu1 %v17501_v34  ;;  %v17467_v27 = vpop.xlane.xlu1 %17466  ;;  %v17498_v39 = vsel %vm722_vm1, %v17454_v2, 0.0  ;;  %22168 = vmatprep.subr.bf16.mxu1 %v22167_v10  ;;  %v22171_v22 = vpack.c.bf16 %v19023_v5, %v19022_v47  ;;  %v19025_v34 = vld [vmem:[%s28243_s10 + $0xb8] sm:$0xff] }
0x20d0   : > { %23371 = vrsqrt.f32 %v17521_v15  ;;  %v17507_v6 = vmul.f32 0.03125, %v17467_v27  ;;  %17499 = vadd.xlane.f32.xlu0 %v17498_v39  ;;  %v17464_v7 = vpop.xlane.xlu0 %17463  ;;  %v19024_v15 = vld [vmem:[%s28243_s10 + $0xb0] sm:$0xff] }
0x20d1   : > { %23373 = vrsqrt.f32 %v17520_v41  ;;  %v17506_v45 = vmul.f32 0.03125, %v17464_v7  ;;  %v22175_v7 = vpack.c.bf16 %v19025_v34, %v19024_v15 }
0x20d2   : > { %v17523_v20 = vadd.f32 1e-05, %v17507_v6  ;;  %22170 = vmatpush3.bf16.msra.mxu1 %v22167_v10 }
0x20d3   : > { %v17522_v16 = vadd.f32 1e-05, %v17506_v45  ;;  %22172 = vmatprep.subr.bf16.mxu1 %v22171_v22 }
0x20d4   : > { %23375 = vrsqrt.f32 %v17523_v20  ;;  %v19026_v20 = vld [vmem:[%s28243_s10 + $0xc0] sm:$0xff] }
0x20d5   : > { %23377 = vrsqrt.f32 %v17522_v16  ;;  %v19027_v16 = vld [vmem:[%s28243_s10 + $0xc8] sm:$0xff] }
0x20d6   : > { %22174 = vmatpush3.bf16.msra.mxu1 %v22171_v22 }
0x20d7   : > { %22176 = vmatprep.subr.bf16.mxu1 %v22175_v7 }
0x20da   : > { %v23372_v36 = vpop.eup %23371  ;;  %22178 = vmatpush3.bf16.msra.mxu1 %v22175_v7 }
0x20db   : > { %v23374_v14 = vpop.eup %23373  ;;  %v17553_v17 = vmul.f32 %v23372_v36, %v27863_v57 }
0x20dc   : > { %v17552_v21 = vmul.f32 %v23374_v14, %v27869_v40 }
0x20dd   : > { %v17575_v54 = vmul.f32 %v27989_v37, %v17553_v17 }
0x20de   : > { %v23376_v56 = vpop.eup %23375  ;;  %v17574_v23 = vmul.f32 %v27989_v37, %v17552_v21  ;;  %v22179_v21 = vpack.c.bf16 %v19027_v16, %v19026_v20 }
0x20df   : > { %v23378_v11 = vpop.eup %23377  ;;  %v17555_v35 = vmul.f32 %v23376_v56, %v27881_v60  ;;  %v17597_v40 = vadd.f32 %v27996_v26, %v17575_v54  ;;  %v19028_v54 = vld [vmem:[%s28243_s10 + $0xd0] sm:$0xff] }
0x20e0   : > { %v28002_v55 = vadd.f32 %v27996_v26, %v17574_v23  ;;  %v17554_v57 = vmul.f32 %v23378_v11, %v27888_v53  ;;  %22180 = vmatprep.subr.bf16.mxu1 %v22179_v21 }
0x20e1   : > { %v17577_v0 = vmul.f32 %v27989_v37, %v17555_v35  ;;  %v19030_v35 = vld [vmem:[%s28243_s10 + $0xe0] sm:$0xff]  ;;  %22182 = vmatpush3.bf16.msra.mxu1 %v22179_v21 }
0x20e2   : > { %21336 = vmatprep.mubr.msk.f32.mxu0 %vm722_vm1, %v28002_v55  ;;  %v17576_v1 = vmul.f32 %v27989_v37, %v17554_v57  ;;  %v19031_v57 = vld [vmem:[%s28243_s10 + $0xe8] sm:$0xff] }
0x20e3   : > { %21337 = vmatmul.mubr.msk.f32.vlgmr.msra.gmra.mrb[230].mxu0 %vm722_vm1, %v17597_v40  ;;  %v17599_v60 = vadd.f32 %v27996_v26, %v17577_v0  ;;  %v22187_v40 = vpack.c.bf16 %v19031_v57, %v19030_v35  ;;  %v19032_v0 = vld [vmem:[%s28243_s10 + $0xf0] sm:$0xff] }
0x20e4   : > { %v28012_v59 = vadd.f32 %v27996_v26, %v17576_v1  ;;  %v19033_v1 = vld [vmem:[%s28243_s10 + $0xf8] sm:$0xff] }
0x20e6   : > { %21339 = vmatprep.mubr.msk.f32.mxu0 %vm722_vm1, %v28012_v59 }
0x20e7   : > { %21340 = vmatmul.mubr.msk.f32.gmra.mrb[232].mxu0 %vm722_vm1, %v17599_v60  ;;  %v22191_v60 = vpack.c.bf16 %v19033_v1, %v19032_v0 }
0x20ea   : > { %v17473_v53 = vpop.xlane.xlu1 %17472 }
0x20eb   : > { %v17509_v25 = vmul.f32 0.03125, %v17473_v53  ;;  %v17470_v44 = vpop.xlane.xlu0 %17469 }
0x20ec   : > { %v17508_v48 = vmul.f32 0.03125, %v17470_v44 }
0x20ed   : > { %v17525_v30 = vadd.f32 1e-05, %v17509_v25 }
0x20ee   : > { %v17524_v28 = vadd.f32 1e-05, %v17508_v48  ;;  %v17479_v42 = vpop.xlane.xlu1 %17478 }
0x20ef   : > { %23379 = vrsqrt.f32 %v17525_v30  ;;  %v17511_v43 = vmul.f32 0.03125, %v17479_v42  ;;  %v17476_v3 = vpop.xlane.xlu0 %17475 }
0x20f0   : > { %23381 = vrsqrt.f32 %v17524_v28  ;;  %v17510_v50 = vmul.f32 0.03125, %v17476_v3 }
0x20f1   : > { %v17527_v4 = vadd.f32 1e-05, %v17511_v43 }
0x20f2   : > { %v17526_v58 = vadd.f32 1e-05, %v17510_v50 }
0x20f3   : > { %23383 = vrsqrt.f32 %v17527_v4 }
0x20f4   : > { %23385 = vrsqrt.f32 %v17526_v58 }
0x20f9   : > { %v23380_v18 = vpop.eup %23379 }
0x20fa   : > { %v23382_v12 = vpop.eup %23381  ;;  %v17557_v2 = vmul.f32 %v23380_v18, %v27903_v33 }
0x20fb   : > { %v17556_v41 = vmul.f32 %v23382_v12, %v27906_v63 }
0x20fc   : > { %v17579_v27 = vmul.f32 %v27989_v37, %v17557_v2 }
0x20fd   : > { %v23384_v39 = vpop.eup %23383  ;;  %v17578_v6 = vmul.f32 %v27989_v37, %v17556_v41 }
0x20fe   : > { %v23386_v45 = vpop.eup %23385  ;;  %v17559_v33 = vmul.f32 %v23384_v39, %v27925_v19  ;;  %v17601_v14 = vadd.f32 %v27996_v26, %v17579_v27 }
0x20ff   : > { %v28054_v63 = vadd.f32 %v27996_v26, %v17578_v6  ;;  %v17558_v36 = vmul.f32 %v23386_v45, %v27929_v52  ;;  %v19029_v52 = vld [vmem:[%s28243_s10 + $0xd8] sm:$0xff] }
0x2100   : > { %v17581_v17 = vmul.f32 %v27989_v37, %v17559_v33  ;;  %v22183_v11 = vpack.c.bf16 %v19029_v52, %v19028_v54 }
0x2101   : > { %21342 = vmatprep.mubr.msk.f32.mxu0 %vm722_vm1, %v28054_v63  ;;  %v17580_v19 = vmul.f32 %v27989_v37, %v17558_v36 }
0x2102   : > { %21343 = vmatmul.mubr.msk.f32.gmra.mrb[234].mxu0 %vm722_vm1, %v17601_v14  ;;  %v17603_v23 = vadd.f32 %v27996_v26, %v17581_v17  ;;  %22184 = vmatprep.subr.bf16.mxu1 %v22183_v11 }
0x2103   : > { %v28070_v56 = vadd.f32 %v27996_v26, %v17580_v19  ;;  %22186 = vmatpush3.bf16.msra.mxu1 %v22183_v11 }
0x2104   : > { %22188 = vmatprep.subr.bf16.mxu1 %v22187_v40 }
0x2105   : > { %21345 = vmatprep.mubr.msk.f32.mxu0 %vm722_vm1, %v28070_v56 }
0x2106   : > { %21346 = vmatmul.mubr.msk.f32.gmra.mrb[236].mxu0 %vm722_vm1, %v17603_v23 }
0x2107   : > { %22190 = vmatpush3.bf16.msra.mxu1 %v22187_v40 }
0x2108   : > { %22192 = vmatprep.subr.bf16.mxu1 %v22191_v60 }
0x210b   : > { %22194 = vmatpush3.bf16.msra.mxu1 %v22191_v60 }
0x214d   : > { %v17485_v53 = vpop.xlane.xlu1 %17484 }
0x214e   : > { %v17513_v25 = vmul.f32 0.03125, %v17485_v53  ;;  %v17482_v44 = vpop.xlane.xlu0 %17481 }
0x214f   : > { %v17512_v48 = vmul.f32 0.03125, %v17482_v44 }
0x2150   : > { %v17529_v30 = vadd.f32 1e-05, %v17513_v25 }
0x2151   : > { %v17528_v28 = vadd.f32 1e-05, %v17512_v48  ;;  %v17491_v42 = vpop.xlane.xlu1 %17490 }
0x2152   : > { %23387 = vrsqrt.f32 %v17529_v30  ;;  %v17515_v43 = vmul.f32 0.03125, %v17491_v42  ;;  %v17488_v3 = vpop.xlane.xlu0 %17487 }
0x2153   : > { %23389 = vrsqrt.f32 %v17528_v28  ;;  %v17514_v50 = vmul.f32 0.03125, %v17488_v3 }
0x2154   : > { %v17531_v4 = vadd.f32 1e-05, %v17515_v43 }
0x2155   : > { %v17530_v58 = vadd.f32 1e-05, %v17514_v50 }
0x2156   : > { %23391 = vrsqrt.f32 %v17531_v4 }
0x2157   : > { %23393 = vrsqrt.f32 %v17530_v58 }
0x2158   : > { %v17497_v24 = vpop.xlane.xlu1 %17496 }
0x2159   : > { %v17517_v8 = vmul.f32 0.03125, %v17497_v24  ;;  %v17494_v29 = vpop.xlane.xlu0 %17493 }
0x215a   : > { %v17516_v51 = vmul.f32 0.03125, %v17494_v29 }
0x215b   : > { %v17533_v38 = vadd.f32 1e-05, %v17517_v8 }
0x215c   : > { %v17532_v10 = vadd.f32 1e-05, %v17516_v51  ;;  %v17503_v47 = vpop.xlane.xlu1 %17502  ;;  %v23388_v5 = vpop.eup %23387 }
0x215d   : > { %23395 = vrsqrt.f32 %v17533_v38  ;;  %v17519_v18 = vmul.f32 0.03125, %v17503_v47  ;;  %v17500_v22 = vpop.xlane.xlu0 %17499  ;;  %v23390_v12 = vpop.eup %23389  ;;  %v17561_v15 = vmul.f32 %v23388_v5, %v27939_v62 }
0x215e   : > { %23397 = vrsqrt.f32 %v17532_v10  ;;  %v17518_v2 = vmul.f32 0.03125, %v17500_v22  ;;  %v17560_v41 = vmul.f32 %v23390_v12, %v27942_v32 }
0x215f   : > { %v17535_v34 = vadd.f32 1e-05, %v17519_v18  ;;  %v17583_v39 = vmul.f32 %v27989_v37, %v17561_v15 }
0x2160   : > { %v17534_v27 = vadd.f32 1e-05, %v17518_v2  ;;  %v23392_v6 = vpop.eup %23391  ;;  %v17582_v7 = vmul.f32 %v27989_v37, %v17560_v41 }
0x2161   : > { %23399 = vrsqrt.f32 %v17535_v34  ;;  %v23394_v45 = vpop.eup %23393  ;;  %v17563_v33 = vmul.f32 %v23392_v6, %v27949_v46  ;;  %v17605_v62 = vadd.f32 %v27996_v26, %v17583_v39 }
0x2162   : > { %23401 = vrsqrt.f32 %v17534_v27  ;;  %v28094_v20 = vadd.f32 %v27996_v26, %v17582_v7  ;;  %v17562_v16 = vmul.f32 %v23394_v45, %v27953_v31 }
0x2163   : > { %v17585_v32 = vmul.f32 %v27989_v37, %v17563_v33 }
0x2164   : > { %21348 = vmatprep.mubr.msk.f32.mxu0 %vm722_vm1, %v28094_v20  ;;  %v17584_v36 = vmul.f32 %v27989_v37, %v17562_v16 }
0x2165   : > { %21349 = vmatmul.mubr.msk.f32.gmra.mrb[238].mxu0 %vm722_vm1, %v17605_v62  ;;  %v17607_v19 = vadd.f32 %v27996_v26, %v17585_v32 }
0x2166   : > { %v28104_v17 = vadd.f32 %v27996_v26, %v17584_v36 }
0x2167   : > { %v23396_v14 = vpop.eup %23395 }
0x2168   : > { %v23398_v46 = vpop.eup %23397  ;;  %v17565_v31 = vmul.f32 %v23396_v14, %v27963_v61  ;;  %21351 = vmatprep.mubr.msk.f32.mxu0 %vm722_vm1, %v28104_v17 }
0x2169   : > { %v17564_v21 = vmul.f32 %v23398_v46, %v27966_v13  ;;  %21352 = vmatmul.mubr.msk.f32.gmra.mrb[240].mxu0 %vm722_vm1, %v17607_v19 }
0x216a   : > { %v17587_v54 = vmul.f32 %v27989_v37, %v17565_v31 }
0x216b   : > { %v23400_v52 = vpop.eup %23399  ;;  %v17586_v23 = vmul.f32 %v27989_v37, %v17564_v21 }
0x216c   : > { %v23402_v11 = vpop.eup %23401  ;;  %v17567_v35 = vmul.f32 %v23400_v52, %v27973_v9  ;;  %v17609_v40 = vadd.f32 %v27996_v26, %v17587_v54 }
0x216d   : > { %v28116_v57 = vadd.f32 %v27996_v26, %v17586_v23  ;;  %v17566_v61 = vmul.f32 %v23402_v11, %v27977_v49  ;;  %v19001_v49 = vld [vmem:[%s28242_s9 + $0x1] ss:$0 sm:$0xff] }
0x216e   : > { %v17589_v0 = vmul.f32 %v27989_v37, %v17567_v35  ;;  %v19035_v11 = vld [vmem:[%s28244_s11 + $0x1] ss:$0 sm:$0xff] }
0x216f   : > { %21354 = vmatprep.mubr.msk.f32.mxu0 %vm722_vm1, %v28116_v57  ;;  %v17588_v13 = vmul.f32 %v27989_v37, %v17566_v61 }
0x2170   : > { %21355 = vmatmul.mubr.msk.f32.gmra.mrb[242].mxu0 %vm722_vm1, %v17609_v40  ;;  %v17611_v9 = vadd.f32 %v27996_v26, %v17589_v0 }
0x2171   : > { %v28126_v1 = vadd.f32 %v27996_v26, %v17588_v13 }
0x2173   : > { %21357 = vmatprep.mubr.msk.f32.mxu0 %vm722_vm1, %v28126_v1 }
0x2174   : > { %21358 = vmatmul.mubr.msk.f32.gmra.mrb[244].mxu0 %vm722_vm1, %v17611_v9 }
0x21b6   : > { %v21338_v60 = vpop.f32.mrb[230].mxu0 }
0x21b7   : > { %v17745_v53 = vadd.f32 %v21338_v60, %v19001_v49  ;;  %v17739_v25 = vpop.f32.mrb[231].mxu0 }
0x21b8   : > { %v17740_v37 = vadd.f32 %v19001_v49, %v17739_v25 }
0x21b9   : > { %v17819_v30 = vmax.f32 %v17745_v53, 0.0 }
0x21ba   : > { %v17818_v44 = vmax.f32 %v17740_v37, 0.0  ;;  %v21341_v48 = vpop.f32.mrb[232].mxu0 }
0x21bb   : > { %v17755_v28 = vadd.f32 %v21341_v48, %v19001_v49  ;;  %v17749_v42 = vpop.f32.mrb[233].mxu0 }
0x21bc   : > { %v17750_v43 = vadd.f32 %v19001_v49, %v17749_v42  ;;  %21392 = vmatprep.mubr.f32.mxu1 %v17818_v44 }
0x21bd   : > { %21393 = vmatmul.mubr.f32.vlgmr.msra.gmra.mrb[194].mxu1 %v17819_v30  ;;  %v17821_v3 = vmax.f32 %v17755_v28, 0.0 }
0x21be   : > { %v17820_v26 = vmax.f32 %v17750_v43, 0.0 }
0x21c0   : > { %21395 = vmatprep.mubr.f32.mxu1 %v17820_v26 }
0x21c1   : > { %21396 = vmatmul.mubr.f32.gmra.mrb[196].mxu1 %v17821_v3 }
0x21d5   : > { %v21344_v50 = vpop.f32.mrb[234].mxu0 }
0x21d6   : > { %v17765_v4 = vadd.f32 %v21344_v50, %v19001_v49  ;;  %v17759_v58 = vpop.f32.mrb[235].mxu0 }
0x21d7   : > { %v17760_v24 = vadd.f32 %v19001_v49, %v17759_v58 }
0x21d8   : > { %v17823_v51 = vmax.f32 %v17765_v4, 0.0 }
0x21d9   : > { %v17822_v8 = vmax.f32 %v17760_v24, 0.0  ;;  %v21347_v29 = vpop.f32.mrb[236].mxu0 }
0x21da   : > { %v17775_v38 = vadd.f32 %v21347_v29, %v19001_v49  ;;  %v17769_v10 = vpop.f32.mrb[237].mxu0 }
0x21db   : > { %v17770_v47 = vadd.f32 %v19001_v49, %v17769_v10  ;;  %21398 = vmatprep.mubr.f32.mxu1 %v17822_v8 }
0x21dc   : > { %21399 = vmatmul.mubr.f32.gmra.mrb[198].mxu1 %v17823_v51  ;;  %v17825_v18 = vmax.f32 %v17775_v38, 0.0 }
0x21dd   : > { %v17824_v5 = vmax.f32 %v17770_v47, 0.0 }
0x21df   : > { %21401 = vmatprep.mubr.f32.mxu1 %v17824_v5 }
0x21e0   : > { %21402 = vmatmul.mubr.f32.gmra.mrb[200].mxu1 %v17825_v18 }
0x2238   : > { %v21350_v22 = vpop.f32.mrb[238].mxu0 }
0x2239   : > { %v17785_v12 = vadd.f32 %v21350_v22, %v19001_v49  ;;  %v17779_v2 = vpop.f32.mrb[239].mxu0 }
0x223a   : > { %v17780_v15 = vadd.f32 %v19001_v49, %v17779_v2 }
0x223b   : > { %v17827_v27 = vmax.f32 %v17785_v12, 0.0 }
0x223c   : > { %v17826_v34 = vmax.f32 %v17780_v15, 0.0  ;;  %v21353_v41 = vpop.f32.mrb[240].mxu0 }
0x223d   : > { %v17795_v39 = vadd.f32 %v21353_v41, %v19001_v49  ;;  %v17789_v6 = vpop.f32.mrb[241].mxu0 }
0x223e   : > { %v17790_v7 = vadd.f32 %v19001_v49, %v17789_v6  ;;  %21404 = vmatprep.mubr.f32.mxu1 %v17826_v34 }
0x223f   : > { %21405 = vmatmul.mubr.f32.gmra.mrb[202].mxu1 %v17827_v27  ;;  %v17829_v33 = vmax.f32 %v17795_v39, 0.0 }
0x2240   : > { %v17828_v45 = vmax.f32 %v17790_v7, 0.0 }
0x2242   : > { %21407 = vmatprep.mubr.f32.mxu1 %v17828_v45 }
0x2243   : > { %v21356_v16 = vpop.f32.mrb[242].mxu0  ;;  %21408 = vmatmul.mubr.f32.gmra.mrb[204].mxu1 %v17829_v33 }
0x2244   : > { %v17805_v62 = vadd.f32 %v21356_v16, %v19001_v49  ;;  %v17799_v32 = vpop.f32.mrb[243].mxu0 }
0x2245   : > { %v17800_v36 = vadd.f32 %v19001_v49, %v17799_v32 }
0x2246   : > { %v17831_v19 = vmax.f32 %v17805_v62, 0.0 }
0x2247   : > { %v17830_v14 = vmax.f32 %v17800_v36, 0.0  ;;  %v21359_v46 = vpop.f32.mrb[244].mxu0 }
0x2248   : > { %v17815_v31 = vadd.f32 %v21359_v46, %v19001_v49  ;;  %v17809_v21 = vpop.f32.mrb[245].mxu0 }
0x2249   : > { %v17810_v54 = vadd.f32 %v19001_v49, %v17809_v21  ;;  %21410 = vmatprep.mubr.f32.mxu1 %v17830_v14 }
0x224a   : > { %21411 = vmatmul.mubr.f32.gmra.mrb[206].mxu1 %v17831_v19  ;;  %v17833_v23 = vmax.f32 %v17815_v31, 0.0 }
0x224b   : > { %v17832_v52 = vmax.f32 %v17810_v54, 0.0 }
0x224d   : > { %21413 = vmatprep.mubr.f32.mxu1 %v17832_v52 }
0x224e   : > { %21414 = vmatmul.mubr.f32.gmra.mrb[208].mxu1 %v17833_v23 }
0x2290   : > { %v21394_v35 = vpop.f32.mrb[194].mxu1 }
0x2291   : > { %v17925_v61 = vpop.f32.mrb[195].mxu1 }
0x2292   : > { %v17926_v40 = vadd.f32 %v19035_v11, %v17925_v61 }
0x2294   : > { %v17996_v0 = vadd.f32 %v17926_v40, %v28002_v55  ;;  %v21397_v13 = vpop.f32.mrb[196].mxu1 }
0x2295   : > { %v17934_v9 = vpop.f32.mrb[197].mxu1 }
0x2296   : > { %v17935_v60 = vadd.f32 %v19035_v11, %v17934_v9  ;;  %v18008_v49 = vsel %vm722_vm1, %v17996_v0, 0.0 }
0x2297   : > { %18009 = vadd.xlane.f32.xlu0 %v18008_v49 }
0x2298   : > { %v17997_v53 = vadd.f32 %v17935_v60, %v28012_v59 }
0x229a   : > { %v18011_v25 = vsel %vm722_vm1, %v17997_v53, 0.0 }
0x229b   : > { %18012 = vadd.xlane.f32.xlu0 %v18011_v25 }
0x22af   : > { %v21400_v37 = vpop.f32.mrb[198].mxu1 }
0x22b0   : > { %v17943_v44 = vpop.f32.mrb[199].mxu1 }
0x22b1   : > { %v17944_v48 = vadd.f32 %v19035_v11, %v17943_v44 }
0x22b3   : > { %v17998_v30 = vadd.f32 %v17944_v48, %v28054_v63  ;;  %v21403_v28 = vpop.f32.mrb[200].mxu1 }
0x22b4   : > { %v17952_v42 = vpop.f32.mrb[201].mxu1 }
0x22b5   : > { %v17953_v43 = vadd.f32 %v19035_v11, %v17952_v42  ;;  %v18014_v55 = vsel %vm722_vm1, %v17998_v30, 0.0 }
0x22b6   : > { %18015 = vadd.xlane.f32.xlu1 %v18014_v55  ;;  %v18141_v55 = vld [vmem:[%s28249_s16 + $0x8] sm:$0xff] }
0x22b7   : > { %v17999_v26 = vadd.f32 %v17953_v43, %v28070_v56  ;;  %v18140_v43 = vld [vmem:[%s28249_s16] sm:$0xff] }
0x22b9   : > { %v18017_v3 = vsel %vm722_vm1, %v17999_v26, 0.0 }
0x22ba   : > { %18018 = vadd.xlane.f32.xlu1 %v18017_v3  ;;  %v23447_v3 = vmov 0.0|0.0  }
0x22bb   : > { %22195 = vmatprep.subr.bf16.mxu0 %v23447_v3 }
0x2312   : > { %v21406_v59 = vpop.f32.mrb[202].mxu1 }
0x2313   : > { %v17961_v50 = vpop.f32.mrb[203].mxu1  ;;  %v18142_v59 = vld [vmem:[%s28249_s16 + $0x10] sm:$0xff] }
0x2314   : > { %v17962_v4 = vadd.f32 %v19035_v11, %v17961_v50  ;;  %v18143_v50 = vld [vmem:[%s28249_s16 + $0x18] sm:$0xff] }
0x2316   : > { %v18000_v58 = vadd.f32 %v17962_v4, %v28094_v20  ;;  %v21409_v24 = vpop.f32.mrb[204].mxu1  ;;  %v22199_v4 = vpack.c.bf16 %v18143_v50, %v18142_v59 }
0x2317   : > { %v17970_v8 = vpop.f32.mrb[205].mxu1 }
0x2318   : > { %v17971_v29 = vadd.f32 %v19035_v11, %v17970_v8  ;;  %v18020_v63 = vsel %vm722_vm1, %v18000_v58, 0.0 }
0x2319   : > { %18021 = vadd.xlane.f32.xlu0 %v18020_v63 }
0x231a   : > { %v18001_v51 = vadd.f32 %v17971_v29, %v28104_v17 }
0x231c   : > { %v18023_v10 = vsel %vm722_vm1, %v18001_v51, 0.0 }
0x231d   : > { %v21412_v38 = vpop.f32.mrb[206].mxu1  ;;  %18024 = vadd.xlane.f32.xlu1 %v18023_v10 }
0x231e   : > { %v17979_v56 = vpop.f32.mrb[207].mxu1 }
0x231f   : > { %v17980_v47 = vadd.f32 %v19035_v11, %v17979_v56 }
0x2321   : > { %v18002_v5 = vadd.f32 %v17980_v47, %v28116_v57  ;;  %v21415_v18 = vpop.f32.mrb[208].mxu1 }
0x2322   : > { %v17988_v22 = vpop.f32.mrb[209].mxu1 }
0x2323   : > { %v17989_v12 = vadd.f32 %v19035_v11, %v17988_v22  ;;  %v18026_v20 = vsel %vm722_vm1, %v18002_v5, 0.0 }
0x2324   : > { %18027 = vadd.xlane.f32.xlu0 %v18026_v20  ;;  %v18010_v2 = vpop.xlane.xlu0 %18009 }
0x2325   : > { %v18003_v15 = vadd.f32 %v17989_v12, %v28126_v1  ;;  %v18032_v34 = vmul.f32 0.03125, %v18010_v2 }
0x2327   : > { %v18029_v17 = vsel %vm722_vm1, %v18003_v15, 0.0  ;;  %v28154_v39 = vsub.f32 %v17996_v0, %v18032_v34 }
0x2328   : > { %18030 = vadd.xlane.f32.xlu1 %v18029_v17  ;;  %v18013_v41 = vpop.xlane.xlu0 %18012 }
0x2329   : > { %v18033_v27 = vmul.f32 0.03125, %v18013_v41  ;;  %v18048_v45 = vmul.f32 %v28154_v39, %v28154_v39 }
0x232b   : > { %v28156_v6 = vsub.f32 %v17997_v53, %v18033_v27  ;;  %v18056_v1 = vsel %vm722_vm1, %v18048_v45, 0.0 }
0x232d   : > { %v18049_v57 = vmul.f32 %v28156_v6, %v28156_v6 }
0x232f   : > { %v18059_v7 = vsel %vm722_vm1, %v18049_v57, 0.0 }
0x2330   : > { %18060 = vadd.xlane.f32.xlu0 %v18059_v7 }
0x2334   : > { %18057 = vadd.xlane.f32.xlu0 %v18056_v1 }
0x2343   : > { %v18016_v33 = vpop.xlane.xlu1 %18015 }
0x2344   : > { %v18034_v16 = vmul.f32 0.03125, %v18016_v33 }
0x2346   : > { %v28164_v62 = vsub.f32 %v17998_v30, %v18034_v16 }
0x2347   : > { %v18019_v32 = vpop.xlane.xlu1 %18018 }
0x2348   : > { %v18035_v36 = vmul.f32 0.03125, %v18019_v32  ;;  %v18050_v14 = vmul.f32 %v28164_v62, %v28164_v62 }
0x234a   : > { %v28168_v46 = vsub.f32 %v17999_v26, %v18035_v36  ;;  %v18062_v19 = vsel %vm722_vm1, %v18050_v14, 0.0  ;;  %v22196_v26 = vpack.c.bf16 %v18141_v55, %v18140_v43 }
0x234b   : > { %18063 = vadd.xlane.f32.xlu1 %v18062_v19 }
0x234c   : > { %v18051_v31 = vmul.f32 %v28168_v46, %v28168_v46  ;;  %22197 = vmatpush3.bf16.msra.mxu0 %v22196_v26 }
0x234d   : > { %22198 = vmatprep.subr.bf16.mxu0 %v23447_v3 }
0x234e   : > { %v18065_v21 = vsel %vm722_vm1, %v18051_v31, 0.0 }
0x234f   : > { %18066 = vadd.xlane.f32.xlu1 %v18065_v21 }
0x2350   : > { %22200 = vmatpush3.bf16.msra.mxu0 %v22199_v4 }
0x23a6   : > { %v18022_v54 = vpop.xlane.xlu0 %18021 }
0x23a7   : > { %v18036_v52 = vmul.f32 0.03125, %v18022_v54 }
0x23a9   : > { %v28174_v23 = vsub.f32 %v18000_v58, %v18036_v52  ;;  %v28518_v58 = vmov 0.0   ;;  %v19038_v52 = vld [vmem:[%s28247_s14 + $0x1] ss:$0 sm:$0xff] }
0x23aa   : > { %v18025_v11 = vpop.xlane.xlu1 %18024  ;;  %21424 = vmatprep.mubr.msk.f32.mxu0 %vm23448_vm6, %v28518_v58 }
0x23ab   : > { %v18037_v35 = vmul.f32 0.03125, %v18025_v11  ;;  %v18052_v61 = vmul.f32 %v28174_v23, %v28174_v23 }
0x23ad   : > { %v28178_v40 = vsub.f32 %v18001_v51, %v18037_v35  ;;  %v18068_v0 = vsel %vm722_vm1, %v18052_v61, 0.0 }
0x23ae   : > { %18069 = vadd.xlane.f32.xlu0 %v18068_v0 }
0x23af   : > { %v18053_v13 = vmul.f32 %v28178_v40, %v28178_v40 }
0x23b1   : > { %v18028_v9 = vpop.xlane.xlu0 %18027  ;;  %v18071_v49 = vsel %vm722_vm1, %v18053_v13, 0.0 }
0x23b2   : > { %v18038_v60 = vmul.f32 0.03125, %v18028_v9  ;;  %18072 = vadd.xlane.f32.xlu1 %v18071_v49 }
0x23b4   : > { %v28184_v53 = vsub.f32 %v18002_v5, %v18038_v60 }
0x23b5   : > { %v18031_v25 = vpop.xlane.xlu1 %18030 }
0x23b6   : > { %v18039_v37 = vmul.f32 0.03125, %v18031_v25  ;;  %v18054_v44 = vmul.f32 %v28184_v53, %v28184_v53 }
0x23b8   : > { %v28188_v48 = vsub.f32 %v18003_v15, %v18039_v37  ;;  %v18074_v30 = vsel %vm722_vm1, %v18054_v44, 0.0 }
0x23b9   : > { %18075 = vadd.xlane.f32.xlu0 %v18074_v30 }
0x23ba   : > { %v18055_v28 = vmul.f32 %v28188_v48, %v28188_v48 }
0x23bc   : > { %v18077_v42 = vsel %vm722_vm1, %v18055_v28, 0.0 }
0x23bd   : > { %18078 = vadd.xlane.f32.xlu1 %v18077_v42  ;;  %v18061_v8 = vpop.xlane.xlu0 %18060 }
0x23be   : > { %v18081_v63 = vmul.f32 0.03125, %v18061_v8 }
0x23c0   : > { %v18089_v56 = vadd.f32 1e-05, %v18081_v63 }
0x23c1   : > { %v18058_v51 = vpop.xlane.xlu0 %18057 }
0x23c2   : > { %v18080_v47 = vmul.f32 0.03125, %v18058_v51  ;;  %23403 = vrsqrt.f32 %v18089_v56 }
0x23c4   : > { %v18088_v20 = vadd.f32 1e-05, %v18080_v47  ;;  %v19040_v47 = vld [vmem:[%s28250_s17] ss:$0 sm:$0xff] }
0x23cc   : > { %v23404_v57 = vpop.eup %23403 }
0x23cd   : > { %v18105_v31 = vmul.f32 %v23404_v57, %v28156_v6  ;;  %v19039_v6 = vld [vmem:[%s28248_s15 + $0x1] ss:$0 sm:$0xff] }
0x23cf   : > { %v18119_v13 = vmul.f32 %v19038_v52, %v18105_v31 }
0x23d1   : > { %v18133_v37 = vadd.f32 %v19039_v6, %v18119_v13 }
0x23d3   : > { %v18159_v55 = vrot.slane %v18133_v37, 7 }
0x23d8   : > { %v18064_v24 = vpop.xlane.xlu1 %18063 }
0x23d9   : > { %v18082_v38 = vmul.f32 0.03125, %v18064_v24 }
0x23db   : > { %v18090_v5 = vadd.f32 1e-05, %v18082_v38 }
0x23dc   : > { %v18067_v29 = vpop.xlane.xlu1 %18066 }
0x23dd   : > { %v18083_v10 = vmul.f32 0.03125, %v18067_v29  ;;  %23405 = vrsqrt.f32 %v18090_v5 }
0x23df   : > { %v18091_v22 = vadd.f32 1e-05, %v18083_v10 }
0x23e1   : > { %23407 = vrsqrt.f32 %v18091_v22 }
0x23e7   : > { %v23406_v45 = vpop.eup %23405 }
0x23e8   : > { %v18106_v14 = vmul.f32 %v23406_v45, %v28164_v62 }
0x23ea   : > { %v18120_v0 = vmul.f32 %v19038_v52, %v18106_v14 }
0x23eb   : > { %v23408_v33 = vpop.eup %23407 }
0x23ec   : > { %v18107_v21 = vmul.f32 %v23408_v33, %v28168_v46  ;;  %v18134_v25 = vadd.f32 %v19039_v6, %v18120_v0 }
0x23ee   : > { %v18121_v62 = vmul.f32 %v19038_v52, %v18107_v21  ;;  %v18162_v43 = vrot.slane %v18134_v25, 6 }
0x23f0   : > { %v18135_v44 = vadd.f32 %v19039_v6, %v18121_v62 }
0x23f2   : > { %v18165_v26 = vrot.slane %v18135_v44, 5 }
0x243b   : > { %v18070_v18 = vpop.xlane.xlu0 %18069 }
0x243c   : > { %v18084_v12 = vmul.f32 0.03125, %v18070_v18 }
0x243e   : > { %v18092_v2 = vadd.f32 1e-05, %v18084_v12 }
0x243f   : > { %v18073_v15 = vpop.xlane.xlu1 %18072 }
0x2440   : > { %v18085_v34 = vmul.f32 0.03125, %v18073_v15  ;;  %23409 = vrsqrt.f32 %v18092_v2 }
0x2441   : > { %23411 = vrsqrt.f32 %v18088_v20 }
0x2442   : > { %v18093_v17 = vadd.f32 1e-05, %v18085_v34 }
0x2444   : > { %23413 = vrsqrt.f32 %v18093_v17 }
0x2446   : > { %v18076_v41 = vpop.xlane.xlu0 %18075 }
0x2447   : > { %v18086_v27 = vmul.f32 0.03125, %v18076_v41 }
0x2449   : > { %v18094_v7 = vadd.f32 1e-05, %v18086_v27 }
0x244a   : > { %v18079_v1 = vpop.xlane.xlu1 %18078  ;;  %v23410_v32 = vpop.eup %23409 }
0x244b   : > { %23415 = vrsqrt.f32 %v18094_v7  ;;  %v18087_v16 = vmul.f32 0.03125, %v18079_v1  ;;  %v23412_v36 = vpop.eup %23411  ;;  %v18108_v11 = vmul.f32 %v23410_v32, %v28174_v23 }
0x244c   : > { %v18104_v35 = vmul.f32 %v23412_v36, %v28154_v39 }
0x244d   : > { %v18095_v19 = vadd.f32 1e-05, %v18087_v16  ;;  %v18122_v46 = vmul.f32 %v19038_v52, %v18108_v11 }
0x244e   : > { %v23414_v54 = vpop.eup %23413  ;;  %v18118_v9 = vmul.f32 %v19038_v52, %v18104_v35 }
0x244f   : > { %23417 = vrsqrt.f32 %v18095_v19  ;;  %v18109_v61 = vmul.f32 %v23414_v54, %v28178_v40  ;;  %v18136_v30 = vadd.f32 %v19039_v6, %v18122_v46 }
0x2450   : > { %v18132_v39 = vadd.f32 %v19039_v6, %v18118_v9 }
0x2451   : > { %v18123_v60 = vmul.f32 %v19038_v52, %v18109_v61  ;;  %v18168_v50 = vrot.slane %v18136_v30, 4 }
0x2452   : > { %v18161_v4 = vsel %vm18160_vm7, %v18159_v55, %v18132_v39 }
0x2453   : > { %v18137_v28 = vadd.f32 %v19039_v6, %v18123_v60 }
0x2455   : > { %v23416_v49 = vpop.eup %23415  ;;  %v18171_v58 = vrot.slane %v18137_v28, 3 }
0x2456   : > { %v18110_v23 = vmul.f32 %v23416_v49, %v28184_v53  ;;  %v18164_v53 = vsel %vm18163_vm8, %v18162_v43, %v18161_v4 }
0x2457   : > { %v18167_v63 = vsel %vm18166_vm9, %v18165_v26, %v18164_v53 }
0x2458   : > { %v18124_v40 = vmul.f32 %v19038_v52, %v18110_v23  ;;  %v18170_v51 = vsel %vm18169_vm10, %v18168_v50, %v18167_v63 }
0x2459   : > { %v23418_v42 = vpop.eup %23417  ;;  %v18173_v38 = vsel %vm18172_vm11, %v18171_v58, %v18170_v51 }
0x245a   : > { %v18111_v3 = vmul.f32 %v23418_v42, %v28188_v48  ;;  %v18138_v59 = vadd.f32 %v19039_v6, %v18124_v40 }
0x245c   : > { %v18125_v24 = vmul.f32 %v19038_v52, %v18111_v3  ;;  %v18174_v8 = vrot.slane %v18138_v59, 2 }
0x245e   : > { %v18139_v29 = vadd.f32 %v19039_v6, %v18125_v24  ;;  %v18176_v48 = vsel %vm18175_vm12, %v18174_v8, %v18173_v38 }
0x2460   : > { %v18177_v10 = vrot.slane %v18139_v29, 1 }
0x2462   : > { %v18179_v56 = vsel %vm18178_vm13, %v18177_v10, %v18176_v48 }
0x2463   : > { %21425 = vmatmul.mubr.msk.f32.vlgmr.msra.gmra.mrb[246].mxu0 %vm722_vm1, %v18179_v56 }
0x2536   : > { %v18248_v5 = vpop.f32.mrb[246].mxu0 }
0x2537   : > { %v18249_v18 = vadd.f32 %v19040_v47, %v18248_v5  ;;  %v21426_v22 = vpop.f32.mrb[247].mxu0 }
0x2539   : > { %18253 = vst.msk [vmem:[%s575_s1] sm:$0xff] %vm18252_vm14, %v18249_v18 }
0x253a PF: > { %s28_s27 = sadd.s32 1, %s23441_s27  }
0x253b   : > { %p25_p5 = scmp.ge.s32.totalorder %s28_s27, 4  }
0x253d   :  { %27 = sbr.rel (!%p25_p5) target bundleno = 4 (0x4), region = 142 }

</bundles_post_ra>
